<compile_context>
chip_gen: v7x
topology: tpu7x:2x2x1
jax: 0.10.0
libtpu: 0.0.40
codegen_flags: <defaults>
</compile_context>

<pallas_src>
import functools

import jax
import jax.numpy as jnp
from jax import lax
from jax.experimental import pallas as pl
from jax.experimental.pallas import tpu as pltpu


def _round_up(x, m):
    return ((x + m - 1) // m) * m


# --------------------------- Fused Tree2Seq kernel ---------------------------
def tree2seq_kernel(
    emb2d_ref,    # (Bp*N, E)       bf16  flattened node embeddings (batch-padded)
    w_enc_ref,    # (E, H)          bf16  encoder weight
    b_enc_ref,    # (1, H)          f32   encoder bias
    y2d_ref,      # (T*Bp, Ed)      bf16  flattened teacher-forced decoder inputs
    w_y_ref,      # (Ed, 4*Hd)      bf16  y -> gates weight
    w_ch_ref,     # (H+Hd, 4*Hd)    bf16  [ctx; h] -> gates weight (recurrent path)
    b_lstm_ref,   # (1, 4*Hd)       f32
    w_att_ref,    # (Hd, H)         bf16  bilinear attention
    w_out_ref,    # (Hd+H, Vp)      bf16  fused output projection [h; ctx]
    b_out_ref,    # (1, Vp)         f32
    logits_ref,   # (T*Bp, Vp)      f32   single lane-dense output block
    h_sc,         # (T*Bp, Hd)      f32   VMEM scratch: per-step h_new
    ctx_sc,       # (T*Bp, H)       f32   VMEM scratch: per-step attention context
    *, Bp, N, T,
):
    H = w_enc_ref.shape[1]
    Hd = w_att_ref.shape[0]

    # ---------------- Encoder: one sublane-dense MXU matmul + tanh -----------
    enc2d = jnp.tanh(
        jnp.dot(emb2d_ref[...], w_enc_ref[...], preferred_element_type=jnp.float32)
        + b_enc_ref[...]
    )                                                   # (Bp*N, H) f32
    enc = enc2d.reshape(Bp, N, H)                       # resident attention memory
    root = jnp.mean(enc, axis=1)                        # (Bp, Hd) initial decoder h

    # -------- Hoisted loop invariants (read once, live across all steps) -----
    w_att = w_att_ref[...]
    w_ch = w_ch_ref[...]
    # y contribution to the gates for ALL steps: one M=T*Bp matmul (+ bias once).
    y_gates = (
        jnp.dot(y2d_ref[...], w_y_ref[...], preferred_element_type=jnp.float32)
        + b_lstm_ref[...]
    )                                                   # (T*Bp, 4*Hd) f32

    # ---------------- Decoder recurrence (fully unrolled, static T) ----------
    h = root
    c = jnp.zeros_like(root)
    for t in range(T):
        r0, r1 = t * Bp, (t + 1) * Bp

        # Bilinear attention: h @ W_att on MXU; reductions on VPU/XLU (f32).
        proj = jnp.dot(h.astype(jnp.bfloat16), w_att,
                       preferred_element_type=jnp.float32)          # (Bp, H)
        scores = jnp.sum(enc * proj[:, None, :], axis=-1)           # (Bp, N)
        scores = scores - jnp.max(scores, axis=-1, keepdims=True)
        p = jnp.exp(scores)
        alpha = p * pl.reciprocal(jnp.sum(p, axis=-1, keepdims=True), approx=True)
        ctx = jnp.sum(alpha[:, :, None] * enc, axis=1)              # (Bp, H) f32
        ctx_sc[r0:r1, :] = ctx

        # LSTM gates: recurrent matmul only over [ctx; h] (K = H + Hd).
        ch = jnp.concatenate(
            [ctx.astype(jnp.bfloat16), h.astype(jnp.bfloat16)], axis=-1)
        gates = (jnp.dot(ch, w_ch, preferred_element_type=jnp.float32)
                 + y_gates[r0:r1])                                  # (Bp, 4*Hd) f32

        # Whole-vreg activations on the (8, 128) tile; i/f/g/o are lane slices.
        sig = jax.nn.sigmoid(gates)
        th = jnp.tanh(gates)
        c = sig[:, Hd:2 * Hd] * c + sig[:, 0:Hd] * th[:, 2 * Hd:3 * Hd]
        h = sig[:, 3 * Hd:4 * Hd] * jnp.tanh(c)
        h_sc[r0:r1, :] = h

    # ------- Hoisted output projection: one matmul, one lane-dense store -----
    hc = jnp.concatenate([h_sc[...], ctx_sc[...]], axis=-1).astype(jnp.bfloat16)
    logits_ref[...] = (
        jnp.dot(hc, w_out_ref[...], preferred_element_type=jnp.float32)
        + b_out_ref[...]
    )                                                   # (T*Bp, Vp) f32


def run_tree2seq(emb2d, w_enc, b_enc, y2d, w_y, w_ch, b_lstm, w_att, w_out, b_out,
                 *, Bp, N, T):
    H = w_enc.shape[1]
    Hd = w_att.shape[0]
    Vp = w_out.shape[1]

    def full(a):
        return pl.BlockSpec(a.shape, lambda i, _nd=a.ndim: (0,) * _nd)

    kernel = functools.partial(tree2seq_kernel, Bp=Bp, N=N, T=T)
    operands = (emb2d, w_enc, b_enc, y2d, w_y, w_ch, b_lstm, w_att, w_out, b_out)
    return pl.pallas_call(
        kernel,
        out_shape=jax.ShapeDtypeStruct((T * Bp, Vp), jnp.float32),
        grid=(1,),
        in_specs=[full(x) for x in operands],
        out_specs=pl.BlockSpec((T * Bp, Vp), lambda i: (0, 0)),
        scratch_shapes=[
            pltpu.VMEM((T * Bp, Hd), jnp.float32),   # per-step h_new
            pltpu.VMEM((T * Bp, H), jnp.float32),    # per-step attention context
        ],
        compiler_params=pltpu.CompilerParams(dimension_semantics=("arbitrary",)),
    )(*operands)


# ------------------- One-time parameter preparation (hoisted) ----------------
def prepare_params(params):
    """Fuse / pad / cast weights once, out of the per-call forward path."""
    E = params["tok_emb"].shape[1]
    H = params["w_enc"].shape[1]
    Hd = params["w_hh"].shape[0]
    assert H == Hd, "decoder assumes encoder width == decoder hidden width"
    V = params["w_oh"].shape[1]
    Vp = _round_up(V, 128)

    # Recurrent-path gate weight [ctx; h] and precompute-path weight (y).
    w_ch = jnp.concatenate([params["w_ic"], params["w_hh"]], axis=0)      # (H+Hd, 4Hd)
    # Fused, lane-padded output projection [h; ctx] -> Vp.
    w_out = jnp.zeros((Hd + H, Vp), jnp.bfloat16)
    w_out = w_out.at[:Hd, :V].set(params["w_oh"].astype(jnp.bfloat16))
    w_out = w_out.at[Hd:, :V].set(params["w_oc"].astype(jnp.bfloat16))
    b_out = jnp.zeros((1, Vp), jnp.float32).at[:, :V].set(params["b_out"])

    return {
        "tok_emb": params["tok_emb"].astype(jnp.bfloat16),
        "typ_emb": params["typ_emb"].astype(jnp.bfloat16),
        "lbl_emb": params["lbl_emb"].astype(jnp.bfloat16),
        "w_enc": params["w_enc"].astype(jnp.bfloat16),
        "b_enc": params["b_enc"],
        "w_att": params["w_att"].astype(jnp.bfloat16),
        "w_y": params["w_iy"].astype(jnp.bfloat16),
        "w_ch": w_ch.astype(jnp.bfloat16),
        "b_lstm": params["b_lstm"],
        "w_out": w_out,
        "b_out": b_out,
        "E": E, "H": H, "Hd": Hd, "V": V, "Vp": Vp,
    }


# ------------------------------ Full forward ---------------------------------
def tree2seq_forward(token_ids, type_ids, labels, prep):
    """token_ids/type_ids: [B, N] int32 node features of the batched graph.
    labels: [T, B] int32 target label ids (teacher forcing).
    Returns logits [T, B, V]."""
    B, N = token_ids.shape
    T = labels.shape[0]
    V, Vp = prep["V"], prep["Vp"]

    # Embedding gathers (XLA glue): token + type embedding per node.
    emb = prep["tok_emb"][token_ids] + prep["typ_emb"][type_ids]          # (B, N, E) bf16

    # Teacher-forced decoder inputs: <SOS> (id 0) then shifted labels.
    sos = jnp.zeros((1, B), dtype=labels.dtype)
    y_ids = jnp.concatenate([sos, labels[:-1]], axis=0)                   # (T, B)
    y_emb = prep["lbl_emb"][y_ids]                                        # (T, B, Ed) bf16

    # Pad batch to the 8-sublane minimum; flatten leading dims in HBM (free)
    # so the kernel's matmul operands arrive sublane-dense.
    Bp = _round_up(max(B, 8), 8)
    E = emb.shape[-1]
    Ed = y_emb.shape[-1]
    emb2d = (jnp.zeros((Bp, N, E), jnp.bfloat16).at[:B].set(emb)
             .reshape(Bp * N, E))
    y2d = (jnp.zeros((T, Bp, Ed), jnp.bfloat16).at[:, :B].set(y_emb)
           .reshape(T * Bp, Ed))

    logits2d = run_tree2seq(
        emb2d, prep["w_enc"], prep["b_enc"],
        y2d, prep["w_y"], prep["w_ch"], prep["b_lstm"],
        prep["w_att"], prep["w_out"], prep["b_out"],
        Bp=Bp, N=N, T=T,
    )                                                                     # (T*Bp, Vp)
    return logits2d.reshape(T, Bp, Vp)[:, :B, :V]


# ---------------------- Pure-JAX reference (f32, same math) ------------------
def tree2seq_reference(token_ids, type_ids, labels, params):
    emb = params["tok_emb"][token_ids] + params["typ_emb"][type_ids]
    enc = jnp.tanh(jnp.einsum("bne,eh->bnh", emb, params["w_enc"]) + params["b_enc"][None])
    root = jnp.mean(enc, axis=1)
    T, B = labels.shape
    sos = jnp.zeros((1, B), labels.dtype)
    y_emb = params["lbl_emb"][jnp.concatenate([sos, labels[:-1]], axis=0)]
    Hd = root.shape[1]

    def step(carry, y):
        h, c = carry
        proj = h @ params["w_att"]
        alpha = jax.nn.softmax(jnp.einsum("bnh,bh->bn", enc, proj), axis=-1)
        ctx = jnp.einsum("bn,bnh->bh", alpha, enc)
        gates = (y @ params["w_iy"] + ctx @ params["w_ic"]
                 + h @ params["w_hh"] + params["b_lstm"])
        i_g = jax.nn.sigmoid(gates[:, :Hd])
        f_g = jax.nn.sigmoid(gates[:, Hd:2 * Hd])
        g_g = jnp.tanh(gates[:, 2 * Hd:3 * Hd])
        o_g = jax.nn.sigmoid(gates[:, 3 * Hd:])
        c_new = f_g * c + i_g * g_g
        h_new = o_g * jnp.tanh(c_new)
        logits = h_new @ params["w_oh"] + ctx @ params["w_oc"] + params["b_out"]
        return (h_new, c_new), logits

    _, logits = lax.scan(step, (root, jnp.zeros_like(root)), y_emb)
    return logits


# --------------------------------- Main ---------------------------------------
if __name__ == "__main__":
    # Small shapes consistent with the module's forward.
    B, N, T = 2, 16, 8               # batch of trees, nodes per tree, max seq len
    V_tok, V_typ, V_lbl = 24, 8, 16  # token / type / label vocab sizes
    E, H, Hd, Ed = 32, 32, 32, 32    # embedding / encoder / decoder hidden sizes

    key = jax.random.PRNGKey(0)
    ks = jax.random.split(key, 16)

    def init(k, shape, scale=0.1):
        return (scale * jax.random.normal(k, shape)).astype(jnp.float32)

    params = {
        "tok_emb": init(ks[0], (V_tok, E)),
        "typ_emb": init(ks[1], (V_typ, E)),
        "w_enc":   init(ks[2], (E, H)),
        "b_enc":   jnp.zeros((1, H), jnp.float32),
        "w_att":   init(ks[3], (Hd, H)),
        "w_iy":    init(ks[4], (Ed, 4 * Hd)),
        "w_ic":    init(ks[5], (H, 4 * Hd)),
        "w_hh":    init(ks[6], (Hd, 4 * Hd)),
        "b_lstm":  jnp.zeros((1, 4 * Hd), jnp.float32),
        "w_oh":    init(ks[7], (Hd, V_lbl)),
        "w_oc":    init(ks[8], (H, V_lbl)),
        "b_out":   jnp.zeros((1, V_lbl), jnp.float32),
        "lbl_emb": init(ks[9], (V_lbl, Ed)),
    }

    token_ids = jax.random.randint(ks[10], (B, N), 0, V_tok, dtype=jnp.int32)
    type_ids = jax.random.randint(ks[11], (B, N), 0, V_typ, dtype=jnp.int32)
    labels = jax.random.randint(ks[12], (T, B), 0, V_lbl, dtype=jnp.int32)

    # One-time parameter prep (hoisted out of the steady-state forward path).
    prep = prepare_params(params)

    logits = tree2seq_forward(token_ids, type_ids, labels, prep)
    logits = jax.block_until_ready(logits)

    assert logits.shape == (T, B, V_lbl), logits.shape
    assert logits.dtype == jnp.float32
    assert bool(jnp.all(jnp.isfinite(logits)))

    # Correctness vs. pure-JAX f32 reference (loose tol: bf16 MXU + approx recip).
    ref = tree2seq_reference(token_ids, type_ids, labels, params)
    max_err = float(jnp.max(jnp.abs(logits - ref)))
    assert max_err < 5e-2, f"max abs error vs reference: {max_err}"

    # Tree2Seq.predict equivalent.
    preds = jnp.argmax(logits, axis=-1)
    assert preds.shape == (T, B)

    print("KERNEL_OK")
</pallas_src>

<mosaic_0001>
module attributes {stable_mosaic.version = 11 : i64} {
  func.func @tree2seq_kernel(%arg0: i32, %arg1: memref<128x32xbf16, #tpu.memory_space<vmem>>, %arg2: memref<32x32xbf16, #tpu.memory_space<vmem>>, %arg3: memref<1x32xf32, #tpu.memory_space<vmem>>, %arg4: memref<64x32xbf16, #tpu.memory_space<vmem>>, %arg5: memref<32x128xbf16, #tpu.memory_space<vmem>>, %arg6: memref<64x128xbf16, #tpu.memory_space<vmem>>, %arg7: memref<1x128xf32, #tpu.memory_space<vmem>>, %arg8: memref<32x32xbf16, #tpu.memory_space<vmem>>, %arg9: memref<64x128xbf16, #tpu.memory_space<vmem>>, %arg10: memref<1x128xf32, #tpu.memory_space<vmem>>, %arg11: memref<64x128xf32, #tpu.memory_space<vmem>>, %arg12: memref<64x32xf32, #tpu.memory_space<vmem>>, %arg13: memref<64x32xf32, #tpu.memory_space<vmem>>) attributes {dimension_semantics = [#tpu.dimension_semantics<arbitrary>], iteration_bounds = array<i64: 1>, scalar_prefetch = 0 : i64, scratch_operands = 2 : i64, tpu.core_type = #tpu.core_type<tc>, window_params = [{pipeline_mode = #tpu.pipeline_mode<synchronous>, transform_indices = @transform_0, window_bounds = array<i64: 128, 32>}, {pipeline_mode = #tpu.pipeline_mode<synchronous>, transform_indices = @transform_1, window_bounds = array<i64: 32, 32>}, {pipeline_mode = #tpu.pipeline_mode<synchronous>, transform_indices = @transform_2, window_bounds = array<i64: 1, 32>}, {pipeline_mode = #tpu.pipeline_mode<synchronous>, transform_indices = @transform_3, window_bounds = array<i64: 64, 32>}, {pipeline_mode = #tpu.pipeline_mode<synchronous>, transform_indices = @transform_4, window_bounds = array<i64: 32, 128>}, {pipeline_mode = #tpu.pipeline_mode<synchronous>, transform_indices = @transform_5, window_bounds = array<i64: 64, 128>}, {pipeline_mode = #tpu.pipeline_mode<synchronous>, transform_indices = @transform_6, window_bounds = array<i64: 1, 128>}, {pipeline_mode = #tpu.pipeline_mode<synchronous>, transform_indices = @transform_7, window_bounds = array<i64: 32, 32>}, {pipeline_mode = #tpu.pipeline_mode<synchronous>, transform_indices = @transform_8, window_bounds = array<i64: 64, 128>}, {pipeline_mode = #tpu.pipeline_mode<synchronous>, transform_indices = @transform_9, window_bounds = array<i64: 1, 128>}, {pipeline_mode = #tpu.pipeline_mode<synchronous>, transform_indices = @transform_10, window_bounds = array<i64: 64, 128>}]} {
    %c0 = arith.constant 0 : index
    %c0_0 = arith.constant 0 : index
    %0 = vector.load %arg1[%c0, %c0_0] : memref<128x32xbf16, #tpu.memory_space<vmem>>, vector<128x32xbf16>
    %c0_1 = arith.constant 0 : index
    %c0_2 = arith.constant 0 : index
    %1 = vector.load %arg2[%c0_1, %c0_2] : memref<32x32xbf16, #tpu.memory_space<vmem>>, vector<32x32xbf16>
    %cst = arith.constant dense<0.000000e+00> : vector<128x32xf32>
    %2 = tpu.matmul %0, %1, %cst {dimension_numbers = #tpu.dot_dimension_numbers<[1], [0], [0], [1], [0, 0, 1, 1], [], []>} : vector<128x32xbf16>, vector<32x32xbf16>, vector<128x32xf32> -> vector<128x32xf32>
    %c0_3 = arith.constant 0 : index
    %c0_4 = arith.constant 0 : index
    %3 = vector.load %arg3[%c0_3, %c0_4] : memref<1x32xf32, #tpu.memory_space<vmem>>, vector<1x32xf32>
    %4 = vector.broadcast %3 : vector<1x32xf32> to vector<128x32xf32>
    %5 = arith.addf %2, %4 : vector<128x32xf32>
    %6 = math.tanh %5 : vector<128x32xf32>
    %7 = vector.shape_cast %6 : vector<128x32xf32> to vector<8x16x32xf32>
    %cst_5 = arith.constant dense<0.000000e+00> : vector<8x32xf32>
    %8 = vector.multi_reduction <add>, %7, %cst_5 [1] : vector<8x16x32xf32> to vector<8x32xf32>
    %cst_6 = arith.constant 1.600000e+01 : f32
    %9 = vector.broadcast %cst_6 : f32 to vector<8x32xf32>
    %10 = arith.divf %8, %9 : vector<8x32xf32>
    %c0_7 = arith.constant 0 : index
    %c0_8 = arith.constant 0 : index
    %11 = vector.load %arg8[%c0_7, %c0_8] : memref<32x32xbf16, #tpu.memory_space<vmem>>, vector<32x32xbf16>
    %c0_9 = arith.constant 0 : index
    %c0_10 = arith.constant 0 : index
    %12 = vector.load %arg6[%c0_9, %c0_10] : memref<64x128xbf16, #tpu.memory_space<vmem>>, vector<64x128xbf16>
    %c0_11 = arith.constant 0 : index
    %c0_12 = arith.constant 0 : index
    %13 = vector.load %arg4[%c0_11, %c0_12] : memref<64x32xbf16, #tpu.memory_space<vmem>>, vector<64x32xbf16>
    %c0_13 = arith.constant 0 : index
    %c0_14 = arith.constant 0 : index
    %14 = vector.load %arg5[%c0_13, %c0_14] : memref<32x128xbf16, #tpu.memory_space<vmem>>, vector<32x128xbf16>
    %cst_15 = arith.constant dense<0.000000e+00> : vector<64x128xf32>
    %15 = tpu.matmul %13, %14, %cst_15 {dimension_numbers = #tpu.dot_dimension_numbers<[1], [0], [0], [1], [0, 0, 1, 1], [], []>} : vector<64x32xbf16>, vector<32x128xbf16>, vector<64x128xf32> -> vector<64x128xf32>
    %c0_16 = arith.constant 0 : index
    %c0_17 = arith.constant 0 : index
    %16 = vector.load %arg7[%c0_16, %c0_17] : memref<1x128xf32, #tpu.memory_space<vmem>>, vector<1x128xf32>
    %17 = vector.broadcast %16 : vector<1x128xf32> to vector<64x128xf32>
    %18 = arith.addf %15, %17 : vector<64x128xf32>
    %cst_18 = arith.constant 0.000000e+00 : f32
    %19 = vector.broadcast %cst_18 : f32 to vector<8x32xf32>
    %20 = arith.truncf %10 : vector<8x32xf32> to vector<8x32xbf16>
    %cst_19 = arith.constant dense<0.000000e+00> : vector<8x32xf32>
    %21 = tpu.matmul %20, %11, %cst_19 {dimension_numbers = #tpu.dot_dimension_numbers<[1], [0], [0], [1], [0, 0, 1, 1], [], []>} : vector<8x32xbf16>, vector<32x32xbf16>, vector<8x32xf32> -> vector<8x32xf32>
    %22 = vector.shape_cast %21 : vector<8x32xf32> to vector<8x1x32xf32>
    %23 = vector.broadcast %22 : vector<8x1x32xf32> to vector<8x16x32xf32>
    %24 = arith.mulf %7, %23 : vector<8x16x32xf32>
    %cst_20 = arith.constant dense<0.000000e+00> : vector<8x16xf32>
    %25 = vector.multi_reduction <add>, %24, %cst_20 [2] : vector<8x16x32xf32> to vector<8x16xf32>
    %cst_21 = arith.constant dense<0xFF800000> : vector<8xf32>
    %26 = vector.multi_reduction <maximumf>, %25, %cst_21 [1] : vector<8x16xf32> to vector<8xf32>
    %27 = vector.shape_cast %26 : vector<8xf32> to vector<8x1xf32>
    %28 = vector.broadcast %27 : vector<8x1xf32> to vector<8x16xf32>
    %29 = arith.subf %25, %28 : vector<8x16xf32>
    %30 = math.exp %29 : vector<8x16xf32>
    %cst_22 = arith.constant dense<0.000000e+00> : vector<8xf32>
    %31 = vector.multi_reduction <add>, %30, %cst_22 [1] : vector<8x16xf32> to vector<8xf32>
    %32 = vector.shape_cast %31 : vector<8xf32> to vector<8x1xf32>
    %33 = tpu.reciprocal %32 {approx = true} : vector<8x1xf32> -> vector<8x1xf32>
    %34 = vector.broadcast %33 : vector<8x1xf32> to vector<8x16xf32>
    %35 = arith.mulf %30, %34 : vector<8x16xf32>
    %36 = vector.shape_cast %35 : vector<8x16xf32> to vector<8x16x1xf32>
    %37 = vector.broadcast %36 : vector<8x16x1xf32> to vector<8x16x32xf32>
    %38 = arith.mulf %37, %7 : vector<8x16x32xf32>
    %cst_23 = arith.constant dense<0.000000e+00> : vector<8x32xf32>
    %39 = vector.multi_reduction <add>, %38, %cst_23 [1] : vector<8x16x32xf32> to vector<8x32xf32>
    %c0_24 = arith.constant 0 : index
    %c0_25 = arith.constant 0 : index
    %40 = vector.load %arg13[%c0_24, %c0_25] : memref<64x32xf32, #tpu.memory_space<vmem>>, vector<8x32xf32>
    tpu.vector_store %arg13[%c0_24, %c0_25], %39 {strides = array<i32>} : memref<64x32xf32, #tpu.memory_space<vmem>>, vector<8x32xf32>,
    %41 = arith.truncf %39 : vector<8x32xf32> to vector<8x32xbf16>
    %42 = arith.truncf %10 : vector<8x32xf32> to vector<8x32xbf16>
    %43 = tpu.concatenate %41, %42 in 1 : vector<8x32xbf16>, vector<8x32xbf16> -> vector<8x64xbf16>
    %cst_26 = arith.constant dense<0.000000e+00> : vector<8x128xf32>
    %44 = tpu.matmul %43, %12, %cst_26 {dimension_numbers = #tpu.dot_dimension_numbers<[1], [0], [0], [1], [0, 0, 1, 1], [], []>} : vector<8x64xbf16>, vector<64x128xbf16>, vector<8x128xf32> -> vector<8x128xf32>
    %45 = vector.extract_strided_slice %18 {offsets = [0, 0], sizes = [8, 128], strides = [1, 1]} : vector<64x128xf32> to vector<8x128xf32>
    %46 = arith.addf %44, %45 : vector<8x128xf32>
    %47 = arith.negf %46 : vector<8x128xf32>
    %48 = math.exp %47 : vector<8x128xf32>
    %cst_27 = arith.constant 1.000000e+00 : f32
    %49 = vector.broadcast %cst_27 : f32 to vector<8x128xf32>
    %50 = arith.addf %49, %48 : vector<8x128xf32>
    %51 = arith.divf %49, %50 : vector<8x128xf32>
    %52 = math.tanh %46 : vector<8x128xf32>
    %53 = vector.extract_strided_slice %51 {offsets = [0, 32], sizes = [8, 32], strides = [1, 1]} : vector<8x128xf32> to vector<8x32xf32>
    %54 = arith.mulf %53, %19 : vector<8x32xf32>
    %55 = vector.extract_strided_slice %51 {offsets = [0, 0], sizes = [8, 32], strides = [1, 1]} : vector<8x128xf32> to vector<8x32xf32>
    %56 = vector.extract_strided_slice %52 {offsets = [0, 64], sizes = [8, 32], strides = [1, 1]} : vector<8x128xf32> to vector<8x32xf32>
    %57 = arith.mulf %55, %56 : vector<8x32xf32>
    %58 = arith.addf %54, %57 : vector<8x32xf32>
    %59 = vector.extract_strided_slice %51 {offsets = [0, 96], sizes = [8, 32], strides = [1, 1]} : vector<8x128xf32> to vector<8x32xf32>
    %60 = math.tanh %58 : vector<8x32xf32>
    %61 = arith.mulf %59, %60 : vector<8x32xf32>
    %c0_28 = arith.constant 0 : index
    %c0_29 = arith.constant 0 : index
    %62 = vector.load %arg12[%c0_28, %c0_29] : memref<64x32xf32, #tpu.memory_space<vmem>>, vector<8x32xf32>
    tpu.vector_store %arg12[%c0_28, %c0_29], %61 {strides = array<i32>} : memref<64x32xf32, #tpu.memory_space<vmem>>, vector<8x32xf32>,
    %63 = arith.truncf %61 : vector<8x32xf32> to vector<8x32xbf16>
    %cst_30 = arith.constant dense<0.000000e+00> : vector<8x32xf32>
    %64 = tpu.matmul %63, %11, %cst_30 {dimension_numbers = #tpu.dot_dimension_numbers<[1], [0], [0], [1], [0, 0, 1, 1], [], []>} : vector<8x32xbf16>, vector<32x32xbf16>, vector<8x32xf32> -> vector<8x32xf32>
    %65 = vector.shape_cast %64 : vector<8x32xf32> to vector<8x1x32xf32>
    %66 = vector.broadcast %65 : vector<8x1x32xf32> to vector<8x16x32xf32>
    %67 = arith.mulf %7, %66 : vector<8x16x32xf32>
    %cst_31 = arith.constant dense<0.000000e+00> : vector<8x16xf32>
    %68 = vector.multi_reduction <add>, %67, %cst_31 [2] : vector<8x16x32xf32> to vector<8x16xf32>
    %cst_32 = arith.constant dense<0xFF800000> : vector<8xf32>
    %69 = vector.multi_reduction <maximumf>, %68, %cst_32 [1] : vector<8x16xf32> to vector<8xf32>
    %70 = vector.shape_cast %69 : vector<8xf32> to vector<8x1xf32>
    %71 = vector.broadcast %70 : vector<8x1xf32> to vector<8x16xf32>
    %72 = arith.subf %68, %71 : vector<8x16xf32>
    %73 = math.exp %72 : vector<8x16xf32>
    %cst_33 = arith.constant dense<0.000000e+00> : vector<8xf32>
    %74 = vector.multi_reduction <add>, %73, %cst_33 [1] : vector<8x16xf32> to vector<8xf32>
    %75 = vector.shape_cast %74 : vector<8xf32> to vector<8x1xf32>
    %76 = tpu.reciprocal %75 {approx = true} : vector<8x1xf32> -> vector<8x1xf32>
    %77 = vector.broadcast %76 : vector<8x1xf32> to vector<8x16xf32>
    %78 = arith.mulf %73, %77 : vector<8x16xf32>
    %79 = vector.shape_cast %78 : vector<8x16xf32> to vector<8x16x1xf32>
    %80 = vector.broadcast %79 : vector<8x16x1xf32> to vector<8x16x32xf32>
    %81 = arith.mulf %80, %7 : vector<8x16x32xf32>
    %cst_34 = arith.constant dense<0.000000e+00> : vector<8x32xf32>
    %82 = vector.multi_reduction <add>, %81, %cst_34 [1] : vector<8x16x32xf32> to vector<8x32xf32>
    %c8 = arith.constant 8 : index
    %c0_35 = arith.constant 0 : index
    %83 = vector.load %arg13[%c8, %c0_35] : memref<64x32xf32, #tpu.memory_space<vmem>>, vector<8x32xf32>
    tpu.vector_store %arg13[%c8, %c0_35], %82 {strides = array<i32>} : memref<64x32xf32, #tpu.memory_space<vmem>>, vector<8x32xf32>,
    %84 = arith.truncf %82 : vector<8x32xf32> to vector<8x32xbf16>
    %85 = arith.truncf %61 : vector<8x32xf32> to vector<8x32xbf16>
    %86 = tpu.concatenate %84, %85 in 1 : vector<8x32xbf16>, vector<8x32xbf16> -> vector<8x64xbf16>
    %cst_36 = arith.constant dense<0.000000e+00> : vector<8x128xf32>
    %87 = tpu.matmul %86, %12, %cst_36 {dimension_numbers = #tpu.dot_dimension_numbers<[1], [0], [0], [1], [0, 0, 1, 1], [], []>} : vector<8x64xbf16>, vector<64x128xbf16>, vector<8x128xf32> -> vector<8x128xf32>
    %88 = vector.extract_strided_slice %18 {offsets = [8, 0], sizes = [8, 128], strides = [1, 1]} : vector<64x128xf32> to vector<8x128xf32>
    %89 = arith.addf %87, %88 : vector<8x128xf32>
    %90 = arith.negf %89 : vector<8x128xf32>
    %91 = math.exp %90 : vector<8x128xf32>
    %cst_37 = arith.constant 1.000000e+00 : f32
    %92 = vector.broadcast %cst_37 : f32 to vector<8x128xf32>
    %93 = arith.addf %92, %91 : vector<8x128xf32>
    %94 = arith.divf %92, %93 : vector<8x128xf32>
    %95 = math.tanh %89 : vector<8x128xf32>
    %96 = vector.extract_strided_slice %94 {offsets = [0, 32], sizes = [8, 32], strides = [1, 1]} : vector<8x128xf32> to vector<8x32xf32>
    %97 = arith.mulf %96, %58 : vector<8x32xf32>
    %98 = vector.extract_strided_slice %94 {offsets = [0, 0], sizes = [8, 32], strides = [1, 1]} : vector<8x128xf32> to vector<8x32xf32>
    %99 = vector.extract_strided_slice %95 {offsets = [0, 64], sizes = [8, 32], strides = [1, 1]} : vector<8x128xf32> to vector<8x32xf32>
    %100 = arith.mulf %98, %99 : vector<8x32xf32>
    %101 = arith.addf %97, %100 : vector<8x32xf32>
    %102 = vector.extract_strided_slice %94 {offsets = [0, 96], sizes = [8, 32], strides = [1, 1]} : vector<8x128xf32> to vector<8x32xf32>
    %103 = math.tanh %101 : vector<8x32xf32>
    %104 = arith.mulf %102, %103 : vector<8x32xf32>
    %c8_38 = arith.constant 8 : index
    %c0_39 = arith.constant 0 : index
    %105 = vector.load %arg12[%c8_38, %c0_39] : memref<64x32xf32, #tpu.memory_space<vmem>>, vector<8x32xf32>
    tpu.vector_store %arg12[%c8_38, %c0_39], %104 {strides = array<i32>} : memref<64x32xf32, #tpu.memory_space<vmem>>, vector<8x32xf32>,
    %106 = arith.truncf %104 : vector<8x32xf32> to vector<8x32xbf16>
    %cst_40 = arith.constant dense<0.000000e+00> : vector<8x32xf32>
    %107 = tpu.matmul %106, %11, %cst_40 {dimension_numbers = #tpu.dot_dimension_numbers<[1], [0], [0], [1], [0, 0, 1, 1], [], []>} : vector<8x32xbf16>, vector<32x32xbf16>, vector<8x32xf32> -> vector<8x32xf32>
    %108 = vector.shape_cast %107 : vector<8x32xf32> to vector<8x1x32xf32>
    %109 = vector.broadcast %108 : vector<8x1x32xf32> to vector<8x16x32xf32>
    %110 = arith.mulf %7, %109 : vector<8x16x32xf32>
    %cst_41 = arith.constant dense<0.000000e+00> : vector<8x16xf32>
    %111 = vector.multi_reduction <add>, %110, %cst_41 [2] : vector<8x16x32xf32> to vector<8x16xf32>
    %cst_42 = arith.constant dense<0xFF800000> : vector<8xf32>
    %112 = vector.multi_reduction <maximumf>, %111, %cst_42 [1] : vector<8x16xf32> to vector<8xf32>
    %113 = vector.shape_cast %112 : vector<8xf32> to vector<8x1xf32>
    %114 = vector.broadcast %113 : vector<8x1xf32> to vector<8x16xf32>
    %115 = arith.subf %111, %114 : vector<8x16xf32>
    %116 = math.exp %115 : vector<8x16xf32>
    %cst_43 = arith.constant dense<0.000000e+00> : vector<8xf32>
    %117 = vector.multi_reduction <add>, %116, %cst_43 [1] : vector<8x16xf32> to vector<8xf32>
    %118 = vector.shape_cast %117 : vector<8xf32> to vector<8x1xf32>
    %119 = tpu.reciprocal %118 {approx = true} : vector<8x1xf32> -> vector<8x1xf32>
    %120 = vector.broadcast %119 : vector<8x1xf32> to vector<8x16xf32>
    %121 = arith.mulf %116, %120 : vector<8x16xf32>
    %122 = vector.shape_cast %121 : vector<8x16xf32> to vector<8x16x1xf32>
    %123 = vector.broadcast %122 : vector<8x16x1xf32> to vector<8x16x32xf32>
    %124 = arith.mulf %123, %7 : vector<8x16x32xf32>
    %cst_44 = arith.constant dense<0.000000e+00> : vector<8x32xf32>
    %125 = vector.multi_reduction <add>, %124, %cst_44 [1] : vector<8x16x32xf32> to vector<8x32xf32>
    %c16 = arith.constant 16 : index
    %c0_45 = arith.constant 0 : index
    %126 = vector.load %arg13[%c16, %c0_45] : memref<64x32xf32, #tpu.memory_space<vmem>>, vector<8x32xf32>
    tpu.vector_store %arg13[%c16, %c0_45], %125 {strides = array<i32>} : memref<64x32xf32, #tpu.memory_space<vmem>>, vector<8x32xf32>,
    %127 = arith.truncf %125 : vector<8x32xf32> to vector<8x32xbf16>
    %128 = arith.truncf %104 : vector<8x32xf32> to vector<8x32xbf16>
    %129 = tpu.concatenate %127, %128 in 1 : vector<8x32xbf16>, vector<8x32xbf16> -> vector<8x64xbf16>
    %cst_46 = arith.constant dense<0.000000e+00> : vector<8x128xf32>
    %130 = tpu.matmul %129, %12, %cst_46 {dimension_numbers = #tpu.dot_dimension_numbers<[1], [0], [0], [1], [0, 0, 1, 1], [], []>} : vector<8x64xbf16>, vector<64x128xbf16>, vector<8x128xf32> -> vector<8x128xf32>
    %131 = vector.extract_strided_slice %18 {offsets = [16, 0], sizes = [8, 128], strides = [1, 1]} : vector<64x128xf32> to vector<8x128xf32>
    %132 = arith.addf %130, %131 : vector<8x128xf32>
    %133 = arith.negf %132 : vector<8x128xf32>
    %134 = math.exp %133 : vector<8x128xf32>
    %cst_47 = arith.constant 1.000000e+00 : f32
    %135 = vector.broadcast %cst_47 : f32 to vector<8x128xf32>
    %136 = arith.addf %135, %134 : vector<8x128xf32>
    %137 = arith.divf %135, %136 : vector<8x128xf32>
    %138 = math.tanh %132 : vector<8x128xf32>
    %139 = vector.extract_strided_slice %137 {offsets = [0, 32], sizes = [8, 32], strides = [1, 1]} : vector<8x128xf32> to vector<8x32xf32>
    %140 = arith.mulf %139, %101 : vector<8x32xf32>
    %141 = vector.extract_strided_slice %137 {offsets = [0, 0], sizes = [8, 32], strides = [1, 1]} : vector<8x128xf32> to vector<8x32xf32>
    %142 = vector.extract_strided_slice %138 {offsets = [0, 64], sizes = [8, 32], strides = [1, 1]} : vector<8x128xf32> to vector<8x32xf32>
    %143 = arith.mulf %141, %142 : vector<8x32xf32>
    %144 = arith.addf %140, %143 : vector<8x32xf32>
    %145 = vector.extract_strided_slice %137 {offsets = [0, 96], sizes = [8, 32], strides = [1, 1]} : vector<8x128xf32> to vector<8x32xf32>
    %146 = math.tanh %144 : vector<8x32xf32>
    %147 = arith.mulf %145, %146 : vector<8x32xf32>
    %c16_48 = arith.constant 16 : index
    %c0_49 = arith.constant 0 : index
    %148 = vector.load %arg12[%c16_48, %c0_49] : memref<64x32xf32, #tpu.memory_space<vmem>>, vector<8x32xf32>
    tpu.vector_store %arg12[%c16_48, %c0_49], %147 {strides = array<i32>} : memref<64x32xf32, #tpu.memory_space<vmem>>, vector<8x32xf32>,
    %149 = arith.truncf %147 : vector<8x32xf32> to vector<8x32xbf16>
    %cst_50 = arith.constant dense<0.000000e+00> : vector<8x32xf32>
    %150 = tpu.matmul %149, %11, %cst_50 {dimension_numbers = #tpu.dot_dimension_numbers<[1], [0], [0], [1], [0, 0, 1, 1], [], []>} : vector<8x32xbf16>, vector<32x32xbf16>, vector<8x32xf32> -> vector<8x32xf32>
    %151 = vector.shape_cast %150 : vector<8x32xf32> to vector<8x1x32xf32>
    %152 = vector.broadcast %151 : vector<8x1x32xf32> to vector<8x16x32xf32>
    %153 = arith.mulf %7, %152 : vector<8x16x32xf32>
    %cst_51 = arith.constant dense<0.000000e+00> : vector<8x16xf32>
    %154 = vector.multi_reduction <add>, %153, %cst_51 [2] : vector<8x16x32xf32> to vector<8x16xf32>
    %cst_52 = arith.constant dense<0xFF800000> : vector<8xf32>
    %155 = vector.multi_reduction <maximumf>, %154, %cst_52 [1] : vector<8x16xf32> to vector<8xf32>
    %156 = vector.shape_cast %155 : vector<8xf32> to vector<8x1xf32>
    %157 = vector.broadcast %156 : vector<8x1xf32> to vector<8x16xf32>
    %158 = arith.subf %154, %157 : vector<8x16xf32>
    %159 = math.exp %158 : vector<8x16xf32>
    %cst_53 = arith.constant dense<0.000000e+00> : vector<8xf32>
    %160 = vector.multi_reduction <add>, %159, %cst_53 [1] : vector<8x16xf32> to vector<8xf32>
    %161 = vector.shape_cast %160 : vector<8xf32> to vector<8x1xf32>
    %162 = tpu.reciprocal %161 {approx = true} : vector<8x1xf32> -> vector<8x1xf32>
    %163 = vector.broadcast %162 : vector<8x1xf32> to vector<8x16xf32>
    %164 = arith.mulf %159, %163 : vector<8x16xf32>
    %165 = vector.shape_cast %164 : vector<8x16xf32> to vector<8x16x1xf32>
    %166 = vector.broadcast %165 : vector<8x16x1xf32> to vector<8x16x32xf32>
    %167 = arith.mulf %166, %7 : vector<8x16x32xf32>
    %cst_54 = arith.constant dense<0.000000e+00> : vector<8x32xf32>
    %168 = vector.multi_reduction <add>, %167, %cst_54 [1] : vector<8x16x32xf32> to vector<8x32xf32>
    %c24 = arith.constant 24 : index
    %c0_55 = arith.constant 0 : index
    %169 = vector.load %arg13[%c24, %c0_55] : memref<64x32xf32, #tpu.memory_space<vmem>>, vector<8x32xf32>
    tpu.vector_store %arg13[%c24, %c0_55], %168 {strides = array<i32>} : memref<64x32xf32, #tpu.memory_space<vmem>>, vector<8x32xf32>,
    %170 = arith.truncf %168 : vector<8x32xf32> to vector<8x32xbf16>
    %171 = arith.truncf %147 : vector<8x32xf32> to vector<8x32xbf16>
    %172 = tpu.concatenate %170, %171 in 1 : vector<8x32xbf16>, vector<8x32xbf16> -> vector<8x64xbf16>
    %cst_56 = arith.constant dense<0.000000e+00> : vector<8x128xf32>
    %173 = tpu.matmul %172, %12, %cst_56 {dimension_numbers = #tpu.dot_dimension_numbers<[1], [0], [0], [1], [0, 0, 1, 1], [], []>} : vector<8x64xbf16>, vector<64x128xbf16>, vector<8x128xf32> -> vector<8x128xf32>
    %174 = vector.extract_strided_slice %18 {offsets = [24, 0], sizes = [8, 128], strides = [1, 1]} : vector<64x128xf32> to vector<8x128xf32>
    %175 = arith.addf %173, %174 : vector<8x128xf32>
    %176 = arith.negf %175 : vector<8x128xf32>
    %177 = math.exp %176 : vector<8x128xf32>
    %cst_57 = arith.constant 1.000000e+00 : f32
    %178 = vector.broadcast %cst_57 : f32 to vector<8x128xf32>
    %179 = arith.addf %178, %177 : vector<8x128xf32>
    %180 = arith.divf %178, %179 : vector<8x128xf32>
    %181 = math.tanh %175 : vector<8x128xf32>
    %182 = vector.extract_strided_slice %180 {offsets = [0, 32], sizes = [8, 32], strides = [1, 1]} : vector<8x128xf32> to vector<8x32xf32>
    %183 = arith.mulf %182, %144 : vector<8x32xf32>
    %184 = vector.extract_strided_slice %180 {offsets = [0, 0], sizes = [8, 32], strides = [1, 1]} : vector<8x128xf32> to vector<8x32xf32>
    %185 = vector.extract_strided_slice %181 {offsets = [0, 64], sizes = [8, 32], strides = [1, 1]} : vector<8x128xf32> to vector<8x32xf32>
    %186 = arith.mulf %184, %185 : vector<8x32xf32>
    %187 = arith.addf %183, %186 : vector<8x32xf32>
    %188 = vector.extract_strided_slice %180 {offsets = [0, 96], sizes = [8, 32], strides = [1, 1]} : vector<8x128xf32> to vector<8x32xf32>
    %189 = math.tanh %187 : vector<8x32xf32>
    %190 = arith.mulf %188, %189 : vector<8x32xf32>
    %c24_58 = arith.constant 24 : index
    %c0_59 = arith.constant 0 : index
    %191 = vector.load %arg12[%c24_58, %c0_59] : memref<64x32xf32, #tpu.memory_space<vmem>>, vector<8x32xf32>
    tpu.vector_store %arg12[%c24_58, %c0_59], %190 {strides = array<i32>} : memref<64x32xf32, #tpu.memory_space<vmem>>, vector<8x32xf32>,
    %192 = arith.truncf %190 : vector<8x32xf32> to vector<8x32xbf16>
    %cst_60 = arith.constant dense<0.000000e+00> : vector<8x32xf32>
    %193 = tpu.matmul %192, %11, %cst_60 {dimension_numbers = #tpu.dot_dimension_numbers<[1], [0], [0], [1], [0, 0, 1, 1], [], []>} : vector<8x32xbf16>, vector<32x32xbf16>, vector<8x32xf32> -> vector<8x32xf32>
    %194 = vector.shape_cast %193 : vector<8x32xf32> to vector<8x1x32xf32>
    %195 = vector.broadcast %194 : vector<8x1x32xf32> to vector<8x16x32xf32>
    %196 = arith.mulf %7, %195 : vector<8x16x32xf32>
    %cst_61 = arith.constant dense<0.000000e+00> : vector<8x16xf32>
    %197 = vector.multi_reduction <add>, %196, %cst_61 [2] : vector<8x16x32xf32> to vector<8x16xf32>
    %cst_62 = arith.constant dense<0xFF800000> : vector<8xf32>
    %198 = vector.multi_reduction <maximumf>, %197, %cst_62 [1] : vector<8x16xf32> to vector<8xf32>
    %199 = vector.shape_cast %198 : vector<8xf32> to vector<8x1xf32>
    %200 = vector.broadcast %199 : vector<8x1xf32> to vector<8x16xf32>
    %201 = arith.subf %197, %200 : vector<8x16xf32>
    %202 = math.exp %201 : vector<8x16xf32>
    %cst_63 = arith.constant dense<0.000000e+00> : vector<8xf32>
    %203 = vector.multi_reduction <add>, %202, %cst_63 [1] : vector<8x16xf32> to vector<8xf32>
    %204 = vector.shape_cast %203 : vector<8xf32> to vector<8x1xf32>
    %205 = tpu.reciprocal %204 {approx = true} : vector<8x1xf32> -> vector<8x1xf32>
    %206 = vector.broadcast %205 : vector<8x1xf32> to vector<8x16xf32>
    %207 = arith.mulf %202, %206 : vector<8x16xf32>
    %208 = vector.shape_cast %207 : vector<8x16xf32> to vector<8x16x1xf32>
    %209 = vector.broadcast %208 : vector<8x16x1xf32> to vector<8x16x32xf32>
    %210 = arith.mulf %209, %7 : vector<8x16x32xf32>
    %cst_64 = arith.constant dense<0.000000e+00> : vector<8x32xf32>
    %211 = vector.multi_reduction <add>, %210, %cst_64 [1] : vector<8x16x32xf32> to vector<8x32xf32>
    %c32 = arith.constant 32 : index
    %c0_65 = arith.constant 0 : index
    %212 = vector.load %arg13[%c32, %c0_65] : memref<64x32xf32, #tpu.memory_space<vmem>>, vector<8x32xf32>
    tpu.vector_store %arg13[%c32, %c0_65], %211 {strides = array<i32>} : memref<64x32xf32, #tpu.memory_space<vmem>>, vector<8x32xf32>,
    %213 = arith.truncf %211 : vector<8x32xf32> to vector<8x32xbf16>
    %214 = arith.truncf %190 : vector<8x32xf32> to vector<8x32xbf16>
    %215 = tpu.concatenate %213, %214 in 1 : vector<8x32xbf16>, vector<8x32xbf16> -> vector<8x64xbf16>
    %cst_66 = arith.constant dense<0.000000e+00> : vector<8x128xf32>
    %216 = tpu.matmul %215, %12, %cst_66 {dimension_numbers = #tpu.dot_dimension_numbers<[1], [0], [0], [1], [0, 0, 1, 1], [], []>} : vector<8x64xbf16>, vector<64x128xbf16>, vector<8x128xf32> -> vector<8x128xf32>
    %217 = vector.extract_strided_slice %18 {offsets = [32, 0], sizes = [8, 128], strides = [1, 1]} : vector<64x128xf32> to vector<8x128xf32>
    %218 = arith.addf %216, %217 : vector<8x128xf32>
    %219 = arith.negf %218 : vector<8x128xf32>
    %220 = math.exp %219 : vector<8x128xf32>
    %cst_67 = arith.constant 1.000000e+00 : f32
    %221 = vector.broadcast %cst_67 : f32 to vector<8x128xf32>
    %222 = arith.addf %221, %220 : vector<8x128xf32>
    %223 = arith.divf %221, %222 : vector<8x128xf32>
    %224 = math.tanh %218 : vector<8x128xf32>
    %225 = vector.extract_strided_slice %223 {offsets = [0, 32], sizes = [8, 32], strides = [1, 1]} : vector<8x128xf32> to vector<8x32xf32>
    %226 = arith.mulf %225, %187 : vector<8x32xf32>
    %227 = vector.extract_strided_slice %223 {offsets = [0, 0], sizes = [8, 32], strides = [1, 1]} : vector<8x128xf32> to vector<8x32xf32>
    %228 = vector.extract_strided_slice %224 {offsets = [0, 64], sizes = [8, 32], strides = [1, 1]} : vector<8x128xf32> to vector<8x32xf32>
    %229 = arith.mulf %227, %228 : vector<8x32xf32>
    %230 = arith.addf %226, %229 : vector<8x32xf32>
    %231 = vector.extract_strided_slice %223 {offsets = [0, 96], sizes = [8, 32], strides = [1, 1]} : vector<8x128xf32> to vector<8x32xf32>
    %232 = math.tanh %230 : vector<8x32xf32>
    %233 = arith.mulf %231, %232 : vector<8x32xf32>
    %c32_68 = arith.constant 32 : index
    %c0_69 = arith.constant 0 : index
    %234 = vector.load %arg12[%c32_68, %c0_69] : memref<64x32xf32, #tpu.memory_space<vmem>>, vector<8x32xf32>
    tpu.vector_store %arg12[%c32_68, %c0_69], %233 {strides = array<i32>} : memref<64x32xf32, #tpu.memory_space<vmem>>, vector<8x32xf32>,
    %235 = arith.truncf %233 : vector<8x32xf32> to vector<8x32xbf16>
    %cst_70 = arith.constant dense<0.000000e+00> : vector<8x32xf32>
    %236 = tpu.matmul %235, %11, %cst_70 {dimension_numbers = #tpu.dot_dimension_numbers<[1], [0], [0], [1], [0, 0, 1, 1], [], []>} : vector<8x32xbf16>, vector<32x32xbf16>, vector<8x32xf32> -> vector<8x32xf32>
    %237 = vector.shape_cast %236 : vector<8x32xf32> to vector<8x1x32xf32>
    %238 = vector.broadcast %237 : vector<8x1x32xf32> to vector<8x16x32xf32>
    %239 = arith.mulf %7, %238 : vector<8x16x32xf32>
    %cst_71 = arith.constant dense<0.000000e+00> : vector<8x16xf32>
    %240 = vector.multi_reduction <add>, %239, %cst_71 [2] : vector<8x16x32xf32> to vector<8x16xf32>
    %cst_72 = arith.constant dense<0xFF800000> : vector<8xf32>
    %241 = vector.multi_reduction <maximumf>, %240, %cst_72 [1] : vector<8x16xf32> to vector<8xf32>
    %242 = vector.shape_cast %241 : vector<8xf32> to vector<8x1xf32>
    %243 = vector.broadcast %242 : vector<8x1xf32> to vector<8x16xf32>
    %244 = arith.subf %240, %243 : vector<8x16xf32>
    %245 = math.exp %244 : vector<8x16xf32>
    %cst_73 = arith.constant dense<0.000000e+00> : vector<8xf32>
    %246 = vector.multi_reduction <add>, %245, %cst_73 [1] : vector<8x16xf32> to vector<8xf32>
    %247 = vector.shape_cast %246 : vector<8xf32> to vector<8x1xf32>
    %248 = tpu.reciprocal %247 {approx = true} : vector<8x1xf32> -> vector<8x1xf32>
    %249 = vector.broadcast %248 : vector<8x1xf32> to vector<8x16xf32>
    %250 = arith.mulf %245, %249 : vector<8x16xf32>
    %251 = vector.shape_cast %250 : vector<8x16xf32> to vector<8x16x1xf32>
    %252 = vector.broadcast %251 : vector<8x16x1xf32> to vector<8x16x32xf32>
    %253 = arith.mulf %252, %7 : vector<8x16x32xf32>
    %cst_74 = arith.constant dense<0.000000e+00> : vector<8x32xf32>
    %254 = vector.multi_reduction <add>, %253, %cst_74 [1] : vector<8x16x32xf32> to vector<8x32xf32>
    %c40 = arith.constant 40 : index
    %c0_75 = arith.constant 0 : index
    %255 = vector.load %arg13[%c40, %c0_75] : memref<64x32xf32, #tpu.memory_space<vmem>>, vector<8x32xf32>
    tpu.vector_store %arg13[%c40, %c0_75], %254 {strides = array<i32>} : memref<64x32xf32, #tpu.memory_space<vmem>>, vector<8x32xf32>,
    %256 = arith.truncf %254 : vector<8x32xf32> to vector<8x32xbf16>
    %257 = arith.truncf %233 : vector<8x32xf32> to vector<8x32xbf16>
    %258 = tpu.concatenate %256, %257 in 1 : vector<8x32xbf16>, vector<8x32xbf16> -> vector<8x64xbf16>
    %cst_76 = arith.constant dense<0.000000e+00> : vector<8x128xf32>
    %259 = tpu.matmul %258, %12, %cst_76 {dimension_numbers = #tpu.dot_dimension_numbers<[1], [0], [0], [1], [0, 0, 1, 1], [], []>} : vector<8x64xbf16>, vector<64x128xbf16>, vector<8x128xf32> -> vector<8x128xf32>
    %260 = vector.extract_strided_slice %18 {offsets = [40, 0], sizes = [8, 128], strides = [1, 1]} : vector<64x128xf32> to vector<8x128xf32>
    %261 = arith.addf %259, %260 : vector<8x128xf32>
    %262 = arith.negf %261 : vector<8x128xf32>
    %263 = math.exp %262 : vector<8x128xf32>
    %cst_77 = arith.constant 1.000000e+00 : f32
    %264 = vector.broadcast %cst_77 : f32 to vector<8x128xf32>
    %265 = arith.addf %264, %263 : vector<8x128xf32>
    %266 = arith.divf %264, %265 : vector<8x128xf32>
    %267 = math.tanh %261 : vector<8x128xf32>
    %268 = vector.extract_strided_slice %266 {offsets = [0, 32], sizes = [8, 32], strides = [1, 1]} : vector<8x128xf32> to vector<8x32xf32>
    %269 = arith.mulf %268, %230 : vector<8x32xf32>
    %270 = vector.extract_strided_slice %266 {offsets = [0, 0], sizes = [8, 32], strides = [1, 1]} : vector<8x128xf32> to vector<8x32xf32>
    %271 = vector.extract_strided_slice %267 {offsets = [0, 64], sizes = [8, 32], strides = [1, 1]} : vector<8x128xf32> to vector<8x32xf32>
    %272 = arith.mulf %270, %271 : vector<8x32xf32>
    %273 = arith.addf %269, %272 : vector<8x32xf32>
    %274 = vector.extract_strided_slice %266 {offsets = [0, 96], sizes = [8, 32], strides = [1, 1]} : vector<8x128xf32> to vector<8x32xf32>
    %275 = math.tanh %273 : vector<8x32xf32>
    %276 = arith.mulf %274, %275 : vector<8x32xf32>
    %c40_78 = arith.constant 40 : index
    %c0_79 = arith.constant 0 : index
    %277 = vector.load %arg12[%c40_78, %c0_79] : memref<64x32xf32, #tpu.memory_space<vmem>>, vector<8x32xf32>
    tpu.vector_store %arg12[%c40_78, %c0_79], %276 {strides = array<i32>} : memref<64x32xf32, #tpu.memory_space<vmem>>, vector<8x32xf32>,
    %278 = arith.truncf %276 : vector<8x32xf32> to vector<8x32xbf16>
    %cst_80 = arith.constant dense<0.000000e+00> : vector<8x32xf32>
    %279 = tpu.matmul %278, %11, %cst_80 {dimension_numbers = #tpu.dot_dimension_numbers<[1], [0], [0], [1], [0, 0, 1, 1], [], []>} : vector<8x32xbf16>, vector<32x32xbf16>, vector<8x32xf32> -> vector<8x32xf32>
    %280 = vector.shape_cast %279 : vector<8x32xf32> to vector<8x1x32xf32>
    %281 = vector.broadcast %280 : vector<8x1x32xf32> to vector<8x16x32xf32>
    %282 = arith.mulf %7, %281 : vector<8x16x32xf32>
    %cst_81 = arith.constant dense<0.000000e+00> : vector<8x16xf32>
    %283 = vector.multi_reduction <add>, %282, %cst_81 [2] : vector<8x16x32xf32> to vector<8x16xf32>
    %cst_82 = arith.constant dense<0xFF800000> : vector<8xf32>
    %284 = vector.multi_reduction <maximumf>, %283, %cst_82 [1] : vector<8x16xf32> to vector<8xf32>
    %285 = vector.shape_cast %284 : vector<8xf32> to vector<8x1xf32>
    %286 = vector.broadcast %285 : vector<8x1xf32> to vector<8x16xf32>
    %287 = arith.subf %283, %286 : vector<8x16xf32>
    %288 = math.exp %287 : vector<8x16xf32>
    %cst_83 = arith.constant dense<0.000000e+00> : vector<8xf32>
    %289 = vector.multi_reduction <add>, %288, %cst_83 [1] : vector<8x16xf32> to vector<8xf32>
    %290 = vector.shape_cast %289 : vector<8xf32> to vector<8x1xf32>
    %291 = tpu.reciprocal %290 {approx = true} : vector<8x1xf32> -> vector<8x1xf32>
    %292 = vector.broadcast %291 : vector<8x1xf32> to vector<8x16xf32>
    %293 = arith.mulf %288, %292 : vector<8x16xf32>
    %294 = vector.shape_cast %293 : vector<8x16xf32> to vector<8x16x1xf32>
    %295 = vector.broadcast %294 : vector<8x16x1xf32> to vector<8x16x32xf32>
    %296 = arith.mulf %295, %7 : vector<8x16x32xf32>
    %cst_84 = arith.constant dense<0.000000e+00> : vector<8x32xf32>
    %297 = vector.multi_reduction <add>, %296, %cst_84 [1] : vector<8x16x32xf32> to vector<8x32xf32>
    %c48 = arith.constant 48 : index
    %c0_85 = arith.constant 0 : index
    %298 = vector.load %arg13[%c48, %c0_85] : memref<64x32xf32, #tpu.memory_space<vmem>>, vector<8x32xf32>
    tpu.vector_store %arg13[%c48, %c0_85], %297 {strides = array<i32>} : memref<64x32xf32, #tpu.memory_space<vmem>>, vector<8x32xf32>,
    %299 = arith.truncf %297 : vector<8x32xf32> to vector<8x32xbf16>
    %300 = arith.truncf %276 : vector<8x32xf32> to vector<8x32xbf16>
    %301 = tpu.concatenate %299, %300 in 1 : vector<8x32xbf16>, vector<8x32xbf16> -> vector<8x64xbf16>
    %cst_86 = arith.constant dense<0.000000e+00> : vector<8x128xf32>
    %302 = tpu.matmul %301, %12, %cst_86 {dimension_numbers = #tpu.dot_dimension_numbers<[1], [0], [0], [1], [0, 0, 1, 1], [], []>} : vector<8x64xbf16>, vector<64x128xbf16>, vector<8x128xf32> -> vector<8x128xf32>
    %303 = vector.extract_strided_slice %18 {offsets = [48, 0], sizes = [8, 128], strides = [1, 1]} : vector<64x128xf32> to vector<8x128xf32>
    %304 = arith.addf %302, %303 : vector<8x128xf32>
    %305 = arith.negf %304 : vector<8x128xf32>
    %306 = math.exp %305 : vector<8x128xf32>
    %cst_87 = arith.constant 1.000000e+00 : f32
    %307 = vector.broadcast %cst_87 : f32 to vector<8x128xf32>
    %308 = arith.addf %307, %306 : vector<8x128xf32>
    %309 = arith.divf %307, %308 : vector<8x128xf32>
    %310 = math.tanh %304 : vector<8x128xf32>
    %311 = vector.extract_strided_slice %309 {offsets = [0, 32], sizes = [8, 32], strides = [1, 1]} : vector<8x128xf32> to vector<8x32xf32>
    %312 = arith.mulf %311, %273 : vector<8x32xf32>
    %313 = vector.extract_strided_slice %309 {offsets = [0, 0], sizes = [8, 32], strides = [1, 1]} : vector<8x128xf32> to vector<8x32xf32>
    %314 = vector.extract_strided_slice %310 {offsets = [0, 64], sizes = [8, 32], strides = [1, 1]} : vector<8x128xf32> to vector<8x32xf32>
    %315 = arith.mulf %313, %314 : vector<8x32xf32>
    %316 = arith.addf %312, %315 : vector<8x32xf32>
    %317 = vector.extract_strided_slice %309 {offsets = [0, 96], sizes = [8, 32], strides = [1, 1]} : vector<8x128xf32> to vector<8x32xf32>
    %318 = math.tanh %316 : vector<8x32xf32>
    %319 = arith.mulf %317, %318 : vector<8x32xf32>
    %c48_88 = arith.constant 48 : index
    %c0_89 = arith.constant 0 : index
    %320 = vector.load %arg12[%c48_88, %c0_89] : memref<64x32xf32, #tpu.memory_space<vmem>>, vector<8x32xf32>
    tpu.vector_store %arg12[%c48_88, %c0_89], %319 {strides = array<i32>} : memref<64x32xf32, #tpu.memory_space<vmem>>, vector<8x32xf32>,
    %321 = arith.truncf %319 : vector<8x32xf32> to vector<8x32xbf16>
    %cst_90 = arith.constant dense<0.000000e+00> : vector<8x32xf32>
    %322 = tpu.matmul %321, %11, %cst_90 {dimension_numbers = #tpu.dot_dimension_numbers<[1], [0], [0], [1], [0, 0, 1, 1], [], []>} : vector<8x32xbf16>, vector<32x32xbf16>, vector<8x32xf32> -> vector<8x32xf32>
    %323 = vector.shape_cast %322 : vector<8x32xf32> to vector<8x1x32xf32>
    %324 = vector.broadcast %323 : vector<8x1x32xf32> to vector<8x16x32xf32>
    %325 = arith.mulf %7, %324 : vector<8x16x32xf32>
    %cst_91 = arith.constant dense<0.000000e+00> : vector<8x16xf32>
    %326 = vector.multi_reduction <add>, %325, %cst_91 [2] : vector<8x16x32xf32> to vector<8x16xf32>
    %cst_92 = arith.constant dense<0xFF800000> : vector<8xf32>
    %327 = vector.multi_reduction <maximumf>, %326, %cst_92 [1] : vector<8x16xf32> to vector<8xf32>
    %328 = vector.shape_cast %327 : vector<8xf32> to vector<8x1xf32>
    %329 = vector.broadcast %328 : vector<8x1xf32> to vector<8x16xf32>
    %330 = arith.subf %326, %329 : vector<8x16xf32>
    %331 = math.exp %330 : vector<8x16xf32>
    %cst_93 = arith.constant dense<0.000000e+00> : vector<8xf32>
    %332 = vector.multi_reduction <add>, %331, %cst_93 [1] : vector<8x16xf32> to vector<8xf32>
    %333 = vector.shape_cast %332 : vector<8xf32> to vector<8x1xf32>
    %334 = tpu.reciprocal %333 {approx = true} : vector<8x1xf32> -> vector<8x1xf32>
    %335 = vector.broadcast %334 : vector<8x1xf32> to vector<8x16xf32>
    %336 = arith.mulf %331, %335 : vector<8x16xf32>
    %337 = vector.shape_cast %336 : vector<8x16xf32> to vector<8x16x1xf32>
    %338 = vector.broadcast %337 : vector<8x16x1xf32> to vector<8x16x32xf32>
    %339 = arith.mulf %338, %7 : vector<8x16x32xf32>
    %cst_94 = arith.constant dense<0.000000e+00> : vector<8x32xf32>
    %340 = vector.multi_reduction <add>, %339, %cst_94 [1] : vector<8x16x32xf32> to vector<8x32xf32>
    %c56 = arith.constant 56 : index
    %c0_95 = arith.constant 0 : index
    %341 = vector.load %arg13[%c56, %c0_95] : memref<64x32xf32, #tpu.memory_space<vmem>>, vector<8x32xf32>
    tpu.vector_store %arg13[%c56, %c0_95], %340 {strides = array<i32>} : memref<64x32xf32, #tpu.memory_space<vmem>>, vector<8x32xf32>,
    %342 = arith.truncf %340 : vector<8x32xf32> to vector<8x32xbf16>
    %343 = arith.truncf %319 : vector<8x32xf32> to vector<8x32xbf16>
    %344 = tpu.concatenate %342, %343 in 1 : vector<8x32xbf16>, vector<8x32xbf16> -> vector<8x64xbf16>
    %cst_96 = arith.constant dense<0.000000e+00> : vector<8x128xf32>
    %345 = tpu.matmul %344, %12, %cst_96 {dimension_numbers = #tpu.dot_dimension_numbers<[1], [0], [0], [1], [0, 0, 1, 1], [], []>} : vector<8x64xbf16>, vector<64x128xbf16>, vector<8x128xf32> -> vector<8x128xf32>
    %346 = vector.extract_strided_slice %18 {offsets = [56, 0], sizes = [8, 128], strides = [1, 1]} : vector<64x128xf32> to vector<8x128xf32>
    %347 = arith.addf %345, %346 : vector<8x128xf32>
    %348 = arith.negf %347 : vector<8x128xf32>
    %349 = math.exp %348 : vector<8x128xf32>
    %cst_97 = arith.constant 1.000000e+00 : f32
    %350 = vector.broadcast %cst_97 : f32 to vector<8x128xf32>
    %351 = arith.addf %350, %349 : vector<8x128xf32>
    %352 = arith.divf %350, %351 : vector<8x128xf32>
    %353 = math.tanh %347 : vector<8x128xf32>
    %354 = vector.extract_strided_slice %352 {offsets = [0, 32], sizes = [8, 32], strides = [1, 1]} : vector<8x128xf32> to vector<8x32xf32>
    %355 = arith.mulf %354, %316 : vector<8x32xf32>
    %356 = vector.extract_strided_slice %352 {offsets = [0, 0], sizes = [8, 32], strides = [1, 1]} : vector<8x128xf32> to vector<8x32xf32>
    %357 = vector.extract_strided_slice %353 {offsets = [0, 64], sizes = [8, 32], strides = [1, 1]} : vector<8x128xf32> to vector<8x32xf32>
    %358 = arith.mulf %356, %357 : vector<8x32xf32>
    %359 = arith.addf %355, %358 : vector<8x32xf32>
    %360 = vector.extract_strided_slice %352 {offsets = [0, 96], sizes = [8, 32], strides = [1, 1]} : vector<8x128xf32> to vector<8x32xf32>
    %361 = math.tanh %359 : vector<8x32xf32>
    %362 = arith.mulf %360, %361 : vector<8x32xf32>
    %c56_98 = arith.constant 56 : index
    %c0_99 = arith.constant 0 : index
    %363 = vector.load %arg12[%c56_98, %c0_99] : memref<64x32xf32, #tpu.memory_space<vmem>>, vector<8x32xf32>
    tpu.vector_store %arg12[%c56_98, %c0_99], %362 {strides = array<i32>} : memref<64x32xf32, #tpu.memory_space<vmem>>, vector<8x32xf32>,
    %c0_100 = arith.constant 0 : index
    %c0_101 = arith.constant 0 : index
    %364 = vector.load %arg12[%c0_100, %c0_101] : memref<64x32xf32, #tpu.memory_space<vmem>>, vector<64x32xf32>
    %c0_102 = arith.constant 0 : index
    %c0_103 = arith.constant 0 : index
    %365 = vector.load %arg13[%c0_102, %c0_103] : memref<64x32xf32, #tpu.memory_space<vmem>>, vector<64x32xf32>
    %366 = tpu.concatenate %364, %365 in 1 : vector<64x32xf32>, vector<64x32xf32> -> vector<64x64xf32>
    %367 = arith.truncf %366 : vector<64x64xf32> to vector<64x64xbf16>
    %c0_104 = arith.constant 0 : index
    %c0_105 = arith.constant 0 : index
    %368 = vector.load %arg9[%c0_104, %c0_105] : memref<64x128xbf16, #tpu.memory_space<vmem>>, vector<64x128xbf16>
    %cst_106 = arith.constant dense<0.000000e+00> : vector<64x128xf32>
    %369 = tpu.matmul %367, %368, %cst_106 {dimension_numbers = #tpu.dot_dimension_numbers<[1], [0], [0], [1], [0, 0, 1, 1], [], []>} : vector<64x64xbf16>, vector<64x128xbf16>, vector<64x128xf32> -> vector<64x128xf32>
    %c0_107 = arith.constant 0 : index
    %c0_108 = arith.constant 0 : index
    %370 = vector.load %arg10[%c0_107, %c0_108] : memref<1x128xf32, #tpu.memory_space<vmem>>, vector<1x128xf32>
    %371 = vector.broadcast %370 : vector<1x128xf32> to vector<64x128xf32>
    %372 = arith.addf %369, %371 : vector<64x128xf32>
    %c0_109 = arith.constant 0 : index
    %c0_110 = arith.constant 0 : index
    %373 = vector.load %arg11[%c0_109, %c0_110] : memref<64x128xf32, #tpu.memory_space<vmem>>, vector<64x128xf32>
    tpu.vector_store %arg11[%c0_109, %c0_110], %372 {strides = array<i32>} : memref<64x128xf32, #tpu.memory_space<vmem>>, vector<64x128xf32>,
    return
  }
  func.func @transform_0(%arg0: i32) -> (i32, i32) {
    %c0_i32 = arith.constant 0 : i32
    %c0_i32_0 = arith.constant 0 : i32
    %c0_i32_1 = arith.constant 0 : i32
    return %c0_i32, %c0_i32_0 : i32, i32
  }
  func.func @transform_1(%arg0: i32) -> (i32, i32) {
    %c0_i32 = arith.constant 0 : i32
    %c0_i32_0 = arith.constant 0 : i32
    %c0_i32_1 = arith.constant 0 : i32
    return %c0_i32, %c0_i32_0 : i32, i32
  }
  func.func @transform_2(%arg0: i32) -> (i32, i32) {
    %c0_i32 = arith.constant 0 : i32
    %c0_i32_0 = arith.constant 0 : i32
    %c0_i32_1 = arith.constant 0 : i32
    return %c0_i32, %c0_i32_0 : i32, i32
  }
  func.func @transform_3(%arg0: i32) -> (i32, i32) {
    %c0_i32 = arith.constant 0 : i32
    %c0_i32_0 = arith.constant 0 : i32
    %c0_i32_1 = arith.constant 0 : i32
    return %c0_i32, %c0_i32_0 : i32, i32
  }
  func.func @transform_4(%arg0: i32) -> (i32, i32) {
    %c0_i32 = arith.constant 0 : i32
    %c0_i32_0 = arith.constant 0 : i32
    %c0_i32_1 = arith.constant 0 : i32
    return %c0_i32, %c0_i32_0 : i32, i32
  }
  func.func @transform_5(%arg0: i32) -> (i32, i32) {
    %c0_i32 = arith.constant 0 : i32
    %c0_i32_0 = arith.constant 0 : i32
    %c0_i32_1 = arith.constant 0 : i32
    return %c0_i32, %c0_i32_0 : i32, i32
  }
  func.func @transform_6(%arg0: i32) -> (i32, i32) {
    %c0_i32 = arith.constant 0 : i32
    %c0_i32_0 = arith.constant 0 : i32
    %c0_i32_1 = arith.constant 0 : i32
    return %c0_i32, %c0_i32_0 : i32, i32
  }
  func.func @transform_7(%arg0: i32) -> (i32, i32) {
    %c0_i32 = arith.constant 0 : i32
    %c0_i32_0 = arith.constant 0 : i32
    %c0_i32_1 = arith.constant 0 : i32
    return %c0_i32, %c0_i32_0 : i32, i32
  }
  func.func @transform_8(%arg0: i32) -> (i32, i32) {
    %c0_i32 = arith.constant 0 : i32
    %c0_i32_0 = arith.constant 0 : i32
    %c0_i32_1 = arith.constant 0 : i32
    return %c0_i32, %c0_i32_0 : i32, i32
  }
  func.func @transform_9(%arg0: i32) -> (i32, i32) {
    %c0_i32 = arith.constant 0 : i32
    %c0_i32_0 = arith.constant 0 : i32
    %c0_i32_1 = arith.constant 0 : i32
    return %c0_i32, %c0_i32_0 : i32, i32
  }
  func.func @transform_10(%arg0: i32) -> (i32, i32) {
    %c0_i32 = arith.constant 0 : i32
    %c0_i32_0 = arith.constant 0 : i32
    %c0_i32_1 = arith.constant 0 : i32
    return %c0_i32, %c0_i32_0 : i32, i32
  }
}

</mosaic_0001>

<bundles_post_ra>
// kernel: tpu_custom_call.1
= control target key start
LH: loop header
LB: loop body
LE: loop exit
PB: predicated region body
PF: predicated region fallthrough
CT: control target
= control target key end

     0   :  { %vm116_vm0 = vcmask 261120   ;;  %s11727_s0 = inlined_call_operand.vmem [shape: bf16[128,32], index: 0, kind: input, shape index: {}]   ;;  %s11728_s1 = inlined_call_operand.vmem [shape: bf16[32,32], index: 1, kind: input, shape index: {}]   ;;  %s11729_s2 = inlined_call_operand.vmem [shape: f32[1,32], index: 2, kind: input, shape index: {}]   ;;  %s11730_s3 = inlined_call_operand.vmem [shape: bf16[64,32], index: 3, kind: input, shape index: {}]   ;;  %s11731_s4 = inlined_call_operand.vmem [shape: bf16[32,128], index: 4, kind: input, shape index: {}]   ;;  %s11732_s5 = inlined_call_operand.vmem [shape: bf16[64,128], index: 5, kind: input, shape index: {}]   ;;  %s11733_s6 = inlined_call_operand.vmem [shape: f32[1,128], index: 6, kind: input, shape index: {}]   ;;  %s11734_s7 = inlined_call_operand.vmem [shape: bf16[32,32], index: 7, kind: input, shape index: {}]   ;;  %s11735_s8 = inlined_call_operand.vmem [shape: bf16[64,128], index: 8, kind: input, shape index: {}]   ;;  %s11736_s9 = inlined_call_operand.vmem [shape: f32[1,128], index: 9, kind: input, shape index: {}]   ;;  %s11737_s10 = inlined_call_operand.hbm [shape: f32[64,128], index: 10, kind: output, shape index: {}]  }
   0x1   :  { %v8248_v0 = vld [vmem:[%s11728_s1] sm:$0xff]   ;;  %v8249_v1 = vld [vmem:[%s11728_s1 + $0x8] sm:$0xff]   ;;  %v8252_v4 = vld [vmem:[%s11727_s0 + $0x10] sm:$0xff]  }
   0x2   :  { %8005 = vmatprep.subr.bf16.mxu0 %v8248_v0  ;;  %v8250_v2 = vld [vmem:[%s11727_s0] sm:$0xff]   ;;  %8213 = vmatprep.subr.bf16.mxu1 %v8248_v0  ;;  %v8251_v3 = vld [vmem:[%s11727_s0 + $0x8] sm:$0xff]   ;;  %v8254_v5 = vld [vmem:[%s11727_s0 + $0x30] sm:$0xff]  }
   0x3   :  { %8006 = vmatpush3.bf16.msra.mxu0 %v8248_v0  ;;  %8215 = vmatpush3.bf16.msra.mxu1 %v8248_v0  ;;  %v8255_v6 = vld [vmem:[%s11727_s0 + $0x38] sm:$0xff]   ;;  %v8256_v8 = vld [vmem:[%s11727_s0 + $0x20] sm:$0xff]  }
   0x4   :  { %8007 = vmatprep.subr.bf16.mxu0 %v8249_v1  ;;  %8009 = vmatprep.mubr.msk.bf16.mxu0 %vm116_vm0, %v8250_v2  ;;  %v8253_v7 = vld [vmem:[%s11727_s0 + $0x18] sm:$0xff]  }
   0x5   :  { %8214 = vmatprep.subr.bf16.mxu1 %v8249_v1  ;;  %8021 = vmatprep.mubr.msk.bf16.mxu1 %vm116_vm0, %v8254_v5 }
   0x7   :  { %8008 = vmatpush3.bf16.msra.mxu0 %v8249_v1  ;;  %8216 = vmatpush3.bf16.msra.mxu1 %v8249_v1 }
   0xa   :  { %8010 = vmatmul.mubr.msk.bf16.vlgmr.msra.gmra.mrb[0].mxu0 %vm116_vm0, %v8251_v3  ;;  %8022 = vmatmul.mubr.msk.bf16.vlgmr.msra.gmra.mrb[0].mxu1 %vm116_vm0, %v8255_v6 }
   0xb   :  { %8013 = vmatprep.mubr.msk.bf16.mxu0 %vm116_vm0, %v8252_v4 }
  0x12   :  { %8014 = vmatmul.mubr.msk.bf16.gmra.mrb[4].mxu0 %vm116_vm0, %v8253_v7 }
  0x13   :  { %8017 = vmatprep.mubr.msk.bf16.mxu0 %vm116_vm0, %v8256_v8 }
  0x14   :  { %15 = vsyncpa [#allocation5], 0  ;;  %v8257_v9 = vld [vmem:[%s11727_s0 + $0x28] sm:$0xff]   ;;  %v8258_v10 = vld [vmem:[%s11731_s4] sm:$0xff]   ;;  %v11738_v13 = vmov 0.0   ;;  %vm8685_vm1 = vmmov 0  }
  0x15   :  { %v8259_v11 = vld [vmem:[%s11731_s4 + $0x8] sm:$0xff]   ;;  %v8260_v12 = vld [vmem:[%s11730_s3] sm:$0xff]   ;;  %8045 = vmatprep.subr.bf16.mxu0 %v11738_v13  ;;  %8025 = vmatprep.subr.bf16.mxu1 %v8258_v10  ;;  %v8263_v16 = vld [vmem:[%s11730_s3 + $0x10] sm:$0xff]   ;;  %vm499_vm2 = vcmask 1041409   ;;  %vm501_vm3 = vcmask 1042434   ;;  %vm503_vm4 = vcmask 1043459  }
  0x16   :  { %8029 = vmatprep.mubr.msk.bf16.mxu1 %vm116_vm0, %v8260_v12  ;;  %8026 = vmatpush3.bf16.msra.mxu1 %v8258_v10  ;;  %v8261_v14 = vld [vmem:[%s11730_s3 + $0x8] sm:$0xff]   ;;  %v8805_v15 = vld [vmem:[%s11734_s7] sm:$0xff]   ;;  %v8264_v18 = vld [vmem:[%s11730_s3 + $0x18] sm:$0xff]   ;;  %vm505_vm5 = vcmask 1044484   ;;  %vm507_vm6 = vcmask 1045509   ;;  %vm509_vm7 = vcmask 1046534  }
  0x17   :  { %8027 = vmatprep.subr.bf16.mxu1 %v8259_v11  ;;  %v8817_v17 = vld [vmem:[%s11734_s7 + $0x8] sm:$0xff]   ;;  %v8831_v19 = vld [vmem:[%s11729_s2] ss:$0 sm:$0xff]  ;;  %vm511_vm8 = vcmask 1047559   ;;  %vm750_vm9 = vcmask 130112   ;;  %vm823_vm10 = vcmask 130048  }
  0x18   :  { %vm1367_vm11 = vcmask 523264   ;;  %s8689_s18 = smov 64  }
  0x1a   :  { %8018 = vmatmul.mubr.msk.bf16.gmra.mrb[8].mxu0 %vm116_vm0, %v8257_v9  ;;  %8028 = vmatpush3.bf16.msra.mxu1 %v8259_v11 }
  0x1b   :  { %8053 = vmatprep.mubr.msk.bf16.mxu0 %vm8685_vm1, %v11738_v13  ;;  %8037 = vmatprep.subr.bf16.mxu1 %v11738_v13 }
  0x1d   :  { %8030 = vmatmul.mubr.msk.bf16.vlgmr.msra.gmra.mrb[4].mxu1 %vm116_vm0, %v8261_v14 }
  0x1e   :  { %8038 = vmatpush3.bf16.msra.mxu1 %v8805_v15  ;;  %8033 = vmatprep.mubr.msk.bf16.mxu1 %vm116_vm0, %v8263_v16 }
  0x1f   :  { %8039 = vmatprep.subr.bf16.mxu1 %v11738_v13 }
  0x22   :  { %8040 = vmatpush3.bf16.msra.mxu1 %v8817_v17 }
  0x23   :  { %8057 = vmatprep.subr.bf16.mxu1 %v11738_v13 }
  0x25   :  { %8034 = vmatmul.mubr.msk.bf16.gmra.mrb[8].mxu1 %vm116_vm0, %v8264_v18 }
  0x26   :  { %8041 = vmatprep.mubr.msk.bf16.mxu1 %vm8685_vm1, %v11738_v13 }
  0xdd   :  { %v8011_v20 = vpop.f32.mrb[0].mxu0  ;;  %v8023_v21 = vpop.f32.mrb[0].mxu1 }
  0xde   :  { %v184_v22 = vadd.f32 %v8011_v20, %v8831_v19  ;;  %v175_v23 = vpop.f32.mrb[1].mxu0  ;;  %v223_v24 = vpop.f32.mrb[1].mxu1  ;;  %v232_v30 = vadd.f32 %v8023_v21, %v8831_v19 }
  0xdf   :  { %v176_v25 = vadd.f32 %v8831_v19, %v175_v23  ;;  %v8012_v26 = vpop.f32.mrb[2].mxu0  ;;  %v8024_v27 = vpop.f32.mrb[2].mxu1  ;;  %v224_v33 = vadd.f32 %v8831_v19, %v223_v24 }
  0xe0   :  { %8274 = vtanh.f32 %v184_v22  ;;  %v187_v28 = vadd.f32 %v8012_v26, %v8831_v19  ;;  %v178_v29 = vpop.f32.mrb[3].mxu0  ;;  %v226_v31 = vpop.f32.mrb[3].mxu1  ;;  %v235_v34 = vadd.f32 %v8024_v27, %v8831_v19 }
  0xe1   :  { %8276 = vtanh.f32 %v176_v25  ;;  %v179_v32 = vadd.f32 %v8831_v19, %v178_v29  ;;  %v227_v35 = vadd.f32 %v8831_v19, %v226_v31 }
  0xe2   :  { %8278 = vtanh.f32 %v187_v28 }
  0xe3   :  { %8280 = vtanh.f32 %v179_v32 }
  0xe4   :  { %8282 = vtanh.f32 %v232_v30 }
  0xe5   :  { %v8015_v36 = vpop.f32.mrb[4].mxu0  ;;  %8284 = vtanh.f32 %v224_v33 }
  0xe6   :  { %v200_v37 = vadd.f32 %v8015_v36, %v8831_v19  ;;  %v191_v38 = vpop.f32.mrb[5].mxu0  ;;  %8286 = vtanh.f32 %v235_v34 }
  0xe7   :  { %v192_v39 = vadd.f32 %v8831_v19, %v191_v38  ;;  %v8016_v40 = vpop.f32.mrb[6].mxu0  ;;  %8288 = vtanh.f32 %v227_v35 }
  0xe8   :  { %8290 = vtanh.f32 %v200_v37  ;;  %v203_v41 = vadd.f32 %v8016_v40, %v8831_v19  ;;  %v194_v42 = vpop.f32.mrb[7].mxu0 }
  0xe9   :  { %8292 = vtanh.f32 %v192_v39  ;;  %v195_v43 = vadd.f32 %v8831_v19, %v194_v42 }
  0xea   :  { %v8845_v44 = vpop.eup %8274  ;;  %8294 = vtanh.f32 %v203_v41 }
  0xeb   :  { %v8847_v45 = vpop.eup %8276  ;;  %8296 = vtanh.f32 %v195_v43  ;;  %v263_v49 = vsel %vm116_vm0, %v8845_v44, 0.0 }
  0xec   :  { %v8849_v46 = vpop.eup %8278  ;;  %v254_v54 = vsel %vm116_vm0, %v8847_v45, 0.0 }
  0xed   :  { %v8851_v47 = vpop.eup %8280  ;;  %v8019_v48 = vpop.f32.mrb[8].mxu0  ;;  %v264_v50 = vsel %vm116_vm0, %v8849_v46, 0.0 }
  0xee   :  { %v8857_v51 = vpop.eup %8282  ;;  %v216_v52 = vadd.f32 %v8019_v48, %v8831_v19  ;;  %v207_v53 = vpop.f32.mrb[9].mxu0  ;;  %v255_v55 = vsel %vm116_vm0, %v8851_v47, 0.0  ;;  %v265_v56 = vadd.f32 %v264_v50, %v263_v49 }
  0xef   :  { %11818 = vst [vmem:[#allocation7_spill] sm:$0xff] %v8857_v51  ;;  %v8864_v57 = vpop.eup %8284  ;;  %v208_v58 = vadd.f32 %v8831_v19, %v207_v53  ;;  %v8020_v59 = vpop.f32.mrb[10].mxu0  ;;  %v256_v60 = vadd.f32 %v255_v55, %v254_v54  ;;  %v317_v61 = vsel %vm116_vm0, %v8857_v51, 0.0 }
  0xf0   :  { %v8869_v62 = vpop.eup %8286  ;;  %8298 = vtanh.f32 %v216_v52  ;;  %v219_v63 = vadd.f32 %v8020_v59, %v8831_v19  ;;  %v210_v0 = vpop.f32.mrb[11].mxu0  ;;  %v266_v1 = vrot.slane %v265_v56, 4  ;;  %v308_v2 = vsel %vm116_vm0, %v8864_v57, 0.0 }
  0xf1   :  { %11819 = vst [vmem:[#allocation8_spill] sm:$0xff] %v8869_v62  ;;  %v8874_v3 = vpop.eup %8288  ;;  %8300 = vtanh.f32 %v208_v58  ;;  %v211_v4 = vadd.f32 %v8831_v19, %v210_v0  ;;  %v257_v5 = vrot.slane %v256_v60, 4  ;;  %v318_v6 = vsel %vm116_vm0, %v8869_v62, 0.0 }
  0xf2   :  { %11820 = vst [vmem:[#allocation9_spill] sm:$0xff] %v8874_v3  ;;  %v8879_v7 = vpop.eup %8290  ;;  %8302 = vtanh.f32 %v219_v63  ;;  %v267_v8 = vadd.f32 %v266_v1, %v265_v56  ;;  %v309_v9 = vsel %vm116_vm0, %v8874_v3, 0.0  ;;  %v319_v10 = vadd.f32 %v318_v6, %v317_v61 }
  0xf3   :  { %v8883_v11 = vpop.eup %8292  ;;  %8304 = vtanh.f32 %v211_v4  ;;  %v258_v12 = vadd.f32 %v257_v5, %v256_v60  ;;  %v310_v14 = vadd.f32 %v309_v9, %v308_v2  ;;  %v281_v22 = vsel %vm116_vm0, %v8879_v7, 0.0 }
  0xf4   :  { %v8885_v16 = vpop.eup %8294  ;;  %v268_v18 = vrot.slane %v267_v8, 2  ;;  %v320_v19 = vrot.slane %v319_v10, 4  ;;  %v272_v26 = vsel %vm116_vm0, %v8883_v11, 0.0 }
  0xf5   :  { %v8887_v20 = vpop.eup %8296  ;;  %v259_v21 = vrot.slane %v258_v12, 2  ;;  %v282_v23 = vsel %vm116_vm0, %v8885_v16, 0.0  ;;  %v311_v24 = vrot.slane %v310_v14, 4 }
  0xf6   :  { %v269_v25 = vadd.f32 %v268_v18, %v267_v8  ;;  %v273_v27 = vsel %vm116_vm0, %v8887_v20, 0.0  ;;  %v283_v28 = vadd.f32 %v282_v23, %v281_v22  ;;  %v321_v34 = vadd.f32 %v320_v19, %v319_v10 }
  0xf7   :  { %v260_v29 = vadd.f32 %v259_v21, %v258_v12  ;;  %v274_v30 = vadd.f32 %v273_v27, %v272_v26  ;;  %v312_v31 = vadd.f32 %v311_v24, %v310_v14 }
  0xf8   :  { %v270_v32 = vrot.slane %v269_v25, 1  ;;  %v284_v33 = vrot.slane %v283_v28, 4  ;;  %v322_v49 = vrot.slane %v321_v34, 2 }
  0xf9   :  { %v261_v35 = vrot.slane %v260_v29, 1  ;;  %v275_v36 = vrot.slane %v274_v30, 4  ;;  %v313_v41 = vrot.slane %v312_v31, 2 }
  0xfa   :  { %v8897_v37 = vpop.eup %8298  ;;  %v285_v38 = vadd.f32 %v284_v33, %v283_v28  ;;  %v271_v43 = vadd.f32 %v270_v32, %v269_v25  ;;  %v323_v4 = vadd.f32 %v322_v49, %v321_v34 }
  0xfb   :  { %v8899_v39 = vpop.eup %8300  ;;  %v276_v40 = vadd.f32 %v275_v36, %v274_v30  ;;  %v262_v52 = vadd.f32 %v261_v35, %v260_v29  ;;  %v299_v54 = vsel %vm116_vm0, %v8897_v37, 0.0  ;;  %v314_v0 = vadd.f32 %v313_v41, %v312_v31 }
  0xfc   :  { %v8901_v42 = vpop.eup %8302  ;;  %v286_v48 = vrot.slane %v285_v38, 2  ;;  %v290_v58 = vsel %vm116_vm0, %v8899_v39, 0.0  ;;  %v328_v10 = vmul.f32 0.0625, %v271_v43  ;;  %v324_v22 = vrot.slane %v323_v4, 1 }
  0xfd   :  { %v8903_v50 = vpop.eup %8304  ;;  %v277_v53 = vrot.slane %v276_v40, 2  ;;  %v300_v55 = vsel %vm116_vm0, %v8901_v42, 0.0  ;;  %v327_v9 = vmul.f32 0.0625, %v262_v52  ;;  %v315_v18 = vrot.slane %v314_v0, 1 }
  0xfe   :  { %v287_v56 = vadd.f32 %v286_v48, %v285_v38  ;;  %v291_v59 = vsel %vm116_vm0, %v8903_v50, 0.0  ;;  %v301_v60 = vadd.f32 %v300_v55, %v299_v54  ;;  %v476_v27 = vpack.c.bf16 %v328_v10, %v328_v10 }
  0xff   :  { %v278_v61 = vadd.f32 %v277_v53, %v276_v40  ;;  %v292_v63 = vadd.f32 %v291_v59, %v290_v58  ;;  %v475_v26 = vpack.c.bf16 %v327_v9, %v327_v9  ;;  %v316_v29 = vadd.f32 %v315_v18, %v314_v0 }
 0x100   :  { %v288_v1 = vrot.slane %v287_v56, 1  ;;  %v302_v2 = vrot.slane %v301_v60, 4  ;;  %v325_v32 = vadd.f32 %v324_v22, %v323_v4  ;;  %v492_v38 = vunpack.c.l.b16 %v476_v27 }
 0x101   :  { %v279_v5 = vrot.slane %v278_v61, 1  ;;  %v293_v6 = vrot.slane %v292_v63, 4  ;;  %v491_v36 = vunpack.c.l.b16 %v475_v26  ;;  %v333_v41 = vmul.f32 0.0625, %v316_v29 }
 0x102   :  { %v303_v8 = vadd.f32 %v302_v2, %v301_v60  ;;  %v289_v19 = vadd.f32 %v288_v1, %v287_v56  ;;  %v334_v49 = vmul.f32 0.0625, %v325_v32 }
 0x103   :  { %v280_v12 = vadd.f32 %v279_v5, %v278_v61  ;;  %v294_v14 = vadd.f32 %v293_v6, %v292_v63  ;;  %v500_v55 = vsel %vm499_vm2, %v492_v38, %v491_v36  ;;  %v481_v58 = vpack.c.bf16 %v333_v41, %v333_v41 }
 0x104   :  { %v304_v21 = vrot.slane %v303_v8, 2  ;;  %v330_v33 = vmul.f32 0.0625, %v289_v19  ;;  %v482_v60 = vpack.c.bf16 %v334_v49, %v334_v49 }
 0x105   :  { %v295_v23 = vrot.slane %v294_v14, 2  ;;  %v329_v24 = vmul.f32 0.0625, %v280_v12  ;;  %v497_v2 = vunpack.c.l.b16 %v481_v58  ;;  %v8933_v12 = vld [vmem:[%s11733_s6] ss:$0 sm:$0xff]  ;;  %s8688_s6 = smov 32  }
 0x106   :  { %v305_v25 = vadd.f32 %v304_v21, %v303_v8  ;;  %v478_v52 = vpack.c.bf16 %v330_v33, %v330_v33  ;;  %v498_v5 = vunpack.c.l.b16 %v482_v60  ;;  %11821 = vst [vmem:[#allocation10_spill] sm:$0xff] %v8933_v12  ;;  %v574_v33 = vlaneseq }
 0x107   :  { %v296_v28 = vadd.f32 %v295_v23, %v294_v14  ;;  %v477_v30 = vpack.c.bf16 %v329_v24, %v329_v24  ;;  %v8031_v14 = vpop.f32.mrb[4].mxu1 }
 0x108   :  { %v306_v31 = vrot.slane %v305_v25, 1  ;;  %v494_v61 = vunpack.c.l.b16 %v478_v52  ;;  %v8936_v18 = vadd.f32 %v8031_v14, %v8933_v12  ;;  %v8938_v19 = vpop.f32.mrb[5].mxu1 }
 0x109   :  { %v297_v34 = vrot.slane %v296_v28, 1  ;;  %v493_v43 = vunpack.c.l.b16 %v477_v30  ;;  %11823 = vst [vmem:[#allocation12_spill] sm:$0xff] %v8938_v19 }
 0x10a   :  { %v307_v35 = vadd.f32 %v306_v31, %v305_v25  ;;  %11822 = vst [vmem:[#allocation11_spill] sm:$0xff] %v8936_v18  ;;  %v8686_v31 = vmov 1966171168  }
 0x10b   :  { %v298_v40 = vadd.f32 %v297_v34, %v296_v28  ;;  %v502_v59 = vsel %vm501_vm3, %v493_v43, %v500_v55  ;;  %v572_v32 = vunpack.c.l.s4 %v8686_v31 }
 0x10c   :  { %v332_v48 = vmul.f32 0.0625, %v307_v35  ;;  %v504_v1 = vsel %vm503_vm4, %v494_v61, %v502_v59  ;;  %v8959_v35 = vshrl.u32 %v574_v33, 7 }
 0x10d   :  { %v331_v53 = vmul.f32 0.0625, %v298_v40  ;;  %v573_v34 = vunpack.c.0.s8 %v572_v32 }
 0x10e   :  { %v480_v54 = vpack.c.bf16 %v332_v48, %v332_v48  ;;  %v8966_v48 = vsub.s32 0, %v8959_v35 }
 0x10f   :  { %v479_v56 = vpack.c.bf16 %v331_v53, %v331_v53  ;;  %v8962_v36 = vsub.s32 %v573_v34, %v8959_v35 }
 0x110   :  { %v496_v0 = vunpack.c.l.b16 %v480_v54 }
 0x111   :  { %v495_v63 = vunpack.c.l.b16 %v479_v56  ;;  %11830 = vst [vmem:[#allocation19_spill] sm:$0xff] %v8962_v36 }
 0x113   :  { %v506_v4 = vsel %vm505_vm5, %v495_v63, %v504_v1 }
 0x114   :  { %v508_v6 = vsel %vm507_vm6, %v496_v0, %v506_v4 }
 0x115   :  { %v510_v8 = vsel %vm509_vm7, %v497_v2, %v508_v6 }
 0x116   :  { %v512_v9 = vsel %vm511_vm8, %v498_v5, %v510_v8 }
 0x117   :  { %v8920_v10 = vpack.c.b16 %v512_v9, %v512_v9 }
 0x119   :  { %8042 = vmatmul.mubr.msk.bf16.vlgmr.msra.gmra.mrb[12].mxu1 %vm116_vm0, %v8920_v10 }
 0x11a   :  { %8058 = vmatpush3.bf16.msra.mxu1 %v8805_v15  ;;  %8061 = vmatprep.mubr.msk.bf16.mxu1 %vm8685_vm1, %v11738_v13  ;;  %v8032_v15 = vpop.f32.mrb[6].mxu1 }
 0x11b   :  { %8059 = vmatprep.subr.bf16.mxu1 %v11738_v13  ;;  %v8941_v21 = vadd.f32 %v8032_v15, %v8933_v12  ;;  %v447_v22 = vpop.f32.mrb[7].mxu1 }
 0x11c   :  { %v8035_v23 = vpop.f32.mrb[8].mxu1 }
 0x11d   :  { %11824 = vst [vmem:[#allocation13_spill] sm:$0xff] %v8941_v21  ;;  %v8947_v24 = vadd.f32 %v8035_v23, %v8933_v12  ;;  %v460_v25 = vpop.f32.mrb[9].mxu1 }
 0x11e   :  { %8060 = vmatpush3.bf16.msra.mxu1 %v8817_v17  ;;  %v8944_v17 = vadd.f32 %v8933_v12, %v447_v22  ;;  %v8950_v26 = vadd.f32 %v8933_v12, %v460_v25  ;;  %v8036_v27 = vpop.f32.mrb[10].mxu1 }
 0x11f   :  { %8065 = vmatprep.subr.bf16.mxu1 %v11738_v13  ;;  %11826 = vst [vmem:[#allocation15_spill] sm:$0xff] %v8947_v24  ;;  %v8953_v28 = vadd.f32 %v8036_v27, %v8933_v12  ;;  %v463_v29 = vpop.f32.mrb[11].mxu1 }
 0x120   :  { %11825 = vst [vmem:[#allocation14_spill] sm:$0xff] %v8944_v17  ;;  %11827 = vst [vmem:[#allocation16_spill] sm:$0xff] %v8950_v26  ;;  %v8956_v30 = vadd.f32 %v8933_v12, %v463_v29 }
 0x121   :  { %11828 = vst [vmem:[#allocation17_spill] sm:$0xff] %v8953_v28 }
 0x122   :  { %11829 = vst [vmem:[#allocation18_spill] sm:$0xff] %v8956_v30 }
 0x1ec   :  { %v563_v38 = vpop.f32.mrb[12].mxu1 }
 0x1ed   :  { %v570_v40 = vcombine.high %v563_v38, %v563_v38  ;;  %v577_v41 = vrot.slane %v563_v38, %v8962_v36  ;;  %v8043_v43 = vpop.f32.mrb[13].mxu1 }
 0x1ee   :  { %v566_v49 = vpop.f32.mrb[14].mxu1 }
 0x1ef   :  { %v585_v52 = vcombine.high %v577_v41, %v577_v41  ;;  %v593_v53 = vrot.slane %v577_v41, %v8962_v36  ;;  %v8044_v54 = vpop.f32.mrb[15].mxu1  ;;  %v584_v55 = vrot.slane %v570_v40, %v8962_v36 }
 0x1f1   :  { %v615_v56 = vcombine.high %v593_v53, %v593_v53  ;;  %v622_v58 = vrot.slane %v593_v53, %v8966_v48  ;;  %v607_v59 = vrot.slane %v585_v52, %v8962_v36  ;;  %v600_v63 = vrot.slane %v584_v55, %v8962_v36 }
 0x1f2   :  { %v586_v5 = vcombine.high %v584_v55, %v584_v55 }
 0x1f3   :  { %v659_v60 = vmul.f32 %v8847_v45, %v622_v58  ;;  %v626_v61 = vrot.slane %v607_v59, %v8966_v48  ;;  %v660_v1 = vmul.f32 %v8851_v47, %v622_v58  ;;  %v630_v2 = vrot.slane %v615_v56, %v8966_v48 }
 0x1f4   :  { %v638_v15 = vrot.slane %v600_v63, %v8966_v48  ;;  %v617_v22 = vcombine.high %v607_v59, %v607_v59  ;;  %v614_v32 = vrot.slane %v586_v5, %v8962_v36  ;;  %v616_v49 = vcombine.high %v600_v63, %v600_v63 }
 0x1f5   :  { %v675_v0 = vsel %vm116_vm0, %v659_v60, 0.0  ;;  %v661_v4 = vmul.f32 %v8845_v44, %v626_v61  ;;  %v662_v8 = vmul.f32 %v8849_v46, %v626_v61  ;;  %v678_v9 = vsel %vm116_vm0, %v660_v1, 0.0 }
 0x1f6   :  { %676 = vadd.xlane.f32.xlu0 %v675_v0  ;;  %v663_v14 = vmul.f32 %v8883_v11, %v630_v2  ;;  %v664_v25 = vmul.f32 %v8887_v20, %v630_v2  ;;  %v667_v29 = vmul.f32 %v8899_v39, %v638_v15  ;;  %v634_v31 = vrot.slane %v617_v22, %v8966_v48 }
 0x1f7   :  { %v681_v6 = vsel %vm116_vm0, %v661_v4, 0.0  ;;  %v684_v23 = vsel %vm116_vm0, %v662_v8, 0.0  ;;  %v668_v38 = vmul.f32 %v8903_v50, %v638_v15  ;;  %v642_v43 = vrot.slane %v614_v32, %v8966_v48 }
 0x1f8   :  { %682 = vadd.xlane.f32.xlu1 %v681_v6  ;;  %v687_v27 = vsel %vm116_vm0, %v663_v14, 0.0  ;;  %v690_v34 = vsel %vm116_vm0, %v664_v25, 0.0  ;;  %v699_v40 = vsel %vm116_vm0, %v667_v29, 0.0  ;;  %v665_v41 = vmul.f32 %v8879_v7, %v634_v31 }
 0x1f9   :  { %v702_v52 = vsel %vm116_vm0, %v668_v38, 0.0  ;;  %v666_v53 = vmul.f32 %v8885_v16, %v634_v31  ;;  %v669_v55 = vmul.f32 %v8897_v37, %v642_v43  ;;  %v646_v56 = vrot.slane %v616_v49, %v8966_v48 }
 0x1fa   :  { %679 = vadd.xlane.f32.xlu0 %v678_v9  ;;  %v693_v54 = vsel %vm116_vm0, %v665_v41, 0.0  ;;  %v618_v58 = vcombine.high %v614_v32, %v614_v32  ;;  %v670_v60 = vmul.f32 %v8901_v42, %v642_v43  ;;  %v740_v31 = vand.u32 127, %v574_v33 }
 0x1fb   :  { %v696_v59 = vsel %vm116_vm0, %v666_v53, 0.0  ;;  %v705_v61 = vsel %vm116_vm0, %v669_v55, 0.0  ;;  %v671_v63 = vmul.f32 %v8864_v57, %v646_v56  ;;  %v672_v2 = vmul.f32 %v8874_v3, %v646_v56 }
 0x1fc   :  { %685 = vadd.xlane.f32.xlu1 %v684_v23  ;;  %v650_v0 = vrot.slane %v618_v58, %v8966_v48  ;;  %v708_v1 = vsel %vm116_vm0, %v670_v60, 0.0  ;;  %v9038_v49 = vsub.s32 %v740_v31, %v8959_v35 }
 0x1fd   :  { %v711_v4 = vsel %vm116_vm0, %v671_v63, 0.0  ;;  %v714_v6 = vsel %vm116_vm0, %v672_v2, 0.0 }
 0x1fe   :  { %688 = vadd.xlane.f32.xlu0 %v687_v27  ;;  %v673_v5 = vmul.f32 %v8857_v51, %v650_v0  ;;  %v674_v8 = vmul.f32 %v8869_v62, %v650_v0 }
 0x200   :  { %691 = vadd.xlane.f32.xlu1 %v690_v34  ;;  %v717_v9 = vsel %vm116_vm0, %v673_v5, 0.0  ;;  %v720_v14 = vsel %vm116_vm0, %v674_v8, 0.0  ;;  %v745_v34 = vadd.s32 4294967288, %v740_v31 }
 0x202   :  { %700 = vadd.xlane.f32.xlu0 %v699_v40  ;;  %v9033_v41 = vsub.s32 %v745_v34, %v8959_v35 }
 0x204   :  { %703 = vadd.xlane.f32.xlu1 %v702_v52 }
 0x206   :  { %694 = vadd.xlane.f32.xlu0 %v693_v54 }
 0x208   :  { %697 = vadd.xlane.f32.xlu1 %v696_v59 }
 0x20a   :  { %706 = vadd.xlane.f32.xlu0 %v705_v61 }
 0x20c   :  { %709 = vadd.xlane.f32.xlu1 %v708_v1 }
 0x20e   :  { %712 = vadd.xlane.f32.xlu0 %v711_v4 }
 0x210   :  { %715 = vadd.xlane.f32.xlu1 %v714_v6 }
 0x212   :  { %718 = vadd.xlane.f32.xlu0 %v717_v9 }
 0x214   :  { %721 = vadd.xlane.f32.xlu1 %v720_v14 }
 0x283   :  { %v9013_v15 = vpop.xlane.xlu0 %676 }
 0x284   :  { %v744_v60 = vrot.slane %v9013_v15, %v9038_v49 }
 0x285   :  { %v9015_v22 = vpop.xlane.xlu1 %682 }
 0x286   :  { %v755_v54 = vrot.slane %v9015_v22, %v9038_v49 }
 0x287   :  { %v9017_v23 = vpop.xlane.xlu0 %679 }
 0x288   :  { %v749_v55 = vrot.slane %v9017_v23, %v9033_v41 }
 0x289   :  { %v9019_v25 = vpop.xlane.xlu1 %685 }
 0x28a   :  { %v759_v52 = vrot.slane %v9019_v25, %v9033_v41  ;;  %v751_v2 = vsel %vm750_vm9, %v749_v55, %v744_v60 }
 0x28b   :  { %v9021_v27 = vpop.xlane.xlu0 %688 }
 0x28c   :  { %v764_v58 = vrot.slane %v9021_v27, %v9038_v49  ;;  %v760_v61 = vsel %vm750_vm9, %v759_v52, %v755_v54 }
 0x28d   :  { %v9023_v29 = vpop.xlane.xlu1 %691  ;;  %v815_v6 = vsel %vm499_vm2, %v760_v61, %v751_v2 }
 0x28e   :  { %v768_v33 = vrot.slane %v9023_v29, %v9033_v41 }
 0x28f   :  { %v9026_v32 = vpop.xlane.xlu0 %700 }
 0x290   :  { %v769_v1 = vsel %vm750_vm9, %v768_v33, %v764_v58  ;;  %v782_v52 = vrot.slane %v9026_v32, %v9038_v49 }
 0x291   :  { %v9028_v38 = vpop.xlane.xlu1 %703  ;;  %v816_v14 = vsel %vm501_vm3, %v769_v1, %v815_v6 }
 0x292   :  { %v786_v8 = vrot.slane %v9028_v38, %v9033_v41 }
 0x293   :  { %v9030_v40 = vpop.xlane.xlu0 %694 }
 0x294   :  { %v773_v63 = vrot.slane %v9030_v40, %v9038_v49  ;;  %v787_v58 = vsel %vm750_vm9, %v786_v8, %v782_v52  ;;  %v9095_v52 = vsub.s32 5, %v8959_v35 }
 0x295   :  { %v9035_v43 = vpop.xlane.xlu1 %697 }
 0x296   :  { %v777_v56 = vrot.slane %v9035_v43, %v9033_v41 }
 0x297   :  { %v707_v53 = vpop.xlane.xlu0 %706 }
 0x298   :  { %v778_v4 = vsel %vm750_vm9, %v777_v56, %v773_v63  ;;  %v791_v31 = vrot.slane %v707_v53, %v9038_v49 }
 0x299   :  { %v9052_v59 = vpop.xlane.xlu1 %709  ;;  %v817_v33 = vsel %vm503_vm4, %v778_v4, %v816_v14 }
 0x29a   :  { %v795_v5 = vrot.slane %v9052_v59, %v9033_v41  ;;  %v818_v2 = vsel %vm505_vm5, %v787_v58, %v817_v33  ;;  %v9098_v33 = vsub.s32 6, %v8959_v35 }
 0x29b   :  { %v713_v0 = vpop.xlane.xlu0 %712 }
 0x29c   :  { %v800_v54 = vrot.slane %v713_v0, %v9038_v49  ;;  %v796_v56 = vsel %vm750_vm9, %v795_v5, %v791_v31  ;;  %v8687_v31 = vmov 0   ;;  %11831 = vst [vmem:[#allocation20_spill] sm:$0xff] %v9098_v33 }
 0x29d   :  { %v9067_v9 = vpop.xlane.xlu1 %715  ;;  %v819_v4 = vsel %vm507_vm6, %v796_v56, %v818_v2  ;;  %8227 = vset.pattern.permute.xlu0 %v8687_v31  ;;  %8226 = vset.pattern.permute.xlu1 %v8687_v31 }
 0x29e   :  { %v804_v34 = vrot.slane %v9067_v9, %v9033_v41 }
 0x29f   :  { %v719_v55 = vpop.xlane.xlu0 %718 }
 0x2a0   :  { %v805_v61 = vsel %vm750_vm9, %v804_v34, %v800_v54  ;;  %v809_v63 = vrot.slane %v719_v55, %v9038_v49  ;;  %v9092_v34 = vsub.s32 1, %v8959_v35 }
 0x2a1   :  { %v9079_v60 = vpop.xlane.xlu1 %721  ;;  %v820_v5 = vsel %vm509_vm7, %v805_v61, %v819_v4 }
 0x2a2   :  { %v813_v1 = vrot.slane %v9079_v60, %v9033_v41 }
 0x2a4   :  { %v814_v6 = vsel %vm750_vm9, %v813_v1, %v809_v63  ;;  %v9106_v63 = vsub.s32 7, %v8959_v35 }
 0x2a5   :  { %v821_v8 = vsel %vm511_vm8, %v814_v6, %v820_v5  ;;  %v9114_v6 = vsub.s32 2, %v8959_v35 }
 0x2a6   :  { %v824_v14 = vsel %vm823_vm10, %v821_v8, -inf  ;;  %11832 = vst [vmem:[#allocation21_spill] sm:$0xff] %v9106_v63 }
 0x2a7   :  { %825 = vmax.xlane.f32.xlu0 %v824_v14 }
 0x334   :  { %v826_v54 = vpop.xlane.xlu0 %825 }
 0x335   :  { %v831_v56 = vrot.slane %v826_v54, %v8966_v48  ;;  %v835_v58 = vrot.slane %v826_v54, %v9092_v34  ;;  %v9103_v61 = vrot.slane %v826_v54, %v9095_v52  ;;  %v9109_v1 = vrot.slane %v826_v54, %v9098_v33 }
 0x336   :  { %v9119_v13 = vrot.slane %v826_v54, %v9106_v63 }
 0x337   :  { %v869_v2 = vsub.f32 %v9017_v23, %v831_v56  ;;  %v868_v4 = vsub.f32 %v9013_v15, %v831_v56  ;;  %v878_v5 = vsub.f32 %v707_v53, %v9103_v61  ;;  %v870_v8 = vsub.f32 %v9015_v22, %v835_v58 }
 0x338   :  { %v880_v24 = vsub.f32 %v713_v0, %v9109_v1  ;;  %v839_v23 = vrot.slane %v826_v54, %v9114_v6  ;;  %v871_v56 = vsub.f32 %v9019_v25, %v835_v58  ;;  %v882_v53 = vsub.f32 %v719_v55, %v9119_v13 }
 0x339   :  { %v886_v14 = vmul.f32 1.442695, %v869_v2  ;;  %v884_v31 = vmul.f32 1.442695, %v868_v4  ;;  %v904_v28 = vmul.f32 1.442695, %v878_v5 }
 0x33a   :  { %v888_v15 = vmul.f32 1.442695, %v870_v8  ;;  %v908_v30 = vmul.f32 1.442695, %v880_v24  ;;  %v9126_v22 = vsub.s32 3, %v8959_v35  ;;  %v872_v4 = vsub.f32 %v9021_v27, %v839_v23 }
 0x33b   :  { %8306 = vpow2.f32 %v886_v14  ;;  %v890_v2 = vmul.f32 1.442695, %v871_v56  ;;  %v912_v5 = vmul.f32 1.442695, %v882_v53  ;;  %v873_v8 = vsub.f32 %v9023_v29, %v839_v23 }
 0x33c   :  { %8308 = vpow2.f32 %v884_v31  ;;  %v843_v0 = vrot.slane %v826_v54, %v9126_v22  ;;  %v892_v14 = vmul.f32 1.442695, %v872_v4 }
 0x33d   :  { %8310 = vpow2.f32 %v904_v28  ;;  %v9138_v28 = vsub.s32 4, %v8959_v35 }
 0x33e   :  { %8312 = vpow2.f32 %v888_v15  ;;  %v874_v27 = vsub.f32 %v9030_v40, %v843_v0  ;;  %v875_v23 = vsub.f32 %v9035_v43, %v843_v0 }
 0x33f   :  { %8314 = vpow2.f32 %v908_v30  ;;  %v894_v30 = vmul.f32 1.442695, %v873_v8  ;;  %v847_v29 = vrot.slane %v826_v54, %v9138_v28  ;;  %v881_v8 = vsub.f32 %v9067_v9, %v9109_v1 }
 0x340   :  { %8316 = vpow2.f32 %v890_v2  ;;  %v896_v31 = vmul.f32 1.442695, %v874_v27  ;;  %v898_v40 = vmul.f32 1.442695, %v875_v23  ;;  %v883_v27 = vsub.f32 %v9079_v60, %v9119_v13 }
 0x341   :  { %8318 = vpow2.f32 %v912_v5  ;;  %v876_v56 = vsub.f32 %v9026_v32, %v847_v29  ;;  %v877_v54 = vsub.f32 %v9028_v38, %v847_v29  ;;  %v879_v32 = vsub.f32 %v9052_v59, %v9103_v61 }
 0x342   :  { %8320 = vpow2.f32 %v892_v14  ;;  %v910_v38 = vmul.f32 1.442695, %v881_v8  ;;  %v914_v59 = vmul.f32 1.442695, %v883_v27 }
 0x343   :  { %8322 = vpow2.f32 %v894_v30  ;;  %v900_v43 = vmul.f32 1.442695, %v876_v56  ;;  %v902_v5 = vmul.f32 1.442695, %v877_v54  ;;  %v906_v14 = vmul.f32 1.442695, %v879_v32 }
 0x344   :  { %8324 = vpow2.f32 %v896_v31 }
 0x345   :  { %v9131_v25 = vpop.eup %8306  ;;  %8326 = vpow2.f32 %v898_v40 }
 0x346   :  { %v9133_v24 = vpop.eup %8308  ;;  %936 = vperm.xlu0 %8227, %v9131_v25   ;;  %8328 = vpow2.f32 %v900_v43 }
 0x347   :  { %933 = vperm.xlu1 %8226, %v9133_v24   ;;  %v9141_v55 = vpop.eup %8310  ;;  %8330 = vpow2.f32 %v902_v5 }
 0x348   :  { %v9143_v58 = vpop.eup %8312  ;;  %8332 = vpow2.f32 %v906_v14 }
 0x349   :  { %v9149_v35 = vpop.eup %8314  ;;  %8334 = vpow2.f32 %v910_v38 }
 0x34a   :  { %963 = vperm.xlu0 %8227, %v9141_v55   ;;  %v9151_v15 = vpop.eup %8316  ;;  %8336 = vpow2.f32 %v914_v59 }
 0x34b   :  { %939 = vperm.xlu1 %8226, %v9143_v58   ;;  %v9156_v53 = vpop.eup %8318 }
 0x34c   :  { %v9158_v2 = vpop.eup %8320 }
 0x34d   :  { %v9163_v4 = vpop.eup %8322 }
 0x34e   :  { %969 = vperm.xlu0 %8227, %v9149_v35   ;;  %v9168_v0 = vpop.eup %8324 }
 0x34f   :  { %942 = vperm.xlu1 %8226, %v9151_v15   ;;  %v9173_v30 = vpop.eup %8326 }
 0x350   :  { %v9178_v29 = vpop.eup %8328 }
 0x351   :  { %v9181_v61 = vpop.eup %8330 }
 0x352   :  { %975 = vperm.xlu0 %8227, %v9156_v53   ;;  %v9184_v9 = vpop.eup %8332 }
 0x353   :  { %945 = vperm.xlu1 %8226, %v9158_v2   ;;  %v9187_v1 = vpop.eup %8334 }
 0x354   :  { %v9190_v13 = vpop.eup %8336 }
 0x357   :  { %948 = vperm.xlu1 %8226, %v9163_v4  }
 0x35b   :  { %951 = vperm.xlu1 %8226, %v9168_v0  }
 0x35f   :  { %954 = vperm.xlu1 %8226, %v9173_v30  }
 0x363   :  { %957 = vperm.xlu1 %8226, %v9178_v29  }
 0x367   :  { %960 = vperm.xlu1 %8226, %v9181_v61  }
 0x36b   :  { %966 = vperm.xlu1 %8226, %v9184_v9  }
 0x36f   :  { %972 = vperm.xlu1 %8226, %v9187_v1  }
 0x373   :  { %978 = vperm.xlu1 %8226, %v9190_v13  }
 0x3c5   :  { %v937_v54 = vpop.permute.xlu0 %936 }
 0x3c6   :  { %v934_v60 = vpop.permute.xlu1 %933  ;;  %v987_v21 = vrot.slane %v937_v54, %v9033_v41 }
 0x3c7   :  { %v983_v18 = vrot.slane %v934_v60, %v9038_v49 }
 0x3c9   :  { %v964_v14 = vpop.permute.xlu0 %963  ;;  %v988_v60 = vsel %vm750_vm9, %v987_v21, %v983_v18 }
 0x3ca   :  { %v940_v31 = vpop.permute.xlu1 %939 }
 0x3cb   :  { %v992_v17 = vrot.slane %v940_v31, %v9038_v49  ;;  %v1028_v31 = vrot.slane %v964_v14, %v9038_v49 }
 0x3cd   :  { %v970_v27 = vpop.permute.xlu0 %969 }
 0x3ce   :  { %v943_v23 = vpop.permute.xlu1 %942 }
 0x3cf   :  { %v996_v38 = vrot.slane %v943_v23, %v9033_v41 }
 0x3d1   :  { %v997_v62 = vsel %vm750_vm9, %v996_v38, %v992_v17 }
 0x3d2   :  { %v946_v40 = vpop.permute.xlu1 %945  ;;  %v1052_v17 = vsel %vm499_vm2, %v997_v62, %v988_v60 }
 0x3d3   :  { %v1001_v12 = vrot.slane %v946_v40, %v9038_v49 }
 0x3d6   :  { %v949_v56 = vpop.permute.xlu1 %948 }
 0x3d7   :  { %v1005_v59 = vrot.slane %v949_v56, %v9033_v41 }
 0x3d9   :  { %v1006_v56 = vsel %vm750_vm9, %v1005_v59, %v1001_v12 }
 0x3da   :  { %v952_v43 = vpop.permute.xlu1 %951  ;;  %v1053_v12 = vsel %vm501_vm3, %v1006_v56, %v1052_v17 }
 0x3db   :  { %v1010_v23 = vrot.slane %v952_v43, %v9038_v49  ;;  %v976_v43 = vpop.permute.xlu0 %975 }
 0x3de   :  { %v955_v5 = vpop.permute.xlu1 %954 }
 0x3df   :  { %v1014_v36 = vrot.slane %v955_v5, %v9033_v41 }
 0x3e1   :  { %v1015_v5 = vsel %vm750_vm9, %v1014_v36, %v1010_v23  ;;  %v1046_v36 = vrot.slane %v976_v43, %v9038_v49 }
 0x3e2   :  { %v958_v32 = vpop.permute.xlu1 %957  ;;  %v1054_v38 = vsel %vm503_vm4, %v1015_v5, %v1053_v12 }
 0x3e3   :  { %v1019_v54 = vrot.slane %v958_v32, %v9038_v49 }
 0x3e6   :  { %v961_v8 = vpop.permute.xlu1 %960 }
 0x3e7   :  { %v1023_v19 = vrot.slane %v961_v8, %v9033_v41  ;;  %v1037_v8 = vrot.slane %v970_v27, %v9038_v49 }
 0x3ea   :  { %v967_v26 = vpop.permute.xlu1 %966 }
 0x3eb   :  { %v1032_v51 = vrot.slane %v967_v26, %v9033_v41  ;;  %v1024_v26 = vsel %vm750_vm9, %v1023_v19, %v1019_v54 }
 0x3ec   :  { %v1055_v14 = vsel %vm505_vm5, %v1024_v26, %v1054_v38 }
 0x3ed   :  { %v1033_v32 = vsel %vm750_vm9, %v1032_v51, %v1028_v31 }
 0x3ee   :  { %v973_v3 = vpop.permute.xlu1 %972  ;;  %v1056_v62 = vsel %vm507_vm6, %v1033_v32, %v1055_v14 }
 0x3ef   :  { %v1041_v40 = vrot.slane %v973_v3, %v9033_v41 }
 0x3f1   :  { %v1042_v21 = vsel %vm750_vm9, %v1041_v40, %v1037_v8 }
 0x3f2   :  { %v979_v18 = vpop.permute.xlu1 %978  ;;  %v1057_v19 = vsel %vm509_vm7, %v1042_v21, %v1056_v62 }
 0x3f3   :  { %v1050_v3 = vrot.slane %v979_v18, %v9033_v41 }
 0x3f5   :  { %v1051_v27 = vsel %vm750_vm9, %v1050_v3, %v1046_v36 }
 0x3f6   :  { %v1058_v59 = vsel %vm511_vm8, %v1051_v27, %v1057_v19 }
 0x3f7   :  { %v1060_v51 = vsel %vm823_vm10, %v1058_v59, 0.0 }
 0x3f8   :  { %1061 = vadd.xlane.f32.xlu0 %v1060_v51 }
 0x485   :  { %v1062_v23 = vpop.xlane.xlu0 %1061 }
 0x486   :  { %8338 = vrcp.f32 %v1062_v23 }
 0x490   :  { %v8339_v56 = vpop.eup %8338 }
 0x491   :  { %v1084_v54 = vrot.slane %v8339_v56, %v9138_v28  ;;  %v1068_v60 = vrot.slane %v8339_v56, %v8966_v48  ;;  %v1096_v40 = vrot.slane %v8339_v56, %v9106_v63  ;;  %v1072_v43 = vrot.slane %v8339_v56, %v9092_v34 }
 0x492   :  { %v1080_v12 = vrot.slane %v8339_v56, %v9126_v22 }
 0x493   :  { %v1113_v31 = vmul.f32 %v9178_v29, %v1084_v54  ;;  %v1105_v5 = vmul.f32 %v9133_v24, %v1068_v60  ;;  %v1119_v8 = vmul.f32 %v9156_v53, %v1096_v40  ;;  %v1106_v17 = vmul.f32 %v9131_v25, %v1068_v60 }
 0x494   :  { %v1107_v26 = vmul.f32 %v9143_v58, %v1072_v43  ;;  %v1108_v24 = vmul.f32 %v9151_v15, %v1072_v43  ;;  %v1076_v29 = vrot.slane %v8339_v56, %v9114_v6  ;;  %v1111_v58 = vmul.f32 %v9168_v0, %v1080_v12 }
 0x495   :  { %1163 = vperm.xlu0 %8227, %v1113_v31   ;;  %1123 = vperm.xlu1 %8226, %v1105_v5   ;;  %v1112_v32 = vmul.f32 %v9173_v30, %v1080_v12  ;;  %v1088_v15 = vrot.slane %v8339_v56, %v9095_v52  ;;  %v1120_v30 = vmul.f32 %v9190_v13, %v1096_v40 }
 0x496   :  { %v1109_v53 = vmul.f32 %v9158_v2, %v1076_v29  ;;  %v1110_v25 = vmul.f32 %v9163_v4, %v1076_v29  ;;  %v1092_v4 = vrot.slane %v8339_v56, %v9098_v33 }
 0x497   :  { %v1115_v38 = vmul.f32 %v9141_v55, %v1088_v15  ;;  %v1116_v2 = vmul.f32 %v9184_v9, %v1088_v15  ;;  %v9260_v55 = vld [vmem:[%s11732_s5 + $0x8] sm:$0xff]   ;;  %v9267_v9 = vld [vmem:[%s11732_s5 + $0x10] sm:$0xff]  }
 0x498   :  { %v1117_v18 = vmul.f32 %v9149_v35, %v1092_v4  ;;  %v1118_v0 = vmul.f32 %v9187_v1, %v1092_v4  ;;  %v11833_v35 = vmov 0.0   ;;  %v9274_v1 = vld [vmem:[%s11732_s5 + $0x18] sm:$0xff]  }
 0x499   :  { %1193 = vperm.xlu0 %8227, %v1119_v8   ;;  %1128 = vperm.xlu1 %8226, %v1106_v17  }
 0x49d   :  { %1338 = vrot.lane.b32.xlu0 %v8920_v10, %s8688_s6  ;;  %1133 = vperm.xlu1 %8226, %v1107_v26   ;;  %v1114_v10 = vmul.f32 %v9181_v61, %v1084_v54  ;;  %v9254_v61 = vld [vmem:[%s11732_s5] sm:$0xff]  }
 0x49e   :  { %8046 = vmatpush3.bf16.msra.mxu0 %v9254_v61 }
 0x49f   :  { %8047 = vmatprep.subr.bf16.mxu0 %v11833_v35 }
 0x4a1   :  { %1138 = vperm.xlu1 %8226, %v1108_v24  }
 0x4a2   :  { %8048 = vmatpush3.bf16.msra.mxu0 %v9260_v55 }
 0x4a3   :  { %8049 = vmatprep.subr.bf16.mxu0 %v11833_v35 }
 0x4a5   :  { %1143 = vperm.xlu1 %8226, %v1109_v53  }
 0x4a6   :  { %8050 = vmatpush3.bf16.msra.mxu0 %v9267_v9 }
 0x4a7   :  { %8051 = vmatprep.subr.bf16.mxu0 %v11833_v35 }
 0x4a9   :  { %1148 = vperm.xlu1 %8226, %v1110_v25  }
 0x4aa   :  { %8052 = vmatpush3.bf16.msra.mxu0 %v9274_v1 }
 0x4ab   :  { %8077 = vmatprep.subr.bf16.mxu0 %v11833_v35 }
 0x4ad   :  { %1153 = vperm.xlu1 %8226, %v1111_v58  }
 0x4b1   :  { %1158 = vperm.xlu1 %8226, %v1112_v32  }
 0x4b5   :  { %1168 = vperm.xlu1 %8226, %v1114_v10  }
 0x4b9   :  { %1173 = vperm.xlu1 %8226, %v1115_v38  }
 0x4bd   :  { %1178 = vperm.xlu1 %8226, %v1116_v2  }
 0x4c1   :  { %1183 = vperm.xlu1 %8226, %v1117_v18  }
 0x4c5   :  { %1188 = vperm.xlu1 %8226, %v1118_v0  }
 0x4c9   :  { %1198 = vperm.xlu1 %8226, %v1120_v30  }
 0x514   :  { %v1124_v13 = vpop.permute.xlu1 %1123  ;;  %v1164_v56 = vpop.permute.xlu0 %1163 }
 0x515   :  { %v1201_v54 = vmul.f32 %v8847_v45, %v1124_v13  ;;  %v1209_v26 = vmul.f32 %v8899_v39, %v1164_v56 }
 0x517   :  { %v1217_v53 = vsel %vm116_vm0, %v1201_v54, 0.0  ;;  %v1253_v4 = vsel %vm116_vm0, %v1209_v26, 0.0 }
 0x518   :  { %v1129_v21 = vpop.permute.xlu1 %1128 }
 0x519   :  { %v1202_v59 = vmul.f32 %v8851_v47, %v1129_v21 }
 0x51b   :  { %v1218_v17 = vsel %vm116_vm0, %v1202_v59, 0.0 }
 0x51c   :  { %v1134_v36 = vpop.permute.xlu1 %1133  ;;  %v1219_v32 = vadd.f32 %v1218_v17, %v1217_v53 }
 0x51d   :  { %v1203_v23 = vmul.f32 %v8845_v44, %v1134_v36 }
 0x51e   :  { %v1220_v21 = vrot.slane %v1219_v32, 4 }
 0x51f   :  { %v1226_v24 = vsel %vm116_vm0, %v1203_v23, 0.0 }
 0x520   :  { %v1139_v3 = vpop.permute.xlu1 %1138  ;;  %v1221_v59 = vadd.f32 %v1220_v21, %v1219_v32 }
 0x521   :  { %v1204_v19 = vmul.f32 %v8849_v46, %v1139_v3 }
 0x522   :  { %v1222_v17 = vrot.slane %v1221_v59, 2 }
 0x523   :  { %v1227_v5 = vsel %vm116_vm0, %v1204_v19, 0.0 }
 0x524   :  { %v1144_v14 = vpop.permute.xlu1 %1143  ;;  %v1228_v25 = vadd.f32 %v1227_v5, %v1226_v24 }
 0x525   :  { %v1205_v60 = vmul.f32 %v8883_v11, %v1144_v14 }
 0x526   :  { %v1229_v0 = vrot.slane %v1228_v25, 4 }
 0x527   :  { %v1235_v12 = vsel %vm116_vm0, %v1205_v60, 0.0 }
 0x528   :  { %v1149_v62 = vpop.permute.xlu1 %1148 }
 0x529   :  { %v1206_v51 = vmul.f32 %v8887_v20, %v1149_v62 }
 0x52b   :  { %v1236_v43 = vsel %vm116_vm0, %v1206_v51, 0.0 }
 0x52c   :  { %v1154_v27 = vpop.permute.xlu1 %1153  ;;  %v1237_v10 = vadd.f32 %v1236_v43, %v1235_v12 }
 0x52d   :  { %v1207_v40 = vmul.f32 %v8879_v7, %v1154_v27  ;;  %v1230_v27 = vadd.f32 %v1229_v0, %v1228_v25  ;;  %v1194_v25 = vpop.permute.xlu0 %1193  ;;  %v11835_v0 = vld [vmem:[#allocation7_spill] sm:$0xff] }
 0x52e   :  { %v1238_v36 = vrot.slane %v1237_v10, 4 }
 0x52f   :  { %v1244_v15 = vsel %vm116_vm0, %v1207_v40, 0.0  ;;  %v1231_v5 = vrot.slane %v1230_v27, 2 }
 0x530   :  { %v1159_v31 = vpop.permute.xlu1 %1158  ;;  %v1239_v51 = vadd.f32 %v1238_v36, %v1237_v10  ;;  %v1223_v10 = vadd.f32 %v1222_v17, %v1221_v59 }
 0x531   :  { %v1208_v8 = vmul.f32 %v8885_v16, %v1159_v31  ;;  %v1232_v12 = vadd.f32 %v1231_v5, %v1230_v27 }
 0x532   :  { %v1240_v43 = vrot.slane %v1239_v51, 2  ;;  %v1224_v27 = vrot.slane %v1223_v10, 1 }
 0x533   :  { %v1245_v29 = vsel %vm116_vm0, %v1208_v8, 0.0 }
 0x534   :  { %v1169_v58 = vpop.permute.xlu1 %1168  ;;  %v1246_v2 = vadd.f32 %v1245_v29, %v1244_v15  ;;  %v1241_v15 = vadd.f32 %v1240_v43, %v1239_v51 }
 0x535   :  { %v1210_v38 = vmul.f32 %v8903_v50, %v1169_v58 }
 0x536   :  { %v1247_v3 = vrot.slane %v1246_v2, 4 }
 0x537   :  { %v1254_v18 = vsel %vm116_vm0, %v1210_v38, 0.0  ;;  %v11834_v38 = vld [vmem:[#allocation9_spill] sm:$0xff] }
 0x538   :  { %v1255_v30 = vadd.f32 %v1254_v18, %v1253_v4  ;;  %v1174_v13 = vpop.permute.xlu1 %1173  ;;  %v1248_v56 = vadd.f32 %v1247_v3, %v1246_v2  ;;  %v1233_v3 = vrot.slane %v1232_v12, 1 }
 0x539   :  { %v1211_v62 = vmul.f32 %v8897_v37, %v1174_v13 }
 0x53a   :  { %v1256_v14 = vrot.slane %v1255_v30, 4  ;;  %v1249_v26 = vrot.slane %v1248_v56, 2 }
 0x53b   :  { %v1262_v60 = vsel %vm116_vm0, %v1211_v62, 0.0 }
 0x53c   :  { %v1179_v19 = vpop.permute.xlu1 %1178  ;;  %v1257_v54 = vadd.f32 %v1256_v14, %v1255_v30  ;;  %v1250_v4 = vadd.f32 %v1249_v26, %v1248_v56  ;;  %v1215_v30 = vmul.f32 %v11835_v0, %v1194_v25  ;;  %v1225_v26 = vadd.f32 %v1224_v27, %v1223_v10 }
 0x53d   :  { %v1212_v23 = vmul.f32 %v8901_v42, %v1179_v19 }
 0x53e   :  { %v1258_v29 = vrot.slane %v1257_v54, 2  ;;  %v1251_v51 = vrot.slane %v1250_v4, 1  ;;  %v1280_v56 = vsel %vm116_vm0, %v1215_v30, 0.0 }
 0x53f   :  { %v1263_v31 = vsel %vm116_vm0, %v1212_v23, 0.0  ;;  %v1242_v23 = vrot.slane %v1241_v15, 1 }
 0x540   :  { %v1264_v40 = vadd.f32 %v1263_v31, %v1262_v60  ;;  %v1184_v8 = vpop.permute.xlu1 %1183  ;;  %v1259_v13 = vadd.f32 %v1258_v29, %v1257_v54  ;;  %v11836_v60 = vld [vmem:[#allocation8_spill] sm:$0xff]  ;;  %v1234_v54 = vadd.f32 %v1233_v3, %v1232_v12  ;;  %v1252_v29 = vadd.f32 %v1251_v51, %v1250_v4 }
 0x541   :  { %v1213_v53 = vmul.f32 %v8864_v57, %v1184_v8 }
 0x542   :  { %v1265_v24 = vrot.slane %v1264_v40, 4  ;;  %v1260_v5 = vrot.slane %v1259_v13, 1  ;;  %v1309_v30 = vpack.c.bf16 %v1252_v29, %v1252_v29  ;;  %v1297_v12 = vsel %vm499_vm2, %v1234_v54, %v1225_v26 }
 0x543   :  { %v1271_v21 = vsel %vm116_vm0, %v1213_v53, 0.0 }
 0x544   :  { %v1266_v58 = vadd.f32 %v1265_v24, %v1264_v40  ;;  %v1189_v32 = vpop.permute.xlu1 %1188  ;;  %v1243_v24 = vadd.f32 %v1242_v23, %v1241_v15  ;;  %v1325_v23 = vunpack.c.l.b16 %v1309_v30  ;;  %v9340_v30 = vld [vmem:[%s11734_s7 + $0x8] sm:$0xff]  }
 0x545   :  { %v1214_v2 = vmul.f32 %v11834_v38, %v1189_v32  ;;  %v1307_v32 = vpack.c.bf16 %v1234_v54, %v1234_v54  ;;  %11838 = vst [vmem:[#allocation23_spill] sm:$0xff] %v9340_v30 }
 0x546   :  { %v1267_v18 = vrot.slane %v1266_v58, 2  ;;  %v1298_v27 = vsel %vm501_vm3, %v1243_v24, %v1297_v12  ;;  %v11839_v12 = vld [vmem:[#allocation12_spill] sm:$0xff] }
 0x547   :  { %v1272_v36 = vsel %vm116_vm0, %v1214_v2, 0.0 }
 0x548   :  { %v1268_v14 = vadd.f32 %v1267_v18, %v1266_v58  ;;  %v1273_v62 = vadd.f32 %v1272_v36, %v1271_v21  ;;  %v1199_v19 = vpop.permute.xlu1 %1198  ;;  %v1261_v58 = vadd.f32 %v1260_v5, %v1259_v13  ;;  %v1306_v36 = vpack.c.bf16 %v1225_v26, %v1225_v26 }
 0x549   :  { %v1216_v59 = vmul.f32 %v11836_v60, %v1199_v19  ;;  %v1308_v19 = vpack.c.bf16 %v1243_v24, %v1243_v24 }
 0x54a   :  { %v1274_v31 = vrot.slane %v1273_v62, 4  ;;  %v1269_v8 = vrot.slane %v1268_v14, 1  ;;  %v1310_v3 = vpack.c.bf16 %v1261_v58, %v1261_v58  ;;  %v1322_v4 = vunpack.c.l.b16 %v1306_v36 }
 0x54b   :  { %v1281_v40 = vsel %vm116_vm0, %v1216_v59, 0.0  ;;  %v1324_v13 = vunpack.c.l.b16 %v1308_v19  ;;  %v9331_v19 = vld [vmem:[%s11734_s7] sm:$0xff]  }
 0x54c   :  { %v1275_v17 = vadd.f32 %v1274_v31, %v1273_v62  ;;  %v1282_v43 = vadd.f32 %v1281_v40, %v1280_v56  ;;  %v1270_v2 = vadd.f32 %v1269_v8, %v1268_v14  ;;  %v1323_v62 = vunpack.c.l.b16 %v1307_v32  ;;  %11837 = vst [vmem:[#allocation22_spill] sm:$0xff] %v9331_v19 }
 0x54d   :  { %v1299_v14 = vsel %vm503_vm4, %v1252_v29, %v1298_v27  ;;  %v1326_v5 = vunpack.c.l.b16 %v1310_v3  ;;  %v11840_v3 = vld [vmem:[#allocation10_spill] sm:$0xff] }
 0x54e   :  { %v1276_v53 = vrot.slane %v1275_v17, 2  ;;  %v1283_v25 = vrot.slane %v1282_v43, 4  ;;  %v1311_v59 = vpack.c.bf16 %v1270_v2, %v1270_v2  ;;  %v1300_v56 = vsel %vm505_vm5, %v1261_v58, %v1299_v14 }
 0x54f   :  { %v1330_v40 = vsel %vm499_vm2, %v1323_v62, %v1322_v4  ;;  %v1301_v54 = vsel %vm507_vm6, %v1270_v2, %v1300_v56  ;;  %v445_v62 = vadd.f32 %v11840_v3, %v11839_v12 }
 0x550   :  { %v1277_v18 = vadd.f32 %v1276_v53, %v1275_v17  ;;  %v1284_v21 = vadd.f32 %v1283_v25, %v1282_v43  ;;  %v1327_v8 = vunpack.c.l.b16 %v1311_v59 }
 0x552   :  { %v1278_v63 = vrot.slane %v1277_v18, 1  ;;  %v1285_v33 = vrot.slane %v1284_v21, 2 }
 0x554   :  { %v1279_v10 = vadd.f32 %v1278_v63, %v1277_v18  ;;  %v1286_v15 = vadd.f32 %v1285_v33, %v1284_v21  ;;  %v1331_v33 = vsel %vm501_vm3, %v1324_v13, %v1330_v40  ;;  %v1339_v21 = vpop.permute.xlu0 %1338 }
 0x555   :  { %v1332_v26 = vsel %vm503_vm4, %v1325_v23, %v1331_v33 }
 0x556   :  { %v1312_v51 = vpack.c.bf16 %v1279_v10, %v1279_v10  ;;  %v1287_v31 = vrot.slane %v1286_v15, 1  ;;  %v1302_v63 = vsel %vm509_vm7, %v1279_v10, %v1301_v54  ;;  %v1333_v53 = vsel %vm505_vm5, %v1326_v5, %v1332_v26 }
 0x557   :  { %v1334_v58 = vsel %vm507_vm6, %v1327_v8, %v1333_v53 }
 0x558   :  { %v1288_v17 = vadd.f32 %v1287_v31, %v1286_v15  ;;  %v1328_v43 = vunpack.c.l.b16 %v1312_v51 }
 0x55a   :  { %v1303_v24 = vsel %vm511_vm8, %v1288_v17, %v1302_v63  ;;  %v1313_v29 = vpack.c.bf16 %v1288_v17, %v1288_v17  ;;  %v1335_v32 = vsel %vm509_vm7, %v1328_v43, %v1334_v58 }
 0x55b   :  { %1305 = vst.msk [vmem:[#allocation3] sm:$0xff] %vm116_vm0, %v1303_v24 }
 0x55c   :  { %v1329_v25 = vunpack.c.l.b16 %v1313_v29 }
 0x55e   :  { %v1336_v2 = vsel %vm511_vm8, %v1329_v25, %v1335_v32 }
 0x55f   :  { %v1337_v18 = vpack.c.b16 %v1336_v2, %v1336_v2 }
 0x561   :  { %v1342_v36 = vsel %vm116_vm0, %v1337_v18, %v1339_v21 }
 0x562   :  { %8054 = vmatmul.mubr.msk.bf16.vlgmr.msra.gmra.mrb[12].mxu0 %vm1367_vm11, %v1342_v36 }
 0x563   :  { %8078 = vmatpush3.bf16.msra.mxu0 %v9331_v19  ;;  %8081 = vmatprep.mubr.msk.bf16.mxu0 %vm8685_vm1, %v11833_v35 }
 0x564   :  { %8079 = vmatprep.subr.bf16.mxu0 %v11833_v35 }
 0x567   :  { %8080 = vmatpush3.bf16.msra.mxu0 %v9340_v30 }
 0x568   :  { %8085 = vmatprep.subr.bf16.mxu0 %v11833_v35 }
 0x635   :  { %v1404_v59 = vpop.f32.mrb[12].mxu0 }
 0x636   :  { %v1405_v10 = vadd.f32 %v1404_v59, %v445_v62  ;;  %v8055_v15 = vpop.f32.mrb[13].mxu0 }
 0x637   :  { %v1407_v4 = vpop.f32.mrb[14].mxu0 }
 0x638   :  { %8340 = vtanh.f32 %v1405_v10  ;;  %v8056_v27 = vpop.f32.mrb[15].mxu0  ;;  %v7886_v14 = vmul.f32 -1.442695, %v1405_v10 }
 0x63a   :  { %8342 = vpow2.f32 %v7886_v14 }
 0x642   :  { %v8341_v13 = vpop.eup %8340 }
 0x643   :  { %1419 = vrot.lane.b32.xlu1 %v8341_v13, %s8689_s18 }
 0x644   :  { %v8343_v23 = vpop.eup %8342 }
 0x645   :  { %v1413_v51 = vadd.f32 1.0, %v8343_v23 }
 0x647   :  { %8344 = vrcp.f32 %v1413_v51 }
 0x651   :  { %v8345_v31 = vpop.eup %8344 }
 0x652   :  { %v1417_v40 = vmul.f32 0.0, %v8345_v31 }
 0x6b5   :  { %v1420_v56 = vpop.permute.xlu1 %1419 }
 0x6b6   :  { %v1422_v5 = vmul.f32 %v8345_v31, %v1420_v56 }
 0x6b8   :  { %1424 = vrot.lane.b32.xlu0 %v1422_v5, %s8688_s6 }
 0x72a   :  { %v1425_v54 = vpop.permute.xlu0 %1424 }
 0x72b   :  { %v9348_v8 = vadd.f32 %v1425_v54, %v1417_v40 }
 0x72d   :  { %11841 = vst [vmem:[#allocation12_spill] sm:$0xff] %v9348_v8  ;;  %8346 = vtanh.f32 %v9348_v8 }
 0x737   :  { %v8347_v17 = vpop.eup %8346 }
 0x738   :  { %1430 = vrot.lane.b32.xlu1 %v8347_v17, %s8689_s18 }
 0x7aa   :  { %v1431_v33 = vpop.permute.xlu1 %1430 }
 0x7ab   :  { %v9352_v63 = vmul.f32 %v8345_v31, %v1431_v33 }
 0x7ad   :  { %11842 = vst [vmem:[#allocation10_spill] sm:$0xff] %v9352_v63  ;;  %v9356_v43 = vpack.c.bf16 %v9352_v63, %v9352_v63 }
 0x7af   :  { %1441 = vrot.lane.b32.xlu0 %v9356_v43, %s8688_s6 }
 0x821   :  { %v1442_v26 = vpop.permute.xlu0 %1441 }
 0x822   :  { %8062 = vmatmul.mubr.msk.bf16.vlgmr.msra.gmra.mrb[16].mxu1 %vm116_vm0, %v1442_v26 }
 0x823   :  { %8066 = vmatpush3.bf16.msra.mxu1 %v9254_v61  ;;  %8073 = vmatprep.mubr.msk.bf16.mxu1 %vm8685_vm1, %v11833_v35  ;;  %v11843_v61 = vld [vmem:[#allocation19_spill] sm:$0xff] }
 0x824   :  { %8067 = vmatprep.subr.bf16.mxu1 %v11833_v35 }
 0x827   :  { %8068 = vmatpush3.bf16.msra.mxu1 %v9260_v55 }
 0x828   :  { %8069 = vmatprep.subr.bf16.mxu1 %v11833_v35 }
 0x82b   :  { %8070 = vmatpush3.bf16.msra.mxu1 %v9267_v9 }
 0x82c   :  { %8071 = vmatprep.subr.bf16.mxu1 %v11833_v35 }
 0x82f   :  { %8072 = vmatpush3.bf16.msra.mxu1 %v9274_v1 }
 0x830   :  { %8097 = vmatprep.subr.bf16.mxu1 %v11833_v35 }
 0x8f5   :  { %v1480_v24 = vpop.f32.mrb[16].mxu1 }
 0x8f6   :  { %v1487_v29 = vcombine.high %v1480_v24, %v1480_v24  ;;  %v1494_v53 = vrot.slane %v1480_v24, %v11843_v61  ;;  %v8063_v25 = vpop.f32.mrb[17].mxu1 }
 0x8f7   :  { %v1483_v58 = vpop.f32.mrb[18].mxu1 }
 0x8f8   :  { %v1502_v32 = vcombine.high %v1494_v53, %v1494_v53  ;;  %v1510_v2 = vrot.slane %v1494_v53, %v11843_v61  ;;  %v8064_v55 = vpop.f32.mrb[19].mxu1  ;;  %v1501_v18 = vrot.slane %v1487_v29, %v11843_v61 }
 0x8fa   :  { %v1524_v9 = vrot.slane %v1502_v32, %v11843_v61  ;;  %v1532_v21 = vcombine.high %v1510_v2, %v1510_v2  ;;  %v1539_v36 = vrot.slane %v1510_v2, %v8966_v48  ;;  %v1517_v62 = vrot.slane %v1501_v18, %v11843_v61 }
 0x8fb   :  { %v1503_v13 = vcombine.high %v1501_v18, %v1501_v18 }
 0x8fc   :  { %v1543_v1 = vrot.slane %v1524_v9, %v8966_v48  ;;  %v1577_v12 = vmul.f32 %v8851_v47, %v1539_v36  ;;  %v1576_v3 = vmul.f32 %v8847_v45, %v1539_v36  ;;  %v1547_v59 = vrot.slane %v1532_v21, %v8966_v48 }
 0x8fd   :  { %v1555_v14 = vrot.slane %v1517_v62, %v8966_v48  ;;  %v1534_v23 = vcombine.high %v1524_v9, %v1524_v9  ;;  %v1531_v54 = vrot.slane %v1503_v13, %v11843_v61  ;;  %v1533_v53 = vcombine.high %v1517_v62, %v1517_v62 }
 0x8fe   :  { %v1595_v10 = vsel %vm116_vm0, %v1577_v12, 0.0  ;;  %v1592_v15 = vsel %vm116_vm0, %v1576_v3, 0.0  ;;  %v1579_v4 = vmul.f32 %v8849_v46, %v1543_v1  ;;  %v1578_v27 = vmul.f32 %v8845_v44, %v1543_v1 }
 0x8ff   :  { %1596 = vadd.xlane.f32.xlu0 %v1595_v10  ;;  %1593 = vadd.xlane.f32.xlu1 %v1592_v15  ;;  %v1581_v56 = vmul.f32 %v8887_v20, %v1547_v59  ;;  %v1580_v5 = vmul.f32 %v8883_v11, %v1547_v59  ;;  %v1585_v40 = vmul.f32 %v8903_v50, %v1555_v14 }
 0x900   :  { %v1601_v51 = vsel %vm116_vm0, %v1579_v4, 0.0  ;;  %v1598_v31 = vsel %vm116_vm0, %v1578_v27, 0.0  ;;  %v1584_v26 = vmul.f32 %v8899_v39, %v1555_v14  ;;  %v1551_v24 = vrot.slane %v1534_v23, %v8966_v48 }
 0x901   :  { %v1607_v17 = vsel %vm116_vm0, %v1581_v56, 0.0  ;;  %v1604_v33 = vsel %vm116_vm0, %v1580_v5, 0.0  ;;  %v1619_v29 = vsel %vm116_vm0, %v1585_v40, 0.0  ;;  %v1559_v2 = vrot.slane %v1531_v54, %v8966_v48 }
 0x902   :  { %v1616_v25 = vsel %vm116_vm0, %v1584_v26, 0.0  ;;  %v1583_v58 = vmul.f32 %v8885_v16, %v1551_v24  ;;  %v1582_v32 = vmul.f32 %v8879_v7, %v1551_v24  ;;  %v1563_v55 = vrot.slane %v1533_v53, %v8966_v48 }
 0x903   :  { %1602 = vadd.xlane.f32.xlu1 %v1601_v51  ;;  %1599 = vadd.xlane.f32.xlu0 %v1598_v31  ;;  %v1535_v18 = vcombine.high %v1531_v54, %v1531_v54  ;;  %v1587_v36 = vmul.f32 %v8901_v42, %v1559_v2  ;;  %v1586_v1 = vmul.f32 %v8897_v37, %v1559_v2 }
 0x904   :  { %v1613_v9 = vsel %vm116_vm0, %v1583_v58, 0.0  ;;  %v1610_v21 = vsel %vm116_vm0, %v1582_v32, 0.0  ;;  %v1589_v12 = vmul.f32 %v11834_v38, %v1563_v55  ;;  %v1588_v59 = vmul.f32 %v8864_v57, %v1563_v55 }
 0x905   :  { %v1625_v3 = vsel %vm116_vm0, %v1587_v36, 0.0  ;;  %v1622_v62 = vsel %vm116_vm0, %v1586_v1, 0.0  ;;  %v1567_v10 = vrot.slane %v1535_v18, %v8966_v48 }
 0x906   :  { %v1631_v15 = vsel %vm116_vm0, %v1589_v12, 0.0  ;;  %v1628_v4 = vsel %vm116_vm0, %v1588_v59, 0.0 }
 0x907   :  { %1608 = vadd.xlane.f32.xlu1 %v1607_v17  ;;  %1605 = vadd.xlane.f32.xlu0 %v1604_v33  ;;  %v1591_v27 = vmul.f32 %v11836_v60, %v1567_v10  ;;  %v1590_v13 = vmul.f32 %v11835_v0, %v1567_v10 }
 0x909   :  { %v1637_v14 = vsel %vm116_vm0, %v1591_v27, 0.0  ;;  %v1634_v23 = vsel %vm116_vm0, %v1590_v13, 0.0 }
 0x90b   :  { %1620 = vadd.xlane.f32.xlu1 %v1619_v29  ;;  %1617 = vadd.xlane.f32.xlu0 %v1616_v25 }
 0x90f   :  { %1614 = vadd.xlane.f32.xlu1 %v1613_v9  ;;  %1611 = vadd.xlane.f32.xlu0 %v1610_v21 }
 0x913   :  { %1626 = vadd.xlane.f32.xlu1 %v1625_v3  ;;  %1623 = vadd.xlane.f32.xlu0 %v1622_v62 }
 0x917   :  { %1632 = vadd.xlane.f32.xlu1 %v1631_v15  ;;  %1629 = vadd.xlane.f32.xlu0 %v1628_v4 }
 0x91b   :  { %1638 = vadd.xlane.f32.xlu1 %v1637_v14  ;;  %1635 = vadd.xlane.f32.xlu0 %v1634_v23 }
 0x98c   :  { %v1597_v51 = vpop.xlane.xlu0 %1596  ;;  %v1594_v31 = vpop.xlane.xlu1 %1593 }
 0x98d   :  { %v1663_v32 = vrot.slane %v1597_v51, %v9033_v41  ;;  %v1659_v2 = vrot.slane %v1594_v31, %v9038_v49 }
 0x98f   :  { %v1664_v12 = vsel %vm750_vm9, %v1663_v32, %v1659_v2 }
 0x990   :  { %v9417_v56 = vpop.xlane.xlu1 %1602  ;;  %v1600_v5 = vpop.xlane.xlu0 %1599 }
 0x991   :  { %v1672_v29 = vrot.slane %v9417_v56, %v9033_v41  ;;  %v1668_v53 = vrot.slane %v1600_v5, %v9038_v49 }
 0x993   :  { %v1673_v36 = vsel %vm750_vm9, %v1672_v29, %v1668_v53 }
 0x994   :  { %v9419_v40 = vpop.xlane.xlu1 %1608  ;;  %v1606_v54 = vpop.xlane.xlu0 %1605  ;;  %v1728_v10 = vsel %vm499_vm2, %v1673_v36, %v1664_v12 }
 0x995   :  { %v1681_v25 = vrot.slane %v9419_v40, %v9033_v41  ;;  %v1677_v58 = vrot.slane %v1606_v54, %v9038_v49 }
 0x997   :  { %v1682_v1 = vsel %vm750_vm9, %v1681_v25, %v1677_v58 }
 0x998   :  { %v9421_v17 = vpop.xlane.xlu1 %1620  ;;  %v9423_v33 = vpop.xlane.xlu0 %1617  ;;  %v1729_v14 = vsel %vm501_vm3, %v1682_v1, %v1728_v10 }
 0x999   :  { %v1699_v15 = vrot.slane %v9421_v17, %v9033_v41  ;;  %v1695_v4 = vrot.slane %v9423_v33, %v9038_v49 }
 0x99b   :  { %v1700_v58 = vsel %vm750_vm9, %v1699_v15, %v1695_v4 }
 0x99c   :  { %v9425_v26 = vpop.xlane.xlu1 %1614  ;;  %v1612_v24 = vpop.xlane.xlu0 %1611 }
 0x99d   :  { %v1690_v55 = vrot.slane %v9425_v26, %v9033_v41  ;;  %v1686_v18 = vrot.slane %v1612_v24, %v9038_v49 }
 0x99f   :  { %v1691_v3 = vsel %vm750_vm9, %v1690_v55, %v1686_v18 }
 0x9a0   :  { %v9438_v9 = vpop.xlane.xlu1 %1626  ;;  %v9440_v21 = vpop.xlane.xlu0 %1623  ;;  %v1730_v53 = vsel %vm503_vm4, %v1691_v3, %v1729_v14 }
 0x9a1   :  { %v1708_v62 = vrot.slane %v9438_v9, %v9033_v41  ;;  %v1704_v59 = vrot.slane %v9440_v21, %v9038_v49  ;;  %v1731_v1 = vsel %vm505_vm5, %v1700_v58, %v1730_v53 }
 0x9a3   :  { %v1709_v25 = vsel %vm750_vm9, %v1708_v62, %v1704_v59 }
 0x9a4   :  { %v9455_v27 = vpop.xlane.xlu1 %1632  ;;  %v9457_v13 = vpop.xlane.xlu0 %1629  ;;  %v1732_v12 = vsel %vm507_vm6, %v1709_v25, %v1731_v1 }
 0x9a5   :  { %v1717_v23 = vrot.slane %v9455_v27, %v9033_v41  ;;  %v1713_v29 = vrot.slane %v9457_v13, %v9038_v49 }
 0x9a7   :  { %v1718_v55 = vsel %vm750_vm9, %v1717_v23, %v1713_v29 }
 0x9a8   :  { %v9467_v32 = vpop.xlane.xlu1 %1638  ;;  %v9469_v2 = vpop.xlane.xlu0 %1635  ;;  %v1733_v62 = vsel %vm509_vm7, %v1718_v55, %v1732_v12 }
 0x9a9   :  { %v1726_v18 = vrot.slane %v9467_v32, %v9033_v41  ;;  %v1722_v36 = vrot.slane %v9469_v2, %v9038_v49 }
 0x9ab   :  { %v1727_v3 = vsel %vm750_vm9, %v1726_v18, %v1722_v36 }
 0x9ac   :  { %v1734_v59 = vsel %vm511_vm8, %v1727_v3, %v1733_v62 }
 0x9ad   :  { %v1736_v10 = vsel %vm823_vm10, %v1734_v59, -inf }
 0x9ae   :  { %1737 = vmax.xlane.f32.xlu0 %v1736_v10 }
 0xa3b   :  { %v1738_v15 = vpop.xlane.xlu0 %1737 }
 0xa3c   :  { %v1743_v4 = vrot.slane %v1738_v15, %v8966_v48  ;;  %v1751_v14 = vrot.slane %v1738_v15, %v9114_v6  ;;  %v1747_v29 = vrot.slane %v1738_v15, %v9092_v34  ;;  %v1755_v25 = vrot.slane %v1738_v15, %v9126_v22 }
 0xa3d   :  { %v1759_v1 = vrot.slane %v1738_v15, %v9138_v28 }
 0xa3e   :  { %v1781_v23 = vsub.f32 %v1597_v51, %v1743_v4  ;;  %v1780_v53 = vsub.f32 %v1594_v31, %v1743_v4  ;;  %v1784_v18 = vsub.f32 %v1606_v54, %v1751_v14  ;;  %v1782_v36 = vsub.f32 %v1600_v5, %v1747_v29  ;;  %v11844_v5 = vld [vmem:[#allocation20_spill] sm:$0xff] }
 0xa3f   :  { %v1786_v3 = vsub.f32 %v1612_v24, %v1755_v25  ;;  %v1783_v59 = vsub.f32 %v9417_v56, %v1747_v29  ;;  %v1763_v51 = vrot.slane %v1738_v15, %v9095_v52  ;;  %v1788_v31 = vsub.f32 %v9423_v33, %v1759_v1 }
 0xa40   :  { %v1798_v58 = vmul.f32 1.442695, %v1781_v23  ;;  %v1796_v55 = vmul.f32 1.442695, %v1780_v53  ;;  %v1804_v12 = vmul.f32 1.442695, %v1784_v18  ;;  %v1785_v54 = vsub.f32 %v9419_v40, %v1751_v14 }
 0xa41   :  { %v1800_v62 = vmul.f32 1.442695, %v1782_v36  ;;  %v1808_v10 = vmul.f32 1.442695, %v1786_v3  ;;  %v1802_v4 = vmul.f32 1.442695, %v1783_v59  ;;  %v1767_v53 = vrot.slane %v1738_v15, %v11844_v5 }
 0xa42   :  { %8348 = vpow2.f32 %v1798_v58  ;;  %v1812_v24 = vmul.f32 1.442695, %v1788_v31  ;;  %v1790_v58 = vsub.f32 %v9440_v21, %v1763_v51  ;;  %v1806_v56 = vmul.f32 1.442695, %v1785_v54  ;;  %v11845_v18 = vld [vmem:[#allocation21_spill] sm:$0xff] }
 0xa43   :  { %8350 = vpow2.f32 %v1796_v55  ;;  %v1787_v29 = vsub.f32 %v9425_v26, %v1755_v25  ;;  %v1771_v33 = vrot.slane %v1738_v15, %v11845_v18  ;;  %v1792_v40 = vsub.f32 %v9457_v13, %v1767_v53 }
 0xa44   :  { %8352 = vpow2.f32 %v1804_v12  ;;  %v1816_v55 = vmul.f32 1.442695, %v1790_v58  ;;  %v1789_v21 = vsub.f32 %v9421_v17, %v1759_v1  ;;  %v1791_v13 = vsub.f32 %v9438_v9, %v1763_v51 }
 0xa45   :  { %8354 = vpow2.f32 %v1800_v62  ;;  %v1810_v12 = vmul.f32 1.442695, %v1787_v29  ;;  %v1820_v26 = vmul.f32 1.442695, %v1792_v40  ;;  %v1794_v15 = vsub.f32 %v9469_v2, %v1771_v33 }
 0xa46   :  { %8356 = vpow2.f32 %v1808_v10  ;;  %v1814_v62 = vmul.f32 1.442695, %v1789_v21  ;;  %v1793_v2 = vsub.f32 %v9455_v27, %v1767_v53  ;;  %v1818_v10 = vmul.f32 1.442695, %v1791_v13 }
 0xa47   :  { %8358 = vpow2.f32 %v1802_v4  ;;  %v1824_v17 = vmul.f32 1.442695, %v1794_v15  ;;  %v1795_v31 = vsub.f32 %v9467_v32, %v1771_v33 }
 0xa48   :  { %8360 = vpow2.f32 %v1812_v24  ;;  %v1822_v4 = vmul.f32 1.442695, %v1793_v2 }
 0xa49   :  { %8362 = vpow2.f32 %v1806_v56  ;;  %v1826_v53 = vmul.f32 1.442695, %v1795_v31 }
 0xa4a   :  { %8364 = vpow2.f32 %v1816_v55 }
 0xa4b   :  { %8366 = vpow2.f32 %v1810_v12 }
 0xa4c   :  { %v9491_v23 = vpop.eup %8348  ;;  %8368 = vpow2.f32 %v1820_v26 }
 0xa4d   :  { %1848 = vperm.xlu0 %8227, %v9491_v23   ;;  %v9499_v14 = vpop.eup %8350  ;;  %8370 = vpow2.f32 %v1814_v62 }
 0xa4e   :  { %v9501_v36 = vpop.eup %8352  ;;  %1845 = vperm.xlu1 %8226, %v9499_v14   ;;  %8372 = vpow2.f32 %v1824_v17 }
 0xa4f   :  { %v9507_v25 = vpop.eup %8354  ;;  %8374 = vpow2.f32 %v1818_v10 }
 0xa50   :  { %v9509_v3 = vpop.eup %8356  ;;  %8376 = vpow2.f32 %v1822_v4 }
 0xa51   :  { %1857 = vperm.xlu0 %8227, %v9501_v36   ;;  %v9514_v1 = vpop.eup %8358  ;;  %8378 = vpow2.f32 %v1826_v53 }
 0xa52   :  { %1851 = vperm.xlu1 %8226, %v9507_v25   ;;  %v9516_v59 = vpop.eup %8360 }
 0xa53   :  { %v9521_v9 = vpop.eup %8362 }
 0xa54   :  { %v9523_v51 = vpop.eup %8364 }
 0xa55   :  { %1863 = vperm.xlu0 %8227, %v9509_v3   ;;  %v9528_v54 = vpop.eup %8366 }
 0xa56   :  { %1854 = vperm.xlu1 %8226, %v9514_v1   ;;  %v9530_v27 = vpop.eup %8368 }
 0xa57   :  { %v9534_v24 = vpop.eup %8370 }
 0xa58   :  { %v9536_v58 = vpop.eup %8372 }
 0xa59   :  { %1869 = vperm.xlu0 %8227, %v9516_v59   ;;  %v9540_v32 = vpop.eup %8374 }
 0xa5a   :  { %1860 = vperm.xlu1 %8226, %v9521_v9   ;;  %v9543_v56 = vpop.eup %8376 }
 0xa5b   :  { %v8379_v29 = vpop.eup %8378 }
 0xa5d   :  { %1875 = vperm.xlu0 %8227, %v9523_v51  }
 0xa5e   :  { %1866 = vperm.xlu1 %8226, %v9528_v54  }
 0xa61   :  { %1881 = vperm.xlu0 %8227, %v9530_v27  }
 0xa62   :  { %1872 = vperm.xlu1 %8226, %v9534_v24  }
 0xa65   :  { %1887 = vperm.xlu0 %8227, %v9536_v58  }
 0xa66   :  { %1878 = vperm.xlu1 %8226, %v9540_v32  }
 0xa6a   :  { %1884 = vperm.xlu1 %8226, %v9543_v56  }
 0xa6e   :  { %1890 = vperm.xlu1 %8226, %v8379_v29  }
 0xacc   :  { %v1849_v33 = vpop.permute.xlu0 %1848 }
 0xacd   :  { %v1846_v55 = vpop.permute.xlu1 %1845  ;;  %v1899_v63 = vrot.slane %v1849_v33, %v9033_v41 }
 0xace   :  { %v1895_v61 = vrot.slane %v1846_v55, %v9038_v49 }
 0xad0   :  { %v1858_v40 = vpop.permute.xlu0 %1857  ;;  %v1900_v55 = vsel %vm750_vm9, %v1899_v63, %v1895_v61 }
 0xad1   :  { %v1852_v21 = vpop.permute.xlu1 %1851  ;;  %v1913_v35 = vrot.slane %v1858_v40, %v9038_v49 }
 0xad2   :  { %v1904_v8 = vrot.slane %v1852_v21, %v9038_v49 }
 0xad4   :  { %v1864_v12 = vpop.permute.xlu0 %1863 }
 0xad5   :  { %v1855_v26 = vpop.permute.xlu1 %1854  ;;  %v1922_v0 = vrot.slane %v1864_v12, %v9038_v49 }
 0xad6   :  { %v1908_v10 = vrot.slane %v1855_v26, %v9033_v41 }
 0xad8   :  { %v1870_v15 = vpop.permute.xlu0 %1869  ;;  %v1909_v26 = vsel %vm750_vm9, %v1908_v10, %v1904_v8 }
 0xad9   :  { %v1861_v13 = vpop.permute.xlu1 %1860  ;;  %v1931_v60 = vrot.slane %v1870_v15, %v9038_v49 }
 0xada   :  { %v1917_v31 = vrot.slane %v1861_v13, %v9033_v41 }
 0xadc   :  { %v1876_v17 = vpop.permute.xlu0 %1875  ;;  %v1918_v33 = vsel %vm750_vm9, %v1917_v31, %v1913_v35 }
 0xadd   :  { %v1867_v62 = vpop.permute.xlu1 %1866  ;;  %v1940_v21 = vrot.slane %v1876_v17, %v9038_v49 }
 0xade   :  { %v1926_v30 = vrot.slane %v1867_v62, %v9033_v41 }
 0xae0   :  { %v1882_v4 = vpop.permute.xlu0 %1881  ;;  %v1927_v62 = vsel %vm750_vm9, %v1926_v30, %v1922_v0 }
 0xae1   :  { %v1873_v2 = vpop.permute.xlu1 %1872  ;;  %v1949_v12 = vrot.slane %v1882_v4, %v9038_v49 }
 0xae2   :  { %v1935_v19 = vrot.slane %v1873_v2, %v9033_v41  ;;  %v1964_v2 = vsel %vm499_vm2, %v1909_v26, %v1900_v55 }
 0xae3   :  { %v1965_v15 = vsel %vm501_vm3, %v1918_v33, %v1964_v2 }
 0xae4   :  { %v1936_v8 = vsel %vm750_vm9, %v1935_v19, %v1931_v60  ;;  %v1888_v10 = vpop.permute.xlu0 %1887  ;;  %v1966_v31 = vsel %vm503_vm4, %v1927_v62, %v1965_v15 }
 0xae5   :  { %v1879_v53 = vpop.permute.xlu1 %1878  ;;  %v1958_v0 = vrot.slane %v1888_v10, %v9038_v49  ;;  %v1967_v30 = vsel %vm505_vm5, %v1936_v8, %v1966_v31 }
 0xae6   :  { %v1944_v13 = vrot.slane %v1879_v53, %v9033_v41 }
 0xae8   :  { %v1945_v35 = vsel %vm750_vm9, %v1944_v13, %v1940_v21 }
 0xae9   :  { %v1885_v38 = vpop.permute.xlu1 %1884  ;;  %v1968_v17 = vsel %vm507_vm6, %v1945_v35, %v1967_v30 }
 0xaea   :  { %v1953_v40 = vrot.slane %v1885_v38, %v9033_v41 }
 0xaec   :  { %v1954_v61 = vsel %vm750_vm9, %v1953_v40, %v1949_v12 }
 0xaed   :  { %v1891_v63 = vpop.permute.xlu1 %1890  ;;  %v1969_v19 = vsel %vm509_vm7, %v1954_v61, %v1968_v17 }
 0xaee   :  { %v1962_v38 = vrot.slane %v1891_v63, %v9033_v41 }
 0xaf0   :  { %v1963_v60 = vsel %vm750_vm9, %v1962_v38, %v1958_v0 }
 0xaf1   :  { %v1970_v4 = vsel %vm511_vm8, %v1963_v60, %v1969_v19 }
 0xaf2   :  { %v1972_v53 = vsel %vm823_vm10, %v1970_v4, 0.0 }
 0xaf3   :  { %1973 = vadd.xlane.f32.xlu0 %v1972_v53 }
 0xb80   :  { %v1974_v26 = vpop.xlane.xlu0 %1973 }
 0xb81   :  { %8380 = vrcp.f32 %v1974_v26 }
 0xb8b   :  { %v8381_v13 = vpop.eup %8380 }
 0xb8c   :  { %v1996_v33 = vrot.slane %v8381_v13, %v9138_v28  ;;  %v1980_v55 = vrot.slane %v8381_v13, %v8966_v48  ;;  %v2008_v40 = vrot.slane %v8381_v13, %v11845_v18  ;;  %v1984_v8 = vrot.slane %v8381_v13, %v9092_v34 }
 0xb8e   :  { %v2025_v21 = vmul.f32 %v9516_v59, %v1996_v33  ;;  %v2017_v62 = vmul.f32 %v9499_v14, %v1980_v55  ;;  %v2032_v2 = vmul.f32 %v8379_v29, %v2008_v40  ;;  %v2018_v12 = vmul.f32 %v9491_v23, %v1980_v55 }
 0xb8f   :  { %v2019_v10 = vmul.f32 %v9507_v25, %v1984_v8  ;;  %v2020_v15 = vmul.f32 %v9514_v1, %v1984_v8  ;;  %v1988_v59 = vrot.slane %v8381_v13, %v9114_v6  ;;  %v1992_v29 = vrot.slane %v8381_v13, %v9126_v22 }
 0xb90   :  { %2075 = vperm.xlu0 %8227, %v2025_v21   ;;  %2035 = vperm.xlu1 %8226, %v2017_v62   ;;  %v2026_v25 = vmul.f32 %v9534_v24, %v1996_v33  ;;  %v2000_v1 = vrot.slane %v8381_v13, %v9095_v52 }
 0xb91   :  { %v2021_v14 = vmul.f32 %v9501_v36, %v1988_v59  ;;  %v2022_v35 = vmul.f32 %v9521_v9, %v1988_v59  ;;  %v2023_v23 = vmul.f32 %v9509_v3, %v1992_v29  ;;  %v2024_v31 = vmul.f32 %v9528_v54, %v1992_v29 }
 0xb92   :  { %v2027_v63 = vmul.f32 %v9523_v51, %v2000_v1  ;;  %v2028_v36 = vmul.f32 %v9540_v32, %v2000_v1  ;;  %v2004_v9 = vrot.slane %v8381_v13, %v11844_v5  ;;  %v2031_v54 = vmul.f32 %v9536_v58, %v2008_v40 }
 0xb94   :  { %2110 = vperm.xlu0 %8227, %v2032_v2   ;;  %2040 = vperm.xlu1 %8226, %v2018_v12   ;;  %v2029_v61 = vmul.f32 %v9530_v27, %v2004_v9  ;;  %v2030_v3 = vmul.f32 %v9543_v56, %v2004_v9 }
 0xb98   :  { %2045 = vperm.xlu1 %8226, %v2019_v10  }
 0xb9c   :  { %2050 = vperm.xlu1 %8226, %v2020_v15  }
 0xba0   :  { %2055 = vperm.xlu1 %8226, %v2021_v14  }
 0xba4   :  { %2060 = vperm.xlu1 %8226, %v2022_v35  }
 0xba8   :  { %2065 = vperm.xlu1 %8226, %v2023_v23  }
 0xbac   :  { %2070 = vperm.xlu1 %8226, %v2024_v31  }
 0xbb0   :  { %2080 = vperm.xlu1 %8226, %v2026_v25  }
 0xbb4   :  { %2085 = vperm.xlu1 %8226, %v2027_v63  }
 0xbb8   :  { %2090 = vperm.xlu1 %8226, %v2028_v36  }
 0xbbc   :  { %2095 = vperm.xlu1 %8226, %v2029_v61  }
 0xbc0   :  { %2100 = vperm.xlu1 %8226, %v2030_v3  }
 0xbc4   :  { %2105 = vperm.xlu1 %8226, %v2031_v54  }
 0xbc8   :  { %2250 = vrot.lane.b32.xlu1 %v9356_v43, %s8689_s18 }
 0xc0f   :  { %v2036_v24 = vpop.permute.xlu1 %2035  ;;  %v2076_v58 = vpop.permute.xlu0 %2075 }
 0xc10   :  { %v2113_v4 = vmul.f32 %v8847_v45, %v2036_v24  ;;  %v2121_v62 = vmul.f32 %v8899_v39, %v2076_v58 }
 0xc12   :  { %v2129_v12 = vsel %vm116_vm0, %v2113_v4, 0.0  ;;  %v2165_v31 = vsel %vm116_vm0, %v2121_v62, 0.0 }
 0xc13   :  { %v2041_v51 = vpop.permute.xlu1 %2040 }
 0xc14   :  { %v2114_v27 = vmul.f32 %v8851_v47, %v2041_v51 }
 0xc16   :  { %v2130_v55 = vsel %vm116_vm0, %v2114_v27, 0.0 }
 0xc17   :  { %v2046_v0 = vpop.permute.xlu1 %2045  ;;  %v2131_v59 = vadd.f32 %v2130_v55, %v2129_v12 }
 0xc18   :  { %v2115_v19 = vmul.f32 %v8845_v44, %v2046_v0 }
 0xc19   :  { %v2132_v9 = vrot.slane %v2131_v59, 4 }
 0xc1a   :  { %v2138_v40 = vsel %vm116_vm0, %v2115_v19, 0.0 }
 0xc1b   :  { %v2051_v38 = vpop.permute.xlu1 %2050 }
 0xc1c   :  { %v2116_v60 = vmul.f32 %v8849_v46, %v2051_v38  ;;  %v2133_v38 = vadd.f32 %v2132_v9, %v2131_v59 }
 0xc1e   :  { %v2139_v26 = vsel %vm116_vm0, %v2116_v60, 0.0 }
 0xc1f   :  { %v2056_v32 = vpop.permute.xlu1 %2055  ;;  %v2140_v8 = vadd.f32 %v2139_v26, %v2138_v40 }
 0xc20   :  { %v2117_v43 = vmul.f32 %v8883_v11, %v2056_v32 }
 0xc21   :  { %v2141_v1 = vrot.slane %v2140_v8, 4 }
 0xc22   :  { %v2147_v10 = vsel %vm116_vm0, %v2117_v43, 0.0  ;;  %v2134_v43 = vrot.slane %v2133_v38, 2 }
 0xc23   :  { %v2061_v30 = vpop.permute.xlu1 %2060  ;;  %v2142_v51 = vadd.f32 %v2141_v1, %v2140_v8 }
 0xc24   :  { %v2118_v56 = vmul.f32 %v8887_v20, %v2061_v30  ;;  %v2135_v12 = vadd.f32 %v2134_v43, %v2133_v38 }
 0xc25   :  { %v2143_v19 = vrot.slane %v2142_v51, 2 }
 0xc26   :  { %v2148_v21 = vsel %vm116_vm0, %v2118_v56, 0.0 }
 0xc27   :  { %v2066_v17 = vpop.permute.xlu1 %2065  ;;  %v2149_v14 = vadd.f32 %v2148_v21, %v2147_v10  ;;  %v2111_v21 = vpop.permute.xlu0 %2110  ;;  %v2144_v62 = vadd.f32 %v2143_v19, %v2142_v51  ;;  %v11846_v10 = vld [vmem:[#allocation9_spill] sm:$0xff] }
 0xc28   :  { %v2119_v13 = vmul.f32 %v8879_v7, %v2066_v17 }
 0xc29   :  { %v2150_v61 = vrot.slane %v2149_v14, 4  ;;  %v2145_v1 = vrot.slane %v2144_v62, 1 }
 0xc2a   :  { %v2156_v35 = vsel %vm116_vm0, %v2119_v13, 0.0 }
 0xc2b   :  { %v2071_v53 = vpop.permute.xlu1 %2070  ;;  %v2151_v32 = vadd.f32 %v2150_v61, %v2149_v14  ;;  %v2136_v61 = vrot.slane %v2135_v12, 1 }
 0xc2c   :  { %v2120_v33 = vmul.f32 %v8885_v16, %v2071_v53 }
 0xc2d   :  { %v2152_v53 = vrot.slane %v2151_v32, 2  ;;  %v2137_v19 = vadd.f32 %v2136_v61, %v2135_v12 }
 0xc2e   :  { %v2157_v2 = vsel %vm116_vm0, %v2120_v33, 0.0 }
 0xc2f   :  { %v2081_v15 = vpop.permute.xlu1 %2080  ;;  %v2158_v23 = vadd.f32 %v2157_v2, %v2156_v35  ;;  %v2153_v8 = vadd.f32 %v2152_v53, %v2151_v32  ;;  %v11847_v35 = vld [vmem:[#allocation8_spill] sm:$0xff] }
 0xc30   :  { %v2122_v29 = vmul.f32 %v8903_v50, %v2081_v15 }
 0xc31   :  { %v2159_v3 = vrot.slane %v2158_v23, 4 }
 0xc32   :  { %v2166_v25 = vsel %vm116_vm0, %v2122_v29, 0.0  ;;  %v2128_v29 = vmul.f32 %v11847_v35, %v2111_v21 }
 0xc33   :  { %v2167_v63 = vadd.f32 %v2166_v25, %v2165_v31  ;;  %v2086_v36 = vpop.permute.xlu1 %2085  ;;  %v2160_v17 = vadd.f32 %v2159_v3, %v2158_v23  ;;  %v2154_v3 = vrot.slane %v2153_v8, 1 }
 0xc34   :  { %v2123_v24 = vmul.f32 %v8897_v37, %v2086_v36  ;;  %v2193_v38 = vsel %vm116_vm0, %v2128_v29, 0.0 }
 0xc35   :  { %v2168_v54 = vrot.slane %v2167_v63, 4  ;;  %v2161_v26 = vrot.slane %v2160_v17, 2 }
 0xc36   :  { %v2174_v27 = vsel %vm116_vm0, %v2123_v24, 0.0 }
 0xc37   :  { %v2091_v0 = vpop.permute.xlu1 %2090  ;;  %v2169_v60 = vadd.f32 %v2168_v54, %v2167_v63  ;;  %v2162_v59 = vadd.f32 %v2161_v26, %v2160_v17  ;;  %v11848_v54 = vld [vmem:[#allocation7_spill] sm:$0xff]  ;;  %v2146_v17 = vadd.f32 %v2145_v1, %v2144_v62 }
 0xc38   :  { %v2124_v30 = vmul.f32 %v8901_v42, %v2091_v0 }
 0xc39   :  { %v2170_v33 = vrot.slane %v2169_v60, 2  ;;  %v2163_v51 = vrot.slane %v2162_v59, 1  ;;  %v2209_v62 = vsel %vm499_vm2, %v2146_v17, %v2137_v19 }
 0xc3a   :  { %v2175_v56 = vsel %vm116_vm0, %v2124_v30, 0.0 }
 0xc3b   :  { %v2176_v58 = vadd.f32 %v2175_v56, %v2174_v27  ;;  %v2096_v4 = vpop.permute.xlu1 %2095  ;;  %v2171_v23 = vadd.f32 %v2170_v33, %v2169_v60 }
 0xc3c   :  { %v2125_v55 = vmul.f32 %v8864_v57, %v2096_v4  ;;  %v2164_v4 = vadd.f32 %v2163_v51, %v2162_v59 }
 0xc3d   :  { %v2177_v13 = vrot.slane %v2176_v58, 4  ;;  %v2172_v32 = vrot.slane %v2171_v23, 1 }
 0xc3e   :  { %v2183_v31 = vsel %vm116_vm0, %v2125_v55, 0.0 }
 0xc3f   :  { %v2178_v40 = vadd.f32 %v2177_v13, %v2176_v58  ;;  %v2101_v2 = vpop.permute.xlu1 %2100  ;;  %v2155_v58 = vadd.f32 %v2154_v3, %v2153_v8  ;;  %v2173_v26 = vadd.f32 %v2172_v32, %v2171_v23  ;;  %v2219_v13 = vpack.c.bf16 %v2146_v17, %v2146_v17 }
 0xc40   :  { %v2126_v15 = vmul.f32 %v11846_v10, %v2101_v2 }
 0xc41   :  { %v2179_v14 = vrot.slane %v2178_v40, 2  ;;  %v2220_v2 = vpack.c.bf16 %v2155_v58, %v2155_v58 }
 0xc42   :  { %v2184_v25 = vsel %vm116_vm0, %v2126_v15, 0.0  ;;  %v2221_v15 = vpack.c.bf16 %v2164_v4, %v2164_v4 }
 0xc43   :  { %v2180_v63 = vadd.f32 %v2179_v14, %v2178_v40  ;;  %v2185_v36 = vadd.f32 %v2184_v25, %v2183_v31  ;;  %v2106_v9 = vpop.permute.xlu1 %2105  ;;  %v2218_v40 = vpack.c.bf16 %v2137_v19, %v2137_v19  ;;  %v2222_v31 = vpack.c.bf16 %v2173_v26, %v2173_v26 }
 0xc44   :  { %v2127_v24 = vmul.f32 %v11848_v54, %v2106_v9  ;;  %v2235_v25 = vunpack.c.l.b16 %v2219_v13  ;;  %v2236_v23 = vunpack.c.l.b16 %v2220_v2  ;;  %v2237_v9 = vunpack.c.l.b16 %v2221_v15  ;;  %v11851_v15 = vld [vmem:[#allocation23_spill] sm:$0xff] }
 0xc45   :  { %v2186_v0 = vrot.slane %v2185_v36, 4  ;;  %v2181_v60 = vrot.slane %v2180_v63, 1  ;;  %v2234_v59 = vunpack.c.l.b16 %v2218_v40  ;;  %v2238_v51 = vunpack.c.l.b16 %v2222_v31  ;;  %v11849_v40 = vld [vmem:[#allocation22_spill] sm:$0xff] }
 0xc46   :  { %v2192_v30 = vsel %vm116_vm0, %v2127_v24, 0.0  ;;  %v11850_v2 = vmov 0.0  }
 0xc47   :  { %v2187_v27 = vadd.f32 %v2186_v0, %v2185_v36  ;;  %v2194_v56 = vadd.f32 %v2193_v38, %v2192_v30  ;;  %v2182_v33 = vadd.f32 %v2181_v60, %v2180_v63  ;;  %v2210_v36 = vsel %vm501_vm3, %v2155_v58, %v2209_v62 }
 0xc48   :  { %v2211_v63 = vsel %vm503_vm4, %v2164_v4, %v2210_v36  ;;  %v2242_v0 = vsel %vm499_vm2, %v2235_v25, %v2234_v59 }
 0xc49   :  { %v2188_v43 = vrot.slane %v2187_v27, 2  ;;  %v2195_v53 = vrot.slane %v2194_v56, 4  ;;  %v2223_v1 = vpack.c.bf16 %v2182_v33, %v2182_v33  ;;  %v2212_v24 = vsel %vm505_vm5, %v2173_v26, %v2211_v63 }
 0xc4a   :  { %v2213_v38 = vsel %vm507_vm6, %v2182_v33, %v2212_v24 }
 0xc4b   :  { %v2189_v55 = vadd.f32 %v2188_v43, %v2187_v27  ;;  %v2196_v21 = vadd.f32 %v2195_v53, %v2194_v56  ;;  %v2239_v32 = vunpack.c.l.b16 %v2223_v1  ;;  %v2243_v27 = vsel %vm501_vm3, %v2236_v23, %v2242_v0 }
 0xc4c   :  { %v2244_v58 = vsel %vm503_vm4, %v2237_v9, %v2243_v27  ;;  %v9687_v27 = vld [vmem:[%s11732_s5 + $0x8] sm:$0xff]  }
 0xc4d   :  { %v2190_v14 = vrot.slane %v2189_v55, 1  ;;  %v2197_v29 = vrot.slane %v2196_v21, 2  ;;  %v2245_v4 = vsel %vm505_vm5, %v2238_v51, %v2244_v58  ;;  %11857 = vst [vmem:[#allocation23_spill] sm:$0xff] %v9687_v27 }
 0xc4e   :  { %v2246_v53 = vsel %vm507_vm6, %v2239_v32, %v2245_v4 }
 0xc4f   :  { %v2191_v12 = vadd.f32 %v2190_v14, %v2189_v55  ;;  %v2198_v8 = vadd.f32 %v2197_v29, %v2196_v21  ;;  %v2251_v55 = vpop.permute.xlu1 %2250  ;;  %v11852_v29 = vld [vmem:[#allocation14_spill] sm:$0xff] }
 0xc51   :  { %v2224_v61 = vpack.c.bf16 %v2191_v12, %v2191_v12  ;;  %v2199_v3 = vrot.slane %v2198_v8, 1  ;;  %v2214_v17 = vsel %vm509_vm7, %v2191_v12, %v2213_v38 }
 0xc53   :  { %v2200_v30 = vadd.f32 %v2199_v3, %v2198_v8  ;;  %v2240_v60 = vunpack.c.l.b16 %v2224_v61  ;;  %v11853_v61 = vld [vmem:[#allocation12_spill] sm:$0xff] }
 0xc55   :  { %v2215_v56 = vsel %vm511_vm8, %v2200_v30, %v2214_v17  ;;  %v2225_v19 = vpack.c.bf16 %v2200_v30, %v2200_v30  ;;  %v2247_v26 = vsel %vm509_vm7, %v2240_v60, %v2246_v53  ;;  %v9678_v60 = vld [vmem:[%s11732_s5] sm:$0xff]  }
 0xc56   :  { %2217 = vst.msk [vmem:[#allocation3 + $0x8] sm:$0xff] %vm116_vm0, %v2215_v56  ;;  %11856 = vst [vmem:[#allocation22_spill] sm:$0xff] %v9678_v60  ;;  %v9694_v56 = vld [vmem:[%s11732_s5 + $0x10] sm:$0xff]  }
 0xc57   :  { %v2241_v43 = vunpack.c.l.b16 %v2225_v19  ;;  %11858 = vst [vmem:[#allocation14_spill] sm:$0xff] %v9694_v56  ;;  %v9701_v19 = vld [vmem:[%s11732_s5 + $0x18] sm:$0xff]  }
 0xc58   :  { %11859 = vst [vmem:[#allocation12_spill] sm:$0xff] %v9701_v19 }
 0xc59   :  { %v2248_v13 = vsel %vm511_vm8, %v2241_v43, %v2247_v26  ;;  %v11860_v43 = vld [vmem:[#allocation19_spill] sm:$0xff] }
 0xc5a   :  { %v2249_v33 = vpack.c.b16 %v2248_v13, %v2248_v13 }
 0xc5c   :  { %v2254_v21 = vsel %vm116_vm0, %v2249_v33, %v2251_v55 }
 0xc5d   :  { %8074 = vmatmul.mubr.msk.bf16.vlgmr.msra.gmra.mrb[20].mxu1 %vm1367_vm11, %v2254_v21 }
 0xc5e   :  { %8098 = vmatpush3.bf16.msra.mxu1 %v11849_v40  ;;  %8101 = vmatprep.mubr.msk.bf16.mxu1 %vm8685_vm1, %v11850_v2 }
 0xc5f   :  { %8099 = vmatprep.subr.bf16.mxu1 %v11850_v2 }
 0xc62   :  { %8100 = vmatpush3.bf16.msra.mxu1 %v11851_v15 }
 0xc63   :  { %8105 = vmatprep.subr.bf16.mxu1 %v11850_v2 }
 0xd30   :  { %v2291_v14 = vpop.f32.mrb[20].mxu1 }
 0xd31   :  { %v2292_v62 = vadd.f32 %v2291_v14, %v11852_v29  ;;  %v8075_v31 = vpop.f32.mrb[21].mxu1 }
 0xd32   :  { %v2294_v25 = vpop.f32.mrb[22].mxu1 }
 0xd33   :  { %8382 = vtanh.f32 %v2292_v62  ;;  %v8076_v1 = vpop.f32.mrb[23].mxu1  ;;  %v7889_v8 = vmul.f32 -1.442695, %v2292_v62 }
 0xd35   :  { %8384 = vpow2.f32 %v7889_v8 }
 0xd3d   :  { %v8383_v12 = vpop.eup %8382 }
 0xd3e   :  { %2306 = vrot.lane.b32.xlu0 %v8383_v12, %s8689_s18 }
 0xd3f   :  { %v8385_v59 = vpop.eup %8384 }
 0xd40   :  { %v2300_v36 = vadd.f32 1.0, %v8385_v59 }
 0xd42   :  { %8386 = vrcp.f32 %v2300_v36 }
 0xd4c   :  { %v8387_v23 = vpop.eup %8386 }
 0xd4d   :  { %v2304_v3 = vmul.f32 %v8387_v23, %v11853_v61 }
 0xdb0   :  { %v2307_v63 = vpop.permute.xlu0 %2306 }
 0xdb1   :  { %v2309_v9 = vmul.f32 %v8387_v23, %v2307_v63 }
 0xdb3   :  { %2311 = vrot.lane.b32.xlu1 %v2309_v9, %s8688_s6 }
 0xe25   :  { %v2312_v24 = vpop.permute.xlu1 %2311 }
 0xe26   :  { %v9662_v51 = vadd.f32 %v2312_v24, %v2304_v3 }
 0xe28   :  { %11854 = vst [vmem:[#allocation20_spill] sm:$0xff] %v9662_v51  ;;  %8388 = vtanh.f32 %v9662_v51 }
 0xe32   :  { %v8389_v0 = vpop.eup %8388 }
 0xe33   :  { %2317 = vrot.lane.b32.xlu0 %v8389_v0, %s8689_s18 }
 0xea5   :  { %v2318_v38 = vpop.permute.xlu0 %2317 }
 0xea6   :  { %v9666_v32 = vmul.f32 %v8387_v23, %v2318_v38 }
 0xea8   :  { %11855 = vst [vmem:[#allocation21_spill] sm:$0xff] %v9666_v32  ;;  %v9670_v30 = vpack.c.bf16 %v9666_v32, %v9666_v32 }
 0xeaa   :  { %2328 = vrot.lane.b32.xlu1 %v9670_v30, %s8688_s6 }
 0xf1c   :  { %v2329_v17 = vpop.permute.xlu1 %2328 }
 0xf1d   :  { %8082 = vmatmul.mubr.msk.bf16.vlgmr.msra.gmra.mrb[16].mxu0 %vm116_vm0, %v2329_v17 }
 0xf1e   :  { %8086 = vmatpush3.bf16.msra.mxu0 %v9678_v60  ;;  %8093 = vmatprep.mubr.msk.bf16.mxu0 %vm8685_vm1, %v11850_v2 }
 0xf1f   :  { %8087 = vmatprep.subr.bf16.mxu0 %v11850_v2 }
 0xf22   :  { %8088 = vmatpush3.bf16.msra.mxu0 %v9687_v27 }
 0xf23   :  { %8089 = vmatprep.subr.bf16.mxu0 %v11850_v2 }
 0xf26   :  { %8090 = vmatpush3.bf16.msra.mxu0 %v9694_v56 }
 0xf27   :  { %8091 = vmatprep.subr.bf16.mxu0 %v11850_v2 }
 0xf2a   :  { %8092 = vmatpush3.bf16.msra.mxu0 %v9701_v19 }
 0xf2b   :  { %8117 = vmatprep.subr.bf16.mxu0 %v11850_v2 }
 0xff0   :  { %v2367_v58 = vpop.f32.mrb[16].mxu0 }
 0xff1   :  { %v2374_v4 = vcombine.high %v2367_v58, %v2367_v58  ;;  %v2381_v53 = vrot.slane %v2367_v58, %v11860_v43  ;;  %v8083_v26 = vpop.f32.mrb[17].mxu0 }
 0xff2   :  { %v2370_v13 = vpop.f32.mrb[18].mxu0 }
 0xff3   :  { %v2388_v33 = vrot.slane %v2374_v4, %v11860_v43  ;;  %v2389_v55 = vcombine.high %v2381_v53, %v2381_v53  ;;  %v2397_v21 = vrot.slane %v2381_v53, %v11860_v43  ;;  %v8084_v40 = vpop.f32.mrb[19].mxu0 }
 0xff5   :  { %v2404_v15 = vrot.slane %v2388_v33, %v11860_v43  ;;  %v2411_v14 = vrot.slane %v2389_v55, %v11860_v43  ;;  %v2419_v29 = vcombine.high %v2397_v21, %v2397_v21  ;;  %v2426_v62 = vrot.slane %v2397_v21, %v8966_v48 }
 0xff6   :  { %v2390_v8 = vcombine.high %v2388_v33, %v2388_v33 }
 0xff7   :  { %v2434_v31 = vrot.slane %v2419_v29, %v8966_v48  ;;  %v2430_v25 = vrot.slane %v2411_v14, %v8966_v48  ;;  %v2464_v1 = vmul.f32 %v8851_v47, %v2426_v62  ;;  %v2463_v12 = vmul.f32 %v8847_v45, %v2426_v62 }
 0xff8   :  { %v2442_v59 = vrot.slane %v2404_v15, %v8966_v48  ;;  %v2421_v36 = vcombine.high %v2411_v14, %v2411_v14  ;;  %v2418_v24 = vrot.slane %v2390_v8, %v11860_v43  ;;  %v2420_v53 = vcombine.high %v2404_v15, %v2404_v15 }
 0xff9   :  { %v2482_v23 = vsel %vm116_vm0, %v2464_v1, 0.0  ;;  %v2479_v63 = vsel %vm116_vm0, %v2463_v12, 0.0  ;;  %v2468_v9 = vmul.f32 %v8887_v20, %v2434_v31  ;;  %v2465_v61 = vmul.f32 %v8845_v44, %v2430_v25 }
 0xffa   :  { %2483 = vadd.xlane.f32.xlu1 %v2482_v23  ;;  %2480 = vadd.xlane.f32.xlu0 %v2479_v63  ;;  %v2466_v3 = vmul.f32 %v8849_v46, %v2430_v25  ;;  %v2472_v17 = vmul.f32 %v8903_v50, %v2442_v59  ;;  %v2438_v58 = vrot.slane %v2421_v36, %v8966_v48 }
 0xffb   :  { %v2494_v0 = vsel %vm116_vm0, %v2468_v9, 0.0  ;;  %v2485_v38 = vsel %vm116_vm0, %v2465_v61, 0.0  ;;  %v2467_v4 = vmul.f32 %v8883_v11, %v2434_v31  ;;  %v2446_v55 = vrot.slane %v2418_v24, %v8966_v48 }
 0xffc   :  { %v2488_v26 = vsel %vm116_vm0, %v2466_v3, 0.0  ;;  %v2506_v13 = vsel %vm116_vm0, %v2472_v17, 0.0  ;;  %v2470_v33 = vmul.f32 %v8885_v16, %v2438_v58  ;;  %v2471_v40 = vmul.f32 %v8899_v39, %v2442_v59 }
 0xffd   :  { %v2491_v21 = vsel %vm116_vm0, %v2467_v4, 0.0  ;;  %v2474_v29 = vmul.f32 %v8901_v42, %v2446_v55  ;;  %v2450_v15 = vrot.slane %v2420_v53, %v8966_v48  ;;  %v2422_v62 = vcombine.high %v2418_v24, %v2418_v24 }
 0xffe   :  { %2495 = vadd.xlane.f32.xlu1 %v2494_v0  ;;  %2486 = vadd.xlane.f32.xlu0 %v2485_v38  ;;  %v2500_v14 = vsel %vm116_vm0, %v2470_v33, 0.0  ;;  %v2469_v31 = vmul.f32 %v8879_v7, %v2438_v58  ;;  %v2503_v25 = vsel %vm116_vm0, %v2471_v40, 0.0  ;;  %v2473_v23 = vmul.f32 %v8897_v37, %v2446_v55 }
 0xfff   :  { %v2512_v1 = vsel %vm116_vm0, %v2474_v29, 0.0  ;;  %v2476_v12 = vmul.f32 %v11846_v10, %v2450_v15  ;;  %v2454_v8 = vrot.slane %v2422_v62, %v8966_v48  ;;  %v2475_v3 = vmul.f32 %v8864_v57, %v2450_v15 }
0x1000   :  { %v2497_v59 = vsel %vm116_vm0, %v2469_v31, 0.0  ;;  %v2509_v9 = vsel %vm116_vm0, %v2473_v23, 0.0 }
0x1001   :  { %v2518_v36 = vsel %vm116_vm0, %v2476_v12, 0.0  ;;  %v2478_v63 = vmul.f32 %v11847_v35, %v2454_v8  ;;  %v2515_v24 = vsel %vm116_vm0, %v2475_v3, 0.0  ;;  %v2477_v0 = vmul.f32 %v11848_v54, %v2454_v8 }
0x1002   :  { %2489 = vadd.xlane.f32.xlu0 %v2488_v26  ;;  %2507 = vadd.xlane.f32.xlu1 %v2506_v13 }
0x1003   :  { %v2524_v61 = vsel %vm116_vm0, %v2478_v63, 0.0  ;;  %v2521_v38 = vsel %vm116_vm0, %v2477_v0, 0.0 }
0x1006   :  { %2492 = vadd.xlane.f32.xlu0 %v2491_v21  ;;  %2501 = vadd.xlane.f32.xlu1 %v2500_v14 }
0x100a   :  { %2504 = vadd.xlane.f32.xlu0 %v2503_v25  ;;  %2513 = vadd.xlane.f32.xlu1 %v2512_v1 }
0x100e   :  { %2498 = vadd.xlane.f32.xlu0 %v2497_v59  ;;  %2519 = vadd.xlane.f32.xlu1 %v2518_v36 }
0x1012   :  { %2510 = vadd.xlane.f32.xlu0 %v2509_v9  ;;  %2525 = vadd.xlane.f32.xlu1 %v2524_v61 }
0x1016   :  { %2516 = vadd.xlane.f32.xlu0 %v2515_v24 }
0x101a   :  { %2522 = vadd.xlane.f32.xlu0 %v2521_v38 }
0x1087   :  { %v2484_v17 = vpop.xlane.xlu1 %2483  ;;  %v2481_v58 = vpop.xlane.xlu0 %2480 }
0x1088   :  { %v2550_v62 = vrot.slane %v2484_v17, %v9033_v41  ;;  %v2546_v31 = vrot.slane %v2481_v58, %v9038_v49 }
0x108a   :  { %v2551_v9 = vsel %vm750_vm9, %v2550_v62, %v2546_v31 }
0x108b   :  { %v9751_v4 = vpop.xlane.xlu1 %2495  ;;  %v2487_v53 = vpop.xlane.xlu0 %2486 }
0x108c   :  { %v2555_v25 = vrot.slane %v2487_v53, %v9038_v49  ;;  %v2568_v12 = vrot.slane %v9751_v4, %v9033_v41 }
0x108f   :  { %v9753_v26 = vpop.xlane.xlu0 %2489  ;;  %v9755_v13 = vpop.xlane.xlu1 %2507 }
0x1090   :  { %v2559_v29 = vrot.slane %v9753_v26, %v9033_v41  ;;  %v2586_v62 = vrot.slane %v9755_v13, %v9033_v41 }
0x1092   :  { %v2560_v36 = vsel %vm750_vm9, %v2559_v29, %v2555_v25 }
0x1093   :  { %v9757_v33 = vpop.xlane.xlu0 %2492  ;;  %v9759_v55 = vpop.xlane.xlu1 %2501  ;;  %v2615_v24 = vsel %vm499_vm2, %v2560_v36, %v2551_v9 }
0x1094   :  { %v2564_v15 = vrot.slane %v9757_v33, %v9038_v49  ;;  %v2577_v23 = vrot.slane %v9759_v55, %v9033_v41 }
0x1096   :  { %v2569_v63 = vsel %vm750_vm9, %v2568_v12, %v2564_v15 }
0x1097   :  { %v9761_v21 = vpop.xlane.xlu0 %2504  ;;  %v9763_v40 = vpop.xlane.xlu1 %2513  ;;  %v2616_v29 = vsel %vm501_vm3, %v2569_v63, %v2615_v24 }
0x1098   :  { %v2582_v0 = vrot.slane %v9761_v21, %v9038_v49  ;;  %v2595_v25 = vrot.slane %v9763_v40, %v9033_v41 }
0x109b   :  { %v9765_v14 = vpop.xlane.xlu0 %2498  ;;  %v9778_v8 = vpop.xlane.xlu1 %2519 }
0x109c   :  { %v2573_v1 = vrot.slane %v9765_v14, %v9038_v49 }
0x109e   :  { %v2578_v61 = vsel %vm750_vm9, %v2577_v23, %v2573_v1  ;;  %v2604_v1 = vrot.slane %v9778_v8, %v9033_v41  ;;  %v2587_v23 = vsel %vm750_vm9, %v2586_v62, %v2582_v0 }
0x109f   :  { %v9780_v59 = vpop.xlane.xlu0 %2510  ;;  %v2617_v31 = vsel %vm503_vm4, %v2578_v61, %v2616_v29  ;;  %v9805_v12 = vpop.xlane.xlu1 %2525 }
0x10a0   :  { %v2591_v3 = vrot.slane %v9780_v59, %v9038_v49  ;;  %v2613_v24 = vrot.slane %v9805_v12, %v9033_v41  ;;  %v2618_v61 = vsel %vm505_vm5, %v2587_v23, %v2617_v31 }
0x10a2   :  { %v2596_v36 = vsel %vm750_vm9, %v2595_v25, %v2591_v3 }
0x10a3   :  { %v9793_v38 = vpop.xlane.xlu0 %2516  ;;  %v2619_v29 = vsel %vm507_vm6, %v2596_v36, %v2618_v61 }
0x10a4   :  { %v2600_v15 = vrot.slane %v9793_v38, %v9038_v49 }
0x10a6   :  { %v2605_v9 = vsel %vm750_vm9, %v2604_v1, %v2600_v15 }
0x10a7   :  { %v9809_v63 = vpop.xlane.xlu0 %2522  ;;  %v2620_v3 = vsel %vm509_vm7, %v2605_v9, %v2619_v29 }
0x10a8   :  { %v2609_v32 = vrot.slane %v9809_v63, %v9038_v49 }
0x10aa   :  { %v2614_v43 = vsel %vm750_vm9, %v2613_v24, %v2609_v32 }
0x10ab   :  { %v2621_v0 = vsel %vm511_vm8, %v2614_v43, %v2620_v3 }
0x10ac   :  { %v2623_v25 = vsel %vm823_vm10, %v2621_v0, -inf }
0x10ad   :  { %2624 = vmax.xlane.f32.xlu0 %v2623_v25 }
0x113a   :  { %v2625_v15 = vpop.xlane.xlu0 %2624 }
0x113b   :  { %v2630_v62 = vrot.slane %v2625_v15, %v8966_v48  ;;  %v2634_v1 = vrot.slane %v2625_v15, %v9092_v34  ;;  %v2638_v19 = vrot.slane %v2625_v15, %v9114_v6  ;;  %v2642_v36 = vrot.slane %v2625_v15, %v9126_v22 }
0x113c   :  { %v2646_v29 = vrot.slane %v2625_v15, %v9138_v28 }
0x113d   :  { %v2667_v56 = vsub.f32 %v2481_v58, %v2630_v62  ;;  %v2668_v31 = vsub.f32 %v2484_v17, %v2630_v62  ;;  %v2669_v23 = vsub.f32 %v2487_v53, %v2634_v1  ;;  %v2672_v32 = vsub.f32 %v9751_v4, %v2638_v19 }
0x113e   :  { %v2670_v43 = vsub.f32 %v9753_v26, %v2634_v1  ;;  %v2674_v3 = vsub.f32 %v9759_v55, %v2642_v36  ;;  %v2671_v58 = vsub.f32 %v9757_v33, %v2638_v19  ;;  %v2650_v53 = vrot.slane %v2625_v15, %v9095_v52 }
0x113f   :  { %v2683_v9 = vmul.f32 1.442695, %v2667_v56  ;;  %v2685_v24 = vmul.f32 1.442695, %v2668_v31  ;;  %v2687_v61 = vmul.f32 1.442695, %v2669_v23  ;;  %v2676_v4 = vsub.f32 %v9755_v13, %v2646_v29 }
0x1140   :  { %v2693_v0 = vmul.f32 1.442695, %v2672_v32  ;;  %v2689_v17 = vmul.f32 1.442695, %v2670_v43  ;;  %v2697_v56 = vmul.f32 1.442695, %v2674_v3  ;;  %v2673_v26 = vsub.f32 %v9765_v14, %v2642_v36 }
0x1141   :  { %8390 = vpow2.f32 %v2683_v9  ;;  %v2691_v25 = vmul.f32 1.442695, %v2671_v58  ;;  %v2654_v62 = vrot.slane %v2625_v15, %v11844_v5  ;;  %v2678_v55 = vsub.f32 %v9763_v40, %v2650_v53 }
0x1142   :  { %8392 = vpow2.f32 %v2685_v24  ;;  %v2701_v1 = vmul.f32 1.442695, %v2676_v4  ;;  %v2675_v13 = vsub.f32 %v9761_v21, %v2646_v29  ;;  %v2695_v33 = vmul.f32 1.442695, %v2673_v26 }
0x1143   :  { %8394 = vpow2.f32 %v2687_v61  ;;  %v2658_v14 = vrot.slane %v2625_v15, %v11845_v18  ;;  %v2680_v23 = vsub.f32 %v9778_v8, %v2654_v62  ;;  %v2705_v40 = vmul.f32 1.442695, %v2678_v55 }
0x1144   :  { %8396 = vpow2.f32 %v2693_v0  ;;  %v2677_v9 = vsub.f32 %v9780_v59, %v2650_v53  ;;  %v2699_v21 = vmul.f32 1.442695, %v2675_v13  ;;  %v2679_v61 = vsub.f32 %v9793_v38, %v2654_v62 }
0x1145   :  { %8398 = vpow2.f32 %v2689_v17  ;;  %v2682_v24 = vsub.f32 %v9805_v12, %v2658_v14  ;;  %v2709_v15 = vmul.f32 1.442695, %v2680_v23  ;;  %v2681_v12 = vsub.f32 %v9809_v63, %v2658_v14 }
0x1146   :  { %8400 = vpow2.f32 %v2697_v56  ;;  %v2703_v29 = vmul.f32 1.442695, %v2677_v9  ;;  %v2707_v58 = vmul.f32 1.442695, %v2679_v61 }
0x1147   :  { %8402 = vpow2.f32 %v2691_v25  ;;  %v2713_v59 = vmul.f32 1.442695, %v2682_v24  ;;  %v2711_v53 = vmul.f32 1.442695, %v2681_v12 }
0x1148   :  { %8404 = vpow2.f32 %v2701_v1 }
0x1149   :  { %8406 = vpow2.f32 %v2695_v33 }
0x114a   :  { %8408 = vpow2.f32 %v2705_v40 }
0x114b   :  { %v9836_v31 = vpop.eup %8390  ;;  %8410 = vpow2.f32 %v2699_v21 }
0x114c   :  { %v9838_v19 = vpop.eup %8392  ;;  %2732 = vperm.xlu1 %8226, %v9836_v31   ;;  %8412 = vpow2.f32 %v2709_v15 }
0x114d   :  { %2735 = vperm.xlu0 %8227, %v9838_v19   ;;  %v9845_v36 = vpop.eup %8394  ;;  %8414 = vpow2.f32 %v2703_v29 }
0x114e   :  { %v9847_v32 = vpop.eup %8396  ;;  %8416 = vpow2.f32 %v2713_v59 }
0x114f   :  { %v9853_v43 = vpop.eup %8398  ;;  %8418 = vpow2.f32 %v2707_v58 }
0x1150   :  { %2738 = vperm.xlu1 %8226, %v9845_v36   ;;  %v9855_v8 = vpop.eup %8400  ;;  %8420 = vpow2.f32 %v2711_v53 }
0x1151   :  { %2747 = vperm.xlu0 %8227, %v9847_v32   ;;  %v9860_v3 = vpop.eup %8402 }
0x1152   :  { %v9862_v0 = vpop.eup %8404 }
0x1153   :  { %v9867_v38 = vpop.eup %8406 }
0x1154   :  { %2741 = vperm.xlu1 %8226, %v9853_v43   ;;  %v9869_v17 = vpop.eup %8408 }
0x1155   :  { %2753 = vperm.xlu0 %8227, %v9855_v8   ;;  %v9873_v4 = vpop.eup %8410 }
0x1156   :  { %v9875_v56 = vpop.eup %8412 }
0x1157   :  { %v9879_v63 = vpop.eup %8414 }
0x1158   :  { %2744 = vperm.xlu1 %8226, %v9860_v3   ;;  %v9881_v26 = vpop.eup %8416 }
0x1159   :  { %2759 = vperm.xlu0 %8227, %v9862_v0   ;;  %v9885_v25 = vpop.eup %8418 }
0x115a   :  { %v9888_v62 = vpop.eup %8420 }
0x115c   :  { %2750 = vperm.xlu1 %8226, %v9867_v38  }
0x115d   :  { %2765 = vperm.xlu0 %8227, %v9869_v17  }
0x1160   :  { %2756 = vperm.xlu1 %8226, %v9873_v4  }
0x1161   :  { %2771 = vperm.xlu0 %8227, %v9875_v56  }
0x1164   :  { %2762 = vperm.xlu1 %8226, %v9879_v63  }
0x1165   :  { %2777 = vperm.xlu0 %8227, %v9881_v26  }
0x1168   :  { %2768 = vperm.xlu1 %8226, %v9885_v25  }
0x116c   :  { %2774 = vperm.xlu1 %8226, %v9888_v62  }
0x11cb   :  { %v2733_v55 = vpop.permute.xlu1 %2732 }
0x11cc   :  { %v2736_v1 = vpop.permute.xlu0 %2735  ;;  %v2782_v53 = vrot.slane %v2733_v55, %v9038_v49 }
0x11cd   :  { %v2786_v58 = vrot.slane %v2736_v1, %v9033_v41 }
0x11cf   :  { %v2739_v13 = vpop.permute.xlu1 %2738  ;;  %v2787_v55 = vsel %vm750_vm9, %v2786_v58, %v2782_v53 }
0x11d0   :  { %v2748_v33 = vpop.permute.xlu0 %2747  ;;  %v2791_v27 = vrot.slane %v2739_v13, %v9038_v49 }
0x11d1   :  { %v2804_v51 = vrot.slane %v2748_v33, %v9033_v41 }
0x11d3   :  { %v2742_v14 = vpop.permute.xlu1 %2741 }
0x11d4   :  { %v2754_v23 = vpop.permute.xlu0 %2753  ;;  %v2795_v61 = vrot.slane %v2742_v14, %v9033_v41 }
0x11d5   :  { %v2813_v54 = vrot.slane %v2754_v23, %v9033_v41 }
0x11d6   :  { %v2796_v14 = vsel %vm750_vm9, %v2795_v61, %v2791_v27 }
0x11d7   :  { %v2745_v40 = vpop.permute.xlu1 %2744 }
0x11d8   :  { %v2760_v9 = vpop.permute.xlu0 %2759  ;;  %v2800_v29 = vrot.slane %v2745_v40, %v9038_v49 }
0x11d9   :  { %v2822_v35 = vrot.slane %v2760_v9, %v9033_v41 }
0x11da   :  { %v2805_v1 = vsel %vm750_vm9, %v2804_v51, %v2800_v29 }
0x11db   :  { %v2751_v21 = vpop.permute.xlu1 %2750 }
0x11dc   :  { %v2766_v24 = vpop.permute.xlu0 %2765  ;;  %v2809_v60 = vrot.slane %v2751_v21, %v9038_v49 }
0x11dd   :  { %v2831_v13 = vrot.slane %v2766_v24, %v9033_v41 }
0x11de   :  { %v2814_v21 = vsel %vm750_vm9, %v2813_v54, %v2809_v60 }
0x11df   :  { %v2757_v15 = vpop.permute.xlu1 %2756 }
0x11e0   :  { %v2772_v59 = vpop.permute.xlu0 %2771  ;;  %v2818_v2 = vrot.slane %v2757_v15, %v9038_v49  ;;  %v2851_v15 = vsel %vm499_vm2, %v2796_v14, %v2787_v55 }
0x11e1   :  { %v2840_v23 = vrot.slane %v2772_v59, %v9033_v41  ;;  %v2852_v9 = vsel %vm501_vm3, %v2805_v1, %v2851_v15 }
0x11e2   :  { %v2823_v27 = vsel %vm750_vm9, %v2822_v35, %v2818_v2  ;;  %v2853_v29 = vsel %vm503_vm4, %v2814_v21, %v2852_v9 }
0x11e3   :  { %v2763_v12 = vpop.permute.xlu1 %2762  ;;  %v2854_v54 = vsel %vm505_vm5, %v2823_v27, %v2853_v29 }
0x11e4   :  { %v2827_v40 = vrot.slane %v2763_v12, %v9038_v49  ;;  %v2778_v61 = vpop.permute.xlu0 %2777 }
0x11e6   :  { %v2832_v51 = vsel %vm750_vm9, %v2831_v13, %v2827_v40 }
0x11e7   :  { %v2769_v10 = vpop.permute.xlu1 %2768  ;;  %v2855_v59 = vsel %vm507_vm6, %v2832_v51, %v2854_v54 }
0x11e8   :  { %v2836_v33 = vrot.slane %v2769_v10, %v9038_v49  ;;  %v2849_v10 = vrot.slane %v2778_v61, %v9033_v41 }
0x11ea   :  { %v2841_v12 = vsel %vm750_vm9, %v2840_v23, %v2836_v33 }
0x11eb   :  { %v2775_v24 = vpop.permute.xlu1 %2774  ;;  %v2856_v2 = vsel %vm509_vm7, %v2841_v12, %v2855_v59 }
0x11ec   :  { %v2845_v60 = vrot.slane %v2775_v24, %v9038_v49 }
0x11ee   :  { %v2850_v35 = vsel %vm750_vm9, %v2849_v10, %v2845_v60 }
0x11ef   :  { %v2857_v58 = vsel %vm511_vm8, %v2850_v35, %v2856_v2 }
0x11f0   :  { %v2859_v53 = vsel %vm823_vm10, %v2857_v58, 0.0 }
0x11f1   :  { %2860 = vadd.xlane.f32.xlu1 %v2859_v53 }
0x127e   :  { %v2861_v14 = vpop.xlane.xlu1 %2860 }
0x127f   :  { %8422 = vrcp.f32 %v2861_v14 }
0x1289   :  { %v8423_v40 = vpop.eup %8422 }
0x128a   :  { %v2883_v1 = vrot.slane %v8423_v40, %v9138_v28  ;;  %v2867_v55 = vrot.slane %v8423_v40, %v8966_v48  ;;  %v2895_v33 = vrot.slane %v8423_v40, %v11845_v18  ;;  %v2871_v27 = vrot.slane %v8423_v40, %v9092_v34 }
0x128c   :  { %v2913_v13 = vmul.f32 %v9862_v0, %v2883_v1  ;;  %v2904_v21 = vmul.f32 %v9836_v31, %v2867_v55  ;;  %v2919_v15 = vmul.f32 %v9881_v26, %v2895_v33  ;;  %v2905_v23 = vmul.f32 %v9838_v19, %v2867_v55 }
0x128d   :  { %v2906_v61 = vmul.f32 %v9845_v36, %v2871_v27  ;;  %v2907_v9 = vmul.f32 %v9853_v43, %v2871_v27  ;;  %v2875_v0 = vrot.slane %v8423_v40, %v9114_v6  ;;  %v2879_v26 = vrot.slane %v8423_v40, %v9126_v22 }
0x128e   :  { %2967 = vperm.xlu1 %8226, %v2913_v13   ;;  %2922 = vperm.xlu0 %8227, %v2904_v21   ;;  %v2912_v36 = vmul.f32 %v9873_v4, %v2883_v1  ;;  %v2887_v43 = vrot.slane %v8423_v40, %v9095_v52 }
0x128f   :  { %v2908_v31 = vmul.f32 %v9860_v3, %v2875_v0  ;;  %v2909_v51 = vmul.f32 %v9847_v32, %v2875_v0  ;;  %v2910_v19 = vmul.f32 %v9867_v38, %v2879_v26  ;;  %v2911_v29 = vmul.f32 %v9855_v8, %v2879_v26 }
0x1290   :  { %v2914_v12 = vmul.f32 %v9879_v63, %v2887_v43  ;;  %v2915_v3 = vmul.f32 %v9869_v17, %v2887_v43  ;;  %v2891_v32 = vrot.slane %v8423_v40, %v11844_v5  ;;  %v2918_v8 = vmul.f32 %v9888_v62, %v2895_v33 }
0x1292   :  { %2997 = vperm.xlu1 %8226, %v2919_v15   ;;  %2927 = vperm.xlu0 %8227, %v2905_v23   ;;  %v2916_v24 = vmul.f32 %v9885_v25, %v2891_v32  ;;  %v2917_v38 = vmul.f32 %v9875_v56, %v2891_v32 }
0x1296   :  { %2932 = vperm.xlu0 %8227, %v2906_v61  }
0x129a   :  { %2937 = vperm.xlu0 %8227, %v2907_v9  }
0x129e   :  { %2942 = vperm.xlu0 %8227, %v2908_v31  }
0x12a2   :  { %2947 = vperm.xlu0 %8227, %v2909_v51  }
0x12a6   :  { %2952 = vperm.xlu0 %8227, %v2910_v19  }
0x12aa   :  { %2957 = vperm.xlu0 %8227, %v2911_v29  }
0x12ae   :  { %2962 = vperm.xlu0 %8227, %v2912_v36  }
0x12b2   :  { %2972 = vperm.xlu0 %8227, %v2914_v12  }
0x12b6   :  { %2977 = vperm.xlu0 %8227, %v2915_v3  }
0x12ba   :  { %2982 = vperm.xlu0 %8227, %v2916_v24  }
0x12be   :  { %2987 = vperm.xlu0 %8227, %v2917_v38  }
0x12c2   :  { %2992 = vperm.xlu0 %8227, %v2918_v8  }
0x12c6   :  { %3137 = vrot.lane.b32.xlu0 %v9670_v30, %s8689_s18 }
0x130d   :  { %v2923_v4 = vpop.permute.xlu0 %2922  ;;  %v2968_v62 = vpop.permute.xlu1 %2967 }
0x130e   :  { %v3000_v58 = vmul.f32 %v8847_v45, %v2923_v4  ;;  %v3009_v21 = vmul.f32 %v8903_v50, %v2968_v62 }
0x1310   :  { %v3016_v23 = vsel %vm116_vm0, %v3000_v58, 0.0  ;;  %v3053_v29 = vsel %vm116_vm0, %v3009_v21, 0.0 }
0x1311   :  { %v2928_v63 = vpop.permute.xlu0 %2927 }
0x1312   :  { %v3001_v25 = vmul.f32 %v8851_v47, %v2928_v63 }
0x1314   :  { %v3017_v55 = vsel %vm116_vm0, %v3001_v25, 0.0 }
0x1315   :  { %v2933_v54 = vpop.permute.xlu0 %2932  ;;  %v3018_v0 = vadd.f32 %v3017_v55, %v3016_v23 }
0x1316   :  { %v3002_v2 = vmul.f32 %v8845_v44, %v2933_v54 }
0x1317   :  { %v3019_v32 = vrot.slane %v3018_v0, 4 }
0x1318   :  { %v3025_v33 = vsel %vm116_vm0, %v3002_v2, 0.0 }
0x1319   :  { %v2938_v10 = vpop.permute.xlu0 %2937 }
0x131a   :  { %v3003_v35 = vmul.f32 %v8849_v46, %v2938_v10  ;;  %v3020_v10 = vadd.f32 %v3019_v32, %v3018_v0 }
0x131c   :  { %v3026_v14 = vsel %vm116_vm0, %v3003_v35, 0.0 }
0x131d   :  { %v2943_v17 = vpop.permute.xlu0 %2942  ;;  %v3027_v27 = vadd.f32 %v3026_v14, %v3025_v33 }
0x131e   :  { %v3004_v30 = vmul.f32 %v8883_v11, %v2943_v17 }
0x131f   :  { %v3028_v43 = vrot.slane %v3027_v27, 4 }
0x1320   :  { %v3034_v61 = vsel %vm116_vm0, %v3004_v30, 0.0  ;;  %v3021_v30 = vrot.slane %v3020_v10, 2 }
0x1321   :  { %v2948_v60 = vpop.permute.xlu0 %2947  ;;  %v3029_v63 = vadd.f32 %v3028_v43, %v3027_v27 }
0x1322   :  { %v3005_v56 = vmul.f32 %v8887_v20, %v2948_v60  ;;  %v3022_v23 = vadd.f32 %v3021_v30, %v3020_v10 }
0x1323   :  { %v3030_v2 = vrot.slane %v3029_v63, 2 }
0x1324   :  { %v3035_v13 = vsel %vm116_vm0, %v3005_v56, 0.0 }
0x1325   :  { %v2953_v59 = vpop.permute.xlu0 %2952  ;;  %v3036_v31 = vadd.f32 %v3035_v13, %v3034_v61  ;;  %v2998_v13 = vpop.permute.xlu1 %2997  ;;  %v3031_v21 = vadd.f32 %v3030_v2, %v3029_v63  ;;  %v11861_v61 = vld [vmem:[#allocation9_spill] sm:$0xff] }
0x1326   :  { %v3006_v40 = vmul.f32 %v8879_v7, %v2953_v59 }
0x1327   :  { %v3037_v24 = vrot.slane %v3036_v31, 4  ;;  %v3032_v43 = vrot.slane %v3031_v21, 1 }
0x1328   :  { %v3043_v51 = vsel %vm116_vm0, %v3006_v40, 0.0 }
0x1329   :  { %v2958_v53 = vpop.permute.xlu0 %2957  ;;  %v3038_v17 = vadd.f32 %v3037_v24, %v3036_v31  ;;  %v3023_v24 = vrot.slane %v3022_v23, 1 }
0x132a   :  { %v3007_v1 = vmul.f32 %v8885_v16, %v2958_v53 }
0x132b   :  { %v3039_v53 = vrot.slane %v3038_v17, 2  ;;  %v3024_v2 = vadd.f32 %v3023_v24, %v3022_v23 }
0x132c   :  { %v3044_v15 = vsel %vm116_vm0, %v3007_v1, 0.0 }
0x132d   :  { %v2963_v9 = vpop.permute.xlu0 %2962  ;;  %v3045_v19 = vadd.f32 %v3044_v15, %v3043_v51  ;;  %v3040_v27 = vadd.f32 %v3039_v53, %v3038_v17  ;;  %v11862_v51 = vld [vmem:[#allocation8_spill] sm:$0xff] }
0x132e   :  { %v3008_v26 = vmul.f32 %v8899_v39, %v2963_v9 }
0x132f   :  { %v3046_v38 = vrot.slane %v3045_v19, 4 }
0x1330   :  { %v3052_v36 = vsel %vm116_vm0, %v3008_v26, 0.0  ;;  %v3015_v26 = vmul.f32 %v11862_v51, %v2998_v13 }
0x1331   :  { %v3054_v12 = vadd.f32 %v3053_v29, %v3052_v36  ;;  %v2973_v3 = vpop.permute.xlu0 %2972  ;;  %v3047_v59 = vadd.f32 %v3046_v38, %v3045_v19  ;;  %v3041_v38 = vrot.slane %v3040_v27, 1 }
0x1332   :  { %v3010_v4 = vmul.f32 %v8897_v37, %v2973_v3  ;;  %v3080_v10 = vsel %vm116_vm0, %v3015_v26, 0.0 }
0x1333   :  { %v3055_v8 = vrot.slane %v3054_v12, 4  ;;  %v3048_v14 = vrot.slane %v3047_v59, 2 }
0x1334   :  { %v3061_v25 = vsel %vm116_vm0, %v3010_v4, 0.0 }
0x1335   :  { %v2978_v54 = vpop.permute.xlu0 %2977  ;;  %v3056_v35 = vadd.f32 %v3055_v8, %v3054_v12  ;;  %v3049_v0 = vadd.f32 %v3048_v14, %v3047_v59  ;;  %v11863_v8 = vld [vmem:[#allocation7_spill] sm:$0xff]  ;;  %v3033_v59 = vadd.f32 %v3032_v43, %v3031_v21 }
0x1336   :  { %v3011_v60 = vmul.f32 %v8901_v42, %v2978_v54 }
0x1337   :  { %v3057_v1 = vrot.slane %v3056_v35, 2  ;;  %v3050_v63 = vrot.slane %v3049_v0, 1  ;;  %v3096_v21 = vsel %vm499_vm2, %v3033_v59, %v3024_v2 }
0x1338   :  { %v3062_v56 = vsel %vm116_vm0, %v3011_v60, 0.0 }
0x1339   :  { %v3063_v62 = vadd.f32 %v3062_v56, %v3061_v25  ;;  %v2983_v58 = vpop.permute.xlu0 %2982  ;;  %v3058_v19 = vadd.f32 %v3057_v1, %v3056_v35 }
0x133a   :  { %v3012_v55 = vmul.f32 %v8864_v57, %v2983_v58  ;;  %v3051_v58 = vadd.f32 %v3050_v63, %v3049_v0 }
0x133b   :  { %v3064_v40 = vrot.slane %v3063_v62, 4  ;;  %v3059_v17 = vrot.slane %v3058_v19, 1 }
0x133c   :  { %v3070_v29 = vsel %vm116_vm0, %v3012_v55, 0.0 }
0x133d   :  { %v3065_v33 = vadd.f32 %v3064_v40, %v3063_v62  ;;  %v2988_v15 = vpop.permute.xlu0 %2987  ;;  %v3042_v62 = vadd.f32 %v3041_v38, %v3040_v27  ;;  %v3060_v14 = vadd.f32 %v3059_v17, %v3058_v19  ;;  %v3106_v40 = vpack.c.bf16 %v3033_v59, %v3033_v59 }
0x133e   :  { %v3013_v9 = vmul.f32 %v11861_v61, %v2988_v15 }
0x133f   :  { %v3066_v31 = vrot.slane %v3065_v33, 2  ;;  %v3107_v15 = vpack.c.bf16 %v3042_v62, %v3042_v62 }
0x1340   :  { %v3071_v36 = vsel %vm116_vm0, %v3013_v9, 0.0  ;;  %v3108_v9 = vpack.c.bf16 %v3051_v58, %v3051_v58 }
0x1341   :  { %v3067_v12 = vadd.f32 %v3066_v31, %v3065_v33  ;;  %v3072_v3 = vadd.f32 %v3071_v36, %v3070_v29  ;;  %v2993_v32 = vpop.permute.xlu0 %2992  ;;  %v3105_v33 = vpack.c.bf16 %v3024_v2, %v3024_v2  ;;  %v3109_v29 = vpack.c.bf16 %v3060_v14, %v3060_v14 }
0x1342   :  { %v3014_v4 = vmul.f32 %v11863_v8, %v2993_v32  ;;  %v3122_v36 = vunpack.c.l.b16 %v3106_v40  ;;  %v3123_v19 = vunpack.c.l.b16 %v3107_v15  ;;  %v3124_v32 = vunpack.c.l.b16 %v3108_v9  ;;  %v10010_v9 = vld [vmem:[%s11734_s7 + $0x8] sm:$0xff]  }
0x1343   :  { %v3073_v54 = vrot.slane %v3072_v3, 4  ;;  %v3068_v35 = vrot.slane %v3067_v12, 1  ;;  %v3121_v0 = vunpack.c.l.b16 %v3105_v33  ;;  %v3125_v63 = vunpack.c.l.b16 %v3109_v29  ;;  %v10001_v33 = vld [vmem:[%s11734_s7] sm:$0xff]   ;;  %11866 = vst [vmem:[#allocation25_spill] sm:$0xff] %v10010_v9 }
0x1344   :  { %v3079_v60 = vsel %vm116_vm0, %v3014_v4, 0.0  ;;  %11864 = vst [vmem:[#allocation24_spill] sm:$0xff] %v10001_v33  ;;  %v11865_v15 = vmov 0.0  }
0x1345   :  { %v3074_v25 = vadd.f32 %v3073_v54, %v3072_v3  ;;  %v3081_v56 = vadd.f32 %v3080_v10, %v3079_v60  ;;  %v3069_v1 = vadd.f32 %v3068_v35, %v3067_v12  ;;  %v3097_v3 = vsel %vm501_vm3, %v3042_v62, %v3096_v21 }
0x1346   :  { %v3098_v12 = vsel %vm503_vm4, %v3051_v58, %v3097_v3  ;;  %v3129_v54 = vsel %vm499_vm2, %v3122_v36, %v3121_v0 }
0x1347   :  { %v3075_v30 = vrot.slane %v3074_v25, 2  ;;  %v3082_v53 = vrot.slane %v3081_v56, 4  ;;  %v3110_v43 = vpack.c.bf16 %v3069_v1, %v3069_v1  ;;  %v3099_v4 = vsel %vm505_vm5, %v3060_v14, %v3098_v12 }
0x1348   :  { %v3100_v10 = vsel %vm507_vm6, %v3069_v1, %v3099_v4 }
0x1349   :  { %v3076_v55 = vadd.f32 %v3075_v30, %v3074_v25  ;;  %v3083_v13 = vadd.f32 %v3082_v53, %v3081_v56  ;;  %v3126_v17 = vunpack.c.l.b16 %v3110_v43  ;;  %v3130_v25 = vsel %vm501_vm3, %v3123_v19, %v3129_v54 }
0x134a   :  { %v3131_v62 = vsel %vm503_vm4, %v3124_v32, %v3130_v25  ;;  %v11872_v25 = vld [vmem:[#allocation23_spill] sm:$0xff] }
0x134b   :  { %v3077_v31 = vrot.slane %v3076_v55, 1  ;;  %v3084_v26 = vrot.slane %v3083_v13, 2  ;;  %v3132_v58 = vsel %vm505_vm5, %v3125_v63, %v3131_v62 }
0x134c   :  { %v3133_v53 = vsel %vm507_vm6, %v3126_v17, %v3132_v58 }
0x134d   :  { %v3078_v23 = vadd.f32 %v3077_v31, %v3076_v55  ;;  %v3085_v27 = vadd.f32 %v3084_v26, %v3083_v13  ;;  %v3138_v55 = vpop.permute.xlu0 %3137  ;;  %v11867_v26 = vld [vmem:[#allocation11_spill] sm:$0xff] }
0x134f   :  { %v3111_v24 = vpack.c.bf16 %v3078_v23, %v3078_v23  ;;  %v3086_v38 = vrot.slane %v3085_v27, 1  ;;  %v3101_v59 = vsel %vm509_vm7, %v3078_v23, %v3100_v10 }
0x1351   :  { %v3087_v60 = vadd.f32 %v3086_v38, %v3085_v27  ;;  %v3127_v35 = vunpack.c.l.b16 %v3111_v24  ;;  %v11868_v24 = vld [vmem:[#allocation20_spill] sm:$0xff] }
0x1353   :  { %v3102_v56 = vsel %vm511_vm8, %v3087_v60, %v3101_v59  ;;  %v3112_v2 = vpack.c.bf16 %v3087_v60, %v3087_v60  ;;  %v3134_v14 = vsel %vm509_vm7, %v3127_v35, %v3133_v53  ;;  %v11871_v35 = vld [vmem:[#allocation22_spill] sm:$0xff] }
0x1354   :  { %3104 = vst.msk [vmem:[#allocation3 + $0x10] sm:$0xff] %vm116_vm0, %v3102_v56  ;;  %v11873_v56 = vld [vmem:[#allocation14_spill] sm:$0xff] }
0x1355   :  { %v3128_v30 = vunpack.c.l.b16 %v3112_v2  ;;  %v11874_v2 = vld [vmem:[#allocation12_spill] sm:$0xff] }
0x1357   :  { %v3135_v40 = vsel %vm511_vm8, %v3128_v30, %v3134_v14  ;;  %v11875_v30 = vld [vmem:[#allocation19_spill] sm:$0xff] }
0x1358   :  { %v3136_v1 = vpack.c.b16 %v3135_v40, %v3135_v40 }
0x135a   :  { %v3141_v13 = vsel %vm116_vm0, %v3136_v1, %v3138_v55 }
0x135b   :  { %8094 = vmatmul.mubr.msk.bf16.vlgmr.msra.gmra.mrb[20].mxu0 %vm1367_vm11, %v3141_v13 }
0x135c   :  { %8118 = vmatpush3.bf16.msra.mxu0 %v10001_v33  ;;  %8121 = vmatprep.mubr.msk.bf16.mxu0 %vm8685_vm1, %v11865_v15 }
0x135d   :  { %8119 = vmatprep.subr.bf16.mxu0 %v11865_v15 }
0x1360   :  { %8120 = vmatpush3.bf16.msra.mxu0 %v10010_v9 }
0x1361   :  { %8125 = vmatprep.subr.bf16.mxu0 %v11865_v15 }
0x142e   :  { %v3178_v31 = vpop.f32.mrb[20].mxu0 }
0x142f   :  { %v3179_v21 = vadd.f32 %v3178_v31, %v11867_v26  ;;  %v8095_v29 = vpop.f32.mrb[21].mxu0 }
0x1430   :  { %v3181_v36 = vpop.f32.mrb[22].mxu0 }
0x1431   :  { %8424 = vtanh.f32 %v3179_v21  ;;  %v8096_v43 = vpop.f32.mrb[23].mxu0  ;;  %v7892_v27 = vmul.f32 -1.442695, %v3179_v21 }
0x1433   :  { %8426 = vpow2.f32 %v7892_v27 }
0x143b   :  { %v8425_v23 = vpop.eup %8424 }
0x143c   :  { %3193 = vrot.lane.b32.xlu1 %v8425_v23, %s8689_s18 }
0x143d   :  { %v8427_v0 = vpop.eup %8426 }
0x143e   :  { %v3187_v3 = vadd.f32 1.0, %v8427_v0 }
0x1440   :  { %8428 = vrcp.f32 %v3187_v3 }
0x144a   :  { %v8429_v19 = vpop.eup %8428 }
0x144b   :  { %v3191_v38 = vmul.f32 %v8429_v19, %v11868_v24 }
0x14ae   :  { %v3194_v12 = vpop.permute.xlu1 %3193 }
0x14af   :  { %v3196_v32 = vmul.f32 %v8429_v19, %v3194_v12 }
0x14b1   :  { %3198 = vrot.lane.b32.xlu0 %v3196_v32, %s8688_s6 }
0x1523   :  { %v3199_v4 = vpop.permute.xlu0 %3198 }
0x1524   :  { %v10018_v63 = vadd.f32 %v3199_v4, %v3191_v38 }
0x1526   :  { %11869 = vst [vmem:[#allocation11_spill] sm:$0xff] %v10018_v63  ;;  %8430 = vtanh.f32 %v10018_v63 }
0x1530   :  { %v8431_v54 = vpop.eup %8430 }
0x1531   :  { %3204 = vrot.lane.b32.xlu1 %v8431_v54, %s8689_s18 }
0x15a3   :  { %v3205_v10 = vpop.permute.xlu1 %3204 }
0x15a4   :  { %v10022_v17 = vmul.f32 %v8429_v19, %v3205_v10 }
0x15a6   :  { %11870 = vst [vmem:[#allocation20_spill] sm:$0xff] %v10022_v17  ;;  %v10026_v60 = vpack.c.bf16 %v10022_v17, %v10022_v17 }
0x15a8   :  { %3215 = vrot.lane.b32.xlu0 %v10026_v60, %s8688_s6 }
0x161a   :  { %v3216_v59 = vpop.permute.xlu0 %3215 }
0x161b   :  { %8102 = vmatmul.mubr.msk.bf16.vlgmr.msra.gmra.mrb[24].mxu1 %vm116_vm0, %v3216_v59 }
0x161c   :  { %8106 = vmatpush3.bf16.msra.mxu1 %v11871_v35  ;;  %8113 = vmatprep.mubr.msk.bf16.mxu1 %vm8685_vm1, %v11865_v15 }
0x161d   :  { %8107 = vmatprep.subr.bf16.mxu1 %v11865_v15 }
0x1620   :  { %8108 = vmatpush3.bf16.msra.mxu1 %v11872_v25 }
0x1621   :  { %8109 = vmatprep.subr.bf16.mxu1 %v11865_v15 }
0x1624   :  { %8110 = vmatpush3.bf16.msra.mxu1 %v11873_v56 }
0x1625   :  { %8111 = vmatprep.subr.bf16.mxu1 %v11865_v15 }
0x1628   :  { %8112 = vmatpush3.bf16.msra.mxu1 %v11874_v2 }
0x1629   :  { %8137 = vmatprep.subr.bf16.mxu1 %v11865_v15 }
0x16ee   :  { %v3254_v62 = vpop.f32.mrb[24].mxu1 }
0x16ef   :  { %v3261_v58 = vcombine.high %v3254_v62, %v3254_v62  ;;  %v3268_v53 = vrot.slane %v3254_v62, %v11875_v30  ;;  %v8103_v14 = vpop.f32.mrb[25].mxu1 }
0x16f0   :  { %v3257_v40 = vpop.f32.mrb[26].mxu1 }
0x16f1   :  { %v3276_v1 = vcombine.high %v3268_v53, %v3268_v53  ;;  %v3284_v55 = vrot.slane %v3268_v53, %v11875_v30  ;;  %v8104_v13 = vpop.f32.mrb[27].mxu1  ;;  %v3275_v31 = vrot.slane %v3261_v58, %v11875_v30 }
0x16f3   :  { %v3298_v26 = vrot.slane %v3276_v1, %v11875_v30  ;;  %v3306_v21 = vcombine.high %v3284_v55, %v3284_v55  ;;  %v3313_v29 = vrot.slane %v3284_v55, %v8966_v48  ;;  %v3291_v27 = vrot.slane %v3275_v31, %v11875_v30 }
0x16f4   :  { %v3277_v24 = vcombine.high %v3275_v31, %v3275_v31 }
0x16f5   :  { %v3317_v36 = vrot.slane %v3298_v26, %v8966_v48  ;;  %v3351_v43 = vmul.f32 %v8851_v47, %v3313_v29  ;;  %v3350_v23 = vmul.f32 %v8847_v45, %v3313_v29  ;;  %v3321_v0 = vrot.slane %v3306_v21, %v8966_v48 }
0x16f6   :  { %v3329_v38 = vrot.slane %v3291_v27, %v8966_v48  ;;  %v3308_v4 = vcombine.high %v3298_v26, %v3298_v26  ;;  %v3305_v56 = vrot.slane %v3277_v24, %v11875_v30  ;;  %v3307_v40 = vcombine.high %v3291_v27, %v3291_v27 }
0x16f7   :  { %v3369_v3 = vsel %vm116_vm0, %v3351_v43, 0.0  ;;  %v3366_v19 = vsel %vm116_vm0, %v3350_v23, 0.0  ;;  %v3353_v12 = vmul.f32 %v8849_v46, %v3317_v36  ;;  %v3352_v32 = vmul.f32 %v8845_v44, %v3317_v36 }
0x16f8   :  { %3370 = vadd.xlane.f32.xlu0 %v3369_v3  ;;  %3367 = vadd.xlane.f32.xlu1 %v3366_v19  ;;  %v3355_v59 = vmul.f32 %v8887_v20, %v3321_v0  ;;  %v3354_v35 = vmul.f32 %v8883_v11, %v3321_v0  ;;  %v3359_v25 = vmul.f32 %v8903_v50, %v3329_v38 }
0x16f9   :  { %v3375_v54 = vsel %vm116_vm0, %v3353_v12, 0.0  ;;  %v3372_v10 = vsel %vm116_vm0, %v3352_v32, 0.0  ;;  %v3358_v58 = vmul.f32 %v8899_v39, %v3329_v38  ;;  %v3325_v53 = vrot.slane %v3308_v4, %v8966_v48 }
0x16fa   :  { %v3381_v2 = vsel %vm116_vm0, %v3355_v59, 0.0  ;;  %v3378_v62 = vsel %vm116_vm0, %v3354_v35, 0.0  ;;  %v3393_v14 = vsel %vm116_vm0, %v3359_v25, 0.0  ;;  %v3333_v31 = vrot.slane %v3305_v56, %v8966_v48 }
0x16fb   :  { %v3390_v1 = vsel %vm116_vm0, %v3358_v58, 0.0  ;;  %v3357_v55 = vmul.f32 %v8885_v16, %v3325_v53  ;;  %v3356_v13 = vmul.f32 %v8879_v7, %v3325_v53  ;;  %v3337_v26 = vrot.slane %v3307_v40, %v8966_v48 }
0x16fc   :  { %3376 = vadd.xlane.f32.xlu1 %v3375_v54  ;;  %3373 = vadd.xlane.f32.xlu0 %v3372_v10  ;;  %v3309_v21 = vcombine.high %v3305_v56, %v3305_v56  ;;  %v3361_v43 = vmul.f32 %v8901_v42, %v3333_v31  ;;  %v3360_v23 = vmul.f32 %v8897_v37, %v3333_v31 }
0x16fd   :  { %v3387_v29 = vsel %vm116_vm0, %v3357_v55, 0.0  ;;  %v3384_v36 = vsel %vm116_vm0, %v3356_v13, 0.0  ;;  %v3363_v27 = vmul.f32 %v11861_v61, %v3337_v26  ;;  %v3362_v19 = vmul.f32 %v8864_v57, %v3337_v26 }
0x16fe   :  { %v3399_v0 = vsel %vm116_vm0, %v3361_v43, 0.0  ;;  %v3396_v3 = vsel %vm116_vm0, %v3360_v23, 0.0  ;;  %v3341_v12 = vrot.slane %v3309_v21, %v8966_v48 }
0x16ff   :  { %v3405_v32 = vsel %vm116_vm0, %v3363_v27, 0.0  ;;  %v3402_v24 = vsel %vm116_vm0, %v3362_v19, 0.0 }
0x1700   :  { %3382 = vadd.xlane.f32.xlu1 %v3381_v2  ;;  %3379 = vadd.xlane.f32.xlu0 %v3378_v62  ;;  %v3365_v38 = vmul.f32 %v11862_v51, %v3341_v12  ;;  %v3364_v4 = vmul.f32 %v11863_v8, %v3341_v12 }
0x1702   :  { %v3411_v54 = vsel %vm116_vm0, %v3365_v38, 0.0  ;;  %v3408_v10 = vsel %vm116_vm0, %v3364_v4, 0.0 }
0x1704   :  { %3394 = vadd.xlane.f32.xlu1 %v3393_v14  ;;  %3391 = vadd.xlane.f32.xlu0 %v3390_v1 }
0x1708   :  { %3388 = vadd.xlane.f32.xlu1 %v3387_v29  ;;  %3385 = vadd.xlane.f32.xlu0 %v3384_v36 }
0x170c   :  { %3400 = vadd.xlane.f32.xlu1 %v3399_v0  ;;  %3397 = vadd.xlane.f32.xlu0 %v3396_v3 }
0x1710   :  { %3406 = vadd.xlane.f32.xlu1 %v3405_v32  ;;  %3403 = vadd.xlane.f32.xlu0 %v3402_v24 }
0x1714   :  { %3412 = vadd.xlane.f32.xlu1 %v3411_v54  ;;  %3409 = vadd.xlane.f32.xlu0 %v3408_v10 }
0x1785   :  { %v3371_v59 = vpop.xlane.xlu0 %3370  ;;  %v3368_v35 = vpop.xlane.xlu1 %3367 }
0x1786   :  { %v3437_v26 = vrot.slane %v3371_v59, %v9033_v41  ;;  %v3433_v21 = vrot.slane %v3368_v35, %v9038_v49 }
0x1788   :  { %v3438_v3 = vsel %vm750_vm9, %v3437_v26, %v3433_v21 }
0x1789   :  { %v10087_v25 = vpop.xlane.xlu1 %3376  ;;  %v3374_v56 = vpop.xlane.xlu0 %3373 }
0x178a   :  { %v3446_v1 = vrot.slane %v10087_v25, %v9033_v41  ;;  %v3442_v55 = vrot.slane %v3374_v56, %v9038_v49 }
0x178c   :  { %v3447_v27 = vsel %vm750_vm9, %v3446_v1, %v3442_v55 }
0x178d   :  { %v10089_v2 = vpop.xlane.xlu1 %3382  ;;  %v3380_v62 = vpop.xlane.xlu0 %3379  ;;  %v3502_v24 = vsel %vm499_vm2, %v3447_v27, %v3438_v3 }
0x178e   :  { %v3455_v13 = vrot.slane %v10089_v2, %v9033_v41  ;;  %v3451_v31 = vrot.slane %v3380_v62, %v9038_v49 }
0x1790   :  { %v3456_v0 = vsel %vm750_vm9, %v3455_v13, %v3451_v31 }
0x1791   :  { %v10091_v58 = vpop.xlane.xlu1 %3394  ;;  %v10093_v53 = vpop.xlane.xlu0 %3391  ;;  %v3503_v1 = vsel %vm501_vm3, %v3456_v0, %v3502_v24 }
0x1792   :  { %v3473_v38 = vrot.slane %v10091_v58, %v9033_v41  ;;  %v3469_v4 = vrot.slane %v10093_v53, %v9038_v49 }
0x1794   :  { %v3474_v21 = vsel %vm750_vm9, %v3473_v38, %v3469_v4 }
0x1795   :  { %v10095_v14 = vpop.xlane.xlu1 %3388  ;;  %v10097_v40 = vpop.xlane.xlu0 %3385 }
0x1796   :  { %v3464_v29 = vrot.slane %v10095_v14, %v9033_v41  ;;  %v3460_v36 = vrot.slane %v10097_v40, %v9038_v49 }
0x1798   :  { %v3465_v19 = vsel %vm750_vm9, %v3464_v29, %v3460_v36 }
0x1799   :  { %v10111_v43 = vpop.xlane.xlu1 %3400  ;;  %v10113_v23 = vpop.xlane.xlu0 %3397  ;;  %v3504_v31 = vsel %vm503_vm4, %v3465_v19, %v3503_v1 }
0x179a   :  { %v3482_v12 = vrot.slane %v10111_v43, %v9033_v41  ;;  %v3478_v32 = vrot.slane %v10113_v23, %v9038_v49  ;;  %v3505_v24 = vsel %vm505_vm5, %v3474_v21, %v3504_v31 }
0x179c   :  { %v3483_v26 = vsel %vm750_vm9, %v3482_v12, %v3478_v32 }
0x179d   :  { %v10128_v54 = vpop.xlane.xlu1 %3406  ;;  %v10130_v10 = vpop.xlane.xlu0 %3403  ;;  %v3506_v19 = vsel %vm507_vm6, %v3483_v26, %v3505_v24 }
0x179e   :  { %v3491_v55 = vrot.slane %v10128_v54, %v9033_v41  ;;  %v3487_v13 = vrot.slane %v10130_v10, %v9038_v49 }
0x17a0   :  { %v3492_v27 = vsel %vm750_vm9, %v3491_v55, %v3487_v13 }
0x17a1   :  { %v10140_v29 = vpop.xlane.xlu1 %3412  ;;  %v10142_v36 = vpop.xlane.xlu0 %3409  ;;  %v3507_v32 = vsel %vm509_vm7, %v3492_v27, %v3506_v19 }
0x17a2   :  { %v3500_v0 = vrot.slane %v10140_v29, %v9033_v41  ;;  %v3496_v3 = vrot.slane %v10142_v36, %v9038_v49 }
0x17a4   :  { %v3501_v12 = vsel %vm750_vm9, %v3500_v0, %v3496_v3 }
0x17a5   :  { %v3508_v38 = vsel %vm511_vm8, %v3501_v12, %v3507_v32 }
0x17a6   :  { %v3510_v4 = vsel %vm823_vm10, %v3508_v38, -inf }
0x17a7   :  { %3511 = vmax.xlane.f32.xlu0 %v3510_v4 }
0x1834   :  { %v3512_v1 = vpop.xlane.xlu0 %3511 }
0x1835   :  { %v3517_v55 = vrot.slane %v3512_v1, %v8966_v48  ;;  %v3521_v13 = vrot.slane %v3512_v1, %v9092_v34  ;;  %v3525_v17 = vrot.slane %v3512_v1, %v9114_v6  ;;  %v3529_v26 = vrot.slane %v3512_v1, %v9126_v22 }
0x1836   :  { %v3533_v12 = vrot.slane %v3512_v1, %v9138_v28 }
0x1837   :  { %v3554_v30 = vsub.f32 %v3368_v35, %v3517_v55  ;;  %v3555_v31 = vsub.f32 %v3371_v59, %v3517_v55  ;;  %v3556_v21 = vsub.f32 %v3374_v56, %v3521_v13  ;;  %v3558_v0 = vsub.f32 %v3380_v62, %v3525_v17 }
0x1838   :  { %v3557_v24 = vsub.f32 %v10087_v25, %v3521_v13  ;;  %v3560_v32 = vsub.f32 %v10097_v40, %v3529_v26  ;;  %v3559_v4 = vsub.f32 %v10089_v2, %v3525_v17  ;;  %v3537_v35 = vrot.slane %v3512_v1, %v9095_v52 }
0x1839   :  { %v3570_v3 = vmul.f32 1.442695, %v3554_v30  ;;  %v3572_v27 = vmul.f32 1.442695, %v3555_v31  ;;  %v3574_v19 = vmul.f32 1.442695, %v3556_v21  ;;  %v3562_v56 = vsub.f32 %v10093_v53, %v3533_v12 }
0x183a   :  { %v3578_v38 = vmul.f32 1.442695, %v3558_v0  ;;  %v3576_v59 = vmul.f32 1.442695, %v3557_v24  ;;  %v3582_v30 = vmul.f32 1.442695, %v3560_v32  ;;  %v3561_v25 = vsub.f32 %v10095_v14, %v3529_v26 }
0x183b   :  { %8432 = vpow2.f32 %v3570_v3  ;;  %v3580_v62 = vmul.f32 1.442695, %v3559_v4  ;;  %v3541_v55 = vrot.slane %v3512_v1, %v11844_v5  ;;  %v3564_v40 = vsub.f32 %v10113_v23, %v3537_v35 }
0x183c   :  { %8434 = vpow2.f32 %v3572_v27  ;;  %v3586_v13 = vmul.f32 1.442695, %v3562_v56  ;;  %v3563_v2 = vsub.f32 %v10091_v58, %v3533_v12  ;;  %v3584_v53 = vmul.f32 1.442695, %v3561_v25 }
0x183d   :  { %8436 = vpow2.f32 %v3574_v19  ;;  %v3545_v14 = vrot.slane %v3512_v1, %v11845_v18  ;;  %v3566_v21 = vsub.f32 %v10130_v10, %v3541_v55  ;;  %v3590_v23 = vmul.f32 1.442695, %v3564_v40 }
0x183e   :  { %8438 = vpow2.f32 %v3578_v38  ;;  %v3565_v3 = vsub.f32 %v10111_v43, %v3537_v35  ;;  %v3588_v58 = vmul.f32 1.442695, %v3563_v2  ;;  %v3567_v19 = vsub.f32 %v10128_v54, %v3541_v55 }
0x183f   :  { %8440 = vpow2.f32 %v3576_v59  ;;  %v3568_v27 = vsub.f32 %v10142_v36, %v3545_v14  ;;  %v3594_v1 = vmul.f32 1.442695, %v3566_v21  ;;  %v3569_v36 = vsub.f32 %v10140_v29, %v3545_v14 }
0x1840   :  { %8442 = vpow2.f32 %v3582_v30  ;;  %v3592_v12 = vmul.f32 1.442695, %v3565_v3  ;;  %v3596_v4 = vmul.f32 1.442695, %v3567_v19 }
0x1841   :  { %8444 = vpow2.f32 %v3580_v62  ;;  %v3598_v43 = vmul.f32 1.442695, %v3568_v27  ;;  %v3600_v35 = vmul.f32 1.442695, %v3569_v36 }
0x1842   :  { %8446 = vpow2.f32 %v3586_v13 }
0x1843   :  { %8448 = vpow2.f32 %v3584_v53 }
0x1844   :  { %8450 = vpow2.f32 %v3590_v23 }
0x1845   :  { %v10168_v31 = vpop.eup %8432  ;;  %8452 = vpow2.f32 %v3588_v58 }
0x1846   :  { %v10170_v17 = vpop.eup %8434  ;;  %3619 = vperm.xlu1 %8226, %v10168_v31   ;;  %8454 = vpow2.f32 %v3594_v1 }
0x1847   :  { %3622 = vperm.xlu0 %8227, %v10170_v17   ;;  %v10177_v26 = vpop.eup %8436  ;;  %8456 = vpow2.f32 %v3592_v12 }
0x1848   :  { %v10179_v0 = vpop.eup %8438  ;;  %8458 = vpow2.f32 %v3598_v43 }
0x1849   :  { %v10185_v24 = vpop.eup %8440  ;;  %8460 = vpow2.f32 %v3596_v4 }
0x184a   :  { %3625 = vperm.xlu1 %8226, %v10177_v26   ;;  %v10187_v10 = vpop.eup %8442  ;;  %8462 = vpow2.f32 %v3600_v35 }
0x184b   :  { %3631 = vperm.xlu0 %8227, %v10179_v0   ;;  %v10192_v32 = vpop.eup %8444 }
0x184c   :  { %v10194_v38 = vpop.eup %8446 }
0x184d   :  { %v10199_v54 = vpop.eup %8448 }
0x184e   :  { %3628 = vperm.xlu1 %8226, %v10185_v24   ;;  %v10201_v59 = vpop.eup %8450 }
0x184f   :  { %3637 = vperm.xlu0 %8227, %v10187_v10   ;;  %v10205_v56 = vpop.eup %8452 }
0x1850   :  { %v10207_v30 = vpop.eup %8454 }
0x1851   :  { %v10211_v29 = vpop.eup %8456 }
0x1852   :  { %3634 = vperm.xlu1 %8226, %v10192_v32   ;;  %v10213_v25 = vpop.eup %8458 }
0x1853   :  { %3643 = vperm.xlu0 %8227, %v10194_v38   ;;  %v10217_v62 = vpop.eup %8460 }
0x1854   :  { %v8463_v55 = vpop.eup %8462 }
0x1856   :  { %3640 = vperm.xlu1 %8226, %v10199_v54  }
0x1857   :  { %3649 = vperm.xlu0 %8227, %v10201_v59  }
0x185a   :  { %3646 = vperm.xlu1 %8226, %v10205_v56  }
0x185b   :  { %3655 = vperm.xlu0 %8227, %v10207_v30  }
0x185e   :  { %3652 = vperm.xlu1 %8226, %v10211_v29  }
0x185f   :  { %3661 = vperm.xlu0 %8227, %v10213_v25  }
0x1862   :  { %3658 = vperm.xlu1 %8226, %v10217_v62  }
0x1866   :  { %3664 = vperm.xlu1 %8226, %v8463_v55  }
0x18c5   :  { %v3620_v40 = vpop.permute.xlu1 %3619 }
0x18c6   :  { %v3623_v13 = vpop.permute.xlu0 %3622  ;;  %v3669_v35 = vrot.slane %v3620_v40, %v9038_v49 }
0x18c7   :  { %v3673_v4 = vrot.slane %v3623_v13, %v9033_v41 }
0x18c9   :  { %v3626_v2 = vpop.permute.xlu1 %3625  ;;  %v3674_v40 = vsel %vm750_vm9, %v3673_v4, %v3669_v35 }
0x18ca   :  { %v3632_v53 = vpop.permute.xlu0 %3631  ;;  %v3678_v63 = vrot.slane %v3626_v2, %v9038_v49 }
0x18cb   :  { %v3687_v15 = vrot.slane %v3632_v53, %v9038_v49 }
0x18cd   :  { %v3629_v14 = vpop.permute.xlu1 %3628 }
0x18ce   :  { %v3638_v21 = vpop.permute.xlu0 %3637  ;;  %v3682_v19 = vrot.slane %v3629_v14, %v9033_v41 }
0x18cf   :  { %v3696_v8 = vrot.slane %v3638_v21, %v9038_v49 }
0x18d0   :  { %v3683_v14 = vsel %vm750_vm9, %v3682_v19, %v3678_v63 }
0x18d1   :  { %v3635_v23 = vpop.permute.xlu1 %3634 }
0x18d2   :  { %v3644_v3 = vpop.permute.xlu0 %3643  ;;  %v3691_v12 = vrot.slane %v3635_v23, %v9033_v41 }
0x18d3   :  { %v3705_v51 = vrot.slane %v3644_v3, %v9038_v49 }
0x18d4   :  { %v3692_v13 = vsel %vm750_vm9, %v3691_v12, %v3687_v15 }
0x18d5   :  { %v3641_v58 = vpop.permute.xlu1 %3640 }
0x18d6   :  { %v3650_v27 = vpop.permute.xlu0 %3649  ;;  %v3700_v9 = vrot.slane %v3641_v58, %v9033_v41 }
0x18d7   :  { %v3714_v2 = vrot.slane %v3650_v27, %v9038_v49 }
0x18d8   :  { %v3701_v58 = vsel %vm750_vm9, %v3700_v9, %v3696_v8 }
0x18d9   :  { %v3647_v1 = vpop.permute.xlu1 %3646 }
0x18da   :  { %v3656_v43 = vpop.permute.xlu0 %3655  ;;  %v3709_v33 = vrot.slane %v3647_v1, %v9033_v41  ;;  %v3738_v1 = vsel %vm499_vm2, %v3683_v14, %v3674_v40 }
0x18db   :  { %v3723_v21 = vrot.slane %v3656_v43, %v9038_v49  ;;  %v3739_v3 = vsel %vm501_vm3, %v3692_v13, %v3738_v1 }
0x18dc   :  { %v3710_v63 = vsel %vm750_vm9, %v3709_v33, %v3705_v51  ;;  %v3740_v12 = vsel %vm503_vm4, %v3701_v58, %v3739_v3 }
0x18dd   :  { %v3653_v36 = vpop.permute.xlu1 %3652  ;;  %v3741_v8 = vsel %vm505_vm5, %v3710_v63, %v3740_v12 }
0x18de   :  { %v3718_v23 = vrot.slane %v3653_v36, %v9033_v41  ;;  %v3662_v19 = vpop.permute.xlu0 %3661 }
0x18e0   :  { %v3719_v15 = vsel %vm750_vm9, %v3718_v23, %v3714_v2 }
0x18e1   :  { %v3659_v61 = vpop.permute.xlu1 %3658  ;;  %v3742_v43 = vsel %vm507_vm6, %v3719_v15, %v3741_v8 }
0x18e2   :  { %v3727_v53 = vrot.slane %v3659_v61, %v9033_v41  ;;  %v3732_v61 = vrot.slane %v3662_v19, %v9038_v49 }
0x18e4   :  { %v3728_v36 = vsel %vm750_vm9, %v3727_v53, %v3723_v21 }
0x18e5   :  { %v3665_v27 = vpop.permute.xlu1 %3664  ;;  %v3743_v33 = vsel %vm509_vm7, %v3728_v36, %v3742_v43 }
0x18e6   :  { %v3736_v9 = vrot.slane %v3665_v27, %v9033_v41 }
0x18e8   :  { %v3737_v51 = vsel %vm750_vm9, %v3736_v9, %v3732_v61 }
0x18e9   :  { %v3744_v4 = vsel %vm511_vm8, %v3737_v51, %v3743_v33 }
0x18ea   :  { %v3746_v35 = vsel %vm823_vm10, %v3744_v4, 0.0 }
0x18eb   :  { %3747 = vadd.xlane.f32.xlu0 %v3746_v35 }
0x1978   :  { %v3748_v14 = vpop.xlane.xlu0 %3747 }
0x1979   :  { %8464 = vrcp.f32 %v3748_v14 }
0x1983   :  { %v8465_v23 = vpop.eup %8464 }
0x1984   :  { %v3770_v13 = vrot.slane %v8465_v23, %v9138_v28  ;;  %v3754_v40 = vrot.slane %v8465_v23, %v8966_v48  ;;  %v3782_v53 = vrot.slane %v8465_v23, %v11845_v18  ;;  %v3758_v63 = vrot.slane %v8465_v23, %v9092_v34 }
0x1986   :  { %v3799_v2 = vmul.f32 %v10194_v38, %v3770_v13  ;;  %v3791_v58 = vmul.f32 %v10168_v31, %v3754_v40  ;;  %v3806_v1 = vmul.f32 %v8463_v55, %v3782_v53  ;;  %v3792_v21 = vmul.f32 %v10170_v17, %v3754_v40 }
0x1987   :  { %v3793_v19 = vmul.f32 %v10177_v26, %v3758_v63  ;;  %v3794_v3 = vmul.f32 %v10185_v24, %v3758_v63  ;;  %v3762_v38 = vrot.slane %v8465_v23, %v9114_v6  ;;  %v3766_v55 = vrot.slane %v8465_v23, %v9126_v22 }
0x1988   :  { %3849 = vperm.xlu0 %8227, %v3799_v2   ;;  %3809 = vperm.xlu1 %8226, %v3791_v58   ;;  %v3800_v26 = vmul.f32 %v10205_v56, %v3770_v13  ;;  %v3774_v24 = vrot.slane %v8465_v23, %v9095_v52 }
0x1989   :  { %v3795_v31 = vmul.f32 %v10179_v0, %v3762_v38  ;;  %v3796_v15 = vmul.f32 %v10192_v32, %v3762_v38  ;;  %v3797_v17 = vmul.f32 %v10187_v10, %v3766_v55  ;;  %v3798_v12 = vmul.f32 %v10199_v54, %v3766_v55 }
0x198a   :  { %v3801_v36 = vmul.f32 %v10201_v59, %v3774_v24  ;;  %v3802_v0 = vmul.f32 %v10211_v29, %v3774_v24  ;;  %v3778_v32 = vrot.slane %v8465_v23, %v11844_v5  ;;  %v3805_v54 = vmul.f32 %v10213_v25, %v3782_v53 }
0x198c   :  { %3884 = vperm.xlu0 %8227, %v3806_v1   ;;  %3814 = vperm.xlu1 %8226, %v3792_v21   ;;  %v3803_v27 = vmul.f32 %v10207_v30, %v3778_v32  ;;  %v3804_v10 = vmul.f32 %v10217_v62, %v3778_v32 }
0x1990   :  { %3819 = vperm.xlu1 %8226, %v3793_v19  }
0x1994   :  { %3824 = vperm.xlu1 %8226, %v3794_v3  }
0x1998   :  { %3829 = vperm.xlu1 %8226, %v3795_v31  }
0x199c   :  { %3834 = vperm.xlu1 %8226, %v3796_v15  }
0x19a0   :  { %3839 = vperm.xlu1 %8226, %v3797_v17  }
0x19a4   :  { %3844 = vperm.xlu1 %8226, %v3798_v12  }
0x19a8   :  { %3854 = vperm.xlu1 %8226, %v3800_v26  }
0x19ac   :  { %3859 = vperm.xlu1 %8226, %v3801_v36  }
0x19b0   :  { %3864 = vperm.xlu1 %8226, %v3802_v0  }
0x19b4   :  { %3869 = vperm.xlu1 %8226, %v3803_v27  }
0x19b8   :  { %3874 = vperm.xlu1 %8226, %v3804_v10  }
0x19bc   :  { %3879 = vperm.xlu1 %8226, %v3805_v54  }
0x19c0   :  { %4024 = vrot.lane.b32.xlu1 %v10026_v60, %s8689_s18 }
0x1a07   :  { %v3810_v56 = vpop.permute.xlu1 %3809  ;;  %v3850_v25 = vpop.permute.xlu0 %3849 }
0x1a08   :  { %v3887_v4 = vmul.f32 %v8847_v45, %v3810_v56  ;;  %v3895_v58 = vmul.f32 %v8899_v39, %v3850_v25 }
0x1a0a   :  { %v3903_v21 = vsel %vm116_vm0, %v3887_v4, 0.0  ;;  %v3939_v12 = vsel %vm116_vm0, %v3895_v58, 0.0 }
0x1a0b   :  { %v3815_v59 = vpop.permute.xlu1 %3814 }
0x1a0c   :  { %v3888_v30 = vmul.f32 %v8851_v47, %v3815_v59 }
0x1a0e   :  { %v3904_v40 = vsel %vm116_vm0, %v3888_v30, 0.0 }
0x1a0f   :  { %v3820_v8 = vpop.permute.xlu1 %3819  ;;  %v3905_v38 = vadd.f32 %v3904_v40, %v3903_v21 }
0x1a10   :  { %v3889_v33 = vmul.f32 %v8845_v44, %v3820_v8 }
0x1a11   :  { %v3906_v32 = vrot.slane %v3905_v38, 4 }
0x1a12   :  { %v3912_v53 = vsel %vm116_vm0, %v3889_v33, 0.0 }
0x1a13   :  { %v3825_v61 = vpop.permute.xlu1 %3824 }
0x1a14   :  { %v3890_v51 = vmul.f32 %v8849_v46, %v3825_v61  ;;  %v3907_v61 = vadd.f32 %v3906_v32, %v3905_v38 }
0x1a16   :  { %v3913_v14 = vsel %vm116_vm0, %v3890_v51, 0.0 }
0x1a17   :  { %v3830_v29 = vpop.permute.xlu1 %3829  ;;  %v3914_v63 = vadd.f32 %v3913_v14, %v3912_v53 }
0x1a18   :  { %v3891_v60 = vmul.f32 %v8883_v11, %v3830_v29 }
0x1a19   :  { %v3915_v24 = vrot.slane %v3914_v63, 4 }
0x1a1a   :  { %v3921_v19 = vsel %vm116_vm0, %v3891_v60, 0.0  ;;  %v3908_v60 = vrot.slane %v3907_v61, 2 }
0x1a1b   :  { %v3835_v9 = vpop.permute.xlu1 %3834  ;;  %v3916_v59 = vadd.f32 %v3915_v24, %v3914_v63 }
0x1a1c   :  { %v3892_v62 = vmul.f32 %v8887_v20, %v3835_v9  ;;  %v3909_v21 = vadd.f32 %v3908_v60, %v3907_v61 }
0x1a1d   :  { %v3917_v33 = vrot.slane %v3916_v59, 2 }
0x1a1e   :  { %v3922_v2 = vsel %vm116_vm0, %v3892_v62, 0.0 }
0x1a1f   :  { %v3840_v43 = vpop.permute.xlu1 %3839  ;;  %v3923_v31 = vadd.f32 %v3922_v2, %v3921_v19  ;;  %v3885_v2 = vpop.permute.xlu0 %3884  ;;  %v3918_v58 = vadd.f32 %v3917_v33, %v3916_v59  ;;  %v11876_v19 = vld [vmem:[#allocation9_spill] sm:$0xff] }
0x1a20   :  { %v3893_v23 = vmul.f32 %v8879_v7, %v3840_v43 }
0x1a21   :  { %v3924_v27 = vrot.slane %v3923_v31, 4  ;;  %v3919_v24 = vrot.slane %v3918_v58, 1 }
0x1a22   :  { %v3930_v15 = vsel %vm116_vm0, %v3893_v23, 0.0 }
0x1a23   :  { %v3845_v35 = vpop.permute.xlu1 %3844  ;;  %v3925_v29 = vadd.f32 %v3924_v27, %v3923_v31  ;;  %v3910_v27 = vrot.slane %v3909_v21, 1 }
0x1a24   :  { %v3894_v13 = vmul.f32 %v8885_v16, %v3845_v35 }
0x1a25   :  { %v3926_v35 = vrot.slane %v3925_v29, 2  ;;  %v3911_v33 = vadd.f32 %v3910_v27, %v3909_v21 }
0x1a26   :  { %v3931_v1 = vsel %vm116_vm0, %v3894_v13, 0.0 }
0x1a27   :  { %v3855_v3 = vpop.permute.xlu1 %3854  ;;  %v3932_v17 = vadd.f32 %v3931_v1, %v3930_v15  ;;  %v3927_v63 = vadd.f32 %v3926_v35, %v3925_v29  ;;  %v11877_v15 = vld [vmem:[#allocation8_spill] sm:$0xff] }
0x1a28   :  { %v3896_v55 = vmul.f32 %v8903_v50, %v3855_v3 }
0x1a29   :  { %v3933_v10 = vrot.slane %v3932_v17, 4 }
0x1a2a   :  { %v3940_v26 = vsel %vm116_vm0, %v3896_v55, 0.0  ;;  %v3902_v55 = vmul.f32 %v11877_v15, %v3885_v2 }
0x1a2b   :  { %v3941_v36 = vadd.f32 %v3940_v26, %v3939_v12  ;;  %v3860_v0 = vpop.permute.xlu1 %3859  ;;  %v3934_v43 = vadd.f32 %v3933_v10, %v3932_v17  ;;  %v3928_v10 = vrot.slane %v3927_v63, 1 }
0x1a2c   :  { %v3897_v56 = vmul.f32 %v8897_v37, %v3860_v0  ;;  %v3967_v61 = vsel %vm116_vm0, %v3902_v55, 0.0 }
0x1a2d   :  { %v3942_v54 = vrot.slane %v3941_v36, 4  ;;  %v3935_v14 = vrot.slane %v3934_v43, 2 }
0x1a2e   :  { %v3948_v30 = vsel %vm116_vm0, %v3897_v56, 0.0 }
0x1a2f   :  { %v3865_v8 = vpop.permute.xlu1 %3864  ;;  %v3943_v51 = vadd.f32 %v3942_v54, %v3941_v36  ;;  %v3936_v38 = vadd.f32 %v3935_v14, %v3934_v43  ;;  %v11878_v54 = vld [vmem:[#allocation7_spill] sm:$0xff]  ;;  %v3920_v43 = vadd.f32 %v3919_v24, %v3918_v58 }
0x1a30   :  { %v3898_v9 = vmul.f32 %v8901_v42, %v3865_v8 }
0x1a31   :  { %v3944_v13 = vrot.slane %v3943_v51, 2  ;;  %v3937_v59 = vrot.slane %v3936_v38, 1  ;;  %v3983_v58 = vsel %vm499_vm2, %v3920_v43, %v3911_v33 }
0x1a32   :  { %v3949_v62 = vsel %vm116_vm0, %v3898_v9, 0.0 }
0x1a33   :  { %v3950_v25 = vadd.f32 %v3949_v62, %v3948_v30  ;;  %v3870_v4 = vpop.permute.xlu1 %3869  ;;  %v3945_v17 = vadd.f32 %v3944_v13, %v3943_v51 }
0x1a34   :  { %v3899_v40 = vmul.f32 %v8864_v57, %v3870_v4  ;;  %v3938_v4 = vadd.f32 %v3937_v59, %v3936_v38 }
0x1a35   :  { %v3951_v23 = vrot.slane %v3950_v25, 4  ;;  %v3946_v29 = vrot.slane %v3945_v17, 1 }
0x1a36   :  { %v3957_v12 = vsel %vm116_vm0, %v3899_v40, 0.0 }
0x1a37   :  { %v3952_v53 = vadd.f32 %v3951_v23, %v3950_v25  ;;  %v3875_v1 = vpop.permute.xlu1 %3874  ;;  %v3929_v25 = vadd.f32 %v3928_v10, %v3927_v63  ;;  %v3947_v14 = vadd.f32 %v3946_v29, %v3945_v17  ;;  %v3993_v23 = vpack.c.bf16 %v3920_v43, %v3920_v43 }
0x1a38   :  { %v3900_v3 = vmul.f32 %v11876_v19, %v3875_v1 }
0x1a39   :  { %v3953_v31 = vrot.slane %v3952_v53, 2  ;;  %v3994_v1 = vpack.c.bf16 %v3929_v25, %v3929_v25 }
0x1a3a   :  { %v3958_v26 = vsel %vm116_vm0, %v3900_v3, 0.0  ;;  %v3995_v3 = vpack.c.bf16 %v3938_v4, %v3938_v4 }
0x1a3b   :  { %v3954_v36 = vadd.f32 %v3953_v31, %v3952_v53  ;;  %v3959_v0 = vadd.f32 %v3958_v26, %v3957_v12  ;;  %v3880_v32 = vpop.permute.xlu1 %3879  ;;  %v3992_v53 = vpack.c.bf16 %v3911_v33, %v3911_v33  ;;  %v3996_v12 = vpack.c.bf16 %v3947_v14, %v3947_v14 }
0x1a3c   :  { %v3901_v56 = vmul.f32 %v11878_v54, %v3880_v32  ;;  %v4009_v26 = vunpack.c.l.b16 %v3993_v23  ;;  %v4010_v17 = vunpack.c.l.b16 %v3994_v1  ;;  %v4011_v32 = vunpack.c.l.b16 %v3995_v3  ;;  %v11881_v3 = vld [vmem:[#allocation25_spill] sm:$0xff] }
0x1a3d   :  { %v3960_v8 = vrot.slane %v3959_v0, 4  ;;  %v3955_v51 = vrot.slane %v3954_v36, 1  ;;  %v4008_v38 = vunpack.c.l.b16 %v3992_v53  ;;  %v4012_v59 = vunpack.c.l.b16 %v3996_v12  ;;  %v11879_v53 = vld [vmem:[#allocation24_spill] sm:$0xff] }
0x1a3e   :  { %v3966_v9 = vsel %vm116_vm0, %v3901_v56, 0.0  ;;  %v11880_v1 = vmov 0.0  }
0x1a3f   :  { %v3961_v30 = vadd.f32 %v3960_v8, %v3959_v0  ;;  %v3968_v62 = vadd.f32 %v3967_v61, %v3966_v9  ;;  %v3956_v13 = vadd.f32 %v3955_v51, %v3954_v36  ;;  %v3984_v0 = vsel %vm501_vm3, %v3929_v25, %v3983_v58 }
0x1a40   :  { %v3985_v36 = vsel %vm503_vm4, %v3938_v4, %v3984_v0  ;;  %v4016_v8 = vsel %vm499_vm2, %v4009_v26, %v4008_v38 }
0x1a41   :  { %v3962_v60 = vrot.slane %v3961_v30, 2  ;;  %v3969_v35 = vrot.slane %v3968_v62, 4  ;;  %v3997_v24 = vpack.c.bf16 %v3956_v13, %v3956_v13  ;;  %v3986_v56 = vsel %vm505_vm5, %v3947_v14, %v3985_v36 }
0x1a42   :  { %v3987_v61 = vsel %vm507_vm6, %v3956_v13, %v3986_v56 }
0x1a43   :  { %v3963_v40 = vadd.f32 %v3962_v60, %v3961_v30  ;;  %v3970_v2 = vadd.f32 %v3969_v35, %v3968_v62  ;;  %v4013_v29 = vunpack.c.l.b16 %v3997_v24  ;;  %v4017_v30 = vsel %vm501_vm3, %v4010_v17, %v4016_v8 }
0x1a44   :  { %v4018_v25 = vsel %vm503_vm4, %v4011_v32, %v4017_v30  ;;  %v10361_v30 = vld [vmem:[%s11732_s5 + $0x8] sm:$0xff]  }
0x1a45   :  { %v3964_v31 = vrot.slane %v3963_v40, 1  ;;  %v3971_v55 = vrot.slane %v3970_v2, 2  ;;  %v4019_v4 = vsel %vm505_vm5, %v4012_v59, %v4018_v25  ;;  %11887 = vst [vmem:[#allocation12_spill] sm:$0xff] %v10361_v30 }
0x1a46   :  { %v4020_v35 = vsel %vm507_vm6, %v4013_v29, %v4019_v4 }
0x1a47   :  { %v3965_v21 = vadd.f32 %v3964_v31, %v3963_v40  ;;  %v3972_v63 = vadd.f32 %v3971_v55, %v3970_v2  ;;  %v4025_v40 = vpop.permute.xlu1 %4024  ;;  %v11882_v55 = vld [vmem:[#allocation13_spill] sm:$0xff] }
0x1a49   :  { %v3998_v27 = vpack.c.bf16 %v3965_v21, %v3965_v21  ;;  %v3973_v10 = vrot.slane %v3972_v63, 1  ;;  %v3988_v43 = vsel %vm509_vm7, %v3965_v21, %v3987_v61 }
0x1a4b   :  { %v3974_v9 = vadd.f32 %v3973_v10, %v3972_v63  ;;  %v4014_v51 = vunpack.c.l.b16 %v3998_v27  ;;  %v11883_v27 = vld [vmem:[#allocation11_spill] sm:$0xff] }
0x1a4d   :  { %v3989_v62 = vsel %vm511_vm8, %v3974_v9, %v3988_v43  ;;  %v3999_v33 = vpack.c.bf16 %v3974_v9, %v3974_v9  ;;  %v4021_v14 = vsel %vm509_vm7, %v4014_v51, %v4020_v35  ;;  %v10352_v51 = vld [vmem:[%s11732_s5] sm:$0xff]  }
0x1a4e   :  { %3991 = vst.msk [vmem:[#allocation3 + $0x18] sm:$0xff] %vm116_vm0, %v3989_v62  ;;  %11886 = vst [vmem:[#allocation14_spill] sm:$0xff] %v10352_v51  ;;  %v10368_v62 = vld [vmem:[%s11732_s5 + $0x10] sm:$0xff]  }
0x1a4f   :  { %v4015_v60 = vunpack.c.l.b16 %v3999_v33  ;;  %11888 = vst [vmem:[#allocation24_spill] sm:$0xff] %v10368_v62  ;;  %v10375_v33 = vld [vmem:[%s11732_s5 + $0x18] sm:$0xff]  }
0x1a50   :  { %11889 = vst [vmem:[#allocation25_spill] sm:$0xff] %v10375_v33 }
0x1a51   :  { %v4022_v23 = vsel %vm511_vm8, %v4015_v60, %v4021_v14  ;;  %v11890_v60 = vld [vmem:[#allocation19_spill] sm:$0xff] }
0x1a52   :  { %v4023_v13 = vpack.c.b16 %v4022_v23, %v4022_v23 }
0x1a54   :  { %v4028_v2 = vsel %vm116_vm0, %v4023_v13, %v4025_v40 }
0x1a55   :  { %8114 = vmatmul.mubr.msk.bf16.vlgmr.msra.gmra.mrb[28].mxu1 %vm1367_vm11, %v4028_v2 }
0x1a56   :  { %8138 = vmatpush3.bf16.msra.mxu1 %v11879_v53  ;;  %8141 = vmatprep.mubr.msk.bf16.mxu1 %vm8685_vm1, %v11880_v1 }
0x1a57   :  { %8139 = vmatprep.subr.bf16.mxu1 %v11880_v1 }
0x1a5a   :  { %8140 = vmatpush3.bf16.msra.mxu1 %v11881_v3 }
0x1a5b   :  { %8145 = vmatprep.subr.bf16.mxu1 %v11880_v1 }
0x1b28   :  { %v4065_v31 = vpop.f32.mrb[28].mxu1 }
0x1b29   :  { %v4066_v58 = vadd.f32 %v4065_v31, %v11882_v55  ;;  %v8115_v12 = vpop.f32.mrb[29].mxu1 }
0x1b2a   :  { %v4068_v26 = vpop.f32.mrb[30].mxu1 }
0x1b2b   :  { %8466 = vtanh.f32 %v4066_v58  ;;  %v8116_v24 = vpop.f32.mrb[31].mxu1  ;;  %v7895_v63 = vmul.f32 -1.442695, %v4066_v58 }
0x1b2d   :  { %8468 = vpow2.f32 %v7895_v63 }
0x1b35   :  { %v8467_v21 = vpop.eup %8466 }
0x1b36   :  { %4080 = vrot.lane.b32.xlu0 %v8467_v21, %s8689_s18 }
0x1b37   :  { %v8469_v38 = vpop.eup %8468 }
0x1b38   :  { %v4074_v0 = vadd.f32 1.0, %v8469_v38 }
0x1b3a   :  { %8470 = vrcp.f32 %v4074_v0 }
0x1b44   :  { %v8471_v17 = vpop.eup %8470 }
0x1b45   :  { %v4078_v10 = vmul.f32 %v8471_v17, %v11883_v27 }
0x1ba8   :  { %v4081_v36 = vpop.permute.xlu0 %4080 }
0x1ba9   :  { %v4083_v32 = vmul.f32 %v8471_v17, %v4081_v36 }
0x1bab   :  { %4085 = vrot.lane.b32.xlu1 %v4083_v32, %s8688_s6 }
0x1c1d   :  { %v4086_v56 = vpop.permute.xlu1 %4085 }
0x1c1e   :  { %v10336_v59 = vadd.f32 %v4086_v56, %v4078_v10 }
0x1c20   :  { %11884 = vst [vmem:[#allocation22_spill] sm:$0xff] %v10336_v59  ;;  %8472 = vtanh.f32 %v10336_v59 }
0x1c2a   :  { %v8473_v8 = vpop.eup %8472 }
0x1c2b   :  { %4091 = vrot.lane.b32.xlu0 %v8473_v8, %s8689_s18 }
0x1c9d   :  { %v4092_v61 = vpop.permute.xlu0 %4091 }
0x1c9e   :  { %v10340_v29 = vmul.f32 %v8471_v17, %v4092_v61 }
0x1ca0   :  { %11885 = vst [vmem:[#allocation23_spill] sm:$0xff] %v10340_v29  ;;  %v10344_v9 = vpack.c.bf16 %v10340_v29, %v10340_v29 }
0x1ca2   :  { %4102 = vrot.lane.b32.xlu1 %v10344_v9, %s8688_s6 }
0x1d14   :  { %v4103_v43 = vpop.permute.xlu1 %4102 }
0x1d15   :  { %8122 = vmatmul.mubr.msk.bf16.vlgmr.msra.gmra.mrb[24].mxu0 %vm116_vm0, %v4103_v43 }
0x1d16   :  { %8126 = vmatpush3.bf16.msra.mxu0 %v10352_v51  ;;  %8133 = vmatprep.mubr.msk.bf16.mxu0 %vm8685_vm1, %v11880_v1 }
0x1d17   :  { %8127 = vmatprep.subr.bf16.mxu0 %v11880_v1 }
0x1d1a   :  { %8128 = vmatpush3.bf16.msra.mxu0 %v10361_v30 }
0x1d1b   :  { %8129 = vmatprep.subr.bf16.mxu0 %v11880_v1 }
0x1d1e   :  { %8130 = vmatpush3.bf16.msra.mxu0 %v10368_v62 }
0x1d1f   :  { %8131 = vmatprep.subr.bf16.mxu0 %v11880_v1 }
0x1d22   :  { %8132 = vmatpush3.bf16.msra.mxu0 %v10375_v33 }
0x1d23   :  { %8157 = vmatprep.subr.bf16.mxu0 %v11880_v1 }
0x1de8   :  { %v4141_v25 = vpop.f32.mrb[24].mxu0 }
0x1de9   :  { %v4148_v4 = vcombine.high %v4141_v25, %v4141_v25  ;;  %v4155_v35 = vrot.slane %v4141_v25, %v11890_v60  ;;  %v8123_v14 = vpop.f32.mrb[25].mxu0 }
0x1dea   :  { %v4144_v23 = vpop.f32.mrb[26].mxu0 }
0x1deb   :  { %v4162_v13 = vrot.slane %v4148_v4, %v11890_v60  ;;  %v4163_v40 = vcombine.high %v4155_v35, %v4155_v35  ;;  %v4171_v2 = vrot.slane %v4155_v35, %v11890_v60  ;;  %v8124_v53 = vpop.f32.mrb[27].mxu0 }
0x1ded   :  { %v4178_v3 = vrot.slane %v4162_v13, %v11890_v60  ;;  %v4185_v31 = vrot.slane %v4163_v40, %v11890_v60  ;;  %v4193_v55 = vcombine.high %v4171_v2, %v4171_v2  ;;  %v4200_v58 = vrot.slane %v4171_v2, %v8966_v48 }
0x1dee   :  { %v4164_v63 = vcombine.high %v4162_v13, %v4162_v13 }
0x1def   :  { %v4208_v12 = vrot.slane %v4193_v55, %v8966_v48  ;;  %v4204_v26 = vrot.slane %v4185_v31, %v8966_v48  ;;  %v4238_v24 = vmul.f32 %v8851_v47, %v4200_v58  ;;  %v4237_v21 = vmul.f32 %v8847_v45, %v4200_v58 }
0x1df0   :  { %v4216_v38 = vrot.slane %v4178_v3, %v8966_v48  ;;  %v4195_v0 = vcombine.high %v4185_v31, %v4185_v31  ;;  %v4192_v56 = vrot.slane %v4164_v63, %v11890_v60  ;;  %v4194_v35 = vcombine.high %v4178_v3, %v4178_v3 }
0x1df1   :  { %v4256_v17 = vsel %vm116_vm0, %v4238_v24, 0.0  ;;  %v4253_v36 = vsel %vm116_vm0, %v4237_v21, 0.0  ;;  %v4242_v32 = vmul.f32 %v8887_v20, %v4208_v12  ;;  %v4239_v27 = vmul.f32 %v8845_v44, %v4204_v26 }
0x1df2   :  { %4257 = vadd.xlane.f32.xlu1 %v4256_v17  ;;  %4254 = vadd.xlane.f32.xlu0 %v4253_v36  ;;  %v4240_v10 = vmul.f32 %v8849_v46, %v4204_v26  ;;  %v4246_v43 = vmul.f32 %v8903_v50, %v4216_v38  ;;  %v4212_v25 = vrot.slane %v4195_v0, %v8966_v48 }
0x1df3   :  { %v4268_v8 = vsel %vm116_vm0, %v4242_v32, 0.0  ;;  %v4259_v61 = vsel %vm116_vm0, %v4239_v27, 0.0  ;;  %v4241_v4 = vmul.f32 %v8883_v11, %v4208_v12  ;;  %v4220_v40 = vrot.slane %v4192_v56, %v8966_v48 }
0x1df4   :  { %v4262_v14 = vsel %vm116_vm0, %v4240_v10, 0.0  ;;  %v4280_v23 = vsel %vm116_vm0, %v4246_v43, 0.0  ;;  %v4244_v13 = vmul.f32 %v8885_v16, %v4212_v25  ;;  %v4245_v53 = vmul.f32 %v8899_v39, %v4216_v38 }
0x1df5   :  { %v4265_v2 = vsel %vm116_vm0, %v4241_v4, 0.0  ;;  %v4248_v55 = vmul.f32 %v8901_v42, %v4220_v40  ;;  %v4224_v3 = vrot.slane %v4194_v35, %v8966_v48  ;;  %v4196_v58 = vcombine.high %v4192_v56, %v4192_v56 }
0x1df6   :  { %4269 = vadd.xlane.f32.xlu1 %v4268_v8  ;;  %4260 = vadd.xlane.f32.xlu0 %v4259_v61  ;;  %v4274_v31 = vsel %vm116_vm0, %v4244_v13, 0.0  ;;  %v4243_v12 = vmul.f32 %v8879_v7, %v4212_v25  ;;  %v4277_v26 = vsel %vm116_vm0, %v4245_v53, 0.0  ;;  %v4247_v17 = vmul.f32 %v8897_v37, %v4220_v40 }
0x1df7   :  { %v4286_v24 = vsel %vm116_vm0, %v4248_v55, 0.0  ;;  %v4250_v21 = vmul.f32 %v11876_v19, %v4224_v3  ;;  %v4228_v63 = vrot.slane %v4196_v58, %v8966_v48  ;;  %v4249_v10 = vmul.f32 %v8864_v57, %v4224_v3 }
0x1df8   :  { %v4271_v38 = vsel %vm116_vm0, %v4243_v12, 0.0  ;;  %v4283_v32 = vsel %vm116_vm0, %v4247_v17, 0.0 }
0x1df9   :  { %v4292_v0 = vsel %vm116_vm0, %v4250_v21, 0.0  ;;  %v4252_v36 = vmul.f32 %v11877_v15, %v4228_v63  ;;  %v4289_v56 = vsel %vm116_vm0, %v4249_v10, 0.0  ;;  %v4251_v8 = vmul.f32 %v11878_v54, %v4228_v63 }
0x1dfa   :  { %4263 = vadd.xlane.f32.xlu0 %v4262_v14  ;;  %4281 = vadd.xlane.f32.xlu1 %v4280_v23 }
0x1dfb   :  { %v4298_v27 = vsel %vm116_vm0, %v4252_v36, 0.0  ;;  %v4295_v61 = vsel %vm116_vm0, %v4251_v8, 0.0 }
0x1dfe   :  { %4266 = vadd.xlane.f32.xlu0 %v4265_v2  ;;  %4275 = vadd.xlane.f32.xlu1 %v4274_v31 }
0x1e02   :  { %4278 = vadd.xlane.f32.xlu0 %v4277_v26  ;;  %4287 = vadd.xlane.f32.xlu1 %v4286_v24 }
0x1e06   :  { %4272 = vadd.xlane.f32.xlu0 %v4271_v38  ;;  %4293 = vadd.xlane.f32.xlu1 %v4292_v0 }
0x1e0a   :  { %4284 = vadd.xlane.f32.xlu0 %v4283_v32  ;;  %4299 = vadd.xlane.f32.xlu1 %v4298_v27 }
0x1e0e   :  { %4290 = vadd.xlane.f32.xlu0 %v4289_v56 }
0x1e12   :  { %4296 = vadd.xlane.f32.xlu0 %v4295_v61 }
0x1e7f   :  { %v4258_v43 = vpop.xlane.xlu1 %4257  ;;  %v4255_v25 = vpop.xlane.xlu0 %4254 }
0x1e80   :  { %v4324_v58 = vrot.slane %v4258_v43, %v9033_v41  ;;  %v4320_v12 = vrot.slane %v4255_v25, %v9038_v49 }
0x1e82   :  { %v4325_v32 = vsel %vm750_vm9, %v4324_v58, %v4320_v12 }
0x1e83   :  { %v10425_v4 = vpop.xlane.xlu1 %4269  ;;  %v4261_v35 = vpop.xlane.xlu0 %4260 }
0x1e84   :  { %v4329_v26 = vrot.slane %v4261_v35, %v9038_v49  ;;  %v4342_v21 = vrot.slane %v10425_v4, %v9033_v41 }
0x1e87   :  { %v10427_v14 = vpop.xlane.xlu0 %4263  ;;  %v10429_v23 = vpop.xlane.xlu1 %4281 }
0x1e88   :  { %v4333_v55 = vrot.slane %v10427_v14, %v9033_v41  ;;  %v4360_v58 = vrot.slane %v10429_v23, %v9033_v41 }
0x1e8a   :  { %v4334_v0 = vsel %vm750_vm9, %v4333_v55, %v4329_v26 }
0x1e8b   :  { %v10431_v13 = vpop.xlane.xlu0 %4266  ;;  %v10433_v40 = vpop.xlane.xlu1 %4275  ;;  %v4389_v56 = vsel %vm499_vm2, %v4334_v0, %v4325_v32 }
0x1e8c   :  { %v4338_v3 = vrot.slane %v10431_v13, %v9038_v49  ;;  %v4351_v17 = vrot.slane %v10433_v40, %v9033_v41 }
0x1e8e   :  { %v4343_v36 = vsel %vm750_vm9, %v4342_v21, %v4338_v3 }
0x1e8f   :  { %v10435_v2 = vpop.xlane.xlu0 %4278  ;;  %v10437_v53 = vpop.xlane.xlu1 %4287  ;;  %v4390_v55 = vsel %vm501_vm3, %v4343_v36, %v4389_v56 }
0x1e90   :  { %v4356_v8 = vrot.slane %v10435_v2, %v9038_v49  ;;  %v4369_v26 = vrot.slane %v10437_v53, %v9033_v41 }
0x1e93   :  { %v10439_v31 = vpop.xlane.xlu0 %4272  ;;  %v10452_v63 = vpop.xlane.xlu1 %4293 }
0x1e94   :  { %v4347_v24 = vrot.slane %v10439_v31, %v9038_v49 }
0x1e96   :  { %v4352_v27 = vsel %vm750_vm9, %v4351_v17, %v4347_v24  ;;  %v4378_v24 = vrot.slane %v10452_v63, %v9033_v41  ;;  %v4361_v17 = vsel %vm750_vm9, %v4360_v58, %v4356_v8 }
0x1e97   :  { %v10454_v38 = vpop.xlane.xlu0 %4284  ;;  %v4391_v12 = vsel %vm503_vm4, %v4352_v27, %v4390_v55  ;;  %v10479_v21 = vpop.xlane.xlu1 %4299 }
0x1e98   :  { %v4365_v10 = vrot.slane %v10454_v38, %v9038_v49  ;;  %v4387_v56 = vrot.slane %v10479_v21, %v9033_v41  ;;  %v4392_v27 = vsel %vm505_vm5, %v4361_v17, %v4391_v12 }
0x1e9a   :  { %v4370_v0 = vsel %vm750_vm9, %v4369_v26, %v4365_v10 }
0x1e9b   :  { %v10467_v61 = vpop.xlane.xlu0 %4290  ;;  %v4393_v55 = vsel %vm507_vm6, %v4370_v0, %v4392_v27 }
0x1e9c   :  { %v4374_v3 = vrot.slane %v10467_v61, %v9038_v49 }
0x1e9e   :  { %v4379_v32 = vsel %vm750_vm9, %v4378_v24, %v4374_v3 }
0x1e9f   :  { %v10483_v36 = vpop.xlane.xlu0 %4296  ;;  %v4394_v10 = vsel %vm509_vm7, %v4379_v32, %v4393_v55 }
0x1ea0   :  { %v4383_v29 = vrot.slane %v10483_v36, %v9038_v49 }
0x1ea2   :  { %v4388_v60 = vsel %vm750_vm9, %v4387_v56, %v4383_v29 }
0x1ea3   :  { %v4395_v8 = vsel %vm511_vm8, %v4388_v60, %v4394_v10 }
0x1ea4   :  { %v4397_v26 = vsel %vm823_vm10, %v4395_v8, -inf }
0x1ea5   :  { %4398 = vmax.xlane.f32.xlu0 %v4397_v26 }
0x1f32   :  { %v4399_v3 = vpop.xlane.xlu0 %4398 }
0x1f33   :  { %v4404_v58 = vrot.slane %v4399_v3, %v8966_v48  ;;  %v4408_v24 = vrot.slane %v4399_v3, %v9092_v34  ;;  %v4412_v33 = vrot.slane %v4399_v3, %v9114_v6  ;;  %v4416_v0 = vrot.slane %v4399_v3, %v9126_v22 }
0x1f34   :  { %v4420_v55 = vrot.slane %v4399_v3, %v9138_v28 }
0x1f35   :  { %v4441_v62 = vsub.f32 %v4255_v25, %v4404_v58  ;;  %v4442_v12 = vsub.f32 %v4258_v43, %v4404_v58  ;;  %v4443_v17 = vsub.f32 %v4261_v35, %v4408_v24  ;;  %v4446_v29 = vsub.f32 %v10425_v4, %v4412_v33 }
0x1f36   :  { %v4444_v60 = vsub.f32 %v10427_v14, %v4408_v24  ;;  %v4448_v10 = vsub.f32 %v10433_v40, %v4416_v0  ;;  %v4445_v25 = vsub.f32 %v10431_v13, %v4412_v33  ;;  %v4424_v35 = vrot.slane %v4399_v3, %v9095_v52 }
0x1f37   :  { %v4457_v32 = vmul.f32 1.442695, %v4441_v62  ;;  %v4459_v56 = vmul.f32 1.442695, %v4442_v12  ;;  %v4461_v27 = vmul.f32 1.442695, %v4443_v17  ;;  %v4450_v4 = vsub.f32 %v10429_v23, %v4420_v55 }
0x1f38   :  { %v4467_v8 = vmul.f32 1.442695, %v4446_v29  ;;  %v4463_v43 = vmul.f32 1.442695, %v4444_v60  ;;  %v4471_v62 = vmul.f32 1.442695, %v4448_v10  ;;  %v4447_v14 = vsub.f32 %v10439_v31, %v4416_v0 }
0x1f39   :  { %8474 = vpow2.f32 %v4457_v32  ;;  %v4465_v26 = vmul.f32 1.442695, %v4445_v25  ;;  %v4428_v58 = vrot.slane %v4399_v3, %v11844_v5  ;;  %v4452_v40 = vsub.f32 %v10437_v53, %v4424_v35 }
0x1f3a   :  { %8476 = vpow2.f32 %v4459_v56  ;;  %v4475_v24 = vmul.f32 1.442695, %v4450_v4  ;;  %v4449_v23 = vsub.f32 %v10435_v2, %v4420_v55  ;;  %v4469_v13 = vmul.f32 1.442695, %v4447_v14 }
0x1f3b   :  { %8478 = vpow2.f32 %v4461_v27  ;;  %v4432_v31 = vrot.slane %v4399_v3, %v11845_v18  ;;  %v4454_v17 = vsub.f32 %v10452_v63, %v4428_v58  ;;  %v4479_v53 = vmul.f32 1.442695, %v4452_v40 }
0x1f3c   :  { %8480 = vpow2.f32 %v4467_v8  ;;  %v4451_v32 = vsub.f32 %v10454_v38, %v4424_v35  ;;  %v4473_v2 = vmul.f32 1.442695, %v4449_v23  ;;  %v4453_v27 = vsub.f32 %v10467_v61, %v4428_v58 }
0x1f3d   :  { %8482 = vpow2.f32 %v4463_v43  ;;  %v4456_v56 = vsub.f32 %v10479_v21, %v4432_v31  ;;  %v4483_v3 = vmul.f32 1.442695, %v4454_v17  ;;  %v4455_v21 = vsub.f32 %v10483_v36, %v4432_v31 }
0x1f3e   :  { %8484 = vpow2.f32 %v4471_v62  ;;  %v4477_v55 = vmul.f32 1.442695, %v4451_v32  ;;  %v4481_v25 = vmul.f32 1.442695, %v4453_v27 }
0x1f3f   :  { %8486 = vpow2.f32 %v4465_v26  ;;  %v4487_v38 = vmul.f32 1.442695, %v4456_v56  ;;  %v4485_v35 = vmul.f32 1.442695, %v4455_v21 }
0x1f40   :  { %8488 = vpow2.f32 %v4475_v24 }
0x1f41   :  { %8490 = vpow2.f32 %v4469_v13 }
0x1f42   :  { %8492 = vpow2.f32 %v4479_v53 }
0x1f43   :  { %v10510_v12 = vpop.eup %8474  ;;  %8494 = vpow2.f32 %v4473_v2 }
0x1f44   :  { %v10512_v33 = vpop.eup %8476  ;;  %4506 = vperm.xlu1 %8226, %v10510_v12   ;;  %8496 = vpow2.f32 %v4483_v3 }
0x1f45   :  { %4509 = vperm.xlu0 %8227, %v10512_v33   ;;  %v10519_v0 = vpop.eup %8478  ;;  %8498 = vpow2.f32 %v4477_v55 }
0x1f46   :  { %v10521_v29 = vpop.eup %8480  ;;  %8500 = vpow2.f32 %v4487_v38 }
0x1f47   :  { %v10527_v60 = vpop.eup %8482  ;;  %8502 = vpow2.f32 %v4481_v25 }
0x1f48   :  { %4512 = vperm.xlu1 %8226, %v10519_v0   ;;  %v10529_v63 = vpop.eup %8484  ;;  %8504 = vpow2.f32 %v4485_v35 }
0x1f49   :  { %4521 = vperm.xlu0 %8227, %v10521_v29   ;;  %v10534_v10 = vpop.eup %8486 }
0x1f4a   :  { %v10536_v8 = vpop.eup %8488 }
0x1f4b   :  { %v10541_v61 = vpop.eup %8490 }
0x1f4c   :  { %4515 = vperm.xlu1 %8226, %v10527_v60   ;;  %v10543_v43 = vpop.eup %8492 }
0x1f4d   :  { %4527 = vperm.xlu0 %8227, %v10529_v63   ;;  %v10547_v4 = vpop.eup %8494 }
0x1f4e   :  { %v10549_v62 = vpop.eup %8496 }
0x1f4f   :  { %v10553_v36 = vpop.eup %8498 }
0x1f50   :  { %4518 = vperm.xlu1 %8226, %v10534_v10   ;;  %v10555_v14 = vpop.eup %8500 }
0x1f51   :  { %4533 = vperm.xlu0 %8227, %v10536_v8   ;;  %v10559_v26 = vpop.eup %8502 }
0x1f52   :  { %v10562_v58 = vpop.eup %8504 }
0x1f54   :  { %4524 = vperm.xlu1 %8226, %v10541_v61  }
0x1f55   :  { %4539 = vperm.xlu0 %8227, %v10543_v43  }
0x1f58   :  { %4530 = vperm.xlu1 %8226, %v10547_v4  }
0x1f59   :  { %4545 = vperm.xlu0 %8227, %v10549_v62  }
0x1f5c   :  { %4536 = vperm.xlu1 %8226, %v10553_v36  }
0x1f5d   :  { %4551 = vperm.xlu0 %8227, %v10555_v14  }
0x1f60   :  { %4542 = vperm.xlu1 %8226, %v10559_v26  }
0x1f64   :  { %4548 = vperm.xlu1 %8226, %v10562_v58  }
0x1fc3   :  { %v4507_v40 = vpop.permute.xlu1 %4506 }
0x1fc4   :  { %v4510_v24 = vpop.permute.xlu0 %4509  ;;  %v4556_v35 = vrot.slane %v4507_v40, %v9038_v49 }
0x1fc5   :  { %v4560_v25 = vrot.slane %v4510_v24, %v9033_v41 }
0x1fc7   :  { %v4513_v23 = vpop.permute.xlu1 %4512  ;;  %v4561_v40 = vsel %vm750_vm9, %v4560_v25, %v4556_v35 }
0x1fc8   :  { %v4522_v13 = vpop.permute.xlu0 %4521  ;;  %v4565_v30 = vrot.slane %v4513_v23, %v9038_v49 }
0x1fc9   :  { %v4578_v59 = vrot.slane %v4522_v13, %v9033_v41 }
0x1fcb   :  { %v4516_v31 = vpop.permute.xlu1 %4515 }
0x1fcc   :  { %v4528_v17 = vpop.permute.xlu0 %4527  ;;  %v4569_v27 = vrot.slane %v4516_v31, %v9033_v41 }
0x1fcd   :  { %v4587_v54 = vrot.slane %v4528_v17, %v9033_v41 }
0x1fce   :  { %v4570_v31 = vsel %vm750_vm9, %v4569_v27, %v4565_v30 }
0x1fcf   :  { %v4519_v53 = vpop.permute.xlu1 %4518 }
0x1fd0   :  { %v4534_v32 = vpop.permute.xlu0 %4533  ;;  %v4574_v55 = vrot.slane %v4519_v53, %v9038_v49 }
0x1fd1   :  { %v4596_v15 = vrot.slane %v4534_v32, %v9033_v41 }
0x1fd2   :  { %v4579_v24 = vsel %vm750_vm9, %v4578_v59, %v4574_v55 }
0x1fd3   :  { %v4525_v2 = vpop.permute.xlu1 %4524 }
0x1fd4   :  { %v4540_v56 = vpop.permute.xlu0 %4539  ;;  %v4583_v51 = vrot.slane %v4525_v2, %v9038_v49 }
0x1fd5   :  { %v4605_v23 = vrot.slane %v4540_v56, %v9033_v41 }
0x1fd6   :  { %v4588_v2 = vsel %vm750_vm9, %v4587_v54, %v4583_v51 }
0x1fd7   :  { %v4531_v3 = vpop.permute.xlu1 %4530 }
0x1fd8   :  { %v4546_v38 = vpop.permute.xlu0 %4545  ;;  %v4592_v1 = vrot.slane %v4531_v3, %v9038_v49  ;;  %v4625_v3 = vsel %vm499_vm2, %v4570_v31, %v4561_v40 }
0x1fd9   :  { %v4614_v17 = vrot.slane %v4546_v38, %v9033_v41  ;;  %v4626_v32 = vsel %vm501_vm3, %v4579_v24, %v4625_v3 }
0x1fda   :  { %v4597_v30 = vsel %vm750_vm9, %v4596_v15, %v4592_v1  ;;  %v4627_v55 = vsel %vm503_vm4, %v4588_v2, %v4626_v32 }
0x1fdb   :  { %v4537_v21 = vpop.permute.xlu1 %4536  ;;  %v4628_v54 = vsel %vm505_vm5, %v4597_v30, %v4627_v55 }
0x1fdc   :  { %v4601_v53 = vrot.slane %v4537_v21, %v9038_v49  ;;  %v4552_v27 = vpop.permute.xlu0 %4551 }
0x1fde   :  { %v4606_v59 = vsel %vm750_vm9, %v4605_v23, %v4601_v53 }
0x1fdf   :  { %v4543_v19 = vpop.permute.xlu1 %4542  ;;  %v4629_v38 = vsel %vm507_vm6, %v4606_v59, %v4628_v54 }
0x1fe0   :  { %v4610_v13 = vrot.slane %v4543_v19, %v9038_v49  ;;  %v4623_v19 = vrot.slane %v4552_v27, %v9033_v41 }
0x1fe2   :  { %v4615_v21 = vsel %vm750_vm9, %v4614_v17, %v4610_v13 }
0x1fe3   :  { %v4549_v56 = vpop.permute.xlu1 %4548  ;;  %v4630_v1 = vsel %vm509_vm7, %v4615_v21, %v4629_v38 }
0x1fe4   :  { %v4619_v51 = vrot.slane %v4549_v56, %v9038_v49 }
0x1fe6   :  { %v4624_v15 = vsel %vm750_vm9, %v4623_v19, %v4619_v51 }
0x1fe7   :  { %v4631_v25 = vsel %vm511_vm8, %v4624_v15, %v4630_v1 }
0x1fe8   :  { %v4633_v35 = vsel %vm823_vm10, %v4631_v25, 0.0 }
0x1fe9   :  { %4634 = vadd.xlane.f32.xlu1 %v4633_v35 }
0x2076   :  { %v4635_v31 = vpop.xlane.xlu1 %4634 }
0x2077   :  { %8506 = vrcp.f32 %v4635_v31 }
0x2081   :  { %v8507_v53 = vpop.eup %8506 }
0x2082   :  { %v4657_v24 = vrot.slane %v8507_v53, %v9138_v28  ;;  %v4641_v40 = vrot.slane %v8507_v53, %v8966_v48  ;;  %v4669_v13 = vrot.slane %v8507_v53, %v11845_v18  ;;  %v4645_v30 = vrot.slane %v8507_v53, %v9092_v34 }
0x2084   :  { %v4687_v23 = vmul.f32 %v10536_v8, %v4657_v24  ;;  %v4678_v2 = vmul.f32 %v10510_v12, %v4641_v40  ;;  %v4693_v3 = vmul.f32 %v10555_v14, %v4669_v13  ;;  %v4679_v17 = vmul.f32 %v10512_v33, %v4641_v40 }
0x2085   :  { %v4680_v27 = vmul.f32 %v10519_v0, %v4645_v30  ;;  %v4681_v32 = vmul.f32 %v10527_v60, %v4645_v30  ;;  %v4649_v8 = vrot.slane %v8507_v53, %v9114_v6  ;;  %v4653_v14 = vrot.slane %v8507_v53, %v9126_v22 }
0x2086   :  { %4741 = vperm.xlu1 %8226, %v4687_v23   ;;  %4696 = vperm.xlu0 %8227, %v4678_v2   ;;  %v4686_v0 = vmul.f32 %v10547_v4, %v4657_v24  ;;  %v4661_v60 = vrot.slane %v8507_v53, %v9095_v52 }
0x2087   :  { %v4682_v12 = vmul.f32 %v10534_v10, %v4649_v8  ;;  %v4683_v59 = vmul.f32 %v10521_v29, %v4649_v8  ;;  %v4684_v33 = vmul.f32 %v10541_v61, %v4653_v14  ;;  %v4685_v55 = vmul.f32 %v10529_v63, %v4653_v14 }
0x2088   :  { %v4688_v21 = vmul.f32 %v10553_v36, %v4661_v60  ;;  %v4689_v10 = vmul.f32 %v10543_v43, %v4661_v60  ;;  %v4665_v29 = vrot.slane %v8507_v53, %v11844_v5  ;;  %v4692_v63 = vmul.f32 %v10562_v58, %v4669_v13 }
0x208a   :  { %4771 = vperm.xlu1 %8226, %v4693_v3   ;;  %4701 = vperm.xlu0 %8227, %v4679_v17   ;;  %v4690_v56 = vmul.f32 %v10559_v26, %v4665_v29  ;;  %v4691_v61 = vmul.f32 %v10549_v62, %v4665_v29 }
0x208e   :  { %4706 = vperm.xlu0 %8227, %v4680_v27  }
0x2092   :  { %4711 = vperm.xlu0 %8227, %v4681_v32  }
0x2096   :  { %4716 = vperm.xlu0 %8227, %v4682_v12  }
0x209a   :  { %4721 = vperm.xlu0 %8227, %v4683_v59  }
0x209e   :  { %4726 = vperm.xlu0 %8227, %v4684_v33  }
0x20a2   :  { %4731 = vperm.xlu0 %8227, %v4685_v55  }
0x20a6   :  { %4736 = vperm.xlu0 %8227, %v4686_v0  }
0x20aa   :  { %4746 = vperm.xlu0 %8227, %v4688_v21  }
0x20ae   :  { %4751 = vperm.xlu0 %8227, %v4689_v10  }
0x20b2   :  { %4756 = vperm.xlu0 %8227, %v4690_v56  }
0x20b6   :  { %4761 = vperm.xlu0 %8227, %v4691_v61  }
0x20ba   :  { %4766 = vperm.xlu0 %8227, %v4692_v63  }
0x20be   :  { %4911 = vrot.lane.b32.xlu0 %v10344_v9, %s8689_s18 }
0x2105   :  { %v4697_v4 = vpop.permute.xlu0 %4696  ;;  %v4742_v58 = vpop.permute.xlu1 %4741 }
0x2106   :  { %v4774_v25 = vmul.f32 %v8847_v45, %v4697_v4  ;;  %v4783_v2 = vmul.f32 %v8903_v50, %v4742_v58 }
0x2108   :  { %v4790_v17 = vsel %vm116_vm0, %v4774_v25, 0.0  ;;  %v4827_v55 = vsel %vm116_vm0, %v4783_v2, 0.0 }
0x2109   :  { %v4702_v36 = vpop.permute.xlu0 %4701 }
0x210a   :  { %v4775_v26 = vmul.f32 %v8851_v47, %v4702_v36 }
0x210c   :  { %v4791_v40 = vsel %vm116_vm0, %v4775_v26, 0.0 }
0x210d   :  { %v4707_v54 = vpop.permute.xlu0 %4706  ;;  %v4792_v8 = vadd.f32 %v4791_v40, %v4790_v17 }
0x210e   :  { %v4776_v1 = vmul.f32 %v8845_v44, %v4707_v54 }
0x210f   :  { %v4793_v29 = vrot.slane %v4792_v8, 4 }
0x2110   :  { %v4799_v13 = vsel %vm116_vm0, %v4776_v1, 0.0 }
0x2111   :  { %v4712_v19 = vpop.permute.xlu0 %4711 }
0x2112   :  { %v4777_v15 = vmul.f32 %v8849_v46, %v4712_v19  ;;  %v4794_v19 = vadd.f32 %v4793_v29, %v4792_v8 }
0x2114   :  { %v4800_v31 = vsel %vm116_vm0, %v4777_v15, 0.0 }
0x2115   :  { %v4717_v43 = vpop.permute.xlu0 %4716  ;;  %v4801_v30 = vadd.f32 %v4800_v31, %v4799_v13 }
0x2116   :  { %v4778_v9 = vmul.f32 %v8883_v11, %v4717_v43 }
0x2117   :  { %v4802_v60 = vrot.slane %v4801_v30, 4 }
0x2118   :  { %v4808_v27 = vsel %vm116_vm0, %v4778_v9, 0.0  ;;  %v4795_v9 = vrot.slane %v4794_v19, 2 }
0x2119   :  { %v4722_v51 = vpop.permute.xlu0 %4721  ;;  %v4803_v36 = vadd.f32 %v4802_v60, %v4801_v30 }
0x211a   :  { %v4779_v62 = vmul.f32 %v8887_v20, %v4722_v51  ;;  %v4796_v17 = vadd.f32 %v4795_v9, %v4794_v19 }
0x211b   :  { %v4804_v1 = vrot.slane %v4803_v36, 2 }
0x211c   :  { %v4809_v23 = vsel %vm116_vm0, %v4779_v62, 0.0 }
0x211d   :  { %v4727_v38 = vpop.permute.xlu0 %4726  ;;  %v4810_v12 = vadd.f32 %v4809_v23, %v4808_v27  ;;  %v4772_v23 = vpop.permute.xlu1 %4771  ;;  %v4805_v2 = vadd.f32 %v4804_v1, %v4803_v36  ;;  %v11891_v27 = vld [vmem:[#allocation9_spill] sm:$0xff] }
0x211e   :  { %v4780_v53 = vmul.f32 %v8879_v7, %v4727_v38 }
0x211f   :  { %v4811_v56 = vrot.slane %v4810_v12, 4  ;;  %v4806_v60 = vrot.slane %v4805_v2, 1 }
0x2120   :  { %v4817_v59 = vsel %vm116_vm0, %v4780_v53, 0.0 }
0x2121   :  { %v4732_v35 = vpop.permute.xlu0 %4731  ;;  %v4812_v43 = vadd.f32 %v4811_v56, %v4810_v12  ;;  %v4797_v56 = vrot.slane %v4796_v17, 1 }
0x2122   :  { %v4781_v24 = vmul.f32 %v8885_v16, %v4732_v35 }
0x2123   :  { %v4813_v35 = vrot.slane %v4812_v43, 2  ;;  %v4798_v1 = vadd.f32 %v4797_v56, %v4796_v17 }
0x2124   :  { %v4818_v3 = vsel %vm116_vm0, %v4781_v24, 0.0 }
0x2125   :  { %v4737_v32 = vpop.permute.xlu0 %4736  ;;  %v4819_v33 = vadd.f32 %v4818_v3, %v4817_v59  ;;  %v4814_v30 = vadd.f32 %v4813_v35, %v4812_v43  ;;  %v11892_v59 = vld [vmem:[#allocation8_spill] sm:$0xff] }
0x2126   :  { %v4782_v14 = vmul.f32 %v8899_v39, %v4737_v32 }
0x2127   :  { %v4820_v61 = vrot.slane %v4819_v33, 4 }
0x2128   :  { %v4826_v0 = vsel %vm116_vm0, %v4782_v14, 0.0  ;;  %v4789_v14 = vmul.f32 %v11892_v59, %v4772_v23 }
0x2129   :  { %v4828_v21 = vadd.f32 %v4827_v55, %v4826_v0  ;;  %v4747_v10 = vpop.permute.xlu0 %4746  ;;  %v4821_v38 = vadd.f32 %v4820_v61, %v4819_v33  ;;  %v4815_v61 = vrot.slane %v4814_v30, 1 }
0x212a   :  { %v4784_v4 = vmul.f32 %v8897_v37, %v4747_v10  ;;  %v4854_v19 = vsel %vm116_vm0, %v4789_v14, 0.0 }
0x212b   :  { %v4829_v63 = vrot.slane %v4828_v21, 4  ;;  %v4822_v31 = vrot.slane %v4821_v38, 2 }
0x212c   :  { %v4835_v26 = vsel %vm116_vm0, %v4784_v4, 0.0 }
0x212d   :  { %v4752_v54 = vpop.permute.xlu0 %4751  ;;  %v4830_v15 = vadd.f32 %v4829_v63, %v4828_v21  ;;  %v4823_v8 = vadd.f32 %v4822_v31, %v4821_v38  ;;  %v11893_v63 = vld [vmem:[#allocation7_spill] sm:$0xff]  ;;  %v4807_v38 = vadd.f32 %v4806_v60, %v4805_v2 }
0x212e   :  { %v4785_v51 = vmul.f32 %v8901_v42, %v4752_v54 }
0x212f   :  { %v4831_v24 = vrot.slane %v4830_v15, 2  ;;  %v4824_v36 = vrot.slane %v4823_v8, 1  ;;  %v4870_v2 = vsel %vm499_vm2, %v4807_v38, %v4798_v1 }
0x2130   :  { %v4836_v62 = vsel %vm116_vm0, %v4785_v51, 0.0 }
0x2131   :  { %v4837_v58 = vadd.f32 %v4836_v62, %v4835_v26  ;;  %v4757_v25 = vpop.permute.xlu0 %4756  ;;  %v4832_v33 = vadd.f32 %v4831_v24, %v4830_v15 }
0x2132   :  { %v4786_v40 = vmul.f32 %v8864_v57, %v4757_v25  ;;  %v4825_v25 = vadd.f32 %v4824_v36, %v4823_v8 }
0x2133   :  { %v4838_v53 = vrot.slane %v4837_v58, 4  ;;  %v4833_v43 = vrot.slane %v4832_v33, 1 }
0x2134   :  { %v4844_v55 = vsel %vm116_vm0, %v4786_v40, 0.0 }
0x2135   :  { %v4839_v13 = vadd.f32 %v4838_v53, %v4837_v58  ;;  %v4762_v3 = vpop.permute.xlu0 %4761  ;;  %v4816_v58 = vadd.f32 %v4815_v61, %v4814_v30  ;;  %v4834_v31 = vadd.f32 %v4833_v43, %v4832_v33  ;;  %v4880_v53 = vpack.c.bf16 %v4807_v38, %v4807_v38 }
0x2136   :  { %v4787_v32 = vmul.f32 %v11891_v27, %v4762_v3 }
0x2137   :  { %v4840_v12 = vrot.slane %v4839_v13, 2  ;;  %v4881_v3 = vpack.c.bf16 %v4816_v58, %v4816_v58 }
0x2138   :  { %v4845_v0 = vsel %vm116_vm0, %v4787_v32, 0.0  ;;  %v4882_v32 = vpack.c.bf16 %v4825_v25, %v4825_v25 }
0x2139   :  { %v4841_v21 = vadd.f32 %v4840_v12, %v4839_v13  ;;  %v4846_v10 = vadd.f32 %v4845_v0, %v4844_v55  ;;  %v4767_v29 = vpop.permute.xlu0 %4766  ;;  %v4879_v13 = vpack.c.bf16 %v4798_v1, %v4798_v1  ;;  %v4883_v55 = vpack.c.bf16 %v4834_v31, %v4834_v31 }
0x213a   :  { %v4788_v4 = vmul.f32 %v11893_v63, %v4767_v29  ;;  %v4896_v0 = vunpack.c.l.b16 %v4880_v53  ;;  %v4897_v33 = vunpack.c.l.b16 %v4881_v3  ;;  %v4898_v29 = vunpack.c.l.b16 %v4882_v32  ;;  %v10684_v32 = vld [vmem:[%s11734_s7 + $0x8] sm:$0xff]  }
0x213b   :  { %v4847_v54 = vrot.slane %v4846_v10, 4  ;;  %v4842_v15 = vrot.slane %v4841_v21, 1  ;;  %v4895_v8 = vunpack.c.l.b16 %v4879_v13  ;;  %v4899_v36 = vunpack.c.l.b16 %v4883_v55  ;;  %v10675_v13 = vld [vmem:[%s11734_s7] sm:$0xff]   ;;  %11896 = vst [vmem:[#allocation11_spill] sm:$0xff] %v10684_v32 }
0x213c   :  { %v4853_v51 = vsel %vm116_vm0, %v4788_v4, 0.0  ;;  %11894 = vst [vmem:[#allocation13_spill] sm:$0xff] %v10675_v13  ;;  %v11895_v3 = vmov 0.0  }
0x213d   :  { %v4848_v26 = vadd.f32 %v4847_v54, %v4846_v10  ;;  %v4855_v62 = vadd.f32 %v4854_v19, %v4853_v51  ;;  %v4843_v24 = vadd.f32 %v4842_v15, %v4841_v21  ;;  %v4871_v10 = vsel %vm501_vm3, %v4816_v58, %v4870_v2 }
0x213e   :  { %v4872_v21 = vsel %vm503_vm4, %v4825_v25, %v4871_v10  ;;  %v4903_v54 = vsel %vm499_vm2, %v4896_v0, %v4895_v8 }
0x213f   :  { %v4849_v9 = vrot.slane %v4848_v26, 2  ;;  %v4856_v35 = vrot.slane %v4855_v62, 4  ;;  %v4884_v60 = vpack.c.bf16 %v4843_v24, %v4843_v24  ;;  %v4873_v4 = vsel %vm505_vm5, %v4834_v31, %v4872_v21 }
0x2140   :  { %v4874_v19 = vsel %vm507_vm6, %v4843_v24, %v4873_v4 }
0x2141   :  { %v4850_v40 = vadd.f32 %v4849_v9, %v4848_v26  ;;  %v4857_v23 = vadd.f32 %v4856_v35, %v4855_v62  ;;  %v4900_v43 = vunpack.c.l.b16 %v4884_v60  ;;  %v4904_v26 = vsel %vm501_vm3, %v4897_v33, %v4903_v54 }
0x2142   :  { %v4905_v58 = vsel %vm503_vm4, %v4898_v29, %v4904_v26  ;;  %v11902_v26 = vld [vmem:[#allocation12_spill] sm:$0xff] }
0x2143   :  { %v4851_v12 = vrot.slane %v4850_v40, 1  ;;  %v4858_v14 = vrot.slane %v4857_v23, 2  ;;  %v4906_v25 = vsel %vm505_vm5, %v4899_v36, %v4905_v58 }
0x2144   :  { %v4907_v35 = vsel %vm507_vm6, %v4900_v43, %v4906_v25 }
0x2145   :  { %v4852_v17 = vadd.f32 %v4851_v12, %v4850_v40  ;;  %v4859_v30 = vadd.f32 %v4858_v14, %v4857_v23  ;;  %v4912_v40 = vpop.permute.xlu0 %4911  ;;  %v11897_v14 = vld [vmem:[#allocation16_spill] sm:$0xff] }
0x2147   :  { %v4885_v56 = vpack.c.bf16 %v4852_v17, %v4852_v17  ;;  %v4860_v61 = vrot.slane %v4859_v30, 1  ;;  %v4875_v38 = vsel %vm509_vm7, %v4852_v17, %v4874_v19 }
0x2149   :  { %v4861_v51 = vadd.f32 %v4860_v61, %v4859_v30  ;;  %v4901_v15 = vunpack.c.l.b16 %v4885_v56  ;;  %v11898_v56 = vld [vmem:[#allocation22_spill] sm:$0xff] }
0x214b   :  { %v4876_v62 = vsel %vm511_vm8, %v4861_v51, %v4875_v38  ;;  %v4886_v1 = vpack.c.bf16 %v4861_v51, %v4861_v51  ;;  %v4908_v31 = vsel %vm509_vm7, %v4901_v15, %v4907_v35  ;;  %v11901_v15 = vld [vmem:[#allocation14_spill] sm:$0xff] }
0x214c   :  { %4878 = vst.msk [vmem:[#allocation3 + $0x20] sm:$0xff] %vm116_vm0, %v4876_v62  ;;  %v11903_v62 = vld [vmem:[#allocation24_spill] sm:$0xff] }
0x214d   :  { %v4902_v9 = vunpack.c.l.b16 %v4886_v1  ;;  %v11904_v1 = vld [vmem:[#allocation25_spill] sm:$0xff] }
0x214f   :  { %v4909_v53 = vsel %vm511_vm8, %v4902_v9, %v4908_v31  ;;  %v11905_v9 = vld [vmem:[#allocation19_spill] sm:$0xff] }
0x2150   :  { %v4910_v24 = vpack.c.b16 %v4909_v53, %v4909_v53 }
0x2152   :  { %v4915_v23 = vsel %vm116_vm0, %v4910_v24, %v4912_v40 }
0x2153   :  { %8134 = vmatmul.mubr.msk.bf16.vlgmr.msra.gmra.mrb[28].mxu0 %vm1367_vm11, %v4915_v23 }
0x2154   :  { %8158 = vmatpush3.bf16.msra.mxu0 %v10675_v13  ;;  %8161 = vmatprep.mubr.msk.bf16.mxu0 %vm8685_vm1, %v11895_v3 }
0x2155   :  { %8159 = vmatprep.subr.bf16.mxu0 %v11895_v3 }
0x2158   :  { %8160 = vmatpush3.bf16.msra.mxu0 %v10684_v32 }
0x2159   :  { %8165 = vmatprep.subr.bf16.mxu0 %v11895_v3 }
0x2226   :  { %v4952_v12 = vpop.f32.mrb[28].mxu0 }
0x2227   :  { %v4953_v2 = vadd.f32 %v4952_v12, %v11897_v14  ;;  %v8135_v55 = vpop.f32.mrb[29].mxu0 }
0x2228   :  { %v4955_v0 = vpop.f32.mrb[30].mxu0 }
0x2229   :  { %8508 = vtanh.f32 %v4953_v2  ;;  %v8136_v60 = vpop.f32.mrb[31].mxu0  ;;  %v7898_v30 = vmul.f32 -1.442695, %v4953_v2 }
0x222b   :  { %8510 = vpow2.f32 %v7898_v30 }
0x2233   :  { %v8509_v17 = vpop.eup %8508 }
0x2234   :  { %4967 = vrot.lane.b32.xlu1 %v8509_v17, %s8689_s18 }
0x2235   :  { %v8511_v8 = vpop.eup %8510 }
0x2236   :  { %v4961_v10 = vadd.f32 1.0, %v8511_v8 }
0x2238   :  { %8512 = vrcp.f32 %v4961_v10 }
0x2242   :  { %v8513_v33 = vpop.eup %8512 }
0x2243   :  { %v4965_v61 = vmul.f32 %v8513_v33, %v11898_v56 }
0x22a6   :  { %v4968_v21 = vpop.permute.xlu1 %4967 }
0x22a7   :  { %v4970_v29 = vmul.f32 %v8513_v33, %v4968_v21 }
0x22a9   :  { %4972 = vrot.lane.b32.xlu0 %v4970_v29, %s8688_s6 }
0x231b   :  { %v4973_v4 = vpop.permute.xlu0 %4972 }
0x231c   :  { %v10692_v36 = vadd.f32 %v4973_v4, %v4965_v61 }
0x231e   :  { %11899 = vst [vmem:[#allocation16_spill] sm:$0xff] %v10692_v36  ;;  %8514 = vtanh.f32 %v10692_v36 }
0x2328   :  { %v8515_v54 = vpop.eup %8514 }
0x2329   :  { %4978 = vrot.lane.b32.xlu1 %v8515_v54, %s8689_s18 }
0x239b   :  { %v4979_v19 = vpop.permute.xlu1 %4978 }
0x239c   :  { %v10696_v43 = vmul.f32 %v8513_v33, %v4979_v19 }
0x239e   :  { %11900 = vst [vmem:[#allocation22_spill] sm:$0xff] %v10696_v43  ;;  %v10700_v51 = vpack.c.bf16 %v10696_v43, %v10696_v43 }
0x23a0   :  { %4989 = vrot.lane.b32.xlu0 %v10700_v51, %s8688_s6 }
0x2412   :  { %v4990_v38 = vpop.permute.xlu0 %4989 }
0x2413   :  { %8142 = vmatmul.mubr.msk.bf16.vlgmr.msra.gmra.mrb[32].mxu1 %vm116_vm0, %v4990_v38 }
0x2414   :  { %8146 = vmatpush3.bf16.msra.mxu1 %v11901_v15  ;;  %8153 = vmatprep.mubr.msk.bf16.mxu1 %vm8685_vm1, %v11895_v3 }
0x2415   :  { %8147 = vmatprep.subr.bf16.mxu1 %v11895_v3 }
0x2418   :  { %8148 = vmatpush3.bf16.msra.mxu1 %v11902_v26 }
0x2419   :  { %8149 = vmatprep.subr.bf16.mxu1 %v11895_v3 }
0x241c   :  { %8150 = vmatpush3.bf16.msra.mxu1 %v11903_v62 }
0x241d   :  { %8151 = vmatprep.subr.bf16.mxu1 %v11895_v3 }
0x2420   :  { %8152 = vmatpush3.bf16.msra.mxu1 %v11904_v1 }
0x2421   :  { %8177 = vmatprep.subr.bf16.mxu1 %v11895_v3 }
0x24e6   :  { %v5028_v58 = vpop.f32.mrb[32].mxu1 }
0x24e7   :  { %v5035_v25 = vcombine.high %v5028_v58, %v5028_v58  ;;  %v5042_v35 = vrot.slane %v5028_v58, %v11905_v9  ;;  %v8143_v31 = vpop.f32.mrb[33].mxu1 }
0x24e8   :  { %v5031_v53 = vpop.f32.mrb[34].mxu1 }
0x24e9   :  { %v5050_v24 = vcombine.high %v5042_v35, %v5042_v35  ;;  %v5058_v40 = vrot.slane %v5042_v35, %v11905_v9  ;;  %v8144_v23 = vpop.f32.mrb[35].mxu1  ;;  %v5049_v12 = vrot.slane %v5035_v25, %v11905_v9 }
0x24eb   :  { %v5072_v14 = vrot.slane %v5050_v24, %v11905_v9  ;;  %v5080_v2 = vcombine.high %v5058_v40, %v5058_v40  ;;  %v5087_v55 = vrot.slane %v5058_v40, %v8966_v48  ;;  %v5065_v30 = vrot.slane %v5049_v12, %v11905_v9 }
0x24ec   :  { %v5051_v56 = vcombine.high %v5049_v12, %v5049_v12 }
0x24ed   :  { %v5091_v0 = vrot.slane %v5072_v14, %v8966_v48  ;;  %v5125_v60 = vmul.f32 %v8851_v47, %v5087_v55  ;;  %v5124_v17 = vmul.f32 %v8847_v45, %v5087_v55  ;;  %v5095_v8 = vrot.slane %v5080_v2, %v8966_v48 }
0x24ee   :  { %v5103_v61 = vrot.slane %v5065_v30, %v8966_v48  ;;  %v5082_v4 = vcombine.high %v5072_v14, %v5072_v14  ;;  %v5079_v62 = vrot.slane %v5051_v56, %v11905_v9  ;;  %v5081_v53 = vcombine.high %v5065_v30, %v5065_v30 }
0x24ef   :  { %v5143_v10 = vsel %vm116_vm0, %v5125_v60, 0.0  ;;  %v5140_v33 = vsel %vm116_vm0, %v5124_v17, 0.0  ;;  %v5127_v21 = vmul.f32 %v8849_v46, %v5091_v0  ;;  %v5126_v29 = vmul.f32 %v8845_v44, %v5091_v0 }
0x24f0   :  { %5144 = vadd.xlane.f32.xlu0 %v5143_v10  ;;  %5141 = vadd.xlane.f32.xlu1 %v5140_v33  ;;  %v5129_v38 = vmul.f32 %v8887_v20, %v5095_v8  ;;  %v5128_v15 = vmul.f32 %v8883_v11, %v5095_v8  ;;  %v5133_v26 = vmul.f32 %v8903_v50, %v5103_v61 }
0x24f1   :  { %v5149_v54 = vsel %vm116_vm0, %v5127_v21, 0.0  ;;  %v5146_v19 = vsel %vm116_vm0, %v5126_v29, 0.0  ;;  %v5132_v25 = vmul.f32 %v8899_v39, %v5103_v61  ;;  %v5099_v35 = vrot.slane %v5082_v4, %v8966_v48 }
0x24f2   :  { %v5155_v1 = vsel %vm116_vm0, %v5129_v38, 0.0  ;;  %v5152_v58 = vsel %vm116_vm0, %v5128_v15, 0.0  ;;  %v5167_v31 = vsel %vm116_vm0, %v5133_v26, 0.0  ;;  %v5107_v12 = vrot.slane %v5079_v62, %v8966_v48 }
0x24f3   :  { %v5164_v24 = vsel %vm116_vm0, %v5132_v25, 0.0  ;;  %v5131_v40 = vmul.f32 %v8885_v16, %v5099_v35  ;;  %v5130_v23 = vmul.f32 %v8879_v7, %v5099_v35  ;;  %v5111_v14 = vrot.slane %v5081_v53, %v8966_v48 }
0x24f4   :  { %5150 = vadd.xlane.f32.xlu1 %v5149_v54  ;;  %5147 = vadd.xlane.f32.xlu0 %v5146_v19  ;;  %v5083_v2 = vcombine.high %v5079_v62, %v5079_v62  ;;  %v5135_v60 = vmul.f32 %v8901_v42, %v5107_v12  ;;  %v5134_v17 = vmul.f32 %v8897_v37, %v5107_v12 }
0x24f5   :  { %v5161_v55 = vsel %vm116_vm0, %v5131_v40, 0.0  ;;  %v5158_v0 = vsel %vm116_vm0, %v5130_v23, 0.0  ;;  %v5137_v30 = vmul.f32 %v11891_v27, %v5111_v14  ;;  %v5136_v33 = vmul.f32 %v8864_v57, %v5111_v14 }
0x24f6   :  { %v5173_v8 = vsel %vm116_vm0, %v5135_v60, 0.0  ;;  %v5170_v10 = vsel %vm116_vm0, %v5134_v17, 0.0  ;;  %v5115_v21 = vrot.slane %v5083_v2, %v8966_v48 }
0x24f7   :  { %v5179_v29 = vsel %vm116_vm0, %v5137_v30, 0.0  ;;  %v5176_v56 = vsel %vm116_vm0, %v5136_v33, 0.0 }
0x24f8   :  { %5156 = vadd.xlane.f32.xlu1 %v5155_v1  ;;  %5153 = vadd.xlane.f32.xlu0 %v5152_v58  ;;  %v5139_v61 = vmul.f32 %v11892_v59, %v5115_v21  ;;  %v5138_v4 = vmul.f32 %v11893_v63, %v5115_v21 }
0x24fa   :  { %v5185_v54 = vsel %vm116_vm0, %v5139_v61, 0.0  ;;  %v5182_v19 = vsel %vm116_vm0, %v5138_v4, 0.0 }
0x24fc   :  { %5168 = vadd.xlane.f32.xlu1 %v5167_v31  ;;  %5165 = vadd.xlane.f32.xlu0 %v5164_v24 }
0x2500   :  { %5162 = vadd.xlane.f32.xlu1 %v5161_v55  ;;  %5159 = vadd.xlane.f32.xlu0 %v5158_v0 }
0x2504   :  { %5174 = vadd.xlane.f32.xlu1 %v5173_v8  ;;  %5171 = vadd.xlane.f32.xlu0 %v5170_v10 }
0x2508   :  { %5180 = vadd.xlane.f32.xlu1 %v5179_v29  ;;  %5177 = vadd.xlane.f32.xlu0 %v5176_v56 }
0x250c   :  { %5186 = vadd.xlane.f32.xlu1 %v5185_v54  ;;  %5183 = vadd.xlane.f32.xlu0 %v5182_v19 }
0x257d   :  { %v5145_v38 = vpop.xlane.xlu0 %5144  ;;  %v5142_v15 = vpop.xlane.xlu1 %5141 }
0x257e   :  { %v5211_v14 = vrot.slane %v5145_v38, %v9033_v41  ;;  %v5207_v2 = vrot.slane %v5142_v15, %v9038_v49 }
0x2580   :  { %v5212_v10 = vsel %vm750_vm9, %v5211_v14, %v5207_v2 }
0x2581   :  { %v10761_v26 = vpop.xlane.xlu1 %5150  ;;  %v5148_v62 = vpop.xlane.xlu0 %5147 }
0x2582   :  { %v5220_v24 = vrot.slane %v10761_v26, %v9033_v41  ;;  %v5216_v40 = vrot.slane %v5148_v62, %v9038_v49 }
0x2584   :  { %v5221_v30 = vsel %vm750_vm9, %v5220_v24, %v5216_v40 }
0x2585   :  { %v10763_v1 = vpop.xlane.xlu1 %5156  ;;  %v5154_v58 = vpop.xlane.xlu0 %5153  ;;  %v5276_v56 = vsel %vm499_vm2, %v5221_v30, %v5212_v10 }
0x2586   :  { %v5229_v23 = vrot.slane %v10763_v1, %v9033_v41  ;;  %v5225_v12 = vrot.slane %v5154_v58, %v9038_v49 }
0x2588   :  { %v5230_v8 = vsel %vm750_vm9, %v5229_v23, %v5225_v12 }
0x2589   :  { %v10765_v25 = vpop.xlane.xlu1 %5168  ;;  %v10767_v35 = vpop.xlane.xlu0 %5165  ;;  %v5277_v24 = vsel %vm501_vm3, %v5230_v8, %v5276_v56 }
0x258a   :  { %v5247_v61 = vrot.slane %v10765_v25, %v9033_v41  ;;  %v5243_v4 = vrot.slane %v10767_v35, %v9038_v49 }
0x258c   :  { %v5248_v2 = vsel %vm750_vm9, %v5247_v61, %v5243_v4 }
0x258d   :  { %v10769_v31 = vpop.xlane.xlu1 %5162  ;;  %v10771_v53 = vpop.xlane.xlu0 %5159 }
0x258e   :  { %v5238_v55 = vrot.slane %v10769_v31, %v9033_v41  ;;  %v5234_v0 = vrot.slane %v10771_v53, %v9038_v49 }
0x2590   :  { %v5239_v33 = vsel %vm750_vm9, %v5238_v55, %v5234_v0 }
0x2591   :  { %v10785_v60 = vpop.xlane.xlu1 %5174  ;;  %v10787_v17 = vpop.xlane.xlu0 %5171  ;;  %v5278_v12 = vsel %vm503_vm4, %v5239_v33, %v5277_v24 }
0x2592   :  { %v5256_v21 = vrot.slane %v10785_v60, %v9033_v41  ;;  %v5252_v29 = vrot.slane %v10787_v17, %v9038_v49  ;;  %v5279_v56 = vsel %vm505_vm5, %v5248_v2, %v5278_v12 }
0x2594   :  { %v5257_v14 = vsel %vm750_vm9, %v5256_v21, %v5252_v29 }
0x2595   :  { %v10802_v54 = vpop.xlane.xlu1 %5180  ;;  %v10804_v19 = vpop.xlane.xlu0 %5177  ;;  %v5280_v33 = vsel %vm507_vm6, %v5257_v14, %v5279_v56 }
0x2596   :  { %v5265_v40 = vrot.slane %v10802_v54, %v9033_v41  ;;  %v5261_v23 = vrot.slane %v10804_v19, %v9038_v49 }
0x2598   :  { %v5266_v30 = vsel %vm750_vm9, %v5265_v40, %v5261_v23 }
0x2599   :  { %v10814_v55 = vpop.xlane.xlu1 %5186  ;;  %v10816_v0 = vpop.xlane.xlu0 %5183  ;;  %v5281_v29 = vsel %vm509_vm7, %v5266_v30, %v5280_v33 }
0x259a   :  { %v5274_v8 = vrot.slane %v10814_v55, %v9033_v41  ;;  %v5270_v10 = vrot.slane %v10816_v0, %v9038_v49 }
0x259c   :  { %v5275_v21 = vsel %vm750_vm9, %v5274_v8, %v5270_v10 }
0x259d   :  { %v5282_v61 = vsel %vm511_vm8, %v5275_v21, %v5281_v29 }
0x259e   :  { %v5284_v4 = vsel %vm823_vm10, %v5282_v61, -inf }
0x259f   :  { %5285 = vmax.xlane.f32.xlu0 %v5284_v4 }
0x262c   :  { %v5286_v24 = vpop.xlane.xlu0 %5285 }
0x262d   :  { %v5291_v40 = vrot.slane %v5286_v24, %v8966_v48  ;;  %v5295_v23 = vrot.slane %v5286_v24, %v9092_v34  ;;  %v5299_v43 = vrot.slane %v5286_v24, %v9114_v6  ;;  %v5303_v14 = vrot.slane %v5286_v24, %v9126_v22 }
0x262e   :  { %v5307_v21 = vrot.slane %v5286_v24, %v9138_v28 }
0x262f   :  { %v5328_v9 = vsub.f32 %v5142_v15, %v5291_v40  ;;  %v5329_v12 = vsub.f32 %v5145_v38, %v5291_v40  ;;  %v5330_v2 = vsub.f32 %v5148_v62, %v5295_v23  ;;  %v5332_v8 = vsub.f32 %v5154_v58, %v5299_v43 }
0x2630   :  { %v5331_v56 = vsub.f32 %v10761_v26, %v5295_v23  ;;  %v5334_v29 = vsub.f32 %v10771_v53, %v5303_v14  ;;  %v5333_v4 = vsub.f32 %v10763_v1, %v5299_v43  ;;  %v5311_v15 = vrot.slane %v5286_v24, %v9095_v52 }
0x2631   :  { %v5344_v10 = vmul.f32 1.442695, %v5328_v9  ;;  %v5346_v30 = vmul.f32 1.442695, %v5329_v12  ;;  %v5348_v33 = vmul.f32 1.442695, %v5330_v2  ;;  %v5336_v62 = vsub.f32 %v10767_v35, %v5307_v21 }
0x2632   :  { %v5352_v61 = vmul.f32 1.442695, %v5332_v8  ;;  %v5350_v38 = vmul.f32 1.442695, %v5331_v56  ;;  %v5356_v9 = vmul.f32 1.442695, %v5334_v29  ;;  %v5335_v26 = vsub.f32 %v10769_v31, %v5303_v14 }
0x2633   :  { %8516 = vpow2.f32 %v5344_v10  ;;  %v5354_v58 = vmul.f32 1.442695, %v5333_v4  ;;  %v5315_v40 = vrot.slane %v5286_v24, %v11844_v5  ;;  %v5338_v53 = vsub.f32 %v10787_v17, %v5311_v15 }
0x2634   :  { %8518 = vpow2.f32 %v5346_v30  ;;  %v5360_v23 = vmul.f32 1.442695, %v5336_v62  ;;  %v5337_v1 = vsub.f32 %v10765_v25, %v5307_v21  ;;  %v5358_v35 = vmul.f32 1.442695, %v5335_v26 }
0x2635   :  { %8520 = vpow2.f32 %v5348_v33  ;;  %v5319_v31 = vrot.slane %v5286_v24, %v11845_v18  ;;  %v5340_v2 = vsub.f32 %v10804_v19, %v5315_v40  ;;  %v5364_v17 = vmul.f32 1.442695, %v5338_v53 }
0x2636   :  { %8522 = vpow2.f32 %v5352_v61  ;;  %v5339_v10 = vsub.f32 %v10785_v60, %v5311_v15  ;;  %v5362_v25 = vmul.f32 1.442695, %v5337_v1  ;;  %v5341_v33 = vsub.f32 %v10802_v54, %v5315_v40 }
0x2637   :  { %8524 = vpow2.f32 %v5350_v38  ;;  %v5342_v30 = vsub.f32 %v10816_v0, %v5319_v31  ;;  %v5368_v24 = vmul.f32 1.442695, %v5340_v2  ;;  %v5343_v0 = vsub.f32 %v10814_v55, %v5319_v31 }
0x2638   :  { %8526 = vpow2.f32 %v5356_v9  ;;  %v5366_v21 = vmul.f32 1.442695, %v5339_v10  ;;  %v5370_v4 = vmul.f32 1.442695, %v5341_v33 }
0x2639   :  { %8528 = vpow2.f32 %v5354_v58  ;;  %v5372_v60 = vmul.f32 1.442695, %v5342_v30  ;;  %v5374_v15 = vmul.f32 1.442695, %v5343_v0 }
0x263a   :  { %8530 = vpow2.f32 %v5360_v23 }
0x263b   :  { %8532 = vpow2.f32 %v5358_v35 }
0x263c   :  { %8534 = vpow2.f32 %v5364_v17 }
0x263d   :  { %v10842_v12 = vpop.eup %8516  ;;  %8536 = vpow2.f32 %v5362_v25 }
0x263e   :  { %v10844_v43 = vpop.eup %8518  ;;  %5393 = vperm.xlu1 %8226, %v10842_v12   ;;  %8538 = vpow2.f32 %v5368_v24 }
0x263f   :  { %5396 = vperm.xlu0 %8227, %v10844_v43   ;;  %v10851_v14 = vpop.eup %8520  ;;  %8540 = vpow2.f32 %v5366_v21 }
0x2640   :  { %v10853_v8 = vpop.eup %8522  ;;  %8542 = vpow2.f32 %v5372_v60 }
0x2641   :  { %v10859_v56 = vpop.eup %8524  ;;  %8544 = vpow2.f32 %v5370_v4 }
0x2642   :  { %5399 = vperm.xlu1 %8226, %v10851_v14   ;;  %v10861_v19 = vpop.eup %8526  ;;  %8546 = vpow2.f32 %v5374_v15 }
0x2643   :  { %5405 = vperm.xlu0 %8227, %v10853_v8   ;;  %v10866_v29 = vpop.eup %8528 }
0x2644   :  { %v10868_v61 = vpop.eup %8530 }
0x2645   :  { %v10873_v54 = vpop.eup %8532 }
0x2646   :  { %5402 = vperm.xlu1 %8226, %v10859_v56   ;;  %v10875_v38 = vpop.eup %8534 }
0x2647   :  { %5411 = vperm.xlu0 %8227, %v10861_v19   ;;  %v10879_v62 = vpop.eup %8536 }
0x2648   :  { %v10881_v9 = vpop.eup %8538 }
0x2649   :  { %v10885_v55 = vpop.eup %8540 }
0x264a   :  { %5408 = vperm.xlu1 %8226, %v10866_v29   ;;  %v10887_v26 = vpop.eup %8542 }
0x264b   :  { %5417 = vperm.xlu0 %8227, %v10868_v61   ;;  %v10891_v58 = vpop.eup %8544 }
0x264c   :  { %v8547_v40 = vpop.eup %8546 }
0x264e   :  { %5414 = vperm.xlu1 %8226, %v10873_v54  }
0x264f   :  { %5423 = vperm.xlu0 %8227, %v10875_v38  }
0x2652   :  { %5420 = vperm.xlu1 %8226, %v10879_v62  }
0x2653   :  { %5429 = vperm.xlu0 %8227, %v10881_v9  }
0x2656   :  { %5426 = vperm.xlu1 %8226, %v10885_v55  }
0x2657   :  { %5435 = vperm.xlu0 %8227, %v10887_v26  }
0x265a   :  { %5432 = vperm.xlu1 %8226, %v10891_v58  }
0x265e   :  { %5438 = vperm.xlu1 %8226, %v8547_v40  }
0x26bd   :  { %v5394_v53 = vpop.permute.xlu1 %5393 }
0x26be   :  { %v5397_v23 = vpop.permute.xlu0 %5396  ;;  %v5443_v15 = vrot.slane %v5394_v53, %v9038_v49 }
0x26bf   :  { %v5447_v4 = vrot.slane %v5397_v23, %v9033_v41 }
0x26c1   :  { %v5400_v1 = vpop.permute.xlu1 %5399  ;;  %v5448_v53 = vsel %vm750_vm9, %v5447_v4, %v5443_v15 }
0x26c2   :  { %v5406_v35 = vpop.permute.xlu0 %5405  ;;  %v5452_v36 = vrot.slane %v5400_v1, %v9038_v49 }
0x26c3   :  { %v5461_v3 = vrot.slane %v5406_v35, %v9038_v49 }
0x26c5   :  { %v5403_v31 = vpop.permute.xlu1 %5402 }
0x26c6   :  { %v5412_v2 = vpop.permute.xlu0 %5411  ;;  %v5456_v33 = vrot.slane %v5403_v31, %v9033_v41 }
0x26c7   :  { %v5470_v63 = vrot.slane %v5412_v2, %v9038_v49 }
0x26c8   :  { %v5457_v31 = vsel %vm750_vm9, %v5456_v33, %v5452_v36 }
0x26c9   :  { %v5409_v17 = vpop.permute.xlu1 %5408 }
0x26ca   :  { %v5418_v10 = vpop.permute.xlu0 %5417  ;;  %v5465_v21 = vrot.slane %v5409_v17, %v9033_v41 }
0x26cb   :  { %v5479_v59 = vrot.slane %v5418_v10, %v9038_v49 }
0x26cc   :  { %v5466_v23 = vsel %vm750_vm9, %v5465_v21, %v5461_v3 }
0x26cd   :  { %v5415_v25 = vpop.permute.xlu1 %5414 }
0x26ce   :  { %v5424_v30 = vpop.permute.xlu0 %5423  ;;  %v5474_v32 = vrot.slane %v5415_v25, %v9033_v41 }
0x26cf   :  { %v5488_v1 = vrot.slane %v5424_v30, %v9038_v49 }
0x26d0   :  { %v5475_v25 = vsel %vm750_vm9, %v5474_v32, %v5470_v63 }
0x26d1   :  { %v5421_v24 = vpop.permute.xlu1 %5420 }
0x26d2   :  { %v5430_v60 = vpop.permute.xlu0 %5429  ;;  %v5483_v13 = vrot.slane %v5421_v24, %v9033_v41  ;;  %v5512_v24 = vsel %vm499_vm2, %v5457_v31, %v5448_v53 }
0x26d3   :  { %v5497_v2 = vrot.slane %v5430_v60, %v9038_v49  ;;  %v5513_v10 = vsel %vm501_vm3, %v5466_v23, %v5512_v24 }
0x26d4   :  { %v5484_v36 = vsel %vm750_vm9, %v5483_v13, %v5479_v59  ;;  %v5514_v21 = vsel %vm503_vm4, %v5475_v25, %v5513_v10 }
0x26d5   :  { %v5427_v0 = vpop.permute.xlu1 %5426  ;;  %v5515_v63 = vsel %vm505_vm5, %v5484_v36, %v5514_v21 }
0x26d6   :  { %v5492_v17 = vrot.slane %v5427_v0, %v9033_v41  ;;  %v5436_v33 = vpop.permute.xlu0 %5435 }
0x26d8   :  { %v5493_v3 = vsel %vm750_vm9, %v5492_v17, %v5488_v1 }
0x26d9   :  { %v5433_v27 = vpop.permute.xlu1 %5432  ;;  %v5516_v60 = vsel %vm507_vm6, %v5493_v3, %v5515_v63 }
0x26da   :  { %v5501_v35 = vrot.slane %v5433_v27, %v9033_v41  ;;  %v5506_v27 = vrot.slane %v5436_v33, %v9038_v49 }
0x26dc   :  { %v5502_v0 = vsel %vm750_vm9, %v5501_v35, %v5497_v2 }
0x26dd   :  { %v5439_v30 = vpop.permute.xlu1 %5438  ;;  %v5517_v13 = vsel %vm509_vm7, %v5502_v0, %v5516_v60 }
0x26de   :  { %v5510_v32 = vrot.slane %v5439_v30, %v9033_v41 }
0x26e0   :  { %v5511_v59 = vsel %vm750_vm9, %v5510_v32, %v5506_v27 }
0x26e1   :  { %v5518_v4 = vsel %vm511_vm8, %v5511_v59, %v5517_v13 }
0x26e2   :  { %v5520_v15 = vsel %vm823_vm10, %v5518_v4, 0.0 }
0x26e3   :  { %5521 = vadd.xlane.f32.xlu0 %v5520_v15 }
0x2770   :  { %v5522_v31 = vpop.xlane.xlu0 %5521 }
0x2771   :  { %8548 = vrcp.f32 %v5522_v31 }
0x277b   :  { %v8549_v17 = vpop.eup %8548 }
0x277c   :  { %v5544_v23 = vrot.slane %v8549_v17, %v9138_v28  ;;  %v5528_v53 = vrot.slane %v8549_v17, %v8966_v48  ;;  %v5556_v35 = vrot.slane %v8549_v17, %v11845_v18  ;;  %v5532_v36 = vrot.slane %v8549_v17, %v9092_v34 }
0x277e   :  { %v5573_v1 = vmul.f32 %v10868_v61, %v5544_v23  ;;  %v5565_v25 = vmul.f32 %v10842_v12, %v5528_v53  ;;  %v5580_v24 = vmul.f32 %v8547_v40, %v5556_v35  ;;  %v5566_v2 = vmul.f32 %v10844_v43, %v5528_v53 }
0x277f   :  { %v5567_v33 = vmul.f32 %v10851_v14, %v5532_v36  ;;  %v5568_v10 = vmul.f32 %v10859_v56, %v5532_v36  ;;  %v5536_v61 = vrot.slane %v8549_v17, %v9114_v6  ;;  %v5540_v40 = vrot.slane %v8549_v17, %v9126_v22 }
0x2780   :  { %5623 = vperm.xlu0 %8227, %v5573_v1   ;;  %5583 = vperm.xlu1 %8226, %v5565_v25   ;;  %v5574_v14 = vmul.f32 %v10879_v62, %v5544_v23  ;;  %v5548_v56 = vrot.slane %v8549_v17, %v9095_v52 }
0x2781   :  { %v5569_v12 = vmul.f32 %v10853_v8, %v5536_v61  ;;  %v5570_v3 = vmul.f32 %v10866_v29, %v5536_v61  ;;  %v5571_v43 = vmul.f32 %v10861_v19, %v5540_v40  ;;  %v5572_v21 = vmul.f32 %v10873_v54, %v5540_v40 }
0x2782   :  { %v5575_v0 = vmul.f32 %v10875_v38, %v5548_v56  ;;  %v5576_v8 = vmul.f32 %v10885_v55, %v5548_v56  ;;  %v5552_v29 = vrot.slane %v8549_v17, %v11844_v5  ;;  %v5579_v54 = vmul.f32 %v10887_v26, %v5556_v35 }
0x2784   :  { %5658 = vperm.xlu0 %8227, %v5580_v24   ;;  %5588 = vperm.xlu1 %8226, %v5566_v2   ;;  %v5577_v30 = vmul.f32 %v10881_v9, %v5552_v29  ;;  %v5578_v19 = vmul.f32 %v10891_v58, %v5552_v29 }
0x2788   :  { %5593 = vperm.xlu1 %8226, %v5567_v33  }
0x278c   :  { %5598 = vperm.xlu1 %8226, %v5568_v10  }
0x2790   :  { %5603 = vperm.xlu1 %8226, %v5569_v12  }
0x2794   :  { %5608 = vperm.xlu1 %8226, %v5570_v3  }
0x2798   :  { %5613 = vperm.xlu1 %8226, %v5571_v43  }
0x279c   :  { %5618 = vperm.xlu1 %8226, %v5572_v21  }
0x27a0   :  { %5628 = vperm.xlu1 %8226, %v5574_v14  }
0x27a4   :  { %5633 = vperm.xlu1 %8226, %v5575_v0  }
0x27a8   :  { %5638 = vperm.xlu1 %8226, %v5576_v8  }
0x27ac   :  { %5643 = vperm.xlu1 %8226, %v5577_v30  }
0x27b0   :  { %5648 = vperm.xlu1 %8226, %v5578_v19  }
0x27b4   :  { %5653 = vperm.xlu1 %8226, %v5579_v54  }
0x27b8   :  { %5798 = vrot.lane.b32.xlu1 %v10700_v51, %s8689_s18 }
0x27ff   :  { %v5584_v62 = vpop.permute.xlu1 %5583  ;;  %v5624_v26 = vpop.permute.xlu0 %5623 }
0x2800   :  { %v5661_v4 = vmul.f32 %v8847_v45, %v5584_v62  ;;  %v5669_v25 = vmul.f32 %v8899_v39, %v5624_v26 }
0x2802   :  { %v5677_v2 = vsel %vm116_vm0, %v5661_v4, 0.0  ;;  %v5713_v21 = vsel %vm116_vm0, %v5669_v25, 0.0 }
0x2803   :  { %v5589_v38 = vpop.permute.xlu1 %5588 }
0x2804   :  { %v5662_v9 = vmul.f32 %v8851_v47, %v5589_v38 }
0x2806   :  { %v5678_v53 = vsel %vm116_vm0, %v5662_v9, 0.0 }
0x2807   :  { %v5594_v63 = vpop.permute.xlu1 %5593  ;;  %v5679_v61 = vadd.f32 %v5678_v53, %v5677_v2 }
0x2808   :  { %v5663_v13 = vmul.f32 %v8845_v44, %v5594_v63 }
0x2809   :  { %v5680_v29 = vrot.slane %v5679_v61, 4 }
0x280a   :  { %v5686_v35 = vsel %vm116_vm0, %v5663_v13, 0.0 }
0x280b   :  { %v5599_v27 = vpop.permute.xlu1 %5598 }
0x280c   :  { %v5664_v59 = vmul.f32 %v8849_v46, %v5599_v27  ;;  %v5681_v27 = vadd.f32 %v5680_v29, %v5679_v61 }
0x280e   :  { %v5687_v31 = vsel %vm116_vm0, %v5664_v59, 0.0 }
0x280f   :  { %v5604_v55 = vpop.permute.xlu1 %5603  ;;  %v5688_v36 = vadd.f32 %v5687_v31, %v5686_v35 }
0x2810   :  { %v5665_v51 = vmul.f32 %v8883_v11, %v5604_v55 }
0x2811   :  { %v5689_v56 = vrot.slane %v5688_v36, 4 }
0x2812   :  { %v5695_v33 = vsel %vm116_vm0, %v5665_v51, 0.0  ;;  %v5682_v51 = vrot.slane %v5681_v27, 2 }
0x2813   :  { %v5609_v32 = vpop.permute.xlu1 %5608  ;;  %v5690_v38 = vadd.f32 %v5689_v56, %v5688_v36 }
0x2814   :  { %v5666_v58 = vmul.f32 %v8887_v20, %v5609_v32  ;;  %v5683_v2 = vadd.f32 %v5682_v51, %v5681_v27 }
0x2815   :  { %v5691_v13 = vrot.slane %v5690_v38, 2 }
0x2816   :  { %v5696_v1 = vsel %vm116_vm0, %v5666_v58, 0.0 }
0x2817   :  { %v5614_v60 = vpop.permute.xlu1 %5613  ;;  %v5697_v12 = vadd.f32 %v5696_v1, %v5695_v33  ;;  %v5659_v1 = vpop.permute.xlu0 %5658  ;;  %v5692_v25 = vadd.f32 %v5691_v13, %v5690_v38  ;;  %v11906_v33 = vld [vmem:[#allocation9_spill] sm:$0xff] }
0x2818   :  { %v5667_v17 = vmul.f32 %v8879_v7, %v5614_v60 }
0x2819   :  { %v5698_v30 = vrot.slane %v5697_v12, 4  ;;  %v5693_v56 = vrot.slane %v5692_v25, 1 }
0x281a   :  { %v5704_v3 = vsel %vm116_vm0, %v5667_v17, 0.0 }
0x281b   :  { %v5619_v15 = vpop.permute.xlu1 %5618  ;;  %v5699_v55 = vadd.f32 %v5698_v30, %v5697_v12  ;;  %v5684_v30 = vrot.slane %v5683_v2, 1 }
0x281c   :  { %v5668_v23 = vmul.f32 %v8885_v16, %v5619_v15 }
0x281d   :  { %v5700_v15 = vrot.slane %v5699_v55, 2  ;;  %v5685_v13 = vadd.f32 %v5684_v30, %v5683_v2 }
0x281e   :  { %v5705_v24 = vsel %vm116_vm0, %v5668_v23, 0.0 }
0x281f   :  { %v5629_v10 = vpop.permute.xlu1 %5628  ;;  %v5706_v43 = vadd.f32 %v5705_v24, %v5704_v3  ;;  %v5701_v36 = vadd.f32 %v5700_v15, %v5699_v55  ;;  %v11907_v3 = vld [vmem:[#allocation8_spill] sm:$0xff] }
0x2820   :  { %v5670_v40 = vmul.f32 %v8903_v50, %v5629_v10 }
0x2821   :  { %v5707_v19 = vrot.slane %v5706_v43, 4 }
0x2822   :  { %v5714_v14 = vsel %vm116_vm0, %v5670_v40, 0.0  ;;  %v5676_v40 = vmul.f32 %v11907_v3, %v5659_v1 }
0x2823   :  { %v5715_v0 = vadd.f32 %v5714_v14, %v5713_v21  ;;  %v5634_v8 = vpop.permute.xlu1 %5633  ;;  %v5708_v60 = vadd.f32 %v5707_v19, %v5706_v43  ;;  %v5702_v19 = vrot.slane %v5701_v36, 1 }
0x2824   :  { %v5671_v62 = vmul.f32 %v8897_v37, %v5634_v8  ;;  %v5741_v27 = vsel %vm116_vm0, %v5676_v40, 0.0 }
0x2825   :  { %v5716_v54 = vrot.slane %v5715_v0, 4  ;;  %v5709_v31 = vrot.slane %v5708_v60, 2 }
0x2826   :  { %v5722_v9 = vsel %vm116_vm0, %v5671_v62, 0.0 }
0x2827   :  { %v5639_v63 = vpop.permute.xlu1 %5638  ;;  %v5717_v59 = vadd.f32 %v5716_v54, %v5715_v0  ;;  %v5710_v61 = vadd.f32 %v5709_v31, %v5708_v60  ;;  %v11908_v54 = vld [vmem:[#allocation7_spill] sm:$0xff]  ;;  %v5694_v60 = vadd.f32 %v5693_v56, %v5692_v25 }
0x2828   :  { %v5672_v32 = vmul.f32 %v8901_v42, %v5639_v63 }
0x2829   :  { %v5718_v23 = vrot.slane %v5717_v59, 2  ;;  %v5711_v38 = vrot.slane %v5710_v61, 1  ;;  %v5757_v25 = vsel %vm499_vm2, %v5694_v60, %v5685_v13 }
0x282a   :  { %v5723_v58 = vsel %vm116_vm0, %v5672_v32, 0.0 }
0x282b   :  { %v5724_v26 = vadd.f32 %v5723_v58, %v5722_v9  ;;  %v5644_v4 = vpop.permute.xlu1 %5643  ;;  %v5719_v43 = vadd.f32 %v5718_v23, %v5717_v59 }
0x282c   :  { %v5673_v53 = vmul.f32 %v8864_v57, %v5644_v4  ;;  %v5712_v4 = vadd.f32 %v5711_v38, %v5710_v61 }
0x282d   :  { %v5725_v17 = vrot.slane %v5724_v26, 4  ;;  %v5720_v55 = vrot.slane %v5719_v43, 1 }
0x282e   :  { %v5731_v21 = vsel %vm116_vm0, %v5673_v53, 0.0 }
0x282f   :  { %v5726_v35 = vadd.f32 %v5725_v17, %v5724_v26  ;;  %v5649_v24 = vpop.permute.xlu1 %5648  ;;  %v5703_v26 = vadd.f32 %v5702_v19, %v5701_v36  ;;  %v5721_v31 = vadd.f32 %v5720_v55, %v5719_v43  ;;  %v5767_v17 = vpack.c.bf16 %v5694_v60, %v5694_v60 }
0x2830   :  { %v5674_v10 = vmul.f32 %v11906_v33, %v5649_v24 }
0x2831   :  { %v5727_v12 = vrot.slane %v5726_v35, 2  ;;  %v5768_v24 = vpack.c.bf16 %v5703_v26, %v5703_v26 }
0x2832   :  { %v5732_v14 = vsel %vm116_vm0, %v5674_v10, 0.0  ;;  %v5769_v10 = vpack.c.bf16 %v5712_v4, %v5712_v4 }
0x2833   :  { %v5728_v0 = vadd.f32 %v5727_v12, %v5726_v35  ;;  %v5733_v8 = vadd.f32 %v5732_v14, %v5731_v21  ;;  %v5654_v29 = vpop.permute.xlu1 %5653  ;;  %v5766_v35 = vpack.c.bf16 %v5685_v13, %v5685_v13  ;;  %v5770_v21 = vpack.c.bf16 %v5721_v31, %v5721_v31 }
0x2834   :  { %v5675_v62 = vmul.f32 %v11908_v54, %v5654_v29  ;;  %v5783_v14 = vunpack.c.l.b16 %v5767_v17  ;;  %v5784_v43 = vunpack.c.l.b16 %v5768_v24  ;;  %v5785_v29 = vunpack.c.l.b16 %v5769_v10  ;;  %v11911_v10 = vld [vmem:[#allocation11_spill] sm:$0xff] }
0x2835   :  { %v5734_v63 = vrot.slane %v5733_v8, 4  ;;  %v5729_v59 = vrot.slane %v5728_v0, 1  ;;  %v5782_v61 = vunpack.c.l.b16 %v5766_v35  ;;  %v5786_v38 = vunpack.c.l.b16 %v5770_v21  ;;  %v11909_v35 = vld [vmem:[#allocation13_spill] sm:$0xff] }
0x2836   :  { %v5740_v32 = vsel %vm116_vm0, %v5675_v62, 0.0  ;;  %v11910_v24 = vmov 0.0  }
0x2837   :  { %v5735_v9 = vadd.f32 %v5734_v63, %v5733_v8  ;;  %v5742_v58 = vadd.f32 %v5741_v27, %v5740_v32  ;;  %v5730_v23 = vadd.f32 %v5729_v59, %v5728_v0  ;;  %v5758_v8 = vsel %vm501_vm3, %v5703_v26, %v5757_v25 }
0x2838   :  { %v5759_v0 = vsel %vm503_vm4, %v5712_v4, %v5758_v8  ;;  %v5790_v63 = vsel %vm499_vm2, %v5783_v14, %v5782_v61 }
0x2839   :  { %v5736_v51 = vrot.slane %v5735_v9, 2  ;;  %v5743_v15 = vrot.slane %v5742_v58, 4  ;;  %v5771_v56 = vpack.c.bf16 %v5730_v23, %v5730_v23  ;;  %v5760_v62 = vsel %vm505_vm5, %v5721_v31, %v5759_v0 }
0x283a   :  { %v5761_v27 = vsel %vm507_vm6, %v5730_v23, %v5760_v62 }
0x283b   :  { %v5737_v53 = vadd.f32 %v5736_v51, %v5735_v9  ;;  %v5744_v1 = vadd.f32 %v5743_v15, %v5742_v58  ;;  %v5787_v55 = vunpack.c.l.b16 %v5771_v56  ;;  %v5791_v9 = vsel %vm501_vm3, %v5784_v43, %v5790_v63 }
0x283c   :  { %v5792_v26 = vsel %vm503_vm4, %v5785_v29, %v5791_v9  ;;  %v11035_v9 = vld [vmem:[%s11732_s5 + $0x8] sm:$0xff]  }
0x283d   :  { %v5738_v12 = vrot.slane %v5737_v53, 1  ;;  %v5745_v40 = vrot.slane %v5744_v1, 2  ;;  %v5793_v4 = vsel %vm505_vm5, %v5786_v38, %v5792_v26  ;;  %11917 = vst [vmem:[#allocation25_spill] sm:$0xff] %v11035_v9 }
0x283e   :  { %v5794_v15 = vsel %vm507_vm6, %v5787_v55, %v5793_v4 }
0x283f   :  { %v5739_v2 = vadd.f32 %v5738_v12, %v5737_v53  ;;  %v5746_v36 = vadd.f32 %v5745_v40, %v5744_v1  ;;  %v5799_v53 = vpop.permute.xlu1 %5798  ;;  %v11912_v40 = vld [vmem:[#allocation18_spill] sm:$0xff] }
0x2841   :  { %v5772_v30 = vpack.c.bf16 %v5739_v2, %v5739_v2  ;;  %v5747_v19 = vrot.slane %v5746_v36, 1  ;;  %v5762_v60 = vsel %vm509_vm7, %v5739_v2, %v5761_v27 }
0x2843   :  { %v5748_v32 = vadd.f32 %v5747_v19, %v5746_v36  ;;  %v5788_v59 = vunpack.c.l.b16 %v5772_v30  ;;  %v11913_v30 = vld [vmem:[#allocation16_spill] sm:$0xff] }
0x2845   :  { %v5763_v58 = vsel %vm511_vm8, %v5748_v32, %v5762_v60  ;;  %v5773_v13 = vpack.c.bf16 %v5748_v32, %v5748_v32  ;;  %v5795_v31 = vsel %vm509_vm7, %v5788_v59, %v5794_v15  ;;  %v11026_v59 = vld [vmem:[%s11732_s5] sm:$0xff]  }
0x2846   :  { %5765 = vst.msk [vmem:[#allocation3 + $0x28] sm:$0xff] %vm116_vm0, %v5763_v58  ;;  %11916 = vst [vmem:[#allocation24_spill] sm:$0xff] %v11026_v59  ;;  %v11042_v58 = vld [vmem:[%s11732_s5 + $0x10] sm:$0xff]  }
0x2847   :  { %v5789_v51 = vunpack.c.l.b16 %v5773_v13  ;;  %11918 = vst [vmem:[#allocation13_spill] sm:$0xff] %v11042_v58  ;;  %v11049_v13 = vld [vmem:[%s11732_s5 + $0x18] sm:$0xff]  }
0x2848   :  { %11919 = vst [vmem:[#allocation11_spill] sm:$0xff] %v11049_v13 }
0x2849   :  { %v5796_v17 = vsel %vm511_vm8, %v5789_v51, %v5795_v31  ;;  %v11920_v51 = vld [vmem:[#allocation19_spill] sm:$0xff] }
0x284a   :  { %v5797_v23 = vpack.c.b16 %v5796_v17, %v5796_v17 }
0x284c   :  { %v5802_v1 = vsel %vm116_vm0, %v5797_v23, %v5799_v53 }
0x284d   :  { %8154 = vmatmul.mubr.msk.bf16.vlgmr.msra.gmra.mrb[36].mxu1 %vm1367_vm11, %v5802_v1 }
0x284e   :  { %8178 = vmatpush3.bf16.msra.mxu1 %v11909_v35  ;;  %8181 = vmatprep.mubr.msk.bf16.mxu1 %vm8685_vm1, %v11910_v24 }
0x284f   :  { %8179 = vmatprep.subr.bf16.mxu1 %v11910_v24 }
0x2852   :  { %8180 = vmatpush3.bf16.msra.mxu1 %v11911_v10 }
0x2853   :  { %8185 = vmatprep.subr.bf16.mxu1 %v11910_v24 }
0x2920   :  { %v5839_v12 = vpop.f32.mrb[36].mxu1 }
0x2921   :  { %v5840_v25 = vadd.f32 %v5839_v12, %v11912_v40  ;;  %v8155_v21 = vpop.f32.mrb[37].mxu1 }
0x2922   :  { %v5842_v14 = vpop.f32.mrb[38].mxu1 }
0x2923   :  { %8550 = vtanh.f32 %v5840_v25  ;;  %v8156_v56 = vpop.f32.mrb[39].mxu1  ;;  %v7901_v36 = vmul.f32 -1.442695, %v5840_v25 }
0x2925   :  { %8552 = vpow2.f32 %v7901_v36 }
0x292d   :  { %v8551_v2 = vpop.eup %8550 }
0x292e   :  { %5854 = vrot.lane.b32.xlu0 %v8551_v2, %s8689_s18 }
0x292f   :  { %v8553_v61 = vpop.eup %8552 }
0x2930   :  { %v5848_v8 = vadd.f32 1.0, %v8553_v61 }
0x2932   :  { %8554 = vrcp.f32 %v5848_v8 }
0x293c   :  { %v8555_v43 = vpop.eup %8554 }
0x293d   :  { %v5852_v19 = vmul.f32 %v8555_v43, %v11913_v30 }
0x29a0   :  { %v5855_v0 = vpop.permute.xlu0 %5854 }
0x29a1   :  { %v5857_v29 = vmul.f32 %v8555_v43, %v5855_v0 }
0x29a3   :  { %5859 = vrot.lane.b32.xlu1 %v5857_v29, %s8688_s6 }
0x2a15   :  { %v5860_v62 = vpop.permute.xlu1 %5859 }
0x2a16   :  { %v11010_v38 = vadd.f32 %v5860_v62, %v5852_v19 }
0x2a18   :  { %11914 = vst [vmem:[#allocation14_spill] sm:$0xff] %v11010_v38  ;;  %8556 = vtanh.f32 %v11010_v38 }
0x2a22   :  { %v8557_v63 = vpop.eup %8556 }
0x2a23   :  { %5865 = vrot.lane.b32.xlu0 %v8557_v63, %s8689_s18 }
0x2a95   :  { %v5866_v27 = vpop.permute.xlu0 %5865 }
0x2a96   :  { %v11014_v55 = vmul.f32 %v8555_v43, %v5866_v27 }
0x2a98   :  { %11915 = vst [vmem:[#allocation12_spill] sm:$0xff] %v11014_v55  ;;  %v11018_v32 = vpack.c.bf16 %v11014_v55, %v11014_v55 }
0x2a9a   :  { %5876 = vrot.lane.b32.xlu1 %v11018_v32, %s8688_s6 }
0x2b0c   :  { %v5877_v60 = vpop.permute.xlu1 %5876 }
0x2b0d   :  { %8162 = vmatmul.mubr.msk.bf16.vlgmr.msra.gmra.mrb[32].mxu0 %vm116_vm0, %v5877_v60 }
0x2b0e   :  { %8166 = vmatpush3.bf16.msra.mxu0 %v11026_v59  ;;  %8173 = vmatprep.mubr.msk.bf16.mxu0 %vm8685_vm1, %v11910_v24 }
0x2b0f   :  { %8167 = vmatprep.subr.bf16.mxu0 %v11910_v24 }
0x2b12   :  { %8168 = vmatpush3.bf16.msra.mxu0 %v11035_v9 }
0x2b13   :  { %8169 = vmatprep.subr.bf16.mxu0 %v11910_v24 }
0x2b16   :  { %8170 = vmatpush3.bf16.msra.mxu0 %v11042_v58 }
0x2b17   :  { %8171 = vmatprep.subr.bf16.mxu0 %v11910_v24 }
0x2b1a   :  { %8172 = vmatpush3.bf16.msra.mxu0 %v11049_v13 }
0x2be0   :  { %v5915_v26 = vpop.f32.mrb[32].mxu0 }
0x2be1   :  { %v5922_v4 = vcombine.high %v5915_v26, %v5915_v26  ;;  %v5929_v15 = vrot.slane %v5915_v26, %v11920_v51  ;;  %v8163_v31 = vpop.f32.mrb[33].mxu0 }
0x2be2   :  { %v5918_v17 = vpop.f32.mrb[34].mxu0 }
0x2be3   :  { %v5936_v23 = vrot.slane %v5922_v4, %v11920_v51  ;;  %v5937_v53 = vcombine.high %v5929_v15, %v5929_v15  ;;  %v5945_v1 = vrot.slane %v5929_v15, %v11920_v51  ;;  %v8164_v35 = vpop.f32.mrb[35].mxu0 }
0x2be5   :  { %v5952_v10 = vrot.slane %v5936_v23, %v11920_v51  ;;  %v5959_v12 = vrot.slane %v5937_v53, %v11920_v51  ;;  %v5967_v40 = vcombine.high %v5945_v1, %v5945_v1  ;;  %v5974_v25 = vrot.slane %v5945_v1, %v8966_v48 }
0x2be6   :  { %v5938_v36 = vcombine.high %v5936_v23, %v5936_v23 }
0x2be7   :  { %v5982_v21 = vrot.slane %v5967_v40, %v8966_v48  ;;  %v5978_v14 = vrot.slane %v5959_v12, %v8966_v48  ;;  %v6012_v56 = vmul.f32 %v8851_v47, %v5974_v25  ;;  %v6011_v2 = vmul.f32 %v8847_v45, %v5974_v25 }
0x2be8   :  { %v5990_v61 = vrot.slane %v5952_v10, %v8966_v48  ;;  %v5969_v8 = vcombine.high %v5959_v12, %v5959_v12  ;;  %v5966_v62 = vrot.slane %v5938_v36, %v11920_v51  ;;  %v5968_v15 = vcombine.high %v5952_v10, %v5952_v10 }
0x2be9   :  { %v6030_v43 = vsel %vm116_vm0, %v6012_v56, 0.0  ;;  %v6027_v0 = vsel %vm116_vm0, %v6011_v2, 0.0  ;;  %v6016_v29 = vmul.f32 %v8887_v20, %v5982_v21  ;;  %v6013_v30 = vmul.f32 %v8845_v44, %v5978_v14 }
0x2bea   :  { %6031 = vadd.xlane.f32.xlu1 %v6030_v43  ;;  %6028 = vadd.xlane.f32.xlu0 %v6027_v0  ;;  %v6014_v19 = vmul.f32 %v8849_v46, %v5978_v14  ;;  %v6020_v60 = vmul.f32 %v8903_v50, %v5990_v61  ;;  %v5986_v26 = vrot.slane %v5969_v8, %v8966_v48 }
0x2beb   :  { %v6042_v63 = vsel %vm116_vm0, %v6016_v29, 0.0  ;;  %v6033_v27 = vsel %vm116_vm0, %v6013_v30, 0.0  ;;  %v6015_v4 = vmul.f32 %v8883_v11, %v5982_v21  ;;  %v5994_v53 = vrot.slane %v5966_v62, %v8966_v48 }
0x2bec   :  { %v6036_v31 = vsel %vm116_vm0, %v6014_v19, 0.0  ;;  %v6054_v17 = vsel %vm116_vm0, %v6020_v60, 0.0  ;;  %v6018_v23 = vmul.f32 %v8885_v16, %v5986_v26  ;;  %v6019_v35 = vmul.f32 %v8899_v39, %v5990_v61 }
0x2bed   :  { %v6039_v1 = vsel %vm116_vm0, %v6015_v4, 0.0  ;;  %v6022_v40 = vmul.f32 %v8901_v42, %v5994_v53  ;;  %v5998_v10 = vrot.slane %v5968_v15, %v8966_v48  ;;  %v5970_v25 = vcombine.high %v5966_v62, %v5966_v62 }
0x2bee   :  { %6043 = vadd.xlane.f32.xlu1 %v6042_v63  ;;  %6034 = vadd.xlane.f32.xlu0 %v6033_v27  ;;  %v6048_v12 = vsel %vm116_vm0, %v6018_v23, 0.0  ;;  %v6017_v21 = vmul.f32 %v8879_v7, %v5986_v26  ;;  %v6051_v14 = vsel %vm116_vm0, %v6019_v35, 0.0  ;;  %v6021_v43 = vmul.f32 %v8897_v37, %v5994_v53 }
0x2bef   :  { %v6060_v56 = vsel %vm116_vm0, %v6022_v40, 0.0  ;;  %v6024_v2 = vmul.f32 %v11906_v33, %v5998_v10  ;;  %v6002_v36 = vrot.slane %v5970_v25, %v8966_v48  ;;  %v6023_v19 = vmul.f32 %v8864_v57, %v5998_v10 }
0x2bf0   :  { %v6045_v61 = vsel %vm116_vm0, %v6017_v21, 0.0  ;;  %v6057_v29 = vsel %vm116_vm0, %v6021_v43, 0.0 }
0x2bf1   :  { %v6066_v8 = vsel %vm116_vm0, %v6024_v2, 0.0  ;;  %v6026_v0 = vmul.f32 %v11907_v3, %v6002_v36  ;;  %v6063_v62 = vsel %vm116_vm0, %v6023_v19, 0.0  ;;  %v6025_v63 = vmul.f32 %v11908_v54, %v6002_v36 }
0x2bf2   :  { %6037 = vadd.xlane.f32.xlu0 %v6036_v31  ;;  %6055 = vadd.xlane.f32.xlu1 %v6054_v17 }
0x2bf3   :  { %v6072_v30 = vsel %vm116_vm0, %v6026_v0, 0.0  ;;  %v6069_v27 = vsel %vm116_vm0, %v6025_v63, 0.0 }
0x2bf6   :  { %6040 = vadd.xlane.f32.xlu0 %v6039_v1  ;;  %6049 = vadd.xlane.f32.xlu1 %v6048_v12 }
0x2bfa   :  { %6052 = vadd.xlane.f32.xlu0 %v6051_v14  ;;  %6061 = vadd.xlane.f32.xlu1 %v6060_v56 }
0x2bfe   :  { %6046 = vadd.xlane.f32.xlu0 %v6045_v61  ;;  %6067 = vadd.xlane.f32.xlu1 %v6066_v8 }
0x2c02   :  { %6058 = vadd.xlane.f32.xlu0 %v6057_v29  ;;  %6073 = vadd.xlane.f32.xlu1 %v6072_v30 }
0x2c06   :  { %6064 = vadd.xlane.f32.xlu0 %v6063_v62 }
0x2c0a   :  { %6070 = vadd.xlane.f32.xlu0 %v6069_v27 }
0x2c77   :  { %v6032_v60 = vpop.xlane.xlu1 %6031  ;;  %v6029_v26 = vpop.xlane.xlu0 %6028 }
0x2c78   :  { %v6098_v25 = vrot.slane %v6032_v60, %v9033_v41  ;;  %v6094_v21 = vrot.slane %v6029_v26, %v9038_v49 }
0x2c7a   :  { %v6099_v29 = vsel %vm750_vm9, %v6098_v25, %v6094_v21 }
0x2c7b   :  { %v11098_v4 = vpop.xlane.xlu1 %6043  ;;  %v6035_v15 = vpop.xlane.xlu0 %6034 }
0x2c7c   :  { %v6103_v14 = vrot.slane %v6035_v15, %v9038_v49  ;;  %v6116_v2 = vrot.slane %v11098_v4, %v9033_v41 }
0x2c7f   :  { %v11100_v31 = vpop.xlane.xlu0 %6037  ;;  %v11102_v17 = vpop.xlane.xlu1 %6055 }
0x2c80   :  { %v6107_v40 = vrot.slane %v11100_v31, %v9033_v41  ;;  %v6134_v25 = vrot.slane %v11102_v17, %v9033_v41 }
0x2c82   :  { %v6108_v8 = vsel %vm750_vm9, %v6107_v40, %v6103_v14 }
0x2c83   :  { %v11104_v23 = vpop.xlane.xlu0 %6040  ;;  %v11106_v53 = vpop.xlane.xlu1 %6049  ;;  %v6163_v62 = vsel %vm499_vm2, %v6108_v8, %v6099_v29 }
0x2c84   :  { %v6112_v10 = vrot.slane %v11104_v23, %v9038_v49  ;;  %v6125_v43 = vrot.slane %v11106_v53, %v9033_v41 }
0x2c86   :  { %v6117_v0 = vsel %vm750_vm9, %v6116_v2, %v6112_v10 }
0x2c87   :  { %v11108_v1 = vpop.xlane.xlu0 %6052  ;;  %v11110_v35 = vpop.xlane.xlu1 %6061  ;;  %v6164_v40 = vsel %vm501_vm3, %v6117_v0, %v6163_v62 }
0x2c88   :  { %v6130_v63 = vrot.slane %v11108_v1, %v9038_v49  ;;  %v6143_v14 = vrot.slane %v11110_v35, %v9033_v41 }
0x2c8b   :  { %v11112_v12 = vpop.xlane.xlu0 %6046  ;;  %v11125_v36 = vpop.xlane.xlu1 %6067 }
0x2c8c   :  { %v6121_v56 = vrot.slane %v11112_v12, %v9038_v49 }
0x2c8e   :  { %v6126_v30 = vsel %vm750_vm9, %v6125_v43, %v6121_v56  ;;  %v6152_v56 = vrot.slane %v11125_v36, %v9033_v41  ;;  %v6135_v43 = vsel %vm750_vm9, %v6134_v25, %v6130_v63 }
0x2c8f   :  { %v11127_v61 = vpop.xlane.xlu0 %6058  ;;  %v6165_v21 = vsel %vm503_vm4, %v6126_v30, %v6164_v40  ;;  %v11152_v2 = vpop.xlane.xlu1 %6073 }
0x2c90   :  { %v6139_v19 = vrot.slane %v11127_v61, %v9038_v49  ;;  %v6161_v62 = vrot.slane %v11152_v2, %v9033_v41  ;;  %v6166_v30 = vsel %vm505_vm5, %v6135_v43, %v6165_v21 }
0x2c92   :  { %v6144_v8 = vsel %vm750_vm9, %v6143_v14, %v6139_v19 }
0x2c93   :  { %v11140_v27 = vpop.xlane.xlu0 %6064  ;;  %v6167_v40 = vsel %vm507_vm6, %v6144_v8, %v6166_v30 }
0x2c94   :  { %v6148_v10 = vrot.slane %v11140_v27, %v9038_v49 }
0x2c96   :  { %v6153_v29 = vsel %vm750_vm9, %v6152_v56, %v6148_v10 }
0x2c97   :  { %v11156_v0 = vpop.xlane.xlu0 %6070  ;;  %v6168_v19 = vsel %vm509_vm7, %v6153_v29, %v6167_v40 }
0x2c98   :  { %v6157_v55 = vrot.slane %v11156_v0, %v9038_v49 }
0x2c9a   :  { %v6162_v51 = vsel %vm750_vm9, %v6161_v62, %v6157_v55 }
0x2c9b   :  { %v6169_v63 = vsel %vm511_vm8, %v6162_v51, %v6168_v19 }
0x2c9c   :  { %v6171_v14 = vsel %vm823_vm10, %v6169_v63, -inf }
0x2c9d   :  { %6172 = vmax.xlane.f32.xlu0 %v6171_v14 }
0x2d2a   :  { %v6173_v10 = vpop.xlane.xlu0 %6172 }
0x2d2b   :  { %v6178_v25 = vrot.slane %v6173_v10, %v8966_v48  ;;  %v6182_v56 = vrot.slane %v6173_v10, %v9092_v34  ;;  %v6186_v13 = vrot.slane %v6173_v10, %v9114_v6  ;;  %v6190_v8 = vrot.slane %v6173_v10, %v9126_v22 }
0x2d2c   :  { %v6194_v40 = vrot.slane %v6173_v10, %v9138_v28 }
0x2d2d   :  { %v6215_v58 = vsub.f32 %v6029_v26, %v6178_v25  ;;  %v6216_v21 = vsub.f32 %v6032_v60, %v6178_v25  ;;  %v6217_v43 = vsub.f32 %v6035_v15, %v6182_v56  ;;  %v6220_v55 = vsub.f32 %v11098_v4, %v6186_v13 }
0x2d2e   :  { %v6218_v51 = vsub.f32 %v11100_v31, %v6182_v56  ;;  %v6222_v19 = vsub.f32 %v11106_v53, %v6190_v8  ;;  %v6219_v26 = vsub.f32 %v11104_v23, %v6186_v13  ;;  %v6198_v15 = vrot.slane %v6173_v10, %v9095_v52 }
0x2d2f   :  { %v6231_v29 = vmul.f32 1.442695, %v6215_v58  ;;  %v6233_v62 = vmul.f32 1.442695, %v6216_v21  ;;  %v6235_v30 = vmul.f32 1.442695, %v6217_v43  ;;  %v6224_v4 = vsub.f32 %v11102_v17, %v6194_v40 }
0x2d30   :  { %v6241_v63 = vmul.f32 1.442695, %v6220_v55  ;;  %v6237_v60 = vmul.f32 1.442695, %v6218_v51  ;;  %v6245_v58 = vmul.f32 1.442695, %v6222_v19  ;;  %v6221_v31 = vsub.f32 %v11112_v12, %v6190_v8 }
0x2d31   :  { %8558 = vpow2.f32 %v6231_v29  ;;  %v6239_v14 = vmul.f32 1.442695, %v6219_v26  ;;  %v6202_v25 = vrot.slane %v6173_v10, %v11844_v5  ;;  %v6226_v53 = vsub.f32 %v11110_v35, %v6198_v15 }
0x2d32   :  { %8560 = vpow2.f32 %v6233_v62  ;;  %v6249_v56 = vmul.f32 1.442695, %v6224_v4  ;;  %v6223_v17 = vsub.f32 %v11108_v1, %v6194_v40  ;;  %v6243_v23 = vmul.f32 1.442695, %v6221_v31 }
0x2d33   :  { %8562 = vpow2.f32 %v6235_v30  ;;  %v6206_v12 = vrot.slane %v6173_v10, %v11845_v18  ;;  %v6228_v43 = vsub.f32 %v11125_v36, %v6202_v25  ;;  %v6253_v35 = vmul.f32 1.442695, %v6226_v53 }
0x2d34   :  { %8564 = vpow2.f32 %v6241_v63  ;;  %v6225_v29 = vsub.f32 %v11127_v61, %v6198_v15  ;;  %v6247_v1 = vmul.f32 1.442695, %v6223_v17  ;;  %v6227_v30 = vsub.f32 %v11140_v27, %v6202_v25 }
0x2d35   :  { %8566 = vpow2.f32 %v6237_v60  ;;  %v6230_v62 = vsub.f32 %v11152_v2, %v6206_v12  ;;  %v6257_v10 = vmul.f32 1.442695, %v6228_v43  ;;  %v6229_v2 = vsub.f32 %v11156_v0, %v6206_v12 }
0x2d36   :  { %8568 = vpow2.f32 %v6245_v58  ;;  %v6251_v40 = vmul.f32 1.442695, %v6225_v29  ;;  %v6255_v26 = vmul.f32 1.442695, %v6227_v30 }
0x2d37   :  { %8570 = vpow2.f32 %v6239_v14  ;;  %v6261_v61 = vmul.f32 1.442695, %v6230_v62  ;;  %v6259_v15 = vmul.f32 1.442695, %v6229_v2 }
0x2d38   :  { %8572 = vpow2.f32 %v6249_v56 }
0x2d39   :  { %8574 = vpow2.f32 %v6243_v23 }
0x2d3a   :  { %8576 = vpow2.f32 %v6253_v35 }
0x2d3b   :  { %v11183_v21 = vpop.eup %8558  ;;  %8578 = vpow2.f32 %v6247_v1 }
0x2d3c   :  { %v11185_v13 = vpop.eup %8560  ;;  %6280 = vperm.xlu1 %8226, %v11183_v21   ;;  %8580 = vpow2.f32 %v6257_v10 }
0x2d3d   :  { %6283 = vperm.xlu0 %8227, %v11185_v13   ;;  %v11192_v8 = vpop.eup %8562  ;;  %8582 = vpow2.f32 %v6251_v40 }
0x2d3e   :  { %v11194_v55 = vpop.eup %8564  ;;  %8584 = vpow2.f32 %v6261_v61 }
0x2d3f   :  { %v11200_v51 = vpop.eup %8566  ;;  %8586 = vpow2.f32 %v6255_v26 }
0x2d40   :  { %6286 = vperm.xlu1 %8226, %v11192_v8   ;;  %v11202_v36 = vpop.eup %8568  ;;  %8588 = vpow2.f32 %v6259_v15 }
0x2d41   :  { %6295 = vperm.xlu0 %8227, %v11194_v55   ;;  %v11207_v19 = vpop.eup %8570 }
0x2d42   :  { %v11209_v63 = vpop.eup %8572 }
0x2d43   :  { %v11214_v27 = vpop.eup %8574 }
0x2d44   :  { %6289 = vperm.xlu1 %8226, %v11200_v51   ;;  %v11216_v60 = vpop.eup %8576 }
0x2d45   :  { %6301 = vperm.xlu0 %8227, %v11202_v36   ;;  %v11220_v4 = vpop.eup %8578 }
0x2d46   :  { %v11222_v58 = vpop.eup %8580 }
0x2d47   :  { %v11226_v0 = vpop.eup %8582 }
0x2d48   :  { %6292 = vperm.xlu1 %8226, %v11207_v19   ;;  %v11228_v31 = vpop.eup %8584 }
0x2d49   :  { %6307 = vperm.xlu0 %8227, %v11209_v63   ;;  %v11232_v14 = vpop.eup %8586 }
0x2d4a   :  { %v11235_v25 = vpop.eup %8588 }
0x2d4c   :  { %6298 = vperm.xlu1 %8226, %v11214_v27  }
0x2d4d   :  { %6313 = vperm.xlu0 %8227, %v11216_v60  }
0x2d50   :  { %6304 = vperm.xlu1 %8226, %v11220_v4  }
0x2d51   :  { %6319 = vperm.xlu0 %8227, %v11222_v58  }
0x2d54   :  { %6310 = vperm.xlu1 %8226, %v11226_v0  }
0x2d55   :  { %6325 = vperm.xlu0 %8227, %v11228_v31  }
0x2d58   :  { %6316 = vperm.xlu1 %8226, %v11232_v14  }
0x2d5c   :  { %6322 = vperm.xlu1 %8226, %v11235_v25  }
0x2dbb   :  { %v6281_v53 = vpop.permute.xlu1 %6280 }
0x2dbc   :  { %v6284_v56 = vpop.permute.xlu0 %6283  ;;  %v6330_v15 = vrot.slane %v6281_v53, %v9038_v49 }
0x2dbd   :  { %v6334_v26 = vrot.slane %v6284_v56, %v9033_v41 }
0x2dbf   :  { %v6287_v17 = vpop.permute.xlu1 %6286  ;;  %v6335_v53 = vsel %vm750_vm9, %v6334_v26, %v6330_v15 }
0x2dc0   :  { %v6296_v23 = vpop.permute.xlu0 %6295  ;;  %v6339_v9 = vrot.slane %v6287_v17, %v9038_v49 }
0x2dc1   :  { %v6352_v59 = vrot.slane %v6296_v23, %v9033_v41 }
0x2dc3   :  { %v6290_v12 = vpop.permute.xlu1 %6289 }
0x2dc4   :  { %v6302_v43 = vpop.permute.xlu0 %6301  ;;  %v6343_v30 = vrot.slane %v6290_v12, %v9033_v41 }
0x2dc5   :  { %v6361_v54 = vrot.slane %v6302_v43, %v9033_v41 }
0x2dc6   :  { %v6344_v12 = vsel %vm750_vm9, %v6343_v30, %v6339_v9 }
0x2dc7   :  { %v6293_v35 = vpop.permute.xlu1 %6292 }
0x2dc8   :  { %v6308_v29 = vpop.permute.xlu0 %6307  ;;  %v6348_v40 = vrot.slane %v6293_v35, %v9038_v49 }
0x2dc9   :  { %v6370_v3 = vrot.slane %v6308_v29, %v9033_v41 }
0x2dca   :  { %v6353_v56 = vsel %vm750_vm9, %v6352_v59, %v6348_v40 }
0x2dcb   :  { %v6299_v1 = vpop.permute.xlu1 %6298 }
0x2dcc   :  { %v6314_v62 = vpop.permute.xlu0 %6313  ;;  %v6357_v24 = vrot.slane %v6299_v1, %v9038_v49 }
0x2dcd   :  { %v6379_v17 = vrot.slane %v6314_v62, %v9033_v41 }
0x2dce   :  { %v6362_v1 = vsel %vm750_vm9, %v6361_v54, %v6357_v24 }
0x2dcf   :  { %v6305_v10 = vpop.permute.xlu1 %6304 }
0x2dd0   :  { %v6320_v61 = vpop.permute.xlu0 %6319  ;;  %v6366_v38 = vrot.slane %v6305_v10, %v9038_v49  ;;  %v6399_v10 = vsel %vm499_vm2, %v6344_v12, %v6335_v53 }
0x2dd1   :  { %v6388_v43 = vrot.slane %v6320_v61, %v9033_v41  ;;  %v6400_v29 = vsel %vm501_vm3, %v6353_v56, %v6399_v10 }
0x2dd2   :  { %v6371_v9 = vsel %vm750_vm9, %v6370_v3, %v6366_v38  ;;  %v6401_v40 = vsel %vm503_vm4, %v6362_v1, %v6400_v29 }
0x2dd3   :  { %v6311_v2 = vpop.permute.xlu1 %6310  ;;  %v6402_v54 = vsel %vm505_vm5, %v6371_v9, %v6401_v40 }
0x2dd4   :  { %v6375_v35 = vrot.slane %v6311_v2, %v9038_v49  ;;  %v6326_v30 = vpop.permute.xlu0 %6325 }
0x2dd6   :  { %v6380_v59 = vsel %vm750_vm9, %v6379_v17, %v6375_v35 }
0x2dd7   :  { %v6317_v33 = vpop.permute.xlu1 %6316  ;;  %v6403_v61 = vsel %vm507_vm6, %v6380_v59, %v6402_v54 }
0x2dd8   :  { %v6384_v23 = vrot.slane %v6317_v33, %v9038_v49  ;;  %v6397_v33 = vrot.slane %v6326_v30, %v9033_v41 }
0x2dda   :  { %v6389_v2 = vsel %vm750_vm9, %v6388_v43, %v6384_v23 }
0x2ddb   :  { %v6323_v62 = vpop.permute.xlu1 %6322  ;;  %v6404_v38 = vsel %vm509_vm7, %v6389_v2, %v6403_v61 }
0x2ddc   :  { %v6393_v24 = vrot.slane %v6323_v62, %v9038_v49 }
0x2dde   :  { %v6398_v3 = vsel %vm750_vm9, %v6397_v33, %v6393_v24 }
0x2ddf   :  { %v6405_v26 = vsel %vm511_vm8, %v6398_v3, %v6404_v38 }
0x2de0   :  { %v6407_v15 = vsel %vm823_vm10, %v6405_v26, 0.0 }
0x2de1   :  { %6408 = vadd.xlane.f32.xlu1 %v6407_v15 }
0x2e6e   :  { %v6409_v12 = vpop.xlane.xlu1 %6408 }
0x2e6f   :  { %8590 = vrcp.f32 %v6409_v12 }
0x2e79   :  { %v8591_v35 = vpop.eup %8590 }
0x2e7a   :  { %v6431_v56 = vrot.slane %v8591_v35, %v9138_v28  ;;  %v6415_v53 = vrot.slane %v8591_v35, %v8966_v48  ;;  %v6443_v23 = vrot.slane %v8591_v35, %v11845_v18  ;;  %v6419_v9 = vrot.slane %v8591_v35, %v9092_v34 }
0x2e7c   :  { %v6461_v17 = vmul.f32 %v11209_v63, %v6431_v56  ;;  %v6452_v1 = vmul.f32 %v11183_v21, %v6415_v53  ;;  %v6467_v10 = vmul.f32 %v11228_v31, %v6443_v23  ;;  %v6453_v43 = vmul.f32 %v11185_v13, %v6415_v53 }
0x2e7d   :  { %v6454_v30 = vmul.f32 %v11192_v8, %v6419_v9  ;;  %v6455_v29 = vmul.f32 %v11200_v51, %v6419_v9  ;;  %v6423_v63 = vrot.slane %v8591_v35, %v9114_v6  ;;  %v6427_v31 = vrot.slane %v8591_v35, %v9126_v22 }
0x2e7e   :  { %6515 = vperm.xlu1 %8226, %v6461_v17   ;;  %6470 = vperm.xlu0 %8227, %v6452_v1   ;;  %v6460_v8 = vmul.f32 %v11220_v4, %v6431_v56  ;;  %v6435_v51 = vrot.slane %v8591_v35, %v9095_v52 }
0x2e7f   :  { %v6456_v21 = vmul.f32 %v11207_v19, %v6423_v63  ;;  %v6457_v59 = vmul.f32 %v11194_v55, %v6423_v63  ;;  %v6458_v13 = vmul.f32 %v11214_v27, %v6427_v31  ;;  %v6459_v40 = vmul.f32 %v11202_v36, %v6427_v31 }
0x2e80   :  { %v6462_v2 = vmul.f32 %v11226_v0, %v6435_v51  ;;  %v6463_v19 = vmul.f32 %v11216_v60, %v6435_v51  ;;  %v6439_v55 = vrot.slane %v8591_v35, %v11844_v5  ;;  %v6466_v36 = vmul.f32 %v11235_v25, %v6443_v23 }
0x2e82   :  { %6545 = vperm.xlu1 %8226, %v6467_v10   ;;  %6475 = vperm.xlu0 %8227, %v6453_v43   ;;  %v6464_v62 = vmul.f32 %v11232_v14, %v6439_v55  ;;  %v6465_v27 = vmul.f32 %v11222_v58, %v6439_v55 }
0x2e86   :  { %6480 = vperm.xlu0 %8227, %v6454_v30  }
0x2e8a   :  { %6485 = vperm.xlu0 %8227, %v6455_v29  }
0x2e8e   :  { %6490 = vperm.xlu0 %8227, %v6456_v21  }
0x2e92   :  { %6495 = vperm.xlu0 %8227, %v6457_v59  }
0x2e96   :  { %6500 = vperm.xlu0 %8227, %v6458_v13  }
0x2e9a   :  { %6505 = vperm.xlu0 %8227, %v6459_v40  }
0x2e9e   :  { %6510 = vperm.xlu0 %8227, %v6460_v8  }
0x2ea2   :  { %6520 = vperm.xlu0 %8227, %v6462_v2  }
0x2ea6   :  { %6525 = vperm.xlu0 %8227, %v6463_v19  }
0x2eaa   :  { %6530 = vperm.xlu0 %8227, %v6464_v62  }
0x2eae   :  { %6535 = vperm.xlu0 %8227, %v6465_v27  }
0x2eb2   :  { %6540 = vperm.xlu0 %8227, %v6466_v36  }
0x2eb6   :  { %6685 = vrot.lane.b32.xlu0 %v11018_v32, %s8689_s18 }
0x2efd   :  { %v6471_v4 = vpop.permute.xlu0 %6470  ;;  %v6516_v25 = vpop.permute.xlu1 %6515 }
0x2efe   :  { %v6548_v26 = vmul.f32 %v8847_v45, %v6471_v4  ;;  %v6557_v1 = vmul.f32 %v8903_v50, %v6516_v25 }
0x2f00   :  { %v6564_v43 = vsel %vm116_vm0, %v6548_v26, 0.0  ;;  %v6601_v40 = vsel %vm116_vm0, %v6557_v1, 0.0 }
0x2f01   :  { %v6476_v0 = vpop.permute.xlu0 %6475 }
0x2f02   :  { %v6549_v14 = vmul.f32 %v8851_v47, %v6476_v0 }
0x2f04   :  { %v6565_v53 = vsel %vm116_vm0, %v6549_v14, 0.0 }
0x2f05   :  { %v6481_v54 = vpop.permute.xlu0 %6480  ;;  %v6566_v63 = vadd.f32 %v6565_v53, %v6564_v43 }
0x2f06   :  { %v6550_v38 = vmul.f32 %v8845_v44, %v6481_v54 }
0x2f07   :  { %v6567_v55 = vrot.slane %v6566_v63, 4 }
0x2f08   :  { %v6573_v23 = vsel %vm116_vm0, %v6550_v38, 0.0 }
0x2f09   :  { %v6486_v33 = vpop.permute.xlu0 %6485 }
0x2f0a   :  { %v6551_v3 = vmul.f32 %v8849_v46, %v6486_v33  ;;  %v6568_v33 = vadd.f32 %v6567_v55, %v6566_v63 }
0x2f0c   :  { %v6574_v12 = vsel %vm116_vm0, %v6551_v3, 0.0 }
0x2f0d   :  { %v6491_v60 = vpop.permute.xlu0 %6490  ;;  %v6575_v9 = vadd.f32 %v6574_v12, %v6573_v23 }
0x2f0e   :  { %v6552_v32 = vmul.f32 %v8883_v11, %v6491_v60 }
0x2f0f   :  { %v6576_v51 = vrot.slane %v6575_v9, 4 }
0x2f10   :  { %v6582_v30 = vsel %vm116_vm0, %v6552_v32, 0.0  ;;  %v6569_v32 = vrot.slane %v6568_v33, 2 }
0x2f11   :  { %v6496_v24 = vpop.permute.xlu0 %6495  ;;  %v6577_v0 = vadd.f32 %v6576_v51, %v6575_v9 }
0x2f12   :  { %v6553_v58 = vmul.f32 %v8887_v20, %v6496_v24  ;;  %v6570_v43 = vadd.f32 %v6569_v32, %v6568_v33 }
0x2f13   :  { %v6578_v38 = vrot.slane %v6577_v0, 2 }
0x2f14   :  { %v6583_v17 = vsel %vm116_vm0, %v6553_v58, 0.0 }
0x2f15   :  { %v6501_v61 = vpop.permute.xlu0 %6500  ;;  %v6584_v21 = vadd.f32 %v6583_v17, %v6582_v30  ;;  %v6546_v17 = vpop.permute.xlu1 %6545  ;;  %v6579_v1 = vadd.f32 %v6578_v38, %v6577_v0  ;;  %v11921_v30 = vld [vmem:[#allocation9_spill] sm:$0xff] }
0x2f16   :  { %v6554_v35 = vmul.f32 %v8879_v7, %v6501_v61 }
0x2f17   :  { %v6585_v62 = vrot.slane %v6584_v21, 4  ;;  %v6580_v51 = vrot.slane %v6579_v1, 1 }
0x2f18   :  { %v6591_v59 = vsel %vm116_vm0, %v6554_v35, 0.0 }
0x2f19   :  { %v6506_v15 = vpop.permute.xlu0 %6505  ;;  %v6586_v60 = vadd.f32 %v6585_v62, %v6584_v21  ;;  %v6571_v62 = vrot.slane %v6570_v43, 1 }
0x2f1a   :  { %v6555_v56 = vmul.f32 %v8885_v16, %v6506_v15 }
0x2f1b   :  { %v6587_v15 = vrot.slane %v6586_v60, 2  ;;  %v6572_v38 = vadd.f32 %v6571_v62, %v6570_v43 }
0x2f1c   :  { %v6592_v10 = vsel %vm116_vm0, %v6555_v56, 0.0 }
0x2f1d   :  { %v6511_v29 = vpop.permute.xlu0 %6510  ;;  %v6593_v13 = vadd.f32 %v6592_v10, %v6591_v59  ;;  %v6588_v9 = vadd.f32 %v6587_v15, %v6586_v60  ;;  %v11922_v59 = vld [vmem:[#allocation8_spill] sm:$0xff] }
0x2f1e   :  { %v6556_v31 = vmul.f32 %v8899_v39, %v6511_v29 }
0x2f1f   :  { %v6594_v27 = vrot.slane %v6593_v13, 4 }
0x2f20   :  { %v6600_v8 = vsel %vm116_vm0, %v6556_v31, 0.0  ;;  %v6563_v31 = vmul.f32 %v11922_v59, %v6546_v17 }
0x2f21   :  { %v6602_v2 = vadd.f32 %v6601_v40, %v6600_v8  ;;  %v6521_v19 = vpop.permute.xlu0 %6520  ;;  %v6595_v61 = vadd.f32 %v6594_v27, %v6593_v13  ;;  %v6589_v27 = vrot.slane %v6588_v9, 1 }
0x2f22   :  { %v6558_v4 = vmul.f32 %v8897_v37, %v6521_v19  ;;  %v6628_v33 = vsel %vm116_vm0, %v6563_v31, 0.0 }
0x2f23   :  { %v6603_v36 = vrot.slane %v6602_v2, 4  ;;  %v6596_v12 = vrot.slane %v6595_v61, 2 }
0x2f24   :  { %v6609_v14 = vsel %vm116_vm0, %v6558_v4, 0.0 }
0x2f25   :  { %v6526_v54 = vpop.permute.xlu0 %6525  ;;  %v6604_v3 = vadd.f32 %v6603_v36, %v6602_v2  ;;  %v6597_v63 = vadd.f32 %v6596_v12, %v6595_v61  ;;  %v11923_v36 = vld [vmem:[#allocation7_spill] sm:$0xff]  ;;  %v6581_v61 = vadd.f32 %v6580_v51, %v6579_v1 }
0x2f26   :  { %v6559_v24 = vmul.f32 %v8901_v42, %v6526_v54 }
0x2f27   :  { %v6605_v56 = vrot.slane %v6604_v3, 2  ;;  %v6598_v0 = vrot.slane %v6597_v63, 1  ;;  %v6644_v1 = vsel %vm499_vm2, %v6581_v61, %v6572_v38 }
0x2f28   :  { %v6610_v58 = vsel %vm116_vm0, %v6559_v24, 0.0 }
0x2f29   :  { %v6611_v25 = vadd.f32 %v6610_v58, %v6609_v14  ;;  %v6531_v26 = vpop.permute.xlu0 %6530  ;;  %v6606_v13 = vadd.f32 %v6605_v56, %v6604_v3 }
0x2f2a   :  { %v6560_v53 = vmul.f32 %v8864_v57, %v6531_v26  ;;  %v6599_v26 = vadd.f32 %v6598_v0, %v6597_v63 }
0x2f2b   :  { %v6612_v35 = vrot.slane %v6611_v25, 4  ;;  %v6607_v60 = vrot.slane %v6606_v13, 1 }
0x2f2c   :  { %v6618_v40 = vsel %vm116_vm0, %v6560_v53, 0.0 }
0x2f2d   :  { %v6613_v23 = vadd.f32 %v6612_v35, %v6611_v25  ;;  %v6536_v10 = vpop.permute.xlu0 %6535  ;;  %v6590_v25 = vadd.f32 %v6589_v27, %v6588_v9  ;;  %v6608_v12 = vadd.f32 %v6607_v60, %v6606_v13  ;;  %v6654_v35 = vpack.c.bf16 %v6581_v61, %v6581_v61 }
0x2f2e   :  { %v6561_v29 = vmul.f32 %v11921_v30, %v6536_v10 }
0x2f2f   :  { %v6614_v21 = vrot.slane %v6613_v23, 2  ;;  %v6655_v10 = vpack.c.bf16 %v6590_v25, %v6590_v25 }
0x2f30   :  { %v6619_v8 = vsel %vm116_vm0, %v6561_v29, 0.0  ;;  %v6656_v29 = vpack.c.bf16 %v6599_v26, %v6599_v26 }
0x2f31   :  { %v6615_v2 = vadd.f32 %v6614_v21, %v6613_v23  ;;  %v6620_v19 = vadd.f32 %v6619_v8, %v6618_v40  ;;  %v6541_v55 = vpop.permute.xlu0 %6540  ;;  %v6653_v23 = vpack.c.bf16 %v6572_v38, %v6572_v38  ;;  %v6657_v40 = vpack.c.bf16 %v6608_v12, %v6608_v12 }
0x2f32   :  { %v6562_v4 = vmul.f32 %v11923_v36, %v6541_v55  ;;  %v6670_v8 = vunpack.c.l.b16 %v6654_v35  ;;  %v6671_v13 = vunpack.c.l.b16 %v6655_v10  ;;  %v6672_v55 = vunpack.c.l.b16 %v6656_v29  ;;  %v11924_v10 = vld [vmem:[#allocation15_spill] sm:$0xff] }
0x2f33   :  { %v6621_v54 = vrot.slane %v6620_v19, 4  ;;  %v6616_v3 = vrot.slane %v6615_v2, 1  ;;  %v6669_v63 = vunpack.c.l.b16 %v6653_v23  ;;  %v6673_v0 = vunpack.c.l.b16 %v6657_v40 }
0x2f34   :  { %v6627_v24 = vsel %vm116_vm0, %v6562_v4, 0.0 }
0x2f35   :  { %v6622_v14 = vadd.f32 %v6621_v54, %v6620_v19  ;;  %v6629_v58 = vadd.f32 %v6628_v33, %v6627_v24  ;;  %v6617_v56 = vadd.f32 %v6616_v3, %v6615_v2  ;;  %v6645_v19 = vsel %vm501_vm3, %v6590_v25, %v6644_v1 }
0x2f36   :  { %v6646_v2 = vsel %vm503_vm4, %v6599_v26, %v6645_v19  ;;  %v6677_v54 = vsel %vm499_vm2, %v6670_v8, %v6669_v63 }
0x2f37   :  { %v6623_v32 = vrot.slane %v6622_v14, 2  ;;  %v6630_v15 = vrot.slane %v6629_v58, 4  ;;  %v6658_v51 = vpack.c.bf16 %v6617_v56, %v6617_v56  ;;  %v6647_v4 = vsel %vm505_vm5, %v6608_v12, %v6646_v2 }
0x2f38   :  { %v6648_v33 = vsel %vm507_vm6, %v6617_v56, %v6647_v4  ;;  %v6678_v61 = vsel %vm501_vm3, %v6671_v13, %v6677_v54  ;;  %v11925_v13 = vld [vmem:[#allocation14_spill] sm:$0xff] }
0x2f39   :  { %v6624_v53 = vadd.f32 %v6623_v32, %v6622_v14  ;;  %v6631_v17 = vadd.f32 %v6630_v15, %v6629_v58  ;;  %v6674_v60 = vunpack.c.l.b16 %v6658_v51  ;;  %v6679_v25 = vsel %vm503_vm4, %v6672_v55, %v6678_v61  ;;  %v11930_v61 = vld [vmem:[#allocation25_spill] sm:$0xff] }
0x2f3a   :  { %v6680_v26 = vsel %vm505_vm5, %v6673_v0, %v6679_v25  ;;  %v11933_v25 = vld [vmem:[#allocation19_spill] sm:$0xff] }
0x2f3b   :  { %v6625_v21 = vrot.slane %v6624_v53, 1  ;;  %v6632_v31 = vrot.slane %v6631_v17, 2  ;;  %v6681_v15 = vsel %vm507_vm6, %v6674_v60, %v6680_v26  ;;  %v11928_v60 = vld [vmem:[#allocation24_spill] sm:$0xff] }
0x2f3d   :  { %v6626_v43 = vadd.f32 %v6625_v21, %v6624_v53  ;;  %v6633_v9 = vadd.f32 %v6632_v31, %v6631_v17  ;;  %v6686_v53 = vpop.permute.xlu0 %6685 }
0x2f3f   :  { %v6659_v62 = vpack.c.bf16 %v6626_v43, %v6626_v43  ;;  %v6634_v27 = vrot.slane %v6633_v9, 1  ;;  %v6649_v3 = vsel %vm509_vm7, %v6626_v43, %v6648_v33 }
0x2f41   :  { %v6635_v24 = vadd.f32 %v6634_v27, %v6633_v9  ;;  %v6675_v14 = vunpack.c.l.b16 %v6659_v62 }
0x2f43   :  { %v6650_v58 = vsel %vm511_vm8, %v6635_v24, %v6649_v3  ;;  %v6660_v38 = vpack.c.bf16 %v6635_v24, %v6635_v24  ;;  %v6682_v12 = vsel %vm509_vm7, %v6675_v14, %v6681_v15  ;;  %v11929_v24 = vmov 0.0   ;;  %v11931_v3 = vld [vmem:[#allocation13_spill] sm:$0xff]  ;;  %v11932_v14 = vld [vmem:[#allocation11_spill] sm:$0xff] }
0x2f44   :  { %6652 = vst.msk [vmem:[#allocation3 + $0x30] sm:$0xff] %vm116_vm0, %v6650_v58 }
0x2f45   :  { %v6676_v32 = vunpack.c.l.b16 %v6660_v38 }
0x2f47   :  { %v6683_v35 = vsel %vm511_vm8, %v6676_v32, %v6682_v12 }
0x2f48   :  { %v6684_v56 = vpack.c.b16 %v6683_v35, %v6683_v35 }
0x2f4a   :  { %v6689_v17 = vsel %vm116_vm0, %v6684_v56, %v6686_v53 }
0x2f4b   :  { %8174 = vmatmul.mubr.msk.bf16.vlgmr.msra.gmra.mrb[36].mxu0 %vm1367_vm11, %v6689_v17 }
0x301e   :  { %v6726_v23 = vpop.f32.mrb[36].mxu0 }
0x301f   :  { %v6727_v29 = vadd.f32 %v6726_v23, %v11924_v10  ;;  %v8175_v21 = vpop.f32.mrb[37].mxu0 }
0x3020   :  { %v6729_v31 = vpop.f32.mrb[38].mxu0 }
0x3021   :  { %8592 = vtanh.f32 %v6727_v29  ;;  %v8176_v1 = vpop.f32.mrb[39].mxu0  ;;  %v7904_v8 = vmul.f32 -1.442695, %v6727_v29 }
0x3023   :  { %8594 = vpow2.f32 %v7904_v8 }
0x302b   :  { %v8593_v40 = vpop.eup %8592 }
0x302c   :  { %6741 = vrot.lane.b32.xlu1 %v8593_v40, %s8689_s18 }
0x302d   :  { %v8595_v51 = vpop.eup %8594 }
0x302e   :  { %v6735_v43 = vadd.f32 1.0, %v8595_v51 }
0x3030   :  { %8596 = vrcp.f32 %v6735_v43 }
0x303a   :  { %v8597_v9 = vpop.eup %8596 }
0x303b   :  { %v6739_v2 = vmul.f32 %v8597_v9, %v11925_v13 }
0x309e   :  { %v6742_v63 = vpop.permute.xlu1 %6741 }
0x309f   :  { %v6744_v19 = vmul.f32 %v8597_v9, %v6742_v63 }
0x30a1   :  { %6746 = vrot.lane.b32.xlu0 %v6744_v19, %s8688_s6 }
0x3113   :  { %v6747_v55 = vpop.permute.xlu0 %6746 }
0x3114   :  { %v11349_v62 = vadd.f32 %v6747_v55, %v6739_v2 }
0x3116   :  { %11926 = vst [vmem:[#allocation18_spill] sm:$0xff] %v11349_v62  ;;  %8598 = vtanh.f32 %v11349_v62 }
0x3120   :  { %v8599_v27 = vpop.eup %8598 }
0x3121   :  { %6752 = vrot.lane.b32.xlu1 %v8599_v27, %s8689_s18 }
0x3193   :  { %v6753_v4 = vpop.permute.xlu1 %6752 }
0x3194   :  { %v11353_v0 = vmul.f32 %v8597_v9, %v6753_v4 }
0x3196   :  { %11927 = vst [vmem:[#allocation16_spill] sm:$0xff] %v11353_v0  ;;  %v11357_v54 = vpack.c.bf16 %v11353_v0, %v11353_v0 }
0x3198   :  { %6763 = vrot.lane.b32.xlu0 %v11357_v54, %s8688_s6 }
0x320a   :  { %v6764_v33 = vpop.permute.xlu0 %6763 }
0x320b   :  { %8182 = vmatmul.mubr.msk.bf16.vlgmr.msra.gmra.mrb[40].mxu1 %vm116_vm0, %v6764_v33 }
0x320c   :  { %8186 = vmatpush3.bf16.msra.mxu1 %v11928_v60  ;;  %8193 = vmatprep.mubr.msk.bf16.mxu1 %vm8685_vm1, %v11929_v24 }
0x320d   :  { %8187 = vmatprep.subr.bf16.mxu1 %v11929_v24 }
0x3210   :  { %8188 = vmatpush3.bf16.msra.mxu1 %v11930_v61 }
0x3211   :  { %8189 = vmatprep.subr.bf16.mxu1 %v11929_v24 }
0x3214   :  { %8190 = vmatpush3.bf16.msra.mxu1 %v11931_v3 }
0x3215   :  { %8191 = vmatprep.subr.bf16.mxu1 %v11929_v24 }
0x3218   :  { %8192 = vmatpush3.bf16.msra.mxu1 %v11932_v14 }
0x32de   :  { %v6802_v58 = vpop.f32.mrb[40].mxu1 }
0x32df   :  { %v6809_v38 = vcombine.high %v6802_v58, %v6802_v58  ;;  %v6816_v26 = vrot.slane %v6802_v58, %v11933_v25  ;;  %v8183_v32 = vpop.f32.mrb[41].mxu1 }
0x32e0   :  { %v6805_v15 = vpop.f32.mrb[42].mxu1 }
0x32e1   :  { %v6824_v12 = vcombine.high %v6816_v26, %v6816_v26  ;;  %v6832_v35 = vrot.slane %v6816_v26, %v11933_v25  ;;  %v8184_v56 = vpop.f32.mrb[43].mxu1  ;;  %v6823_v53 = vrot.slane %v6809_v38, %v11933_v25 }
0x32e3   :  { %v6846_v17 = vrot.slane %v6824_v12, %v11933_v25  ;;  %v6854_v23 = vcombine.high %v6832_v35, %v6832_v35  ;;  %v6861_v10 = vrot.slane %v6832_v35, %v8966_v48  ;;  %v6839_v1 = vrot.slane %v6823_v53, %v11933_v25 }
0x32e4   :  { %v6825_v63 = vcombine.high %v6823_v53, %v6823_v53 }
0x32e5   :  { %v6865_v29 = vrot.slane %v6846_v17, %v8966_v48  ;;  %v6899_v21 = vmul.f32 %v8851_v47, %v6861_v10  ;;  %v6898_v31 = vmul.f32 %v8847_v45, %v6861_v10  ;;  %v6869_v40 = vrot.slane %v6854_v23, %v8966_v48 }
0x32e6   :  { %v6877_v19 = vrot.slane %v6839_v1, %v8966_v48  ;;  %v6856_v13 = vcombine.high %v6846_v17, %v6846_v17  ;;  %v6853_v60 = vrot.slane %v6825_v63, %v11933_v25  ;;  %v6855_v38 = vcombine.high %v6839_v1, %v6839_v1 }
0x32e7   :  { %v6917_v8 = vsel %vm116_vm0, %v6899_v21, 0.0  ;;  %v6914_v51 = vsel %vm116_vm0, %v6898_v31, 0.0  ;;  %v6901_v43 = vmul.f32 %v8849_v46, %v6865_v29  ;;  %v6900_v9 = vmul.f32 %v8845_v44, %v6865_v29 }
0x32e8   :  { %6918 = vadd.xlane.f32.xlu0 %v6917_v8  ;;  %6915 = vadd.xlane.f32.xlu1 %v6914_v51  ;;  %v6903_v27 = vmul.f32 %v8887_v20, %v6869_v40  ;;  %v6902_v4 = vmul.f32 %v8883_v11, %v6869_v40  ;;  %v6907_v33 = vmul.f32 %v8903_v50, %v6877_v19 }
0x32e9   :  { %v6923_v2 = vsel %vm116_vm0, %v6901_v43, 0.0  ;;  %v6920_v55 = vsel %vm116_vm0, %v6900_v9, 0.0  ;;  %v6906_v3 = vmul.f32 %v8899_v39, %v6877_v19  ;;  %v6873_v14 = vrot.slane %v6856_v13, %v8966_v48 }
0x32ea   :  { %v6929_v24 = vsel %vm116_vm0, %v6903_v27, 0.0  ;;  %v6926_v61 = vsel %vm116_vm0, %v6902_v4, 0.0  ;;  %v6941_v58 = vsel %vm116_vm0, %v6907_v33, 0.0  ;;  %v6881_v25 = vrot.slane %v6853_v60, %v8966_v48 }
0x32eb   :  { %v6938_v26 = vsel %vm116_vm0, %v6906_v3, 0.0  ;;  %v6905_v32 = vmul.f32 %v8885_v16, %v6873_v14  ;;  %v6904_v15 = vmul.f32 %v8879_v7, %v6873_v14  ;;  %v6885_v12 = vrot.slane %v6855_v38, %v8966_v48 }
0x32ec   :  { %6924 = vadd.xlane.f32.xlu1 %v6923_v2  ;;  %6921 = vadd.xlane.f32.xlu0 %v6920_v55  ;;  %v6857_v35 = vcombine.high %v6853_v60, %v6853_v60  ;;  %v6909_v17 = vmul.f32 %v8901_v42, %v6881_v25  ;;  %v6908_v23 = vmul.f32 %v8897_v37, %v6881_v25 }
0x32ed   :  { %v6935_v56 = vsel %vm116_vm0, %v6905_v32, 0.0  ;;  %v6932_v53 = vsel %vm116_vm0, %v6904_v15, 0.0  ;;  %v6911_v10 = vmul.f32 %v11921_v30, %v6885_v12  ;;  %v6910_v31 = vmul.f32 %v8864_v57, %v6885_v12 }
0x32ee   :  { %v6947_v29 = vsel %vm116_vm0, %v6909_v17, 0.0  ;;  %v6944_v21 = vsel %vm116_vm0, %v6908_v23, 0.0  ;;  %v6889_v1 = vrot.slane %v6857_v35, %v8966_v48 }
0x32ef   :  { %v6953_v40 = vsel %vm116_vm0, %v6911_v10, 0.0  ;;  %v6950_v8 = vsel %vm116_vm0, %v6910_v31, 0.0 }
0x32f0   :  { %6930 = vadd.xlane.f32.xlu1 %v6929_v24  ;;  %6927 = vadd.xlane.f32.xlu0 %v6926_v61  ;;  %v6913_v51 = vmul.f32 %v11922_v59, %v6889_v1  ;;  %v6912_v43 = vmul.f32 %v11923_v36, %v6889_v1 }
0x32f2   :  { %v6959_v9 = vsel %vm116_vm0, %v6913_v51, 0.0  ;;  %v6956_v63 = vsel %vm116_vm0, %v6912_v43, 0.0 }
0x32f4   :  { %6942 = vadd.xlane.f32.xlu1 %v6941_v58  ;;  %6939 = vadd.xlane.f32.xlu0 %v6938_v26 }
0x32f8   :  { %6936 = vadd.xlane.f32.xlu1 %v6935_v56  ;;  %6933 = vadd.xlane.f32.xlu0 %v6932_v53 }
0x32fc   :  { %6948 = vadd.xlane.f32.xlu1 %v6947_v29  ;;  %6945 = vadd.xlane.f32.xlu0 %v6944_v21 }
0x3300   :  { %6954 = vadd.xlane.f32.xlu1 %v6953_v40  ;;  %6951 = vadd.xlane.f32.xlu0 %v6950_v8 }
0x3304   :  { %6960 = vadd.xlane.f32.xlu1 %v6959_v9  ;;  %6957 = vadd.xlane.f32.xlu0 %v6956_v63 }
0x3375   :  { %v6919_v19 = vpop.xlane.xlu0 %6918  ;;  %v6916_v13 = vpop.xlane.xlu1 %6915 }
0x3376   :  { %v6985_v26 = vrot.slane %v6919_v19, %v9033_v41  ;;  %v6981_v32 = vrot.slane %v6916_v13, %v9038_v49 }
0x3378   :  { %v6986_v17 = vsel %vm750_vm9, %v6985_v26, %v6981_v32 }
0x3379   :  { %v11417_v2 = vpop.xlane.xlu1 %6924  ;;  %v6922_v55 = vpop.xlane.xlu0 %6921 }
0x337a   :  { %v6994_v3 = vrot.slane %v11417_v2, %v9033_v41  ;;  %v6990_v14 = vrot.slane %v6922_v55, %v9038_v49 }
0x337c   :  { %v6995_v56 = vsel %vm750_vm9, %v6994_v3, %v6990_v14 }
0x337d   :  { %v11419_v27 = vpop.xlane.xlu1 %6930  ;;  %v6928_v4 = vpop.xlane.xlu0 %6927  ;;  %v7050_v21 = vsel %vm499_vm2, %v6995_v56, %v6986_v17 }
0x337e   :  { %v7003_v58 = vrot.slane %v11419_v27, %v9033_v41  ;;  %v6999_v38 = vrot.slane %v6928_v4, %v9038_v49 }
0x3380   :  { %v7004_v53 = vsel %vm750_vm9, %v7003_v58, %v6999_v38 }
0x3381   :  { %v11421_v33 = vpop.xlane.xlu1 %6942  ;;  %v11423_v60 = vpop.xlane.xlu0 %6939  ;;  %v7051_v51 = vsel %vm501_vm3, %v7004_v53, %v7050_v21 }
0x3382   :  { %v7021_v31 = vrot.slane %v11421_v33, %v9033_v41  ;;  %v7017_v1 = vrot.slane %v11423_v60, %v9038_v49 }
0x3384   :  { %v7022_v14 = vsel %vm750_vm9, %v7021_v31, %v7017_v1 }
0x3385   :  { %v11425_v24 = vpop.xlane.xlu1 %6936  ;;  %v11427_v61 = vpop.xlane.xlu0 %6933 }
0x3386   :  { %v7012_v15 = vrot.slane %v11425_v24, %v9033_v41  ;;  %v7008_v25 = vrot.slane %v11427_v61, %v9038_v49 }
0x3388   :  { %v7013_v23 = vsel %vm750_vm9, %v7012_v15, %v7008_v25 }
0x3389   :  { %v11441_v12 = vpop.xlane.xlu1 %6948  ;;  %v11443_v35 = vpop.xlane.xlu0 %6945  ;;  %v7052_v63 = vsel %vm503_vm4, %v7013_v23, %v7051_v51 }
0x338a   :  { %v7030_v10 = vrot.slane %v11441_v12, %v9033_v41  ;;  %v7026_v29 = vrot.slane %v11443_v35, %v9038_v49  ;;  %v7053_v25 = vsel %vm505_vm5, %v7022_v14, %v7052_v63 }
0x338c   :  { %v7031_v3 = vsel %vm750_vm9, %v7030_v10, %v7026_v29 }
0x338d   :  { %v11458_v40 = vpop.xlane.xlu1 %6954  ;;  %v11460_v8 = vpop.xlane.xlu0 %6951  ;;  %v7054_v56 = vsel %vm507_vm6, %v7031_v3, %v7053_v25 }
0x338e   :  { %v7039_v43 = vrot.slane %v11458_v40, %v9033_v41  ;;  %v7035_v9 = vrot.slane %v11460_v8, %v9038_v49 }
0x3390   :  { %v7040_v58 = vsel %vm750_vm9, %v7039_v43, %v7035_v9 }
0x3391   :  { %v11471_v38 = vpop.xlane.xlu1 %6960  ;;  %v11473_v26 = vpop.xlane.xlu0 %6957  ;;  %v7055_v17 = vsel %vm509_vm7, %v7040_v58, %v7054_v56 }
0x3392   :  { %v7048_v32 = vrot.slane %v11471_v38, %v9033_v41  ;;  %v7044_v15 = vrot.slane %v11473_v26, %v9038_v49 }
0x3394   :  { %v7049_v53 = vsel %vm750_vm9, %v7048_v32, %v7044_v15 }
0x3395   :  { %v7056_v23 = vsel %vm511_vm8, %v7049_v53, %v7055_v17 }
0x3396   :  { %v7058_v10 = vsel %vm823_vm10, %v7056_v23, -inf }
0x3397   :  { %7059 = vmax.xlane.f32.xlu0 %v7058_v10 }
0x3424   :  { %v7060_v29 = vpop.xlane.xlu0 %7059 }
0x3425   :  { %v7065_v21 = vrot.slane %v7060_v29, %v8966_v48  ;;  %v7069_v31 = vrot.slane %v7060_v29, %v9092_v34  ;;  %v7073_v1 = vrot.slane %v7060_v29, %v9114_v6  ;;  %v7077_v63 = vrot.slane %v7060_v29, %v9126_v22 }
0x3426   :  { %v7081_v25 = vrot.slane %v7060_v29, %v9138_v28  ;;  %v7089_v10 = vrot.slane %v7060_v29, %v11844_v5 }
0x3427   :  { %v7102_v51 = vsub.f32 %v6916_v13, %v7065_v21  ;;  %v7103_v43 = vsub.f32 %v6919_v19, %v7065_v21  ;;  %v7104_v9 = vsub.f32 %v6922_v55, %v7069_v31  ;;  %v7106_v3 = vsub.f32 %v6928_v4, %v7073_v1 }
0x3428   :  { %v7105_v32 = vsub.f32 %v11417_v2, %v7069_v31  ;;  %v7108_v56 = vsub.f32 %v11427_v61, %v7077_v63  ;;  %v7107_v17 = vsub.f32 %v11419_v27, %v7073_v1  ;;  %v7085_v13 = vrot.slane %v7060_v29, %v9095_v52 }
0x3429   :  { %v7118_v14 = vmul.f32 1.442695, %v7102_v51  ;;  %v7120_v58 = vmul.f32 1.442695, %v7103_v43  ;;  %v7122_v15 = vmul.f32 1.442695, %v7104_v9  ;;  %v7110_v55 = vsub.f32 %v11423_v60, %v7081_v25 }
0x342a   :  { %v7126_v53 = vmul.f32 1.442695, %v7106_v3  ;;  %v7124_v19 = vmul.f32 1.442695, %v7105_v32  ;;  %v7130_v4 = vmul.f32 1.442695, %v7108_v56  ;;  %v7109_v2 = vsub.f32 %v11425_v24, %v7077_v63 }
0x342b   :  { %8600 = vpow2.f32 %v7118_v14  ;;  %v7128_v23 = vmul.f32 1.442695, %v7107_v17  ;;  %v7112_v61 = vsub.f32 %v11443_v35, %v7085_v13  ;;  %v7134_v21 = vmul.f32 1.442695, %v7110_v55 }
0x342c   :  { %8602 = vpow2.f32 %v7120_v58  ;;  %v7111_v60 = vsub.f32 %v11421_v33, %v7081_v25  ;;  %v7132_v1 = vmul.f32 1.442695, %v7109_v2  ;;  %v7093_v24 = vrot.slane %v7060_v29, %v11845_v18 }
0x342d   :  { %8604 = vpow2.f32 %v7122_v15  ;;  %v7114_v51 = vsub.f32 %v11460_v8, %v7089_v10  ;;  %v7138_v35 = vmul.f32 1.442695, %v7112_v61  ;;  %v7113_v63 = vsub.f32 %v11441_v12, %v7085_v13 }
0x342e   :  { %8606 = vpow2.f32 %v7126_v53  ;;  %v7136_v33 = vmul.f32 1.442695, %v7111_v60  ;;  %v7116_v3 = vsub.f32 %v11473_v26, %v7093_v24  ;;  %v7115_v58 = vsub.f32 %v11458_v40, %v7089_v10 }
0x342f   :  { %8608 = vpow2.f32 %v7124_v19  ;;  %v7142_v29 = vmul.f32 1.442695, %v7114_v51  ;;  %v7140_v32 = vmul.f32 1.442695, %v7113_v63  ;;  %v7117_v26 = vsub.f32 %v11471_v38, %v7093_v24 }
0x3430   :  { %8610 = vpow2.f32 %v7130_v4  ;;  %v7146_v12 = vmul.f32 1.442695, %v7116_v3  ;;  %v7144_v56 = vmul.f32 1.442695, %v7115_v58 }
0x3431   :  { %8612 = vpow2.f32 %v7128_v23  ;;  %v7148_v17 = vmul.f32 1.442695, %v7117_v26 }
0x3432   :  { %8614 = vpow2.f32 %v7134_v21 }
0x3433   :  { %8616 = vpow2.f32 %v7132_v1 }
0x3434   :  { %8618 = vpow2.f32 %v7138_v35 }
0x3435   :  { %v11498_v31 = vpop.eup %8600  ;;  %8620 = vpow2.f32 %v7136_v33 }
0x3436   :  { %v11500_v27 = vpop.eup %8602  ;;  %7167 = vperm.xlu1 %8226, %v11498_v31   ;;  %8622 = vpow2.f32 %v7142_v29 }
0x3437   :  { %7170 = vperm.xlu0 %8227, %v11500_v27   ;;  %v11507_v43 = vpop.eup %8604  ;;  %8624 = vpow2.f32 %v7140_v32 }
0x3438   :  { %v11509_v9 = vpop.eup %8606  ;;  %8626 = vpow2.f32 %v7146_v12 }
0x3439   :  { %v11515_v14 = vpop.eup %8608  ;;  %8628 = vpow2.f32 %v7144_v56 }
0x343a   :  { %7173 = vperm.xlu1 %8226, %v11507_v43   ;;  %v11517_v8 = vpop.eup %8610  ;;  %8630 = vpow2.f32 %v7148_v17 }
0x343b   :  { %7179 = vperm.xlu0 %8227, %v11509_v9   ;;  %v11522_v15 = vpop.eup %8612 }
0x343c   :  { %v11524_v25 = vpop.eup %8614 }
0x343d   :  { %v11529_v40 = vpop.eup %8616 }
0x343e   :  { %7176 = vperm.xlu1 %8226, %v11515_v14   ;;  %v11531_v53 = vpop.eup %8618 }
0x343f   :  { %7185 = vperm.xlu0 %8227, %v11517_v8   ;;  %v11535_v19 = vpop.eup %8620 }
0x3440   :  { %v11537_v13 = vpop.eup %8622 }
0x3441   :  { %v11541_v38 = vpop.eup %8624 }
0x3442   :  { %7182 = vperm.xlu1 %8226, %v11522_v15   ;;  %v11543_v55 = vpop.eup %8626 }
0x3443   :  { %7191 = vperm.xlu0 %8227, %v11524_v25   ;;  %v11547_v4 = vpop.eup %8628 }
0x3444   :  { %v8631_v2 = vpop.eup %8630 }
0x3446   :  { %7188 = vperm.xlu1 %8226, %v11529_v40  }
0x3447   :  { %7197 = vperm.xlu0 %8227, %v11531_v53  }
0x344a   :  { %7194 = vperm.xlu1 %8226, %v11535_v19  }
0x344b   :  { %7203 = vperm.xlu0 %8227, %v11537_v13  }
0x344e   :  { %7200 = vperm.xlu1 %8226, %v11541_v38  }
0x344f   :  { %7209 = vperm.xlu0 %8227, %v11543_v55  }
0x3452   :  { %7206 = vperm.xlu1 %8226, %v11547_v4  }
0x3456   :  { %7212 = vperm.xlu1 %8226, %v8631_v2  }
0x34b5   :  { %v7168_v23 = vpop.permute.xlu1 %7167 }
0x34b6   :  { %v7171_v10 = vpop.permute.xlu0 %7170  ;;  %v7217_v26 = vrot.slane %v7168_v23, %v9038_v49 }
0x34b7   :  { %v7221_v12 = vrot.slane %v7171_v10, %v9033_v41 }
0x34b9   :  { %v7174_v61 = vpop.permute.xlu1 %7173  ;;  %v7222_v23 = vsel %vm750_vm9, %v7221_v12, %v7217_v26 }
0x34ba   :  { %v7180_v21 = vpop.permute.xlu0 %7179  ;;  %v7226_v56 = vrot.slane %v7174_v61, %v9038_v49 }
0x34bb   :  { %v7235_v0 = vrot.slane %v7180_v21, %v9038_v49 }
0x34bd   :  { %v7177_v60 = vpop.permute.xlu1 %7176 }
0x34be   :  { %v7186_v1 = vpop.permute.xlu0 %7185  ;;  %v7230_v3 = vrot.slane %v7177_v60, %v9033_v41 }
0x34bf   :  { %v7244_v36 = vrot.slane %v7186_v1, %v9038_v49 }
0x34c0   :  { %v7231_v60 = vsel %vm750_vm9, %v7230_v3, %v7226_v56 }
0x34c1   :  { %v7183_v24 = vpop.permute.xlu1 %7182 }
0x34c2   :  { %v7192_v51 = vpop.permute.xlu0 %7191  ;;  %v7239_v29 = vrot.slane %v7183_v24, %v9033_v41 }
0x34c3   :  { %v7253_v59 = vrot.slane %v7192_v51, %v9038_v49 }
0x34c4   :  { %v7240_v10 = vsel %vm750_vm9, %v7239_v29, %v7235_v0 }
0x34c5   :  { %v7189_v35 = vpop.permute.xlu1 %7188 }
0x34c6   :  { %v7198_v63 = vpop.permute.xlu0 %7197  ;;  %v7248_v17 = vrot.slane %v7189_v35, %v9033_v41 }
0x34c7   :  { %v7262_v61 = vrot.slane %v7198_v63, %v9038_v49 }
0x34c8   :  { %v7249_v35 = vsel %vm750_vm9, %v7248_v17, %v7244_v36 }
0x34c9   :  { %v7195_v33 = vpop.permute.xlu1 %7194 }
0x34ca   :  { %v7204_v58 = vpop.permute.xlu0 %7203  ;;  %v7257_v62 = vrot.slane %v7195_v33, %v9033_v41  ;;  %v7286_v33 = vsel %vm499_vm2, %v7231_v60, %v7222_v23 }
0x34cb   :  { %v7271_v1 = vrot.slane %v7204_v58, %v9038_v49  ;;  %v7287_v51 = vsel %vm501_vm3, %v7240_v10, %v7286_v33 }
0x34cc   :  { %v7258_v3 = vsel %vm750_vm9, %v7257_v62, %v7253_v59  ;;  %v7288_v29 = vsel %vm503_vm4, %v7249_v35, %v7287_v51 }
0x34cd   :  { %v7201_v32 = vpop.permute.xlu1 %7200  ;;  %v7289_v36 = vsel %vm505_vm5, %v7258_v3, %v7288_v29 }
0x34ce   :  { %v7266_v24 = vrot.slane %v7201_v32, %v9033_v41  ;;  %v7210_v32 = vpop.permute.xlu0 %7209 }
0x34d0   :  { %v7267_v0 = vsel %vm750_vm9, %v7266_v24, %v7262_v61 }
0x34d1   :  { %v7207_v30 = vpop.permute.xlu1 %7206  ;;  %v7290_v58 = vsel %vm507_vm6, %v7267_v0, %v7289_v36 }
0x34d2   :  { %v7275_v21 = vrot.slane %v7207_v30, %v9033_v41  ;;  %v7280_v30 = vrot.slane %v7210_v32, %v9038_v49 }
0x34d4   :  { %v7276_v12 = vsel %vm750_vm9, %v7275_v21, %v7271_v1 }
0x34d5   :  { %v7213_v63 = vpop.permute.xlu1 %7212  ;;  %v7291_v62 = vsel %vm509_vm7, %v7276_v12, %v7290_v58 }
0x34d6   :  { %v7284_v26 = vrot.slane %v7213_v63, %v9033_v41 }
0x34d8   :  { %v7285_v59 = vsel %vm750_vm9, %v7284_v26, %v7280_v30 }
0x34d9   :  { %v7292_v56 = vsel %vm511_vm8, %v7285_v59, %v7291_v62 }
0x34da   :  { %v7294_v17 = vsel %vm823_vm10, %v7292_v56, 0.0 }
0x34db   :  { %7295 = vadd.xlane.f32.xlu0 %v7294_v17 }
0x3568   :  { %v7296_v60 = vpop.xlane.xlu0 %7295 }
0x3569   :  { %8632 = vrcp.f32 %v7296_v60 }
0x3573   :  { %v8633_v24 = vpop.eup %8632 }
0x3574   :  { %v7318_v10 = vrot.slane %v8633_v24, %v9138_v28  ;;  %v7302_v49 = vrot.slane %v8633_v24, %v8966_v48  ;;  %v7330_v61 = vrot.slane %v8633_v24, %v11845_v18  ;;  %v7306_v33 = vrot.slane %v8633_v24, %v9092_v34 }
0x3575   :  { %v7310_v28 = vrot.slane %v8633_v24, %v9114_v6 }
0x3576   :  { %v7347_v41 = vmul.f32 %v11524_v25, %v7318_v10  ;;  %v7339_v23 = vmul.f32 %v11498_v31, %v7302_v49  ;;  %v7354_v35 = vmul.f32 %v8631_v2, %v7330_v61  ;;  %v7340_v21 = vmul.f32 %v11500_v27, %v7302_v49 }
0x3577   :  { %v7341_v1 = vmul.f32 %v11507_v43, %v7306_v33  ;;  %v7342_v48 = vmul.f32 %v11515_v14, %v7306_v33  ;;  %v7343_v31 = vmul.f32 %v11509_v9, %v7310_v28  ;;  %v7344_v18 = vmul.f32 %v11522_v15, %v7310_v28 }
0x3578   :  { %7397 = vperm.xlu0 %8227, %v7347_v41   ;;  %7357 = vperm.xlu1 %8226, %v7339_v23   ;;  %v7314_v25 = vrot.slane %v8633_v24, %v9126_v22  ;;  %v7348_v43 = vmul.f32 %v11535_v19, %v7318_v10  ;;  %v7322_v14 = vrot.slane %v8633_v24, %v9095_v52 }
0x3579   :  { %v7326_v15 = vrot.slane %v8633_v24, %v11844_v5 }
0x357a   :  { %v7345_v34 = vmul.f32 %v11517_v8, %v7314_v25  ;;  %v7346_v27 = vmul.f32 %v11529_v40, %v7314_v25  ;;  %v7349_v6 = vmul.f32 %v11531_v53, %v7322_v14  ;;  %v7350_v9 = vmul.f32 %v11541_v38, %v7322_v14 }
0x357b   :  { %v7351_v22 = vmul.f32 %v11537_v13, %v7326_v15  ;;  %v7352_v8 = vmul.f32 %v11547_v4, %v7326_v15  ;;  %v7353_v40 = vmul.f32 %v11543_v55, %v7330_v61 }
0x357c   :  { %7432 = vperm.xlu0 %8227, %v7354_v35   ;;  %7362 = vperm.xlu1 %8226, %v7340_v21  }
0x3580   :  { %7367 = vperm.xlu1 %8226, %v7341_v1  }
0x3584   :  { %7372 = vperm.xlu1 %8226, %v7342_v48  }
0x3588   :  { %7377 = vperm.xlu1 %8226, %v7343_v31  }
0x358c   :  { %7382 = vperm.xlu1 %8226, %v7344_v18  }
0x3590   :  { %7387 = vperm.xlu1 %8226, %v7345_v34  }
0x3594   :  { %7392 = vperm.xlu1 %8226, %v7346_v27  }
0x3598   :  { %7402 = vperm.xlu1 %8226, %v7348_v43  }
0x359c   :  { %7407 = vperm.xlu1 %8226, %v7349_v6  }
0x35a0   :  { %7412 = vperm.xlu1 %8226, %v7350_v9  }
0x35a4   :  { %7417 = vperm.xlu1 %8226, %v7351_v22  }
0x35a8   :  { %7422 = vperm.xlu1 %8226, %v7352_v8  }
0x35ac   :  { %7427 = vperm.xlu1 %8226, %v7353_v40  }
0x35b0   :  { %7572 = vrot.lane.b32.xlu1 %v11357_v54, %s8689_s18 }
0x35f7   :  { %v7358_v52 = vpop.permute.xlu1 %7357  ;;  %v7398_v55 = vpop.permute.xlu0 %7397 }
0x35f8   :  { %v7435_v0 = vmul.f32 %v8847_v45, %v7358_v52 }
0x35fa   :  { %v7451_v45 = vsel %vm116_vm0, %v7435_v0, 0.0 }
0x35fb   :  { %v7363_v53 = vpop.permute.xlu1 %7362  ;;  %v7433_v8 = vpop.permute.xlu0 %7432 }
0x35fc   :  { %v7436_v13 = vmul.f32 %v8851_v47, %v7363_v53 }
0x35ff   :  { %v7368_v19 = vpop.permute.xlu1 %7367 }
0x3600   :  { %v7437_v51 = vmul.f32 %v8845_v44, %v7368_v19 }
0x3602   :  { %v7460_v44 = vsel %vm116_vm0, %v7437_v51, 0.0 }
0x3603   :  { %v7373_v2 = vpop.permute.xlu1 %7372 }
0x3604   :  { %v7438_v32 = vmul.f32 %v8849_v46, %v7373_v2  ;;  %v7452_v46 = vsel %vm116_vm0, %v7436_v13, 0.0  ;;  %v11934_v2 = vld [vmem:[#allocation9_spill] sm:$0xff] }
0x3605   :  { %v7453_v59 = vadd.f32 %v7452_v46, %v7451_v45 }
0x3606   :  { %v7461_v12 = vsel %vm116_vm0, %v7438_v32, 0.0  ;;  %v11935_v32 = vld [vmem:[#allocation8_spill] sm:$0xff] }
0x3607   :  { %v7378_v38 = vpop.permute.xlu1 %7377  ;;  %v7454_v49 = vrot.slane %v7453_v59, 4  ;;  %v7450_v13 = vmul.f32 %v11935_v32, %v7433_v8 }
0x3608   :  { %v7439_v54 = vmul.f32 %v8883_v11, %v7378_v38  ;;  %v7462_v11 = vadd.f32 %v7461_v12, %v7460_v44 }
0x3609   :  { %v7455_v1 = vadd.f32 %v7454_v49, %v7453_v59  ;;  %v7515_v44 = vsel %vm116_vm0, %v7450_v13, 0.0 }
0x360a   :  { %v7469_v26 = vsel %vm116_vm0, %v7439_v54, 0.0  ;;  %v7463_v60 = vrot.slane %v7462_v11, 4 }
0x360b   :  { %v7383_v3 = vpop.permute.xlu1 %7382  ;;  %v7456_v14 = vrot.slane %v7455_v1, 2 }
0x360c   :  { %v7440_v4 = vmul.f32 %v8887_v20, %v7383_v3  ;;  %v7443_v20 = vmul.f32 %v8899_v39, %v7398_v55  ;;  %v7464_v21 = vadd.f32 %v7463_v60, %v7462_v11 }
0x360d   :  { %v7457_v53 = vadd.f32 %v7456_v14, %v7455_v1 }
0x360e   :  { %v7470_v47 = vsel %vm116_vm0, %v7440_v4, 0.0  ;;  %v7487_v17 = vsel %vm116_vm0, %v7443_v20, 0.0  ;;  %v7465_v34 = vrot.slane %v7464_v21, 2 }
0x360f   :  { %v7388_v5 = vpop.permute.xlu1 %7387  ;;  %v7458_v12 = vrot.slane %v7457_v53, 1 }
0x3610   :  { %v7441_v63 = vmul.f32 %v8879_v7, %v7388_v5  ;;  %v7471_v7 = vadd.f32 %v7470_v47, %v7469_v26  ;;  %v7466_v40 = vadd.f32 %v7465_v34, %v7464_v21 }
0x3612   :  { %v7472_v41 = vrot.slane %v7471_v7, 4  ;;  %v7467_v0 = vrot.slane %v7466_v40, 1 }
0x3613   :  { %v7393_v29 = vpop.permute.xlu1 %7392 }
0x3614   :  { %v7442_v36 = vmul.f32 %v8885_v16, %v7393_v29  ;;  %v7478_v16 = vsel %vm116_vm0, %v7441_v63, 0.0  ;;  %v7473_v48 = vadd.f32 %v7472_v41, %v7471_v7  ;;  %v7468_v11 = vadd.f32 %v7467_v0, %v7466_v40 }
0x3615   :  { %v7459_v7 = vadd.f32 %v7458_v12, %v7457_v53 }
0x3616   :  { %v7479_v30 = vsel %vm116_vm0, %v7442_v36, 0.0  ;;  %v7474_v6 = vrot.slane %v7473_v48, 2  ;;  %v11936_v36 = vld [vmem:[#allocation7_spill] sm:$0xff]  ;;  %v7541_v60 = vpack.c.bf16 %v7468_v11, %v7468_v11 }
0x3617   :  { %v7403_v58 = vpop.permute.xlu1 %7402  ;;  %v7480_v56 = vadd.f32 %v7479_v30, %v7478_v16  ;;  %v7540_v41 = vpack.c.bf16 %v7459_v7, %v7459_v7 }
0x3618   :  { %v7444_v62 = vmul.f32 %v8903_v50, %v7403_v58  ;;  %v7475_v19 = vadd.f32 %v7474_v6, %v7473_v48  ;;  %v7557_v48 = vunpack.c.l.b16 %v7541_v60 }
0x3619   :  { %v7481_v23 = vrot.slane %v7480_v56, 4 }
0x361a   :  { %v7488_v39 = vsel %vm116_vm0, %v7444_v62, 0.0  ;;  %v7476_v63 = vrot.slane %v7475_v19, 1 }
0x361b   :  { %v7489_v24 = vadd.f32 %v7488_v39, %v7487_v17  ;;  %v7408_v10 = vpop.permute.xlu1 %7407  ;;  %v7482_v28 = vadd.f32 %v7481_v23, %v7480_v56 }
0x361c   :  { %v7445_v35 = vmul.f32 %v8897_v37, %v7408_v10  ;;  %v7477_v16 = vadd.f32 %v7476_v63, %v7475_v19 }
0x361d   :  { %v7490_v61 = vrot.slane %v7489_v24, 4  ;;  %v7483_v9 = vrot.slane %v7482_v28, 2 }
0x361e   :  { %v7496_v18 = vsel %vm116_vm0, %v7445_v35, 0.0  ;;  %v7542_v23 = vpack.c.bf16 %v7477_v16, %v7477_v16 }
0x361f   :  { %v7413_v33 = vpop.permute.xlu1 %7412  ;;  %v7491_v31 = vadd.f32 %v7490_v61, %v7489_v24  ;;  %v7484_v3 = vadd.f32 %v7483_v9, %v7482_v28 }
0x3620   :  { %v7446_v50 = vmul.f32 %v8901_v42, %v7413_v33  ;;  %v7531_v33 = vsel %vm499_vm2, %v7468_v11, %v7459_v7  ;;  %v7558_v34 = vunpack.c.l.b16 %v7542_v23  ;;  %v11940_v7 = vld [vmem:[#allocation22_spill] sm:$0xff] }
0x3621   :  { %v7492_v37 = vrot.slane %v7491_v31, 2  ;;  %v7485_v47 = vrot.slane %v7484_v3, 1 }
0x3622   :  { %v7497_v25 = vsel %vm116_vm0, %v7446_v50, 0.0 }
0x3623   :  { %v7498_v27 = vadd.f32 %v7497_v25, %v7496_v18  ;;  %v7418_v43 = vpop.permute.xlu1 %7417  ;;  %v7493_v4 = vadd.f32 %v7492_v37, %v7491_v31  ;;  %v7486_v62 = vadd.f32 %v7485_v47, %v7484_v3  ;;  %v7556_v18 = vunpack.c.l.b16 %v7540_v41 }
0x3624   :  { %v7447_v22 = vmul.f32 %v8864_v57, %v7418_v43  ;;  %v7532_v25 = vsel %vm501_vm3, %v7477_v16, %v7531_v33  ;;  %v7656_v16 = vld [vmem:[#allocation3] sm:$0xff] }
0x3625   :  { %v7499_v15 = vrot.slane %v7498_v27, 4  ;;  %v7494_v30 = vrot.slane %v7493_v4, 1  ;;  %v7543_v61 = vpack.c.bf16 %v7486_v62, %v7486_v62  ;;  %v7564_v37 = vsel %vm499_vm2, %v7557_v48, %v7556_v18  ;;  %v11943_v33 = vld [vmem:[#allocation23_spill] sm:$0xff]  ;;  %v11944_v48 = vld [vmem:[#allocation12_spill] sm:$0xff] }
0x3626   :  { %v7505_v51 = vsel %vm116_vm0, %v7447_v22, 0.0 }
0x3627   :  { %v7500_v52 = vadd.f32 %v7499_v15, %v7498_v27  ;;  %v7423_v42 = vpop.permute.xlu1 %7422  ;;  %v7495_v39 = vadd.f32 %v7494_v30, %v7493_v4  ;;  %v7533_v27 = vsel %vm503_vm4, %v7486_v62, %v7532_v25  ;;  %v7559_v43 = vunpack.c.l.b16 %v7543_v61  ;;  %v8271_v61 = vld [vmem:[%s11735_s8 + $0x8] sm:$0xff]  }
0x3628   :  { %v7448_v38 = vmul.f32 %v11934_v2, %v7423_v42 }
0x3629   :  { %v7501_v5 = vrot.slane %v7500_v52, 2  ;;  %v7544_v1 = vpack.c.bf16 %v7495_v39, %v7495_v39  ;;  %v7534_v9 = vsel %vm505_vm5, %v7495_v39, %v7533_v27 }
0x362a   :  { %v7506_v55 = vsel %vm116_vm0, %v7448_v38, 0.0 }
0x362b   :  { %v7502_v54 = vadd.f32 %v7501_v5, %v7500_v52  ;;  %v7507_v57 = vadd.f32 %v7506_v55, %v7505_v51  ;;  %v7428_v29 = vpop.permute.xlu1 %7427  ;;  %v7560_v15 = vunpack.c.l.b16 %v7544_v1  ;;  %v7565_v52 = vsel %vm501_vm3, %v7558_v34, %v7564_v37  ;;  %v8273_v1 = vld [vmem:[%s11735_s8 + $0x18] sm:$0xff]   ;;  %v7662_v34 = vld [vmem:[#allocation3 + $0x30] sm:$0xff] }
0x362c   :  { %v7449_v46 = vmul.f32 %v11936_v36, %v7428_v29  ;;  %v7566_v38 = vsel %vm503_vm4, %v7559_v43, %v7565_v52 }
0x362d   :  { %v7508_v20 = vrot.slane %v7507_v57, 4  ;;  %v7503_v26 = vrot.slane %v7502_v54, 1  ;;  %v7567_v3 = vsel %vm505_vm5, %v7560_v15, %v7566_v38  ;;  %v7660_v15 = vld [vmem:[#allocation3 + $0x20] sm:$0xff] }
0x362e   :  { %v7514_v45 = vsel %vm116_vm0, %v7449_v46, 0.0 }
0x362f   :  { %v7509_v58 = vadd.f32 %v7508_v20, %v7507_v57  ;;  %v7516_v59 = vadd.f32 %v7515_v44, %v7514_v45  ;;  %v7504_v24 = vadd.f32 %v7503_v26, %v7502_v54  ;;  %v7573_v55 = vpop.permute.xlu1 %7572  ;;  %v11937_v57 = vld [vmem:[#allocation17_spill] sm:$0xff]  ;;  %v11938_v26 = vld [vmem:[#allocation10_spill] sm:$0xff] }
0x3631   :  { %v7510_v56 = vrot.slane %v7509_v58, 2  ;;  %v7517_v17 = vrot.slane %v7516_v59, 4  ;;  %v7545_v50 = vpack.c.bf16 %v7504_v24, %v7504_v24  ;;  %v7535_v22 = vsel %vm507_vm6, %v7504_v24, %v7534_v9 }
0x3633   :  { %v7511_v10 = vadd.f32 %v7510_v56, %v7509_v58  ;;  %v7518_v49 = vadd.f32 %v7517_v17, %v7516_v59  ;;  %v7561_v8 = vunpack.c.l.b16 %v7545_v50  ;;  %v11939_v58 = vld [vmem:[#allocation20_spill] sm:$0xff]  ;;  %v11941_v56 = vld [vmem:[#allocation18_spill] sm:$0xff] }
0x3634   :  { %v7657_v59 = vld [vmem:[#allocation3 + $0x8] sm:$0xff]  ;;  %v7659_v50 = vld [vmem:[#allocation3 + $0x18] sm:$0xff] }
0x3635   :  { %v7512_v35 = vrot.slane %v7511_v10, 1  ;;  %v7519_v21 = vrot.slane %v7518_v49, 2  ;;  %v7568_v32 = vsel %vm507_vm6, %v7561_v8, %v7567_v3  ;;  %v8228_v62 = vpack.i.bf16 %v7657_v59, %v7656_v16 }
0x3637   :  { %v7513_v28 = vadd.f32 %v7512_v35, %v7511_v10  ;;  %v7520_v31 = vadd.f32 %v7519_v21, %v7518_v49  ;;  %v8270_v49 = vld [vmem:[%s11735_s8] sm:$0xff]   ;;  %v8272_v35 = vld [vmem:[%s11735_s8 + $0x10] sm:$0xff]  }
0x3638   :  { %8197 = vmatprep.subr.bf16.mxu0 %v8270_v49  ;;  %v11942_v21 = vld [vmem:[#allocation21_spill] sm:$0xff] }
0x3639   :  { %v7546_v14 = vpack.c.bf16 %v7513_v28, %v7513_v28  ;;  %v7521_v6 = vrot.slane %v7520_v31, 1  ;;  %v7536_v42 = vsel %vm509_vm7, %v7513_v28, %v7535_v22  ;;  %8198 = vmatpush3.bf16.msra.mxu0 %v8270_v49  ;;  %v11945_v28 = vld [vmem:[#allocation16_spill] sm:$0xff] }
0x363a   :  { %8199 = vmatprep.subr.bf16.mxu0 %v8271_v61 }
0x363b   :  { %v7522_v40 = vadd.f32 %v7521_v6, %v7520_v31  ;;  %v7562_v53 = vunpack.c.l.b16 %v7546_v14  ;;  %v7658_v31 = vld [vmem:[#allocation3 + $0x10] sm:$0xff]  ;;  %v7661_v6 = vld [vmem:[#allocation3 + $0x28] sm:$0xff] }
0x363c   :  { %v8233_v18 = vpack.i.bf16 %v7659_v50, %v7658_v31  ;;  %v8238_v37 = vpack.i.bf16 %v7661_v6, %v7660_v15 }
0x363d   :  { %v7537_v19 = vsel %vm511_vm8, %v7522_v40, %v7536_v42  ;;  %v7547_v2 = vpack.c.bf16 %v7522_v40, %v7522_v40  ;;  %v7569_v13 = vsel %vm509_vm7, %v7562_v53, %v7568_v32  ;;  %8200 = vmatpush3.bf16.msra.mxu0 %v8271_v61 }
0x363e   :  { %7539 = vst.msk [vmem:[#allocation3 + $0x38] sm:$0xff] %vm116_vm0, %v7537_v19  ;;  %8201 = vmatprep.subr.bf16.mxu0 %v8272_v35 }
0x363f   :  { %v7563_v5 = vunpack.c.l.b16 %v7547_v2 }
0x3641   :  { %v7570_v4 = vsel %vm511_vm8, %v7563_v5, %v7569_v13  ;;  %8202 = vmatpush3.bf16.msra.mxu0 %v8272_v35 }
0x3642   :  { %v7571_v51 = vpack.c.b16 %v7570_v4, %v7570_v4  ;;  %8203 = vmatprep.subr.bf16.mxu0 %v8273_v1 }
0x3644   :  { %v7576_v0 = vsel %vm116_vm0, %v7571_v51, %v7573_v55 }
0x3645   :  { %8194 = vmatmul.mubr.msk.bf16.vlgmr.msra.gmra.mrb[44].mxu1 %vm1367_vm11, %v7576_v0  ;;  %8204 = vmatpush3.bf16.msra.mxu0 %v8273_v1  ;;  %v7663_v25 = vld [vmem:[#allocation3 + $0x38] sm:$0xff] }
0x3646   :  { %v8243_v27 = vpack.i.bf16 %v7663_v25, %v7662_v34 }
0x3718   :  { %v7613_v54 = vpop.f32.mrb[44].mxu1 }
0x3719   :  { %v7614_v29 = vadd.f32 %v7613_v54, %v11937_v57  ;;  %v8195_v12 = vpop.f32.mrb[45].mxu1 }
0x371a   :  { %v7616_v63 = vpop.f32.mrb[46].mxu1 }
0x371b   :  { %8634 = vtanh.f32 %v7614_v29  ;;  %v8196_v36 = vpop.f32.mrb[47].mxu1  ;;  %v7907_v47 = vmul.f32 -1.442695, %v7614_v29 }
0x371d   :  { %8636 = vpow2.f32 %v7907_v47 }
0x3725   :  { %v8635_v46 = vpop.eup %8634 }
0x3726   :  { %7628 = vrot.lane.b32.xlu0 %v8635_v46, %s8689_s18 }
0x3727   :  { %v8637_v20 = vpop.eup %8636 }
0x3728   :  { %v7622_v44 = vadd.f32 1.0, %v8637_v20 }
0x372a   :  { %8638 = vrcp.f32 %v7622_v44 }
0x3734   :  { %v8639_v30 = vpop.eup %8638 }
0x3735   :  { %v7626_v17 = vmul.f32 %v8639_v30, %v11941_v56  ;;  %v7908_v56 = vld [vmem:[%s11736_s9] ss:$0 sm:$0xff] }
0x3798   :  { %v7629_v45 = vpop.permute.xlu0 %7628 }
0x3799   :  { %v7631_v11 = vmul.f32 %v8639_v30, %v7629_v45 }
0x379b   :  { %7633 = vrot.lane.b32.xlu1 %v7631_v11, %s8688_s6 }
0x379f   :  { %1435 = vrot.lane.b32.xlu1 %v11938_v26, %s8688_s6 }
0x37a3   :  { %3209 = vrot.lane.b32.xlu1 %v11939_v58, %s8688_s6 }
0x37a7   :  { %4983 = vrot.lane.b32.xlu1 %v11940_v7, %s8688_s6 }
0x37ab   :  { %8229 = vrot.lane.b32.xlu1 %v8228_v62, %s8688_s6 }
0x380d   :  { %v7634_v39 = vpop.permute.xlu1 %7633 }
0x380e   :  { %v7636_v60 = vadd.f32 %v7634_v39, %v7626_v17 }
0x3810   :  { %8640 = vtanh.f32 %v7636_v60 }
0x3811   :  { %v1436_v24 = vpop.permute.xlu1 %1435 }
0x3812   :  { %1438 = vst.msk [vmem:[#allocation2] sm:$0xff] %vm116_vm0, %v1436_v24 }
0x3815   :  { %v3210_v10 = vpop.permute.xlu1 %3209 }
0x3816   :  { %3212 = vst.msk [vmem:[#allocation2 + $0x10] sm:$0xff] %vm116_vm0, %v3210_v10 }
0x3819   :  { %v4984_v41 = vpop.permute.xlu1 %4983  ;;  %v7648_v42 = vld [vmem:[#allocation2] sm:$0xff] }
0x381a   :  { %v8641_v23 = vpop.eup %8640  ;;  %4986 = vst.msk [vmem:[#allocation2 + $0x20] sm:$0xff] %vm116_vm0, %v4984_v41 }
0x381b   :  { %7639 = vrot.lane.b32.xlu0 %v8641_v23, %s8689_s18  ;;  %s8690_s18 = smov [#allocation4]  }
0x381c   :  { %s7837_s29 = sshll.u32 %s8690_s18, 4  ;;  %s7838_s29 = int_to_ptr.vmem [resolvable:$true] %s7837_s29 }
0x381d   :  { %v8230_v22 = vpop.permute.xlu1 %8229  ;;  %v7650_v51 = vld [vmem:[#allocation2 + $0x10] sm:$0xff]  ;;  %s8660_s9 = scalar_lea.vmem %s7838_s29, 1024  ;;  %p8665_p1 = scmp.lt.s32.totalorder %s7838_s29, %s7838_s29 }
0x381e   :  { %v8231_v40 = vunpack.i.l.bf16 %v8230_v22  ;;  %v8232_v52 = vunpack.i.h.bf16 %v8230_v22  ;;  %p8661_p0 = scmp.ne.s32.totalorder %s7838_s29, %s8660_s9  ;;  %p8666_p2 = scmp.lt.s32.totalorder %s8660_s9, %s8660_s9 }
0x381f   :  { %2322 = vrot.lane.b32.xlu0 %v11942_v21, %s8688_s6 }
0x3820   :  { %v7696_v2 = vsel %vm116_vm0, %v7648_v42, %v8231_v40  ;;  %p8667_p3 = por %p8666_p2, %p8665_p1 }
0x3821   :  { %v7652_v20 = vld [vmem:[#allocation2 + $0x20] sm:$0xff] }
0x3822   :  { %p8668_p4 = pnand %p8667_p3, %p8661_p0 }
0x3823   :  { %4096 = vrot.lane.b32.xlu0 %v11943_v33, %s8688_s6 }
0x3827   :  { %5870 = vrot.lane.b32.xlu0 %v11944_v48, %s8688_s6 }
0x382b   :  { %6757 = vrot.lane.b32.xlu0 %v11945_v28, %s8688_s6 }
0x382f   :  { %8234 = vrot.lane.b32.xlu0 %v8233_v18, %s8688_s6 }
0x3833   :  { %8244 = vrot.lane.b32.xlu0 %v8243_v27, %s8688_s6 }
0x388d   :  { %v7640_v43 = vpop.permute.xlu0 %7639 }
0x388e   :  { %v7642_v14 = vmul.f32 %v8639_v30, %v7640_v43 }
0x3890   :  { %7644 = vrot.lane.b32.xlu1 %v7642_v14, %s8688_s6 }
0x3891   :  { %v2323_v9 = vpop.permute.xlu0 %2322 }
0x3892   :  { %2325 = vst.msk [vmem:[#allocation2 + $0x8] sm:$0xff] %vm116_vm0, %v2323_v9 }
0x3894   :  { %8239 = vrot.lane.b32.xlu1 %v8238_v37, %s8688_s6 }
0x3895   :  { %v4097_v8 = vpop.permute.xlu0 %4096 }
0x3896   :  { %4099 = vst.msk [vmem:[#allocation2 + $0x18] sm:$0xff] %vm116_vm0, %v4097_v8 }
0x3899   :  { %v5871_v53 = vpop.permute.xlu0 %5870  ;;  %v7649_v19 = vld [vmem:[#allocation2 + $0x8] sm:$0xff] }
0x389a   :  { %5873 = vst.msk [vmem:[#allocation2 + $0x28] sm:$0xff] %vm116_vm0, %v5871_v53  ;;  %v7697_v38 = vsel %vm116_vm0, %v7649_v19, %v8232_v52 }
0x389b   :  { %v7704_v3 = vpack.c.bf16 %v7697_v38, %v7696_v2 }
0x389d   :  { %8205 = vmatprep.mubr.msk.bf16.mxu0 %vm1367_vm11, %v7704_v3  ;;  %v6758_v5 = vpop.permute.xlu0 %6757  ;;  %v7651_v55 = vld [vmem:[#allocation2 + $0x18] sm:$0xff] }
0x389e   :  { %6760 = vst.msk [vmem:[#allocation2 + $0x30] sm:$0xff] %vm116_vm0, %v6758_v5 }
0x38a1   :  { %v8235_v32 = vpop.permute.xlu0 %8234  ;;  %v7653_v44 = vld [vmem:[#allocation2 + $0x28] sm:$0xff] }
0x38a2   :  { %v8237_v13 = vunpack.i.h.bf16 %v8235_v32  ;;  %v8236_v4 = vunpack.i.l.bf16 %v8235_v32 }
0x38a4   :  { %v7699_v0 = vsel %vm116_vm0, %v7651_v55, %v8237_v13  ;;  %v7698_v54 = vsel %vm116_vm0, %v7650_v51, %v8236_v4 }
0x38a5   :  { %v7705_v57 = vpack.c.bf16 %v7699_v0, %v7698_v54  ;;  %v8245_v12 = vpop.permute.xlu0 %8244  ;;  %v7654_v26 = vld [vmem:[#allocation2 + $0x30] sm:$0xff] }
0x38a6   :  { %v8246_v36 = vunpack.i.l.bf16 %v8245_v12  ;;  %v8247_v30 = vunpack.i.h.bf16 %v8245_v12 }
0x38a7   :  { %8206 = vmatmul.mubr.msk.bf16.vlgmr.msra.gmra.mrb[40].mxu0 %vm1367_vm11, %v7705_v57 }
0x38a8   :  { %v7702_v7 = vsel %vm116_vm0, %v7654_v26, %v8246_v36 }
0x3902   :  { %v7645_v29 = vpop.permute.xlu1 %7644 }
0x3903   :  { %7647 = vst.msk [vmem:[#allocation2 + $0x38] sm:$0xff] %vm116_vm0, %v7645_v29 }
0x3906   :  { %v8240_v63 = vpop.permute.xlu1 %8239 }
0x3907   :  { %v8242_v46 = vunpack.i.h.bf16 %v8240_v63  ;;  %v8241_v47 = vunpack.i.l.bf16 %v8240_v63 }
0x3909   :  { %v7700_v45 = vsel %vm116_vm0, %v7652_v20, %v8241_v47  ;;  %v7701_v11 = vsel %vm116_vm0, %v7653_v44, %v8242_v46 }
0x390a   :  { %v7706_v58 = vpack.c.bf16 %v7701_v11, %v7700_v45  ;;  %v7655_v59 = vld [vmem:[#allocation2 + $0x38] sm:$0xff] }
0x390b   :  { %v7703_v16 = vsel %vm116_vm0, %v7655_v59, %v8247_v30 }
0x390c   :  { %8209 = vmatprep.mubr.msk.bf16.mxu0 %vm1367_vm11, %v7706_v58  ;;  %v7707_v62 = vpack.c.bf16 %v7703_v16, %v7702_v7 }
0x390e   :  { %8210 = vmatmul.mubr.msk.bf16.gmra.mrb[44].mxu0 %vm1367_vm11, %v7707_v62 }
0x397a   :  { %v8207_v17 = vpop.f32.mrb[40].mxu0 }
0x397b   :  { %v7802_v39 = vadd.f32 %v8207_v17, %v7908_v56  ;;  %v7793_v60 = vpop.f32.mrb[41].mxu0 }
0x397c   :  { %v7794_v24 = vadd.f32 %v7908_v56, %v7793_v60  ;;  %v8208_v10 = vpop.f32.mrb[42].mxu0 }
0x397d   :  { %7826 = vst [vmem:[#allocation4 + $0x10] sm:$0xff] %v7802_v39  ;;  %v7805_v49 = vadd.f32 %v8208_v10, %v7908_v56  ;;  %v7796_v41 = vpop.f32.mrb[43].mxu0 }
0x397e   :  { %7824 = vst [vmem:[#allocation4] sm:$0xff] %v7794_v24  ;;  %v7797_v23 = vadd.f32 %v7908_v56, %v7796_v41 }
0x397f   :  { %7827 = vst [vmem:[#allocation4 + $0x18] sm:$0xff] %v7805_v49 }
0x3980   :  { %7825 = vst [vmem:[#allocation4 + $0x8] sm:$0xff] %v7797_v23 }
0x39e1   :  { %v8211_v61 = vpop.f32.mrb[44].mxu0 }
0x39e2   :  { %v7818_v35 = vadd.f32 %v8211_v61, %v7908_v56  ;;  %v7809_v21 = vpop.f32.mrb[45].mxu0 }
0x39e3   :  { %v7810_v33 = vadd.f32 %v7908_v56, %v7809_v21  ;;  %v8212_v1 = vpop.f32.mrb[46].mxu0 }
0x39e4   :  { %7830 = vst [vmem:[#allocation4 + $0x30] sm:$0xff] %v7818_v35  ;;  %v7821_v48 = vadd.f32 %v8212_v1, %v7908_v56  ;;  %v7812_v50 = vpop.f32.mrb[47].mxu0 }
0x39e5   :  { %7828 = vst [vmem:[#allocation4 + $0x20] sm:$0xff] %v7810_v33  ;;  %v7813_v28 = vadd.f32 %v7908_v56, %v7812_v50 }
0x39e6   :  { %7831 = vst [vmem:[#allocation4 + $0x38] sm:$0xff] %v7821_v48 }
0x39e7   :  { %7829 = vst [vmem:[#allocation4 + $0x28] sm:$0xff] %v7813_v28 }
0x39e8   :  { %8671 = shalt.err (!%p8668_p4)
}
0x39e9   :  { %s8672_s12 = scalar_lea.hbm %s11737_s10, 1024 }
0x39ea   :  { %p8673_p5 = scmp.ne.s32.totalorder %s11737_s10, %s8672_s12  ;;  %p8676_p6 = scmp.lt.u32.totalorder %s8672_s12, %s11737_s10 }
0x39ec   :  { %p8678_p7 = pnand %p8676_p6, %p8673_p5 }
0x39ee   :  { %8681 = shalt.err (!%p8678_p7)
}
0x39ef   :  { %s8691_s17 = smov 128   ;;  %s8692_s0 = smov 8  }
0x39f0   :  { %7843 = dma.vmem_to_hbm [thread:$0]  %s7838_s29, 1024, %s11737_s10, [#allocation5], %s8691_s17, %s8691_s17, %s8692_s0  }
0x39f1   :  { %8682 = dma.done.wait [#allocation5], 1024  }
0x39f2   :  { %8683 = vsyncadd [#allocation5], 4294966272 }
0x39f3   :  { %7847 = vsyncpa [#allocation5], 1 }

</bundles_post_ra>
